<compile_context>
chip_gen: v5e
topology: v5e:2x2
jax: 0.10.0
libtpu: 0.0.40
codegen_flags: <defaults>
</compile_context>

<pallas_src>
import jax
import jax.numpy as jnp
from jax.experimental import pallas as pl
from jax.experimental.pallas import tpu as pltpu

LANES = 1024                       # slab width: 8 x 128-lane vregs -> long unmasked vst bursts
_DEFAULT_BLOCK_ROWS = 1024         # (1024, 1024) f32 tile = 4 MiB; (in+out) x 2 buffers = 16 MiB
_SMALL_FALLBACK_ELEMS = 64 * 1024  # below ~256 KiB f32, pallas_call + reshape overhead dominates
_VMEM_LIMIT_BYTES = 48 << 20       # explicit scoped-VMEM: safe on v5e/v6e (128 MiB) and v7x (64 MiB)


def _swish_kernel(x_ref, o_ref):
    xf = x_ref[...].astype(jnp.float32)
    # sigmoid(x) = 1 / (1 + exp(-x)); exp goes to the (otherwise idle) EUP slot.
    # approx=False keeps f32 accuracy tight (approx recip would relax it to ~2^-12).
    sig = pl.reciprocal(1.0 + jnp.exp(-xf), approx=False)
    o_ref[...] = (xf * sig).astype(o_ref.dtype)


def _round_up(a: int, b: int) -> int:
    return pl.cdiv(a, b) * b


def swish(x: jax.Array) -> jax.Array:
    """Swish / SiLU: x * sigmoid(x), matching torch's `x * torch.sigmoid(x)`."""
    orig_shape = x.shape
    orig_dtype = x.dtype
    n = x.size

    # Small-input fallback: fused XLA beats kernel-launch + pad/reshape overhead.
    if n < _SMALL_FALLBACK_ELEMS:
        return x * jax.nn.sigmoid(x)

    flat = x.reshape(-1)
    # Pad only to one slab row (1024 elems), never to a full block.
    n_pad = _round_up(n, LANES)
    if n_pad != n:
        flat = jnp.pad(flat, (0, n_pad - n))
    rows = n_pad // LANES
    x2d = flat.reshape(rows, LANES)

    if rows <= 8:
        # Single block equal to the full array (bypasses the (8,128) divisibility rule).
        block_rows = rows
    else:
        # Big lane-dense tiles, but always >= 2 grid steps so both v7x TensorCores
        # get work; block_rows stays a multiple of 8.
        block_rows = min(_DEFAULT_BLOCK_ROWS, _round_up(pl.cdiv(rows, 2), 8))
    grid = (pl.cdiv(rows, block_rows),)

    out2d = pl.pallas_call(
        _swish_kernel,
        out_shape=jax.ShapeDtypeStruct((rows, LANES), orig_dtype),
        grid_spec=pltpu.PrefetchScalarGridSpec(
            num_scalar_prefetch=0,
            grid=grid,
            in_specs=[pl.BlockSpec((block_rows, LANES), lambda i: (i, 0))],
            out_specs=pl.BlockSpec((block_rows, LANES), lambda i: (i, 0)),
        ),
        compiler_params=pltpu.CompilerParams(
            dimension_semantics=("parallel",),
            vmem_limit_bytes=_VMEM_LIMIT_BYTES,
        ),
    )(x2d)

    out_flat = out2d.reshape(-1)
    if n_pad != n:
        out_flat = out_flat[:n]
    return out_flat.reshape(orig_shape)


if __name__ == "__main__":
    key = jax.random.PRNGKey(0)
    k1, k2, k3 = jax.random.split(key, 3)

    def _ref(a):
        return a * jax.nn.sigmoid(a)

    # 1) Small NCHW input matching the module spec (2048 elems -> XLA fallback path).
    x_small = jax.random.normal(k1, (2, 4, 16, 16), dtype=jnp.float32)
    y_small = jax.block_until_ready(swish(x_small))
    assert y_small.shape == x_small.shape and y_small.dtype == x_small.dtype
    assert jnp.allclose(y_small, _ref(x_small), atol=1e-5, rtol=1e-5)

    # 2) Larger input exercising the Pallas kernel (multiple of 1024 -> no padding,
    #    rows=512 -> block_rows=256, grid=2 full blocks).
    x_big = jax.random.normal(k2, (4, 8, 128, 128), dtype=jnp.float32)
    y_big = jax.block_until_ready(swish(x_big))
    assert y_big.shape == x_big.shape and y_big.dtype == x_big.dtype
    assert jnp.allclose(y_big, _ref(x_big), atol=1e-5, rtol=1e-5)

    # 3) Ragged input exercising padding + partial trailing block (masked writeback).
    x_odd = jax.random.normal(k3, (3, 7, 101, 53), dtype=jnp.float32)
    y_odd = jax.block_until_ready(swish(x_odd))
    assert y_odd.shape == x_odd.shape and y_odd.dtype == x_odd.dtype
    assert jnp.allclose(y_odd, _ref(x_odd), atol=1e-5, rtol=1e-5)

    print("KERNEL_OK")
</pallas_src>

<mosaic_0001>
module attributes {stable_mosaic.version = 11 : i64} {
  func.func @_swish_kernel(%arg0: i32, %arg1: memref<256x1024xf32, #tpu.memory_space<vmem>>, %arg2: memref<256x1024xf32, #tpu.memory_space<vmem>>) attributes {dimension_semantics = [#tpu.dimension_semantics<parallel>], iteration_bounds = array<i64: 2>, scalar_prefetch = 0 : i64, scratch_operands = 0 : i64, tpu.core_type = #tpu.core_type<tc>, window_params = [{transform_indices = @transform_0, window_bounds = array<i64: 256, 1024>}, {transform_indices = @transform_1, window_bounds = array<i64: 256, 1024>}]} {
    %c0 = arith.constant 0 : index
    %c0_0 = arith.constant 0 : index
    %0 = vector.load %arg1[%c0, %c0_0] : memref<256x1024xf32, #tpu.memory_space<vmem>>, vector<256x1024xf32>
    %cst = arith.constant 0.000000e+00 : f32
    %1 = vector.broadcast %cst : f32 to vector<256x1024xf32>
    %2 = arith.subf %1, %0 : vector<256x1024xf32>
    %3 = math.exp %2 : vector<256x1024xf32>
    %cst_1 = arith.constant 1.000000e+00 : f32
    %4 = vector.broadcast %cst_1 : f32 to vector<256x1024xf32>
    %5 = arith.addf %4, %3 : vector<256x1024xf32>
    %6 = tpu.reciprocal %5 : vector<256x1024xf32> -> vector<256x1024xf32>
    %7 = arith.mulf %0, %6 : vector<256x1024xf32>
    %c0_2 = arith.constant 0 : index
    %c0_3 = arith.constant 0 : index
    %8 = vector.load %arg2[%c0_2, %c0_3] : memref<256x1024xf32, #tpu.memory_space<vmem>>, vector<256x1024xf32>
    tpu.vector_store %arg2[%c0_2, %c0_3], %7 {strides = array<i32>} : memref<256x1024xf32, #tpu.memory_space<vmem>>, vector<256x1024xf32>,
    return
  }
  func.func @transform_0(%arg0: i32) -> (i32, i32) {
    %c0_i32 = arith.constant 0 : i32
    %c0_i32_0 = arith.constant 0 : i32
    return %arg0, %c0_i32 : i32, i32
  }
  func.func @transform_1(%arg0: i32) -> (i32, i32) {
    %c0_i32 = arith.constant 0 : i32
    %c0_i32_0 = arith.constant 0 : i32
    return %arg0, %c0_i32 : i32, i32
  }
}

</mosaic_0001>

<bundles_post_ra>
// kernel: tpu_custom_call.1
= control target key start
LH: loop header
LB: loop body
LE: loop exit
PB: predicated region body
PF: predicated region fallthrough
CT: control target
= control target key end

     0   :  { %6 = vsyncpa [#allocation3], 0  ;;  %s14081_s0 = inlined_call_operand.hbm [shape: f32[512,1024], index: 0, kind: input, shape index: {}]   ;;  %s14082_s1 = inlined_call_operand.hbm [shape: f32[512,1024], index: 1, kind: output, shape index: {}]  }
   0x1   :  { %8 = vsyncpa [#allocation3 + $0x1], 0 }
   0x2   :  { %9 = vsyncpa [#allocation4], 0 }
   0x3   :  { %11 = vsyncpa [#allocation4 + $0x1], 0  ;;  %s6812_s6 = smov 0   ;;  %s6814_s7 = smov 0  }
   0x4   :  { %s6816_s8 = smov 0   ;;  %s6818_s9 = smov 0  }
   0x5 LB: > { %s6833_s10 = sadd.s32 4294967295, %s6796_s9   ;;  %s5606_s11 = sadd.s32 4294967294, %s6796_s9   ;;  %s6796_s9 = sphi %s6818_s9, %s15084_s9   ;;  %s6792_s8 = sphi %s6816_s8, %s15083_s8   ;;  %s6788_s7 = sphi %s6814_s7, %s15082_s7   ;;  %s6784_s6 = sphi %s6812_s6, %s15081_s6  }
   0x6   : > { %s6837_s12 = sadd.s32 1, %s6796_s9   ;;  %s24_s13 = sadd.s32 1, %s6792_s8 }
   0x7   : > { %s21_s14 = ssub.s32 %s6796_s9, %s6837_s12  ;;  %p31_p0 = scmp.ne.s32.totalorder %s6792_s8, %s6788_s7 }
   0x8   : > { %p22_p1 = scmp.eq.s32.totalorder %s21_s14, 0  ;;  %p32_p2 = scmp.eq.s32.totalorder %s6796_s9, 0 }
   0x9   : > { %p37_p3 = scmp.ne.s32.totalorder %s6788_s7, %s6784_s6  ;;  %p38_p4 = scmp.eq.s32.totalorder %s6833_s10, 0 }
   0xa   : > { %s6849_s15 = scalar_select %p22_p1, %s6792_s8, %s24_s13  }
   0xb   : > { %p6851_p5 = por %p32_p2, %p31_p0  ;;  %p6855_p6 = por %p38_p4, %p37_p3 }
   0xc   : > { %p61_p7 = scmp.eq.s32.totalorder %s6833_s10, 1  ;;  %p67_p8 = scmp.eq.s32.totalorder %s5606_s11, 1 }
   0xd   : > { %p5638_p10 = scmp.lt.s32.totalorder %s6796_s9, 2  ;;  %s87_s20 = sand.u32 1, %s6792_s8  }
   0xe   : > { %p6862_p11 = por %p61_p7, %p31_p0  ;;  %p6866_p12 = por %p67_p8, %p37_p3 }
   0xf   : > { %s5623_s21 = sshll.u32 %s6796_s9, 11  ;;  %s5609_s22 = sshll.u32 %s87_s20, 11 }
  0x10   : > { %s97_s25 = scalar_lea.hbm %s14081_s0, %s5623_s21  ;;  %s91_s27 = scalar_lea.vmem [#allocation2], %s5609_s22 }
  0x11   : > { %s98_s26 = sshll.u32 %s97_s25, 4  ;;  %s100_s28 = sshll.u32 %s91_s27, 4  ;;  %s99_s26 = int_to_ptr.hbm [resolvable:$true] %s98_s26  ;;  %s101_s28 = int_to_ptr.vmem [resolvable:$true] %s100_s28 }
  0x12   : > { %p6877_p13 = pnand %p5638_p10, %p6851_p5  ;;  %p5613_p0 = scmp.ge.s32.totalorder %s6796_s9, 1 }
  0x13   : > { %p108_p1 = scmp.lt.s32.totalorder %s6796_s9, 3  ;;  %s88_s30 = scalar_lea.sflag [#allocation3], %s87_s20 }
  0x14   : > { %s6700_s2 = sshra.s32 %s99_s26, 4  ;;  %p6704_p3 = pneg %p6877_p13  ;;  %s6701_s2 = int_to_ptr.hbm [resolvable:$true] %s6700_s2 }
  0x15   : > { %s6702_s3 = scalar_lea.hbm %s6701_s2, 2048  ;;  %s6707_s11 = scalar_lea.hbm %s14081_s0, 4096 }
  0x16   : > { %p6703_p2 = scmp.ne.s32.totalorder %s6701_s2, %s6702_s3  ;;  %p6708_p5 = scmp.lt.s32.totalorder %s6701_s2, %s14081_s0 }
  0x17   : > { %p6709_p8 = scmp.lt.s32.totalorder %s6707_s11, %s6702_s3 }
  0x18   : > { %p6705_p4 = pnand %p6704_p3, %p6703_p2 }
  0x19   : > { %p6710_p10 = por %p6709_p8, %p6708_p5 }
  0x1a   : > { %p6706_p7 = pneg %p6705_p4 }
  0x1c   : > { %p6711_p9 = pnand %p6710_p10, %p6706_p7 }
  0x1e   : > { %6714 = shalt.err (!%p6711_p9)
}
  0x1f   : > { %s6798_s16 = smov 1024   ;;  %s6799_s20 = smov 64  }
  0x20   : > { %5633 = dma.hbm_to_vmem [thread:$0]  (!%p6877_p13), %s99_s26, 32768, %s101_s28, %s88_s30, %s6798_s16, %s6798_s16, %s6799_s20  }
  0x21   : > { %p109_p2 = pnand %p5613_p0, %p108_p1 }
  0x22   : > { %s6898_s21 = sand.u32 (!%p109_p2), 1, %s6788_s7  }
  0x23   : > { %112 = sbr.rel (%p109_p2) target bundleno = 1212 (0x4bc), region = 24  ;;  %s5614_s22 = sshll.u32 (!%p109_p2), %s6898_s21, 11 }
  0x24   : > { %s115_s23 = scalar_lea.sflag (!%p109_p2), [#allocation3], %s6898_s21  ;;  %s6904_s24 = scalar_lea.vmem (!%p109_p2), [#allocation2], %s5614_s22 }
  0x28   : > { %6775 = dma.done.wait (%p6855_p6), %s115_s23, 32768  }
  0x29   : > { %6777 = vsyncadd (%p6855_p6), %s115_s23, 4294934528  ;;  %v6911_v0 = vld [vmem:[%s6904_s24] sm:$0xff]  ;;  %v6914_v1 = vld [vmem:[%s6904_s24 + $0x8] sm:$0xff]  ;;  %s7078_s17 = scalar_lea.vmem [#allocation5], %s5614_s22  ;;  %s5625_s25 = sshll.u32 %s6833_s10, 11 }
  0x2a   : > { %v6917_v2 = vld [vmem:[%s6904_s24 + $0x10] sm:$0xff]  ;;  %v396_v3 = vsub.f32 0.0, %v6911_v0  ;;  %v397_v4 = vsub.f32 0.0, %v6914_v1  ;;  %v6923_v6 = vld [vmem:[%s6904_s24 + $0x18] sm:$0xff]  ;;  %v6926_v7 = vld [vmem:[%s6904_s24 + $0x20] sm:$0xff]  ;;  %s5529_s27 = scalar_lea.hbm %s14082_s1, %s5625_s25  ;;  %s5530_s28 = sshll.u32 %s7078_s17, 4  ;;  %s5531_s28 = int_to_ptr.vmem [resolvable:$true] %s5530_s28 }
  0x2b   : > { %v398_v5 = vsub.f32 0.0, %v6917_v2  ;;  %v6929_v8 = vld [vmem:[%s6904_s24 + $0x28] sm:$0xff]  ;;  %v399_v9 = vsub.f32 0.0, %v6923_v6  ;;  %v400_v10 = vsub.f32 0.0, %v6926_v7  ;;  %v6935_v12 = vld [vmem:[%s6904_s24 + $0x30] sm:$0xff]  ;;  %v6938_v13 = vld [vmem:[%s6904_s24 + $0x38] sm:$0xff] }
  0x2c   : > { %v401_v11 = vsub.f32 0.0, %v6929_v8  ;;  %v652_v14 = vmul.f32 1.442695, %v396_v3  ;;  %v654_v15 = vmul.f32 1.442695, %v397_v4  ;;  %v402_v19 = vsub.f32 0.0, %v6935_v12 }
  0x2d   : > { %v656_v16 = vmul.f32 1.442695, %v398_v5  ;;  %v658_v17 = vmul.f32 1.442695, %v399_v9  ;;  %v660_v18 = vmul.f32 1.442695, %v400_v10 }
  0x2e   : > { %5676 = vpow2.f32 %v652_v14  ;;  %v403_v20 = vsub.f32 0.0, %v6938_v13  ;;  %v662_v21 = vmul.f32 1.442695, %v401_v11  ;;  %v6943_v22 = vld [vmem:[%s6904_s24 + $0x40] sm:$0xff]  ;;  %v664_v23 = vmul.f32 1.442695, %v402_v19 }
  0x2f   : > { %5678 = vpow2.f32 %v654_v15  ;;  %v404_v25 = vsub.f32 0.0, %v6943_v22  ;;  %v6947_v26 = vld [vmem:[%s6904_s24 + $0x48] sm:$0xff]  ;;  %v6952_v30 = vld [vmem:[%s6904_s24 + $0x50] sm:$0xff]  ;;  %v6955_v31 = vld [vmem:[%s6904_s24 + $0x58] sm:$0xff]  ;;  %s5532_s29 = sshll.u32 %s5529_s27, 4  ;;  %s5517_s30 = scalar_lea.sflag [#allocation4], %s6898_s21  ;;  %s5533_s29 = int_to_ptr.hbm [resolvable:$true] %s5532_s29 }
  0x30   : > { %5680 = vpow2.f32 %v656_v16  ;;  %v666_v24 = vmul.f32 1.442695, %v403_v20  ;;  %v405_v35 = vsub.f32 0.0, %v6947_v26  ;;  %v406_v40 = vsub.f32 0.0, %v6952_v30  ;;  %s6744_s2 = sshra.s32 %s5533_s29, 4  ;;  %s6750_s11 = scalar_lea.hbm %s14082_s1, 4096  ;;  %s6745_s2 = int_to_ptr.hbm [resolvable:$true] %s6744_s2 }
  0x31   : > { %5682 = vpow2.f32 %v658_v17  ;;  %v668_v34 = vmul.f32 1.442695, %v404_v25  ;;  %v407_v41 = vsub.f32 0.0, %v6955_v31  ;;  %s6746_s3 = scalar_lea.hbm %s6745_s2, 2048  ;;  %p6751_p0 = scmp.lt.s32.totalorder %s6745_s2, %s14082_s1 }
  0x32   : > { %5684 = vpow2.f32 %v660_v18  ;;  %v6975_v48 = vmul.f32 1.442695, %v405_v35  ;;  %p6747_p6 = scmp.ne.s32.totalorder %s6745_s2, %s6746_s3  ;;  %p6752_p1 = scmp.lt.s32.totalorder %s6750_s11, %s6746_s3 }
  0x33   : > { %5686 = vpow2.f32 %v662_v21 }
  0x34   : > { %v5677_v27 = vpop.eup %5676  ;;  %5688 = vpow2.f32 %v664_v23  ;;  %p6748_p9 = pnand %p6747_p6, %p6862_p11  ;;  %p6753_p3 = por %p6752_p1, %p6751_p0 }
  0x35   : > { %v5679_v28 = vpop.eup %5678  ;;  %v6949_v29 = vadd.f32 1.0, %v5677_v27  ;;  %5690 = vpow2.f32 %v666_v24 }
  0x36   : > { %v5681_v32 = vpop.eup %5680  ;;  %v6957_v33 = vadd.f32 1.0, %v5679_v28  ;;  %v7132_v28 = vld [vmem:[%s6904_s24 + $0x68] sm:$0xff]  ;;  %p6749_p13 = pneg %p6748_p9 }
  0x37   : > { %v5683_v36 = vpop.eup %5682  ;;  %5692 = vrcp.f32 %v6949_v29  ;;  %v1431_v37 = vand.u32 2147483648, %v6949_v29  ;;  %v1429_v39 = vand.u32 2147483647, %v6949_v29  ;;  %v6968_v45 = vadd.f32 1.0, %v5681_v32 }
  0x38   : > { %v5685_v38 = vpop.eup %5684  ;;  %5694 = vrcp.f32 %v6957_v33  ;;  %v1443_v43 = vand.u32 2147483647, %v6957_v33  ;;  %v1445_v44 = vand.u32 2147483648, %v6957_v33  ;;  %v6970_v46 = vadd.f32 1.0, %v5683_v36  ;;  %v7139_v36 = vld [vmem:[%s6904_s24 + $0x70] sm:$0xff]  ;;  %p6754_p4 = pnand %p6753_p3, %p6749_p13 }
  0x39   : > { %v5687_v42 = vpop.eup %5686  ;;  %vm1425_vm0 = vweird.f32 %v6949_v29  ;;  %v6973_v47 = vadd.f32 1.0, %v5685_v38  ;;  %5696 = vpow2.f32 %v668_v34  ;;  %v6977_v50 = vor.u32 1.1754944e-38, %v1431_v37 }
  0x3a   : > { %v5689_v49 = vpop.eup %5688  ;;  %vm1439_vm1 = vweird.f32 %v6957_v33  ;;  %5698 = vrcp.f32 %v6968_v45  ;;  %v1459_v51 = vand.u32 2147483648, %v6968_v45  ;;  %vm6982_vm2 = vcmp.eq.f32.partialorder %v1429_v39, 8.507059e+37 }
  0x3b   : > { %v5691_v52 = vpop.eup %5690  ;;  %v1457_v54 = vand.u32 2147483647, %v6968_v45  ;;  %5700 = vrcp.f32 %v6970_v46  ;;  %v1473_v55 = vand.u32 2147483648, %v6970_v46  ;;  %v6989_v56 = vadd.f32 1.0, %v5687_v42 }
  0x3c   : > { %vm6991_vm3 = vcmp.eq.f32.partialorder %v1443_v43, 8.507059e+37  ;;  %v1446_v59 = vor.u32 1.1754944e-38, %v1445_v44  ;;  %vm1453_vm4 = vweird.f32 %v6968_v45  ;;  %v1471_v60 = vand.u32 2147483647, %v6970_v46 }
  0x3d   : > { %v5693_v57 = vpop.eup %5692  ;;  %5702 = vrcp.f32 %v6973_v47  ;;  %v6999_v63 = vor.u32 1.1754944e-38, %v1459_v51  ;;  %vm1467_vm5 = vweird.f32 %v6970_v46  ;;  %vm1481_vm6 = vweird.f32 %v6973_v47 }
  0x3e   : > { %v5695_v61 = vpop.eup %5694  ;;  %v1421_v62 = vmul.f32 %v5693_v57, %v6949_v29  ;;  %vm1426_vm7 = vweird.f32 %v5693_v57  ;;  %v1485_v4 = vand.u32 2147483647, %v6973_v47  ;;  %v1487_v5 = vand.u32 2147483648, %v6973_v47 }
  0x3f   : > { %v1435_v3 = vmul.f32 %v5695_v61, %v6957_v33  ;;  %v5697_v9 = vpop.eup %5696  ;;  %vm1440_vm8 = vweird.f32 %v5695_v61  ;;  %vm7006_vm9 = vcmp.eq.f32.partialorder %v1457_v54, 8.507059e+37  ;;  %v1474_v14 = vor.u32 1.1754944e-38, %v1473_v55  ;;  %vm7026_vm13 = vmor %vm1425_vm0, %vm1426_vm7 }
  0x40   : > { %v1422_v10 = vsub.f32 1.0, %v1421_v62  ;;  %5704 = vrcp.f32 %v6989_v56  ;;  %v5699_v15 = vpop.eup %5698  ;;  %vm7011_vm10 = vcmp.eq.f32.partialorder %v1471_v60, 8.507059e+37  ;;  %v1499_v18 = vand.u32 2147483647, %v6989_v56  ;;  %vm7034_vm11 = vmor %vm1439_vm1, %vm1440_vm8 }
  0x41   : > { %v1436_v16 = vsub.f32 1.0, %v1435_v3  ;;  %v1501_v19 = vand.u32 2147483648, %v6989_v56  ;;  %v5701_v20 = vpop.eup %5700  ;;  %v1449_v23 = vmul.f32 %v5699_v15, %v6968_v45  ;;  %vm7019_vm12 = vcmp.eq.f32.partialorder %v1485_v4, 8.507059e+37 }
  0x42   : > { %v1423_v21 = vmul.f32 %v5693_v57, %v1422_v10  ;;  %v1488_v25 = vor.u32 1.1754944e-38, %v1487_v5  ;;  %vm1454_vm14 = vweird.f32 %v5699_v15  ;;  %v1463_v34 = vmul.f32 %v5701_v20, %v6970_v46 }
  0x43   : > { %v5703_v27 = vpop.eup %5702  ;;  %v1437_v32 = vmul.f32 %v5695_v61, %v1436_v16  ;;  %vm1468_vm15 = vweird.f32 %v5701_v20  ;;  %v1450_v37 = vsub.f32 1.0, %v1449_v23  ;;  %v1502_v38 = vor.u32 1.1754944e-38, %v1501_v19  ;;  %vm7053_vm1 = vmor %vm1453_vm4, %vm1454_vm14 }
  0x44   : > { %v1424_v35 = vadd.f32 %v5693_v57, %v1423_v21  ;;  %v1477_v29 = vmul.f32 %v5703_v27, %v6973_v47  ;;  %v1464_v42 = vsub.f32 1.0, %v1463_v34  ;;  %vm1482_vm0 = vweird.f32 %v5703_v27 }
  0x45   : > { %v1438_v39 = vadd.f32 %v5695_v61, %v1437_v32  ;;  %v7039_v43 = vadd.f32 1.0, %v5689_v49  ;;  %v1451_v54 = vmul.f32 %v5699_v15, %v1450_v37  ;;  %v7043_v33 = vadd.f32 1.0, %v5691_v52  ;;  %vm7072_vm4 = vmor %vm1481_vm6, %vm1482_vm0  ;;  %v7142_v37 = vld [vmem:[%s6904_s24 + $0x78] sm:$0xff] }
  0x46   : > { %v5705_v44 = vpop.eup %5704  ;;  %v1428_v51 = vsel %vm7026_vm13, %v5693_v57, %v1424_v35  ;;  %v1478_v55 = vsub.f32 1.0, %v1477_v29  ;;  %v1465_v57 = vmul.f32 %v5701_v20, %v1464_v42  ;;  %v7084_v47 = vadd.f32 1.0, %v5697_v9 }
  0x47   : > { %v1433_v60 = vsel %vm6982_vm2, %v6977_v50, %v1428_v51  ;;  %v1442_v62 = vsel %vm7034_vm11, %v5695_v61, %v1438_v39  ;;  %v1491_v3 = vmul.f32 %v5705_v44, %v6989_v56  ;;  %v1452_v4 = vadd.f32 %v5699_v15, %v1451_v54  ;;  %vm7064_vm2 = vmor %vm1467_vm5, %vm1468_vm15 }
  0x48   : > { %v5004_v52 = vmul.f32 %v1433_v60, %v6911_v0  ;;  %v1447_v53 = vsel %vm6991_vm3, %v1446_v59, %v1442_v62  ;;  %v1479_v45 = vmul.f32 %v5703_v27, %v1478_v55  ;;  %v1466_v5 = vadd.f32 %v5701_v20, %v1465_v57  ;;  %v7158_v57 = vld [vmem:[%s6904_s24 + $0x80] sm:$0xff] }
  0x49   : > { %v5005_v61 = vmul.f32 %v1447_v53, %v6914_v1  ;;  %v1492_v58 = vsub.f32 1.0, %v1491_v3  ;;  %vm1496_vm3 = vweird.f32 %v5705_v44  ;;  %v1456_v1 = vsel %vm7053_vm1, %v5699_v15, %v1452_v4 }
  0x4a   : > { %5260 = vst [vmem:[%s7078_s17] sm:$0xff] %v5004_v52  ;;  %v1480_v46 = vadd.f32 %v5703_v27, %v1479_v45  ;;  %5706 = vrcp.f32 %v7039_v43  ;;  %v1461_v59 = vsel %vm7006_vm9, %v6999_v63, %v1456_v1  ;;  %v1470_v10 = vsel %vm7064_vm2, %v5701_v20, %v1466_v5  ;;  %v7107_v20 = vld [vmem:[%s6904_s24 + $0x60] sm:$0xff] }
  0x4b   : > { %5261 = vst [vmem:[%s7078_s17 + $0x8] sm:$0xff] %v5005_v61  ;;  %v1493_v16 = vmul.f32 %v5705_v44, %v1492_v58  ;;  %v1513_v19 = vand.u32 2147483647, %v7039_v43  ;;  %v5006_v15 = vmul.f32 %v1461_v59, %v6917_v2  ;;  %v1475_v21 = vsel %vm7011_vm10, %v1474_v14, %v1470_v10 }
  0x4c   : > { %v1484_v9 = vsel %vm7072_vm4, %v5703_v27, %v1480_v46  ;;  %vm14108_vm5 = vweird.f32 %v6989_v56  ;;  %v1515_v11 = vand.u32 2147483648, %v7039_v43  ;;  %v5007_v2 = vmul.f32 %v1475_v21, %v6923_v6 }
  0x4d   : > { %vm7101_vm6 = vmor %vm14108_vm5, %vm1496_vm3  ;;  %v1489_v14 = vsel %vm7019_vm12, %v1488_v25, %v1484_v9  ;;  %v1494_v17 = vadd.f32 %v5705_v44, %v1493_v16  ;;  %vm1500_vm7 = vcmp.eq.f32.partialorder %v1499_v18, 8.507059e+37  ;;  %5262 = vst [vmem:[%s7078_s17 + $0x10] sm:$0xff] %v5006_v15  ;;  %5708 = vrcp.f32 %v7043_v33 }
  0x4e   : > { %v5008_v56 = vmul.f32 %v1489_v14, %v6926_v7  ;;  %v672_v23 = vmul.f32 1.442695, %v406_v40  ;;  %v674_v27 = vmul.f32 1.442695, %v407_v41  ;;  %5263 = vst [vmem:[%s7078_s17 + $0x18] sm:$0xff] %v5007_v2  ;;  %vm1509_vm8 = vweird.f32 %v7039_v43  ;;  %v7194_v2 = vld [vmem:[%s6904_s24 + $0x88] sm:$0xff] }
  0x4f   : > { %v1498_v6 = vsel %vm7101_vm6, %v5705_v44, %v1494_v17  ;;  %5710 = vrcp.f32 %v7084_v47  ;;  %v408_v7 = vsub.f32 0.0, %v7107_v20  ;;  %vm7126_vm9 = vcmp.eq.f32.partialorder %v1513_v19, 8.507059e+37 }
  0x50   : > { %v5707_v18 = vpop.eup %5706  ;;  %5264 = vst [vmem:[%s7078_s17 + $0x20] sm:$0xff] %v5008_v56  ;;  %v1503_v24 = vsel %vm1500_vm7, %v1502_v38, %v1498_v6  ;;  %v1516_v41 = vor.u32 1.1754944e-38, %v1515_v11  ;;  %v1527_v25 = vand.u32 2147483647, %v7043_v33  ;;  %vm1523_vm10 = vweird.f32 %v7043_v33  ;;  %v7203_v56 = vld [vmem:[%s6904_s24 + $0x90] sm:$0xff] }
  0x51   : > { %v5009_v32 = vmul.f32 %v1503_v24, %v6929_v8  ;;  %v1505_v34 = vmul.f32 %v5707_v18, %v7039_v43  ;;  %v1529_v35 = vand.u32 2147483648, %v7043_v33  ;;  %vm1510_vm11 = vweird.f32 %v5707_v18 }
  0x52   : > { %vm1537_vm12 = vweird.f32 %v7084_v47  ;;  %v1541_v29 = vand.u32 2147483647, %v7084_v47  ;;  %5712 = vpow2.f32 %v6975_v48  ;;  %v676_v38 = vmul.f32 1.442695, %v408_v7  ;;  %vm7163_vm14 = vmor %vm1509_vm8, %vm1510_vm11 }
  0x53   : > { %5265 = vst [vmem:[%s7078_s17 + $0x28] sm:$0xff] %v5009_v32  ;;  %v1506_v8 = vsub.f32 1.0, %v1505_v34  ;;  %5714 = vpow2.f32 %v672_v23  ;;  %v409_v39 = vsub.f32 0.0, %v7132_v28  ;;  %v5709_v42 = vpop.eup %5708  ;;  %vm7149_vm13 = vcmp.eq.f32.partialorder %v1527_v25, 8.507059e+37 }
  0x54   : > { %v1543_v51 = vand.u32 2147483648, %v7084_v47  ;;  %v410_v54 = vsub.f32 0.0, %v7139_v36  ;;  %v411_v55 = vsub.f32 0.0, %v7142_v37  ;;  %v1519_v62 = vmul.f32 %v5709_v42, %v7043_v33 }
  0x55   : > { %v5711_v60 = vpop.eup %5710  ;;  %v1507_v48 = vmul.f32 %v5707_v18, %v1506_v8  ;;  %v1530_v49 = vor.u32 1.1754944e-38, %v1529_v35  ;;  %5716 = vpow2.f32 %v674_v27  ;;  %vm1524_vm15 = vweird.f32 %v5709_v42 }
  0x56   : > { %v1533_v52 = vmul.f32 %v5711_v60, %v7084_v47  ;;  %v678_v53 = vmul.f32 1.442695, %v409_v39  ;;  %v680_v4 = vmul.f32 1.442695, %v410_v54  ;;  %v1520_v45 = vsub.f32 1.0, %v1519_v62  ;;  %vm7178_vm1 = vmor %vm1523_vm10, %vm1524_vm15 }
  0x57   : > { %v1508_v50 = vadd.f32 %v5707_v18, %v1507_v48  ;;  %5718 = vpow2.f32 %v676_v38  ;;  %v682_v61 = vmul.f32 1.442695, %v411_v55  ;;  %vm1538_vm0 = vweird.f32 %v5711_v60 }
  0x58   : > { %v5713_v5 = vpop.eup %5712  ;;  %v1534_v0 = vsub.f32 1.0, %v1533_v52  ;;  %5720 = vpow2.f32 %v678_v53  ;;  %v412_v58 = vsub.f32 0.0, %v7158_v57  ;;  %v1521_v46 = vmul.f32 %v5709_v42, %v1520_v45  ;;  %vm7188_vm2 = vmor %vm1537_vm12, %vm1538_vm0 }
  0x59   : > { %v5715_v43 = vpop.eup %5714  ;;  %v1512_v1 = vsel %vm7163_vm14, %v5707_v18, %v1508_v50  ;;  %v7171_v59 = vadd.f32 1.0, %v5713_v5  ;;  %5722 = vpow2.f32 %v680_v4  ;;  %v1544_v33 = vor.u32 1.1754944e-38, %v1543_v51 }
  0x5a   : > { %v1517_v10 = vsel %vm7126_vm9, %v1516_v41, %v1512_v1  ;;  %v1535_v19 = vmul.f32 %v5711_v60, %v1534_v0  ;;  %v7182_v15 = vadd.f32 1.0, %v5715_v43  ;;  %5724 = vpow2.f32 %v682_v61 }
  0x5b   : > { %v5717_v21 = vpop.eup %5716  ;;  %v5010_v9 = vmul.f32 %v1517_v10, %v6935_v12  ;;  %v1522_v63 = vadd.f32 %v5709_v42, %v1521_v46  ;;  %5726 = vrcp.f32 %v7171_v59  ;;  %vm7196_vm4 = vcmp.eq.f32.partialorder %v1541_v29, 8.507059e+37 }
  0x5c   : > { %v1536_v14 = vadd.f32 %v5711_v60, %v1535_v19  ;;  %v1555_v12 = vand.u32 2147483647, %v7171_v59  ;;  %5728 = vrcp.f32 %v7182_v15  ;;  %v1557_v27 = vand.u32 2147483648, %v7171_v59 }
  0x5d   : > { %v5719_v47 = vpop.eup %5718  ;;  %5266 = vst [vmem:[%s7078_s17 + $0x30] sm:$0xff] %v5010_v9  ;;  %v1526_v23 = vsel %vm7178_vm1, %v5709_v42, %v1522_v63  ;;  %v1569_v6 = vand.u32 2147483647, %v7182_v15  ;;  %v1571_v7 = vand.u32 2147483648, %v7182_v15  ;;  %v684_v41 = vmul.f32 1.442695, %v412_v58 }
  0x5e   : > { %v5721_v18 = vpop.eup %5720  ;;  %v1531_v24 = vsel %vm7149_vm13, %v1530_v49, %v1526_v23  ;;  %v1540_v40 = vsel %vm7188_vm2, %v5711_v60, %v1536_v14  ;;  %v413_v25 = vsub.f32 0.0, %v7194_v2  ;;  %vm1551_vm3 = vweird.f32 %v7171_v59 }
  0x5f   : > { %v5723_v32 = vpop.eup %5722  ;;  %v5011_v34 = vmul.f32 %v1531_v24, %v6938_v13  ;;  %v1545_v35 = vsel %vm7196_vm4, %v1544_v33, %v1540_v40  ;;  %v414_v29 = vsub.f32 0.0, %v7203_v56  ;;  %vm1565_vm5 = vweird.f32 %v7182_v15 }
  0x60   : > { %v5725_v8 = vpop.eup %5724  ;;  %v5012_v38 = vmul.f32 %v1545_v35, %v6943_v22  ;;  %v7223_v39 = vadd.f32 1.0, %v5717_v21  ;;  %v7225_v42 = vadd.f32 1.0, %v5719_v47  ;;  %vm7228_vm6 = vcmp.eq.f32.partialorder %v1555_v12, 8.507059e+37 }
  0x61   : > { %v5727_v44 = vpop.eup %5726  ;;  %5267 = vst [vmem:[%s7078_s17 + $0x38] sm:$0xff] %v5011_v34  ;;  %v1558_v51 = vor.u32 1.1754944e-38, %v1557_v27  ;;  %vm7232_vm7 = vcmp.eq.f32.partialorder %v1569_v6, 8.507059e+37  ;;  %v1572_v55 = vor.u32 1.1754944e-38, %v1571_v7  ;;  %v7239_v48 = vadd.f32 1.0, %v5721_v18  ;;  %v7387_v7 = vld [vmem:[%s6904_s24 + $0xb0] sm:$0xff] }
  0x62   : > { %v5729_v60 = vpop.eup %5728  ;;  %5268 = vst [vmem:[%s7078_s17 + $0x40] sm:$0xff] %v5012_v38  ;;  %v1547_v22 = vmul.f32 %v5727_v44, %v7171_v59  ;;  %5730 = vrcp.f32 %v7223_v39  ;;  %v7241_v62 = vadd.f32 1.0, %v5723_v32  ;;  %v1583_v3 = vand.u32 2147483647, %v7223_v39 }
  0x63   : > { %v1561_v49 = vmul.f32 %v5729_v60, %v7182_v15  ;;  %v7245_v52 = vadd.f32 1.0, %v5725_v8  ;;  %5732 = vpow2.f32 %v684_v41  ;;  %vm1552_vm8 = vweird.f32 %v5727_v44 }
  0x64   : > { %v1548_v53 = vsub.f32 1.0, %v1547_v22  ;;  %v1585_v4 = vand.u32 2147483648, %v7223_v39  ;;  %5734 = vrcp.f32 %v7225_v42  ;;  %vm1566_vm9 = vweird.f32 %v5729_v60  ;;  %vm7257_vm11 = vmor %vm1551_vm3, %vm1552_vm8 }
  0x65   : > { %v1562_v50 = vsub.f32 1.0, %v1561_v49  ;;  %v1597_v45 = vand.u32 2147483647, %v7225_v42  ;;  %v1599_v61 = vand.u32 2147483648, %v7225_v42  ;;  %vm1579_vm10 = vweird.f32 %v7223_v39  ;;  %vm7269_vm14 = vmor %vm1565_vm5, %vm1566_vm9 }
  0x66   : > { %v1549_v5 = vmul.f32 %v5727_v44, %v1548_v53  ;;  %5736 = vrcp.f32 %v7239_v48  ;;  %v7253_v0 = vmul.f32 1.442695, %v413_v25  ;;  %vm7261_vm12 = vcmp.eq.f32.partialorder %v1583_v3, 8.507059e+37 }
  0x67   : > { %v1563_v43 = vmul.f32 %v5729_v60, %v1562_v50  ;;  %vm1593_vm13 = vweird.f32 %v7225_v42  ;;  %v1611_v46 = vand.u32 2147483647, %v7239_v48  ;;  %v1586_v59 = vor.u32 1.1754944e-38, %v1585_v4 }
  0x68   : > { %v5731_v10 = vpop.eup %5730  ;;  %v1550_v16 = vadd.f32 %v5727_v44, %v1549_v5  ;;  %v1613_v21 = vand.u32 2147483648, %v7239_v48  ;;  %5738 = vrcp.f32 %v7241_v62  ;;  %vm7276_vm15 = vcmp.eq.f32.partialorder %v1597_v45, 8.507059e+37 }
  0x69   : > { %v5733_v9 = vpop.eup %5732  ;;  %v1564_v63 = vadd.f32 %v5729_v60, %v1563_v43  ;;  %v1575_v11 = vmul.f32 %v5731_v10, %v7223_v39  ;;  %v1600_v14 = vor.u32 1.1754944e-38, %v1599_v61  ;;  %vm1607_vm0 = vweird.f32 %v7239_v48 }
  0x6a   : > { %v5735_v15 = vpop.eup %5734  ;;  %v1554_v17 = vsel %vm7257_vm11, %v5727_v44, %v1550_v16  ;;  %vm1580_vm1 = vweird.f32 %v5731_v10  ;;  %vm1621_vm2 = vweird.f32 %v7241_v62  ;;  %v1625_v12 = vand.u32 2147483647, %v7241_v62 }
  0x6b   : > { %v1559_v47 = vsel %vm7228_vm6, %v1558_v51, %v1554_v17  ;;  %v1568_v23 = vsel %vm7269_vm14, %v5729_v60, %v1564_v63  ;;  %v1576_v27 = vsub.f32 1.0, %v1575_v11  ;;  %v1589_v6 = vmul.f32 %v5735_v15, %v7225_v42  ;;  %vm7303_vm5 = vmor %vm1579_vm10, %vm1580_vm1  ;;  %v7369_v63 = vld [vmem:[%s6904_s24 + $0xa8] sm:$0xff] }
  0x6c   : > { %vm7290_vm4 = vcmp.eq.f32.partialorder %v1611_v46, 8.507059e+37  ;;  %v5737_v18 = vpop.eup %5736  ;;  %v5013_v24 = vmul.f32 %v1559_v47, %v6947_v26  ;;  %v1573_v40 = vsel %vm7232_vm7, %v1572_v55, %v1568_v23  ;;  %vm1594_vm3 = vweird.f32 %v5735_v15 }
  0x6d   : > { %v1614_v41 = vor.u32 1.1754944e-38, %v1613_v21  ;;  %v5014_v25 = vmul.f32 %v1573_v40, %v6952_v30  ;;  %v1577_v32 = vmul.f32 %v5731_v10, %v1576_v27  ;;  %v1590_v34 = vsub.f32 1.0, %v1589_v6  ;;  %vm7315_vm7 = vmor %vm1593_vm13, %vm1594_vm3 }
  0x6e   : > { %v1603_v35 = vmul.f32 %v5737_v18, %v7239_v48  ;;  %v5739_v8 = vpop.eup %5738  ;;  %5269 = vst [vmem:[%s7078_s17 + $0x48] sm:$0xff] %v5013_v24  ;;  %vm1608_vm6 = vweird.f32 %v5737_v18  ;;  %v1627_v26 = vand.u32 2147483648, %v7241_v62  ;;  %5740 = vrcp.f32 %v7245_v52  ;;  %v7393_v24 = vld [vmem:[%s6904_s24 + $0xb8] sm:$0xff] }
  0x6f   : > { %v1639_v30 = vand.u32 2147483647, %v7245_v52  ;;  %5270 = vst [vmem:[%s7078_s17 + $0x50] sm:$0xff] %v5014_v25  ;;  %v1578_v44 = vadd.f32 %v5731_v10, %v1577_v32  ;;  %v1591_v13 = vmul.f32 %v5735_v15, %v1590_v34  ;;  %v1617_v54 = vmul.f32 %v5739_v8, %v7241_v62  ;;  %vm7333_vm10 = vmor %vm1607_vm0, %vm1608_vm6  ;;  %v7363_v62 = vld [vmem:[%s6904_s24 + $0x98] sm:$0xff] }
  0x70   : > { %v1604_v51 = vsub.f32 1.0, %v1603_v35  ;;  %vm1622_vm8 = vweird.f32 %v5739_v8  ;;  %vm7319_vm9 = vcmp.eq.f32.partialorder %v1625_v12, 8.507059e+37  ;;  %v1641_v60 = vand.u32 2147483648, %v7245_v52 }
  0x71   : > { %v7324_v22 = vadd.f32 1.0, %v5733_v9  ;;  %v1582_v49 = vsel %vm7303_vm5, %v5731_v10, %v1578_v44  ;;  %v1592_v3 = vadd.f32 %v5735_v15, %v1591_v13  ;;  %v1618_v4 = vsub.f32 1.0, %v1617_v54  ;;  %vm7351_vm13 = vmor %vm1621_vm2, %vm1622_vm8  ;;  %v7366_v9 = vld [vmem:[%s6904_s24 + $0xa0] sm:$0xff]  ;;  %v7418_v54 = vld [vmem:[%s6904_s24 + $0xc8] sm:$0xff] }
  0x72   : > { %v1605_v53 = vmul.f32 %v5737_v18, %v1604_v51  ;;  %v1587_v42 = vsel %vm7261_vm12, %v1586_v59, %v1582_v49  ;;  %v1628_v45 = vor.u32 1.1754944e-38, %v1627_v26  ;;  %vm1635_vm11 = vweird.f32 %v7245_v52  ;;  %v7407_v26 = vld [vmem:[%s6904_s24 + $0xc0] sm:$0xff] }
  0x73   : > { %5742 = vrcp.f32 %v7324_v22  ;;  %v5015_v61 = vmul.f32 %v1587_v42, %v6955_v31  ;;  %v1596_v5 = vsel %vm7315_vm7, %v5735_v15, %v1592_v3  ;;  %v1619_v48 = vmul.f32 %v5739_v8, %v1618_v4 }
  0x74   : > { %v1606_v58 = vadd.f32 %v5737_v18, %v1605_v53  ;;  %vm7342_vm12 = vcmp.eq.f32.partialorder %v1639_v30, 8.507059e+37  ;;  %v5741_v1 = vpop.eup %5740  ;;  %v1601_v46 = vsel %vm7276_vm15, %v1600_v14, %v1596_v5  ;;  %v1642_v10 = vor.u32 1.1754944e-38, %v1641_v60 }
  0x75   : > { %vm1649_vm14 = vweird.f32 %v7324_v22  ;;  %5744 = vpow2.f32 %v7253_v0  ;;  %5271 = vst [vmem:[%s7078_s17 + $0x58] sm:$0xff] %v5015_v61  ;;  %v5016_v16 = vmul.f32 %v1601_v46, %v7107_v20  ;;  %v1620_v59 = vadd.f32 %v5739_v8, %v1619_v48 }
  0x76   : > { %v1610_v19 = vsel %vm7333_vm10, %v5737_v18, %v1606_v58  ;;  %v1631_v21 = vmul.f32 %v5741_v1, %v7245_v52  ;;  %vm1636_vm15 = vweird.f32 %v5741_v1  ;;  %v1653_v20 = vand.u32 2147483647, %v7324_v22  ;;  %v7440_v58 = vld [vmem:[%s6904_s24 + $0xd0] sm:$0xff] }
  0x77   : > { %v1615_v0 = vsel %vm7290_vm4, %v1614_v41, %v1610_v19  ;;  %v1655_v11 = vand.u32 2147483648, %v7324_v22  ;;  %5272 = vst [vmem:[%s7078_s17 + $0x60] sm:$0xff] %v5016_v16  ;;  %v1624_v14 = vsel %vm7351_vm13, %v5739_v8, %v1620_v59  ;;  %v688_v17 = vmul.f32 1.442695, %v414_v29  ;;  %vm7398_vm1 = vmor %vm1635_vm11, %vm1636_vm15 }
  0x78   : > { %v5017_v33 = vmul.f32 %v1615_v0, %v7132_v28  ;;  %v1632_v15 = vsub.f32 1.0, %v1631_v21  ;;  %v1629_v47 = vsel %vm7319_vm9, %v1628_v45, %v1624_v14  ;;  %v415_v23 = vsub.f32 0.0, %v7363_v62 }
  0x79   : > { %v5743_v12 = vpop.eup %5742  ;;  %v416_v27 = vsub.f32 0.0, %v7366_v9  ;;  %v417_v6 = vsub.f32 0.0, %v7369_v63  ;;  %v5018_v28 = vmul.f32 %v1629_v47, %v7139_v36  ;;  %5746 = vpow2.f32 %v688_v17 }
  0x7a   : > { %5273 = vst [vmem:[%s7078_s17 + $0x68] sm:$0xff] %v5017_v33  ;;  %v1633_v18 = vmul.f32 %v5741_v1, %v1632_v15  ;;  %v1645_v29 = vmul.f32 %v5743_v12, %v7324_v22  ;;  %vm1650_vm0 = vweird.f32 %v5743_v12  ;;  %v690_v25 = vmul.f32 1.442695, %v415_v23 }
  0x7b   : > { %v5745_v40 = vpop.eup %5744  ;;  %v692_v32 = vmul.f32 1.442695, %v416_v27  ;;  %v694_v36 = vmul.f32 1.442695, %v417_v6  ;;  %5274 = vst [vmem:[%s7078_s17 + $0x70] sm:$0xff] %v5018_v28  ;;  %v418_v38 = vsub.f32 0.0, %v7387_v7  ;;  %vm7425_vm4 = vmor %vm1649_vm14, %vm1650_vm0 }
  0x7c   : > { %v1634_v34 = vadd.f32 %v5741_v1, %v1633_v18  ;;  %v1646_v35 = vsub.f32 1.0, %v1645_v29  ;;  %v7403_v8 = vadd.f32 1.0, %v5745_v40  ;;  %vm7409_vm2 = vcmp.eq.f32.partialorder %v1653_v20, 8.507059e+37 }
  0x7d   : > { %5748 = vpow2.f32 %v690_v25  ;;  %v419_v30 = vsub.f32 0.0, %v7393_v24  ;;  %v1656_v51 = vor.u32 1.1754944e-38, %v1655_v11  ;;  %v420_v49 = vsub.f32 0.0, %v7407_v26 }
  0x7e   : > { %v1638_v44 = vsel %vm7398_vm1, %v5741_v1, %v1634_v34  ;;  %v1647_v13 = vmul.f32 %v5743_v12, %v1646_v35  ;;  %5750 = vrcp.f32 %v7403_v8  ;;  %v1667_v60 = vand.u32 2147483647, %v7403_v8 }
  0x7f   : > { %v1643_v39 = vsel %vm7342_vm12, %v1642_v10, %v1638_v44  ;;  %5752 = vpow2.f32 %v692_v32  ;;  %v696_v4 = vmul.f32 1.442695, %v418_v38  ;;  %v5747_v42 = vpop.eup %5746  ;;  %v698_v50 = vmul.f32 1.442695, %v419_v30  ;;  %v7452_v10 = vld [vmem:[%s6904_s24 + $0xd8] sm:$0xff] }
  0x80   : > { %v5019_v3 = vmul.f32 %v1643_v39, %v7142_v37  ;;  %v1648_v53 = vadd.f32 %v5743_v12, %v1647_v13  ;;  %5754 = vpow2.f32 %v694_v36  ;;  %v421_v45 = vsub.f32 0.0, %v7418_v54 }
  0x81   : > { %v1669_v61 = vand.u32 2147483648, %v7403_v8  ;;  %v7437_v5 = vadd.f32 1.0, %v5747_v42  ;;  %5756 = vpow2.f32 %v696_v4  ;;  %vm1663_vm3 = vweird.f32 %v7403_v8 }
  0x82   : > { %5275 = vst [vmem:[%s7078_s17 + $0x78] sm:$0xff] %v5019_v3  ;;  %v1652_v22 = vsel %vm7425_vm4, %v5743_v12, %v1648_v53  ;;  %5758 = vpow2.f32 %v698_v50  ;;  %vm7446_vm5 = vcmp.eq.f32.partialorder %v1667_v60, 8.507059e+37  ;;  %v700_v31 = vmul.f32 1.442695, %v420_v49 }
  0x83   : > { %v5749_v37 = vpop.eup %5748  ;;  %v1657_v48 = vsel %vm7409_vm2, %v1656_v51, %v1652_v22  ;;  %5760 = vrcp.f32 %v7437_v5  ;;  %v1681_v59 = vand.u32 2147483647, %v7437_v5  ;;  %v422_v0 = vsub.f32 0.0, %v7440_v58 }
  0x84   : > { %v5751_v43 = vpop.eup %5750  ;;  %v5020_v1 = vmul.f32 %v1657_v48, %v7158_v57  ;;  %v7456_v21 = vadd.f32 1.0, %v5749_v37  ;;  %v1670_v57 = vor.u32 1.1754944e-38, %v1669_v61  ;;  %v1683_v11 = vand.u32 2147483648, %v7437_v5  ;;  %v7620_v61 = vld [vmem:[%s6904_s24 + $0xf8] sm:$0xff] }
  0x85   : > { %v5753_v16 = vpop.eup %5752  ;;  %v1659_v19 = vmul.f32 %v5751_v43, %v7403_v8  ;;  %v7463_v14 = vmul.f32 1.442695, %v421_v45  ;;  %vm1664_vm6 = vweird.f32 %v5751_v43  ;;  %v423_v17 = vsub.f32 0.0, %v7452_v10 }
  0x86   : > { %v5755_v20 = vpop.eup %5754  ;;  %5276 = vst [vmem:[%s7078_s17 + $0x80] sm:$0xff] %v5020_v1  ;;  %v7461_v33 = vadd.f32 1.0, %v5753_v16  ;;  %5762 = vrcp.f32 %v7456_v21  ;;  %vm1677_vm7 = vweird.f32 %v7437_v5  ;;  %v1695_v47 = vand.u32 2147483647, %v7456_v21  ;;  %vm7482_vm9 = vmor %vm1663_vm3, %vm1664_vm6 }
  0x87   : > { %v1660_v15 = vsub.f32 1.0, %v1659_v19  ;;  %v5757_v12 = vpop.eup %5756  ;;  %v1697_v23 = vand.u32 2147483648, %v7456_v21  ;;  %vm7471_vm8 = vcmp.eq.f32.partialorder %v1681_v59, 8.507059e+37  ;;  %v7475_v18 = vadd.f32 1.0, %v5755_v20 }
  0x88   : > { %5764 = vrcp.f32 %v7461_v33  ;;  %v5759_v27 = vpop.eup %5758  ;;  %v7477_v29 = vmul.f32 1.442695, %v422_v0  ;;  %v1684_v25 = vor.u32 1.1754944e-38, %v1683_v11  ;;  %vm1691_vm10 = vweird.f32 %v7456_v21 }
  0x89   : > { %v1661_v6 = vmul.f32 %v5751_v43, %v1660_v15  ;;  %5766 = vpow2.f32 %v700_v31  ;;  %v5761_v40 = vpop.eup %5760  ;;  %v1709_v32 = vand.u32 2147483647, %v7461_v33  ;;  %v7488_v36 = vadd.f32 1.0, %v5757_v12 }
  0x8a   : > { %v1673_v35 = vmul.f32 %v5761_v40, %v7437_v5  ;;  %vm1705_vm11 = vweird.f32 %v7461_v33  ;;  %v1711_v38 = vand.u32 2147483648, %v7461_v33  ;;  %vm1678_vm12 = vweird.f32 %v5761_v40 }
  0x8b   : > { %v1662_v34 = vadd.f32 %v5751_v43, %v1661_v6  ;;  %vm7493_vm13 = vcmp.eq.f32.partialorder %v1695_v47, 8.507059e+37  ;;  %v1698_v52 = vor.u32 1.1754944e-38, %v1697_v23  ;;  %5768 = vrcp.f32 %v7475_v18  ;;  %vm7517_vm15 = vmor %vm1677_vm7, %vm1678_vm12 }
  0x8c   : > { %v7498_v30 = vadd.f32 1.0, %v5759_v27  ;;  %v5763_v44 = vpop.eup %5762  ;;  %v1674_v51 = vsub.f32 1.0, %v1673_v35  ;;  %v1723_v39 = vand.u32 2147483647, %v7475_v18  ;;  %5770 = vrcp.f32 %v7488_v36 }
  0x8d   : > { %v1666_v13 = vsel %vm7482_vm9, %v5751_v43, %v1662_v34  ;;  %v1687_v49 = vmul.f32 %v5763_v44, %v7456_v21  ;;  %vm7507_vm14 = vcmp.eq.f32.partialorder %v1709_v32, 8.507059e+37  ;;  %v1725_v53 = vand.u32 2147483648, %v7475_v18 }
  0x8e   : > { %v5765_v55 = vpop.eup %5764  ;;  %v1671_v60 = vsel %vm7446_vm5, %v1670_v57, %v1666_v13  ;;  %v1675_v50 = vmul.f32 %v5761_v40, %v1674_v51  ;;  %v1712_v22 = vor.u32 1.1754944e-38, %v1711_v38  ;;  %vm1692_vm0 = vweird.f32 %v5763_v44 }
  0x8f   : > { %v5767_v4 = vpop.eup %5766  ;;  %v5021_v42 = vmul.f32 %v1671_v60, %v7194_v2  ;;  %v1701_v45 = vmul.f32 %v5765_v55, %v7461_v33  ;;  %v1688_v37 = vsub.f32 1.0, %v1687_v49  ;;  %vm1719_vm1 = vweird.f32 %v7475_v18  ;;  %vm7536_vm5 = vmor %vm1691_vm10, %vm1692_vm0 }
  0x90   : > { %v1737_v48 = vand.u32 2147483647, %v7488_v36  ;;  %v1676_v43 = vadd.f32 %v5761_v40, %v1675_v50  ;;  %vm1706_vm2 = vweird.f32 %v5765_v55  ;;  %vm7524_vm4 = vcmp.eq.f32.partialorder %v1723_v39, 8.507059e+37 }
  0x91   : > { %5277 = vst [vmem:[%s7078_s17 + $0x88] sm:$0xff] %v5021_v42  ;;  %v1702_v2 = vsub.f32 1.0, %v1701_v45  ;;  %5772 = vrcp.f32 %v7498_v30  ;;  %v5769_v5 = vpop.eup %5768  ;;  %v1689_v46 = vmul.f32 %v5763_v44, %v1688_v37  ;;  %v1726_v31 = vor.u32 1.1754944e-38, %v1725_v53  ;;  %vm7550_vm7 = vmor %vm1705_vm11, %vm1706_vm2  ;;  %v7604_v42 = vld [vmem:[%s6904_s24 + $0xf0] sm:$0xff] }
  0x92   : > { %vm1733_vm3 = vweird.f32 %v7488_v36  ;;  %v1739_v16 = vand.u32 2147483648, %v7488_v36  ;;  %v5771_v19 = vpop.eup %5770  ;;  %v1680_v59 = vsel %vm7517_vm15, %v5761_v40, %v1676_v43  ;;  %v1715_v57 = vmul.f32 %v5769_v5, %v7475_v18 }
  0x93   : > { %v1703_v20 = vmul.f32 %v5765_v55, %v1702_v2  ;;  %vm7541_vm6 = vcmp.eq.f32.partialorder %v1737_v48, 8.507059e+37  ;;  %v1685_v15 = vsel %vm7471_vm8, %v1684_v25, %v1680_v59  ;;  %v1690_v12 = vadd.f32 %v5763_v44, %v1689_v46 }
  0x94   : > { %v1729_v47 = vmul.f32 %v5771_v19, %v7488_v36  ;;  %vm1747_vm9 = vweird.f32 %v7498_v30  ;;  %v5022_v23 = vmul.f32 %v1685_v15, %v7203_v56  ;;  %v1716_v6 = vsub.f32 1.0, %v1715_v57  ;;  %v7593_v36 = vld [vmem:[%s6904_s24 + $0xe0] sm:$0xff] }
  0x95   : > { %v1704_v27 = vadd.f32 %v5765_v55, %v1703_v20  ;;  %vm1720_vm10 = vweird.f32 %v5769_v5  ;;  %v1694_v28 = vsel %vm7536_vm5, %v5763_v44, %v1690_v12  ;;  %vm1734_vm8 = vweird.f32 %v5771_v19 }
  0x96   : > { %v1730_v40 = vsub.f32 1.0, %v1729_v47  ;;  %v1751_v33 = vand.u32 2147483647, %v7498_v30  ;;  %5278 = vst [vmem:[%s7078_s17 + $0x90] sm:$0xff] %v5022_v23  ;;  %v1699_v25 = vsel %vm7493_vm13, %v1698_v52, %v1694_v28  ;;  %v1717_v56 = vmul.f32 %v5769_v5, %v1716_v6  ;;  %vm7572_vm11 = vmor %vm1719_vm1, %vm1720_vm10  ;;  %v7647_v23 = vld [vmem:[%s6904_s24 + $0x100] sm:$0xff]  ;;  %v7653_v28 = vld [vmem:[%s6904_s24 + $0x108] sm:$0xff] }
  0x97   : > { %v5773_v41 = vpop.eup %5772  ;;  %v1708_v32 = vsel %vm7550_vm7, %v5765_v55, %v1704_v27  ;;  %v7565_v34 = vadd.f32 1.0, %v5767_v4  ;;  %v5023_v35 = vmul.f32 %v1699_v25, %v7363_v62  ;;  %vm7581_vm12 = vmor %vm1733_vm3, %vm1734_vm8  ;;  %v1740_v18 = vor.u32 1.1754944e-38, %v1739_v16  ;;  %v7601_v4 = vld [vmem:[%s6904_s24 + $0xe8] sm:$0xff] }
  0x98   : > { %v1713_v38 = vsel %vm7507_vm14, %v1712_v22, %v1708_v32  ;;  %v1731_v8 = vmul.f32 %v5771_v19, %v1730_v40  ;;  %v1743_v52 = vmul.f32 %v5773_v41, %v7498_v30  ;;  %v1718_v51 = vadd.f32 %v5769_v5, %v1717_v56 }
  0x99   : > { %v5024_v13 = vmul.f32 %v1713_v38, %v7366_v9  ;;  %v1753_v39 = vand.u32 2147483648, %v7498_v30  ;;  %5279 = vst [vmem:[%s7078_s17 + $0x98] sm:$0xff] %v5023_v35  ;;  %vm1748_vm13 = vweird.f32 %v5773_v41  ;;  %5774 = vrcp.f32 %v7565_v34 }
  0x9a   : > { %v1732_v55 = vadd.f32 %v5771_v19, %v1731_v8  ;;  %v1744_v60 = vsub.f32 1.0, %v1743_v52  ;;  %v1722_v9 = vsel %vm7572_vm11, %v5769_v5, %v1718_v51  ;;  %5776 = vpow2.f32 %v7463_v14  ;;  %vm7611_vm14 = vmor %vm1747_vm9, %vm1748_vm13 }
  0x9b   : > { %5280 = vst [vmem:[%s7078_s17 + $0xa0] sm:$0xff] %v5024_v13  ;;  %v1727_v49 = vsel %vm7524_vm4, %v1726_v31, %v1722_v9  ;;  %5778 = vpow2.f32 %v7477_v29  ;;  %vm7615_vm15 = vcmp.eq.f32.partialorder %v1751_v33, 8.507059e+37  ;;  %v1754_v29 = vor.u32 1.1754944e-38, %v1753_v39  ;;  %v7682_v39 = vld [vmem:[%s6904_s24 + $0x110] sm:$0xff] }
  0x9c   : > { %v1736_v3 = vsel %vm7581_vm12, %v5771_v19, %v1732_v55  ;;  %v1745_v53 = vmul.f32 %v5773_v41, %v1744_v60  ;;  %v5025_v50 = vmul.f32 %v1727_v49, %v7369_v63  ;;  %v706_v48 = vmul.f32 1.442695, %v423_v17 }
  0x9d   : > { %v1741_v14 = vsel %vm7541_vm6, %v1740_v18, %v1736_v3  ;;  %v424_v43 = vsub.f32 0.0, %v7593_v36  ;;  %vm1761_vm0 = vweird.f32 %v7565_v34  ;;  %v1765_v30 = vand.u32 2147483647, %v7565_v34 }
  0x9e   : > { %v5026_v37 = vmul.f32 %v1741_v14, %v7387_v7  ;;  %v1746_v63 = vadd.f32 %v5773_v41, %v1745_v53  ;;  %5281 = vst [vmem:[%s7078_s17 + $0xa8] sm:$0xff] %v5025_v50  ;;  %v425_v2 = vsub.f32 0.0, %v7601_v4  ;;  %v426_v1 = vsub.f32 0.0, %v7604_v42 }
  0x9f   : > { %v5775_v5 = vpop.eup %5774  ;;  %5780 = vpow2.f32 %v706_v48  ;;  %v708_v46 = vmul.f32 1.442695, %v424_v43  ;;  %v427_v17 = vsub.f32 0.0, %v7620_v61  ;;  %v1767_v59 = vand.u32 2147483648, %v7565_v34 }
  0xa0   : > { %5282 = vst [vmem:[%s7078_s17 + $0xb0] sm:$0xff] %v5026_v37  ;;  %v1750_v7 = vsel %vm7611_vm14, %v5773_v41, %v1746_v63  ;;  %v5777_v31 = vpop.eup %5776  ;;  %v1757_v19 = vmul.f32 %v5775_v5, %v7565_v34  ;;  %v710_v0 = vmul.f32 1.442695, %v425_v2  ;;  %vm1762_vm1 = vweird.f32 %v5775_v5 }
  0xa1   : > { %v1755_v16 = vsel %vm7615_vm15, %v1754_v29, %v1750_v7  ;;  %v5779_v20 = vpop.eup %5778  ;;  %v7640_v11 = vadd.f32 1.0, %v5777_v31  ;;  %5782 = vpow2.f32 %v708_v46  ;;  %v712_v21 = vmul.f32 1.442695, %v426_v1  ;;  %vm7658_vm2 = vmor %vm1761_vm0, %vm1762_vm1 }
  0xa2   : > { %v5027_v57 = vmul.f32 %v1755_v16, %v7393_v24  ;;  %v1758_v15 = vsub.f32 1.0, %v1757_v19  ;;  %v7642_v12 = vadd.f32 1.0, %v5779_v20  ;;  %5784 = vpow2.f32 %v710_v0 }
  0xa3   : > { %5786 = vrcp.f32 %v7640_v11  ;;  %v714_v47 = vmul.f32 1.442695, %v427_v17  ;;  %v1779_v6 = vand.u32 2147483647, %v7640_v11  ;;  %v1781_v24 = vand.u32 2147483648, %v7640_v11 }
  0xa4   : > { %5283 = vst [vmem:[%s7078_s17 + $0xb8] sm:$0xff] %v5027_v57  ;;  %v1759_v27 = vmul.f32 %v5775_v5, %v1758_v15  ;;  %5788 = vrcp.f32 %v7642_v12  ;;  %vm7662_vm4 = vcmp.eq.f32.partialorder %v1765_v30, 8.507059e+37  ;;  %v1768_v25 = vor.u32 1.1754944e-38, %v1767_v59 }
  0xa5   : > { %v5781_v40 = vpop.eup %5780  ;;  %v1793_v32 = vand.u32 2147483647, %v7642_v12  ;;  %v1795_v56 = vand.u32 2147483648, %v7642_v12  ;;  %5790 = vpow2.f32 %v712_v21  ;;  %v428_v34 = vsub.f32 0.0, %v7647_v23 }
  0xa6   : > { %v1760_v35 = vadd.f32 %v5775_v5, %v1759_v27  ;;  %v7668_v38 = vadd.f32 1.0, %v5781_v40  ;;  %vm1775_vm3 = vweird.f32 %v7640_v11  ;;  %vm1789_vm5 = vweird.f32 %v7642_v12 }
  0xa7   : > { %v5783_v44 = vpop.eup %5782  ;;  %5792 = vpow2.f32 %v714_v47  ;;  %v429_v8 = vsub.f32 0.0, %v7653_v28  ;;  %vm7676_vm6 = vcmp.eq.f32.partialorder %v1779_v6, 8.507059e+37  ;;  %v1782_v62 = vor.u32 1.1754944e-38, %v1781_v24 }
  0xa8   : > { %v5785_v52 = vpop.eup %5784  ;;  %v1764_v13 = vsel %vm7658_vm2, %v5775_v5, %v1760_v35  ;;  %v1796_v18 = vor.u32 1.1754944e-38, %v1795_v56  ;;  %5794 = vrcp.f32 %v7668_v38  ;;  %vm7686_vm7 = vcmp.eq.f32.partialorder %v1793_v32, 8.507059e+37 }
  0xa9   : > { %v5787_v55 = vpop.eup %5786  ;;  %v1769_v60 = vsel %vm7662_vm4, %v1768_v25, %v1764_v13  ;;  %v1807_v49 = vand.u32 2147483647, %v7668_v38  ;;  %v7691_v3 = vadd.f32 1.0, %v5783_v44  ;;  %v7693_v53 = vadd.f32 1.0, %v5785_v52 }
  0xaa   : > { %v5789_v50 = vpop.eup %5788  ;;  %v5028_v14 = vmul.f32 %v1769_v60, %v7407_v26  ;;  %v1771_v45 = vmul.f32 %v5787_v55, %v7640_v11  ;;  %v1809_v22 = vand.u32 2147483648, %v7668_v38  ;;  %v716_v29 = vmul.f32 1.442695, %v428_v34 }
  0xab   : > { %v1785_v37 = vmul.f32 %v5789_v50, %v7642_v12  ;;  %5796 = vrcp.f32 %v7691_v3  ;;  %v7700_v63 = vmul.f32 1.442695, %v429_v8  ;;  %v430_v48 = vsub.f32 0.0, %v7682_v39  ;;  %v5791_v43 = vpop.eup %5790 }
  0xac   : > { %5284 = vst [vmem:[%s7078_s17 + $0xc0] sm:$0xff] %v5028_v14  ;;  %v1772_v30 = vsub.f32 1.0, %v1771_v45  ;;  %vm1776_vm9 = vweird.f32 %v5787_v55  ;;  %vm1803_vm10 = vweird.f32 %v7668_v38  ;;  %v1821_v26 = vand.u32 2147483647, %v7691_v3 }
  0xad   : > { %v5793_v2 = vpop.eup %5792  ;;  %v1786_v1 = vsub.f32 1.0, %v1785_v37  ;;  %vm1790_vm8 = vweird.f32 %v5789_v50  ;;  %vm7706_vm11 = vcmp.eq.f32.partialorder %v1807_v49, 8.507059e+37  ;;  %5798 = vrcp.f32 %v7693_v53  ;;  %vm7715_vm13 = vmor %vm1775_vm3, %vm1776_vm9 }
  0xae   : > { %v5795_v7 = vpop.eup %5794  ;;  %v1773_v46 = vmul.f32 %v5787_v55, %v1772_v30  ;;  %v1810_v17 = vor.u32 1.1754944e-38, %v1809_v22  ;;  %vm1817_vm12 = vweird.f32 %v7691_v3  ;;  %v1823_v31 = vand.u32 2147483648, %v7691_v3  ;;  %vm7724_vm15 = vmor %vm1789_vm5, %vm1790_vm8 }
  0xaf   : > { %v1787_v19 = vmul.f32 %v5789_v50, %v1786_v1  ;;  %v1799_v59 = vmul.f32 %v5795_v7, %v7668_v38  ;;  %vm1831_vm14 = vweird.f32 %v7693_v53  ;;  %v1835_v0 = vand.u32 2147483647, %v7693_v53 }
  0xb0   : > { %v1774_v20 = vadd.f32 %v5787_v55, %v1773_v46  ;;  %vm7728_vm0 = vcmp.eq.f32.partialorder %v1821_v26, 8.507059e+37  ;;  %v1837_v15 = vand.u32 2147483648, %v7693_v53  ;;  %v7733_v21 = vadd.f32 1.0, %v5791_v43 }
  0xb1   : > { %v5797_v47 = vpop.eup %5796  ;;  %v1788_v27 = vadd.f32 %v5789_v50, %v1787_v19  ;;  %v1800_v6 = vsub.f32 1.0, %v1799_v59  ;;  %vm1804_vm1 = vweird.f32 %v5795_v7  ;;  %5800 = vpow2.f32 %v716_v29  ;;  %v7777_v29 = vld [vmem:[%s6904_s24 + $0x118] sm:$0xff] }
  0xb2   : > { %v1778_v12 = vsel %vm7715_vm13, %v5787_v55, %v1774_v20  ;;  %v1813_v24 = vmul.f32 %v5797_v47, %v7691_v3  ;;  %5802 = vrcp.f32 %v7733_v21  ;;  %v7739_v40 = vadd.f32 1.0, %v5793_v2  ;;  %vm7750_vm4 = vmor %vm1803_vm10, %vm1804_vm1 }
  0xb3   : > { %v5799_v33 = vpop.eup %5798  ;;  %v1783_v41 = vsel %vm7676_vm6, %v1782_v62, %v1778_v12  ;;  %v1792_v25 = vsel %vm7724_vm15, %v5789_v50, %v1788_v27  ;;  %v1801_v32 = vmul.f32 %v5795_v7, %v1800_v6  ;;  %vm1818_vm2 = vweird.f32 %v5797_v47  ;;  %v7828_v6 = vld [vmem:[%s6904_s24 + $0x130] sm:$0xff] }
  0xb4   : > { %v5029_v56 = vmul.f32 %v1783_v41, %v7418_v54  ;;  %v1797_v35 = vsel %vm7686_vm7, %v1796_v18, %v1792_v25  ;;  %v1814_v44 = vsub.f32 1.0, %v1813_v24  ;;  %v1827_v8 = vmul.f32 %v5799_v33, %v7693_v53  ;;  %vm7768_vm6 = vmor %vm1817_vm12, %vm1818_vm2 }
  0xb5   : > { %v5030_v52 = vmul.f32 %v1797_v35, %v7440_v58  ;;  %v1802_v13 = vadd.f32 %v5795_v7, %v1801_v32  ;;  %v1824_v51 = vor.u32 1.1754944e-38, %v1823_v31  ;;  %vm7756_vm3 = vcmp.eq.f32.partialorder %v1835_v0, 8.507059e+37  ;;  %v7815_v0 = vld [vmem:[%s6904_s24 + $0x128] sm:$0xff] }
  0xb6   : > { %5285 = vst [vmem:[%s7078_s17 + $0xc8] sm:$0xff] %v5029_v56  ;;  %v1815_v54 = vmul.f32 %v5797_v47, %v1814_v44  ;;  %v1828_v18 = vsub.f32 1.0, %v1827_v8  ;;  %vm1832_vm5 = vweird.f32 %v5799_v33  ;;  %5804 = vrcp.f32 %v7739_v40 }
  0xb7   : > { %v5801_v38 = vpop.eup %5800  ;;  %5286 = vst [vmem:[%s7078_s17 + $0xd0] sm:$0xff] %v5030_v52  ;;  %v1806_v55 = vsel %vm7750_vm4, %v5795_v7, %v1802_v13  ;;  %v1838_v60 = vor.u32 1.1754944e-38, %v1837_v15  ;;  %vm1845_vm7 = vweird.f32 %v7733_v21  ;;  %v720_v9 = vmul.f32 1.442695, %v430_v48  ;;  %vm7783_vm9 = vmor %vm1831_vm14, %vm1832_vm5 }
  0xb8   : > { %v5803_v49 = vpop.eup %5802  ;;  %v1811_v50 = vsel %vm7706_vm11, %v1810_v17, %v1806_v55  ;;  %v1816_v14 = vadd.f32 %v5797_v47, %v1815_v54  ;;  %v1829_v45 = vmul.f32 %v5799_v33, %v1828_v18  ;;  %v1849_v22 = vand.u32 2147483647, %v7733_v21  ;;  %v7858_v18 = vld [vmem:[%s6904_s24 + $0x138] sm:$0xff] }
  0xb9   : > { %v5031_v3 = vmul.f32 %v1811_v50, %v7452_v10  ;;  %v1841_v48 = vmul.f32 %v5803_v49, %v7733_v21  ;;  %v1851_v43 = vand.u32 2147483648, %v7733_v21  ;;  %v1863_v30 = vand.u32 2147483647, %v7739_v40 }
  0xba   : > { %v1820_v26 = vsel %vm7768_vm6, %v5797_v47, %v1816_v14  ;;  %v1830_v2 = vadd.f32 %v5799_v33, %v1829_v45  ;;  %vm1846_vm10 = vweird.f32 %v5803_v49  ;;  %v7792_v10 = vadd.f32 1.0, %v5801_v38 }
  0xbb   : > { %5287 = vst [vmem:[%s7078_s17 + $0xd8] sm:$0xff] %v5031_v3  ;;  %v1825_v53 = vsel %vm7728_vm0, %v1824_v51, %v1820_v26  ;;  %v1842_v1 = vsub.f32 1.0, %v1841_v48  ;;  %5806 = vpow2.f32 %v7700_v63  ;;  %v431_v5 = vsub.f32 0.0, %v7777_v29  ;;  %vm7822_vm11 = vmor %vm1845_vm7, %vm1846_vm10 }
  0xbc   : > { %v5805_v7 = vpop.eup %5804  ;;  %v5032_v46 = vmul.f32 %v1825_v53, %v7593_v36  ;;  %v1834_v17 = vsel %vm7783_vm9, %v5799_v33, %v1830_v2  ;;  %v1865_v31 = vand.u32 2147483648, %v7739_v40  ;;  %5808 = vrcp.f32 %v7792_v10  ;;  %v7812_v36 = vld [vmem:[%s6904_s24 + $0x120] sm:$0xff] }
  0xbd   : > { %v1839_v16 = vsel %vm7756_vm3, %v1838_v60, %v1834_v17  ;;  %v1843_v19 = vmul.f32 %v5803_v49, %v1842_v1  ;;  %vm7806_vm8 = vcmp.eq.f32.partialorder %v1849_v22, 8.507059e+37  ;;  %v1855_v59 = vmul.f32 %v5805_v7, %v7739_v40 }
  0xbe   : > { %5288 = vst [vmem:[%s7078_s17 + $0xe0] sm:$0xff] %v5032_v46  ;;  %v5033_v20 = vmul.f32 %v1839_v16, %v7601_v4  ;;  %v1852_v11 = vor.u32 1.1754944e-38, %v1851_v43  ;;  %vm1859_vm12 = vweird.f32 %v7739_v40  ;;  %vm1860_vm13 = vweird.f32 %v5805_v7  ;;  %v7902_v16 = vld [vmem:[%s6904_s24 + $0x148] sm:$0xff] }
  0xbf   : > { %v1844_v15 = vadd.f32 %v5803_v49, %v1843_v19  ;;  %v1856_v47 = vsub.f32 1.0, %v1855_v59  ;;  %5810 = vpow2.f32 %v720_v9  ;;  %v722_v27 = vmul.f32 1.442695, %v431_v5  ;;  %vm7845_vm0 = vmor %vm1859_vm12, %vm1860_vm13 }
  0xc0   : > { %5289 = vst [vmem:[%s7078_s17 + $0xe8] sm:$0xff] %v5033_v20  ;;  %vm7831_vm14 = vcmp.eq.f32.partialorder %v1863_v30, 8.507059e+37  ;;  %v1866_v21 = vor.u32 1.1754944e-38, %v1865_v31  ;;  %v432_v12 = vsub.f32 0.0, %v7812_v36  ;;  %v433_v24 = vsub.f32 0.0, %v7815_v0  ;;  %v7885_v30 = vld [vmem:[%s6904_s24 + $0x140] sm:$0xff] }
  0xc1   : > { %v5807_v33 = vpop.eup %5806  ;;  %v1848_v41 = vsel %vm7822_vm11, %v5803_v49, %v1844_v15  ;;  %v1857_v25 = vmul.f32 %v5805_v7, %v1856_v47  ;;  %vm1873_vm15 = vweird.f32 %v7792_v10  ;;  %5812 = vpow2.f32 %v722_v27 }
  0xc2   : > { %v5809_v32 = vpop.eup %5808  ;;  %v1853_v56 = vsel %vm7806_vm8, %v1852_v11, %v1848_v41  ;;  %v7849_v34 = vadd.f32 1.0, %v5807_v33  ;;  %v724_v44 = vmul.f32 1.442695, %v432_v12  ;;  %v434_v8 = vsub.f32 0.0, %v7828_v6 }
  0xc3   : > { %v5034_v52 = vmul.f32 %v1853_v56, %v7604_v42  ;;  %v1858_v13 = vadd.f32 %v5805_v7, %v1857_v25  ;;  %v1869_v51 = vmul.f32 %v5809_v32, %v7792_v10  ;;  %v726_v62 = vmul.f32 1.442695, %v433_v24 }
  0xc4   : > { %vm1874_vm1 = vweird.f32 %v5809_v32  ;;  %v1877_v54 = vand.u32 2147483647, %v7792_v10  ;;  %v1879_v40 = vand.u32 2147483648, %v7792_v10  ;;  %5814 = vrcp.f32 %v7849_v34 }
  0xc5   : > { %v5811_v38 = vpop.eup %5810  ;;  %5290 = vst [vmem:[%s7078_s17 + $0xf0] sm:$0xff] %v5034_v52  ;;  %v1862_v55 = vsel %vm7845_vm0, %v5805_v7, %v1858_v13  ;;  %v1870_v58 = vsub.f32 1.0, %v1869_v51  ;;  %v1891_v42 = vand.u32 2147483647, %v7849_v34  ;;  %5816 = vpow2.f32 %v724_v44  ;;  %vm7874_vm2 = vmor %vm1873_vm15, %vm1874_vm1 }
  0xc6   : > { %v1867_v60 = vsel %vm7831_vm14, %v1866_v21, %v1862_v55  ;;  %v1893_v9 = vand.u32 2147483648, %v7849_v34  ;;  %v7867_v49 = vadd.f32 1.0, %v5811_v38  ;;  %v728_v50 = vmul.f32 1.442695, %v434_v8 }
  0xc7   : > { %v5813_v14 = vpop.eup %5812  ;;  %v5035_v45 = vmul.f32 %v1867_v60, %v7620_v61  ;;  %v1871_v22 = vmul.f32 %v5809_v32, %v1870_v58  ;;  %5818 = vpow2.f32 %v726_v62  ;;  %v435_v3 = vsub.f32 0.0, %v7858_v18 }
  0xc8   : > { %vm7878_vm4 = vcmp.eq.f32.partialorder %v1877_v54, 8.507059e+37  ;;  %v1880_v43 = vor.u32 1.1754944e-38, %v1879_v40  ;;  %5820 = vrcp.f32 %v7867_v49  ;;  %v1907_v61 = vand.u32 2147483648, %v7867_v49 }
  0xc9   : > { %5291 = vst [vmem:[%s7078_s17 + $0xf8] sm:$0xff] %v5035_v45  ;;  %v1872_v26 = vadd.f32 %v5809_v32, %v1871_v22  ;;  %v1905_v2 = vand.u32 2147483647, %v7867_v49  ;;  %v7889_v10 = vadd.f32 1.0, %v5813_v14  ;;  %v730_v53 = vmul.f32 1.442695, %v435_v3 }
  0xca   : > { %v5815_v1 = vpop.eup %5814  ;;  %vm1887_vm3 = vweird.f32 %v7849_v34  ;;  %vm7892_vm5 = vcmp.eq.f32.partialorder %v1891_v42, 8.507059e+37  ;;  %v1894_v7 = vor.u32 1.1754944e-38, %v1893_v9  ;;  %5822 = vpow2.f32 %v728_v50 }
  0xcb   : > { %v5817_v46 = vpop.eup %5816  ;;  %v1876_v17 = vsel %vm7874_vm2, %v5809_v32, %v1872_v26  ;;  %v1883_v31 = vmul.f32 %v5815_v1, %v7849_v34  ;;  %vm1901_vm6 = vweird.f32 %v7867_v49  ;;  %5824 = vrcp.f32 %v7889_v10 }
  0xcc   : > { %v1881_v19 = vsel %vm7878_vm4, %v1880_v43, %v1876_v17  ;;  %vm1888_vm7 = vweird.f32 %v5815_v1  ;;  %v1908_v63 = vor.u32 1.1754944e-38, %v1907_v61  ;;  %v436_v59 = vsub.f32 0.0, %v7885_v30 }
  0xcd   : > { %v5819_v20 = vpop.eup %5818  ;;  %v5036_v57 = vmul.f32 %v1881_v19, %v7647_v23  ;;  %v1884_v11 = vsub.f32 1.0, %v1883_v31  ;;  %vm7908_vm9 = vcmp.eq.f32.partialorder %v1905_v2, 8.507059e+37  ;;  %v7912_v47 = vadd.f32 1.0, %v5817_v46  ;;  %vm7926_vm8 = vmor %vm1887_vm3, %vm1888_vm7 }
  0xce   : > { %5826 = vpow2.f32 %v730_v53  ;;  %v5821_v27 = vpop.eup %5820  ;;  %v1919_v4 = vand.u32 2147483647, %v7889_v10  ;;  %v1921_v21 = vand.u32 2147483648, %v7889_v10  ;;  %v7916_v12 = vadd.f32 1.0, %v5819_v20 }
  0xcf   : > { %v437_v24 = vsub.f32 0.0, %v7902_v16  ;;  %5292 = vst [vmem:[%s7078_s17 + $0x100] sm:$0xff] %v5036_v57  ;;  %v1885_v33 = vmul.f32 %v5815_v1, %v1884_v11  ;;  %v1897_v23 = vmul.f32 %v5821_v27, %v7867_v49  ;;  %vm1915_vm10 = vweird.f32 %v7889_v10  ;;  %v8097_v11 = vld [vmem:[%s6904_s24 + $0x188] sm:$0xff] }
  0xd0   : > { %5828 = vrcp.f32 %v7912_v47  ;;  %v5823_v41 = vpop.eup %5822  ;;  %v1933_v32 = vand.u32 2147483647, %v7912_v47  ;;  %v1935_v56 = vand.u32 2147483648, %v7912_v47  ;;  %v732_v35 = vmul.f32 1.442695, %v436_v59 }
  0xd1   : > { %5830 = vrcp.f32 %v7916_v12  ;;  %v5825_v44 = vpop.eup %5824  ;;  %v1886_v8 = vadd.f32 %v5815_v1, %v1885_v33  ;;  %v1898_v52 = vsub.f32 1.0, %v1897_v23  ;;  %vm1902_vm11 = vweird.f32 %v5821_v27 }
  0xd2   : > { %v1947_v13 = vand.u32 2147483647, %v7916_v12  ;;  %v1911_v51 = vmul.f32 %v5825_v44, %v7889_v10  ;;  %vm7935_vm12 = vcmp.eq.f32.partialorder %v1919_v4, 8.507059e+37  ;;  %v1922_v62 = vor.u32 1.1754944e-38, %v1921_v21  ;;  %vm7947_vm0 = vmor %vm1901_vm6, %vm1902_vm11 }
  0xd3   : > { %vm1929_vm13 = vweird.f32 %v7912_v47  ;;  %v1890_v40 = vsel %vm7926_vm8, %v5815_v1, %v1886_v8  ;;  %v1899_v38 = vmul.f32 %v5821_v27, %v1898_v52  ;;  %vm1916_vm14 = vweird.f32 %v5825_v44 }
  0xd4   : > { %v5827_v54 = vpop.eup %5826  ;;  %vm1943_vm15 = vweird.f32 %v7916_v12  ;;  %v1895_v55 = vsel %vm7892_vm5, %v1894_v7, %v1890_v40  ;;  %v1912_v42 = vsub.f32 1.0, %v1911_v51  ;;  %vm7951_vm1 = vcmp.eq.f32.partialorder %v1933_v32, 8.507059e+37  ;;  %vm7973_vm4 = vmor %vm1915_vm10, %vm1916_vm14  ;;  %v8031_v51 = vld [vmem:[%s6904_s24 + $0x158] sm:$0xff]  ;;  %v8039_v40 = vld [vmem:[%s6904_s24 + $0x160] sm:$0xff] }
  0xd5   : > { %v1936_v9 = vor.u32 1.1754944e-38, %v1935_v56  ;;  %v7955_v50 = vadd.f32 1.0, %v5823_v41  ;;  %v5037_v45 = vmul.f32 %v1895_v55, %v7653_v28  ;;  %v1900_v22 = vadd.f32 %v5821_v27, %v1899_v38  ;;  %v8042_v38 = vld [vmem:[%s6904_s24 + $0x168] sm:$0xff] }
  0xd6   : > { %v5829_v14 = vpop.eup %5828  ;;  %vm7958_vm2 = vcmp.eq.f32.partialorder %v1947_v13, 8.507059e+37  ;;  %v7962_v49 = vadd.f32 1.0, %v5827_v54  ;;  %5832 = vpow2.f32 %v732_v35  ;;  %v1913_v48 = vmul.f32 %v5825_v44, %v1912_v42  ;;  %v8028_v13 = vld [vmem:[%s6904_s24 + $0x150] sm:$0xff] }
  0xd7   : > { %v5831_v37 = vpop.eup %5830  ;;  %v1925_v43 = vmul.f32 %v5829_v14, %v7912_v47  ;;  %v1949_v61 = vand.u32 2147483648, %v7916_v12  ;;  %5834 = vrcp.f32 %v7955_v50  ;;  %5293 = vst [vmem:[%s7078_s17 + $0x108] sm:$0xff] %v5037_v45  ;;  %v1904_v28 = vsel %vm7947_vm0, %v5821_v27, %v1900_v22 }
  0xd8   : > { %vm1930_vm3 = vweird.f32 %v5829_v14  ;;  %v1939_v2 = vmul.f32 %v5831_v37, %v7916_v12  ;;  %vm1944_vm5 = vweird.f32 %v5831_v37  ;;  %v1909_v53 = vsel %vm7908_vm9, %v1908_v63, %v1904_v28  ;;  %v8115_v12 = vld [vmem:[%s6904_s24 + $0x190] sm:$0xff] }
  0xd9   : > { %v1914_v1 = vadd.f32 %v5825_v44, %v1913_v48  ;;  %v1926_v5 = vsub.f32 1.0, %v1925_v43  ;;  %v1961_v7 = vand.u32 2147483647, %v7955_v50  ;;  %v5038_v46 = vmul.f32 %v1909_v53, %v7682_v39  ;;  %vm7993_vm7 = vmor %vm1929_vm13, %vm1930_vm3 }
  0xda   : > { %v1940_v17 = vsub.f32 1.0, %v1939_v2  ;;  %v1963_v10 = vand.u32 2147483648, %v7955_v50  ;;  %5836 = vrcp.f32 %v7962_v49  ;;  %v1950_v59 = vor.u32 1.1754944e-38, %v1949_v61  ;;  %vm8006_vm10 = vmor %vm1943_vm15, %vm1944_vm5 }
  0xdb   : > { %v1918_v31 = vsel %vm7973_vm4, %v5825_v44, %v1914_v1  ;;  %v1927_v19 = vmul.f32 %v5829_v14, %v1926_v5  ;;  %vm1957_vm6 = vweird.f32 %v7955_v50  ;;  %5294 = vst [vmem:[%s7078_s17 + $0x110] sm:$0xff] %v5038_v46  ;;  %vm7997_vm9 = vcmp.eq.f32.partialorder %v1961_v7, 8.507059e+37  ;;  %v8076_v1 = vld [vmem:[%s6904_s24 + $0x178] sm:$0xff]  ;;  %v8079_v5 = vld [vmem:[%s6904_s24 + $0x180] sm:$0xff] }
  0xdc   : > { %v5833_v20 = vpop.eup %5832  ;;  %v1923_v63 = vsel %vm7935_vm12, %v1922_v62, %v1918_v31  ;;  %v1941_v57 = vmul.f32 %v5831_v37, %v1940_v17  ;;  %v1975_v15 = vand.u32 2147483647, %v7962_v49  ;;  %v1977_v33 = vand.u32 2147483648, %v7962_v49 }
  0xdd   : > { %v5835_v27 = vpop.eup %5834  ;;  %v5039_v4 = vmul.f32 %v1923_v63, %v7777_v29  ;;  %v1928_v21 = vadd.f32 %v5829_v14, %v1927_v19  ;;  %v8011_v23 = vadd.f32 1.0, %v5833_v20  ;;  %v1964_v32 = vor.u32 1.1754944e-38, %v1963_v10 }
  0xde   : > { %v1942_v41 = vadd.f32 %v5831_v37, %v1941_v57  ;;  %v1953_v25 = vmul.f32 %v5835_v27, %v7955_v50  ;;  %vm1971_vm8 = vweird.f32 %v7962_v49  ;;  %vm1958_vm11 = vweird.f32 %v5835_v27 }
  0xdf   : > { %5295 = vst [vmem:[%s7078_s17 + $0x118] sm:$0xff] %v5039_v4  ;;  %v1932_v29 = vsel %vm7993_vm7, %v5829_v14, %v1928_v21  ;;  %vm8018_vm12 = vcmp.eq.f32.partialorder %v1975_v15, 8.507059e+37  ;;  %5838 = vrcp.f32 %v8011_v23  ;;  %v1978_v52 = vor.u32 1.1754944e-38, %v1977_v33  ;;  %vm8050_vm15 = vmor %vm1957_vm6, %vm1958_vm11 }
  0xe0   : > { %v5837_v56 = vpop.eup %5836  ;;  %v1937_v35 = vsel %vm7951_vm1, %v1936_v9, %v1932_v29  ;;  %v1946_v44 = vsel %vm8006_vm10, %v5831_v37, %v1942_v41  ;;  %v1954_v8 = vsub.f32 1.0, %v1953_v25  ;;  %vm1985_vm13 = vweird.f32 %v8011_v23 }
  0xe1   : > { %v5040_v34 = vmul.f32 %v1937_v35, %v7812_v36  ;;  %v1951_v62 = vsel %vm7958_vm2, %v1950_v59, %v1946_v44  ;;  %v1967_v54 = vmul.f32 %v5837_v56, %v7962_v49  ;;  %vm1972_vm14 = vweird.f32 %v5837_v56 }
  0xe2   : > { %v5041_v55 = vmul.f32 %v1951_v62, %v7815_v0  ;;  %v1955_v58 = vmul.f32 %v5835_v27, %v1954_v8  ;;  %v1989_v42 = vand.u32 2147483647, %v8011_v23  ;;  %v734_v9 = vmul.f32 1.442695, %v437_v24  ;;  %v8063_v24 = vld [vmem:[%s6904_s24 + $0x170] sm:$0xff]  ;;  %vm8070_vm0 = vmor %vm1971_vm8, %vm1972_vm14 }
  0xe3   : > { %5296 = vst [vmem:[%s7078_s17 + $0x120] sm:$0xff] %v5040_v34  ;;  %v1968_v60 = vsub.f32 1.0, %v1967_v54  ;;  %v438_v14 = vsub.f32 0.0, %v8028_v13  ;;  %v439_v0 = vsub.f32 0.0, %v8031_v51  ;;  %v1991_v22 = vand.u32 2147483648, %v8011_v23 }
  0xe4   : > { %5297 = vst [vmem:[%s7078_s17 + $0x128] sm:$0xff] %v5041_v55  ;;  %v1956_v45 = vadd.f32 %v5835_v27, %v1955_v58  ;;  %v440_v50 = vsub.f32 0.0, %v8039_v40  ;;  %v441_v3 = vsub.f32 0.0, %v8042_v38  ;;  %5840 = vpow2.f32 %v734_v9 }
  0xe5   : > { %v5839_v37 = vpop.eup %5838  ;;  %v1969_v48 = vmul.f32 %v5837_v56, %v1968_v60  ;;  %v736_v43 = vmul.f32 1.442695, %v438_v14  ;;  %v738_v61 = vmul.f32 1.442695, %v439_v0  ;;  %v442_v31 = vsub.f32 0.0, %v8063_v24 }
  0xe6   : > { %v1960_v28 = vsel %vm8050_vm15, %v5835_v27, %v1956_v45  ;;  %v1981_v2 = vmul.f32 %v5839_v37, %v8011_v23  ;;  %vm1986_vm1 = vweird.f32 %v5839_v37  ;;  %v740_v53 = vmul.f32 1.442695, %v440_v50 }
  0xe7   : > { %v1965_v7 = vsel %vm7997_vm9, %v1964_v32, %v1960_v28  ;;  %v1970_v46 = vadd.f32 %v5837_v56, %v1969_v48  ;;  %5842 = vpow2.f32 %v736_v43  ;;  %v742_v49 = vmul.f32 1.442695, %v441_v3  ;;  %vm8103_vm4 = vmor %vm1985_vm13, %vm1986_vm1 }
  0xe8   : > { %v5042_v17 = vmul.f32 %v1965_v7, %v7828_v6  ;;  %v1982_v10 = vsub.f32 1.0, %v1981_v2  ;;  %5844 = vpow2.f32 %v738_v61  ;;  %v443_v59 = vsub.f32 0.0, %v8076_v1 }
  0xe9   : > { %v1974_v19 = vsel %vm8070_vm0, %v5837_v56, %v1970_v46  ;;  %5846 = vpow2.f32 %v740_v53  ;;  %v444_v20 = vsub.f32 0.0, %v8079_v5  ;;  %vm8092_vm2 = vcmp.eq.f32.partialorder %v1989_v42, 8.507059e+37  ;;  %v8118_v56 = vld [vmem:[%s6904_s24 + $0x198] sm:$0xff] }
  0xea   : > { %5298 = vst [vmem:[%s7078_s17 + $0x130] sm:$0xff] %v5042_v17  ;;  %v1979_v63 = vsel %vm8018_vm12, %v1978_v52, %v1974_v19  ;;  %v1983_v39 = vmul.f32 %v5839_v37, %v1982_v10  ;;  %v744_v57 = vmul.f32 1.442695, %v442_v31  ;;  %v5841_v15 = vpop.eup %5840  ;;  %v1992_v21 = vor.u32 1.1754944e-38, %v1991_v22 }
  0xeb   : > { %v5043_v27 = vmul.f32 %v1979_v63, %v7858_v18  ;;  %5848 = vpow2.f32 %v742_v49  ;;  %v746_v47 = vmul.f32 1.442695, %v443_v59  ;;  %v8107_v41 = vadd.f32 1.0, %v5841_v15 }
  0xec   : > { %v1984_v33 = vadd.f32 %v5839_v37, %v1983_v39  ;;  %5850 = vpow2.f32 %v744_v57  ;;  %v748_v25 = vmul.f32 1.442695, %v444_v20  ;;  %v445_v18 = vsub.f32 0.0, %v8097_v11 }
  0xed   : > { %v5843_v32 = vpop.eup %5842  ;;  %5299 = vst [vmem:[%s7078_s17 + $0x138] sm:$0xff] %v5043_v27  ;;  %5852 = vpow2.f32 %v746_v47  ;;  %v2003_v8 = vand.u32 2147483647, %v8107_v41  ;;  %v2005_v54 = vand.u32 2147483648, %v8107_v41  ;;  %v446_v36 = vsub.f32 0.0, %v8115_v12 }
  0xee   : > { %v5845_v23 = vpop.eup %5844  ;;  %v1988_v29 = vsel %vm8103_vm4, %v5839_v37, %v1984_v33  ;;  %5854 = vrcp.f32 %v8107_v41  ;;  %v8123_v52 = vadd.f32 1.0, %v5843_v32  ;;  %v8132_v42 = vmul.f32 1.442695, %v445_v18 }
  0xef   : > { %v5847_v35 = vpop.eup %5846  ;;  %v1993_v44 = vsel %vm8092_vm2, %v1992_v21, %v1988_v29  ;;  %v8125_v34 = vadd.f32 1.0, %v5845_v23  ;;  %5856 = vpow2.f32 %v748_v25  ;;  %v447_v60 = vsub.f32 0.0, %v8118_v56 }
  0xf0   : > { %v5044_v62 = vmul.f32 %v1993_v44, %v7885_v30  ;;  %v8129_v55 = vadd.f32 1.0, %v5847_v35  ;;  %5858 = vrcp.f32 %v8123_v52  ;;  %vm1999_vm3 = vweird.f32 %v8107_v41 }
  0xf1   : > { %v5849_v58 = vpop.eup %5848  ;;  %v2017_v30 = vand.u32 2147483647, %v8123_v52  ;;  %v2019_v14 = vand.u32 2147483648, %v8123_v52  ;;  %5860 = vrcp.f32 %v8125_v34  ;;  %vm8141_vm5 = vcmp.eq.f32.partialorder %v2003_v8, 8.507059e+37 }
  0xf2   : > { %v5851_v9 = vpop.eup %5850  ;;  %5300 = vst [vmem:[%s7078_s17 + $0x140] sm:$0xff] %v5044_v62  ;;  %v2031_v22 = vand.u32 2147483647, %v8125_v34  ;;  %v2033_v50 = vand.u32 2147483648, %v8125_v34  ;;  %5862 = vrcp.f32 %v8129_v55  ;;  %v2006_v37 = vor.u32 1.1754944e-38, %v2005_v54 }
  0xf3   : > { %v5853_v0 = vpop.eup %5852  ;;  %vm2013_vm6 = vweird.f32 %v8123_v52  ;;  %v2045_v48 = vand.u32 2147483647, %v8129_v55  ;;  %v2047_v43 = vand.u32 2147483648, %v8129_v55  ;;  %vm2027_vm7 = vweird.f32 %v8125_v34 }
  0xf4   : > { %v5855_v3 = vpop.eup %5854  ;;  %vm2041_vm9 = vweird.f32 %v8129_v55  ;;  %v8154_v28 = vadd.f32 1.0, %v5849_v58  ;;  %vm8158_vm8 = vcmp.eq.f32.partialorder %v2017_v30, 8.507059e+37  ;;  %v2020_v53 = vor.u32 1.1754944e-38, %v2019_v14  ;;  %v8319_v58 = vld [vmem:[%s6904_s24 + $0x1c0] sm:$0xff] }
  0xf5   : > { %v1995_v61 = vmul.f32 %v5855_v3, %v8107_v41  ;;  %v8156_v26 = vpop.eup %5856  ;;  %vm2000_vm10 = vweird.f32 %v5855_v3  ;;  %v8162_v7 = vor.u32 1.1754944e-38, %v2033_v50  ;;  %v8164_v46 = vadd.f32 1.0, %v5851_v9 }
  0xf6   : > { %v5859_v49 = vpop.eup %5858  ;;  %vm8166_vm11 = vcmp.eq.f32.partialorder %v2031_v22, 8.507059e+37  ;;  %v2048_v31 = vor.u32 1.1754944e-38, %v2047_v43  ;;  %5864 = vrcp.f32 %v8154_v28  ;;  %v8171_v19 = vadd.f32 1.0, %v5853_v0  ;;  %vm8186_vm0 = vmor %vm1999_vm3, %vm2000_vm10 }
  0xf7   : > { %v1996_v17 = vsub.f32 1.0, %v1995_v61  ;;  %v5861_v59 = vpop.eup %5860  ;;  %v2009_v20 = vmul.f32 %v5859_v49, %v8123_v52  ;;  %vm8174_vm12 = vcmp.eq.f32.partialorder %v2045_v48, 8.507059e+37  ;;  %vm2055_vm13 = vweird.f32 %v8154_v28 }
  0xf8   : > { %v2059_v39 = vand.u32 2147483647, %v8154_v28  ;;  %v2061_v6 = vand.u32 2147483648, %v8154_v28  ;;  %5866 = vrcp.f32 %v8164_v46  ;;  %v5863_v57 = vpop.eup %5862  ;;  %vm2014_vm14 = vweird.f32 %v5859_v49 }
  0xf9   : > { %v1997_v15 = vmul.f32 %v5855_v3, %v1996_v17  ;;  %v2023_v27 = vmul.f32 %v5861_v59, %v8125_v34  ;;  %vm2028_vm15 = vweird.f32 %v5861_v59  ;;  %v2010_v21 = vsub.f32 1.0, %v2009_v20  ;;  %vm8206_vm3 = vmor %vm2013_vm6, %vm2014_vm14 }
  0xfa   : > { %v2037_v47 = vmul.f32 %v5863_v57, %v8129_v55  ;;  %vm2042_vm1 = vweird.f32 %v5863_v57  ;;  %v8191_v33 = vor.u32 1.1754944e-38, %v2061_v6  ;;  %v2073_v18 = vand.u32 2147483647, %v8164_v46  ;;  %vm8220_vm6 = vmor %vm2027_vm7, %vm2028_vm15 }
  0xfb   : > { %v1998_v25 = vadd.f32 %v5855_v3, %v1997_v15  ;;  %v2024_v32 = vsub.f32 1.0, %v2023_v27  ;;  %v2011_v23 = vmul.f32 %v5859_v49, %v2010_v21  ;;  %vm8195_vm4 = vcmp.eq.f32.partialorder %v2059_v39, 8.507059e+37  ;;  %vm8229_vm14 = vmor %vm2041_vm9, %vm2042_vm1 }
  0xfc   : > { %v2038_v29 = vsub.f32 1.0, %v2037_v47  ;;  %v2075_v35 = vand.u32 2147483648, %v8164_v46  ;;  %5868 = vrcp.f32 %v8171_v19  ;;  %v5865_v44 = vpop.eup %5864  ;;  %vm8210_vm10 = vcmp.eq.f32.partialorder %v2073_v18, 8.507059e+37  ;;  %v8289_v18 = vld [vmem:[%s6904_s24 + $0x1a8] sm:$0xff] }
  0xfd   : > { %v2002_v8 = vsel %vm8186_vm0, %v5855_v3, %v1998_v25  ;;  %v2025_v54 = vmul.f32 %v5861_v59, %v2024_v32  ;;  %vm2083_vm2 = vweird.f32 %v8171_v19  ;;  %v2012_v14 = vadd.f32 %v5859_v49, %v2011_v23 }
  0xfe   : > { %v5867_v9 = vpop.eup %5866  ;;  %v2007_v30 = vsel %vm8141_vm5, %v2006_v37, %v2002_v8  ;;  %v2039_v0 = vmul.f32 %v5863_v57, %v2038_v29  ;;  %v2051_v22 = vmul.f32 %v5865_v44, %v8154_v28  ;;  %vm2056_vm5 = vweird.f32 %v5865_v44  ;;  %v8303_v29 = vld [vmem:[%s6904_s24 + $0x1b0] sm:$0xff] }
  0xff   : > { %v5045_v50 = vmul.f32 %v2007_v30, %v7902_v16  ;;  %v2026_v3 = vadd.f32 %v5861_v59, %v2025_v54  ;;  %v2065_v34 = vmul.f32 %v5867_v9, %v8164_v46  ;;  %v2016_v37 = vsel %vm8206_vm3, %v5859_v49, %v2012_v14  ;;  %vm8253_vm9 = vmor %vm2055_vm13, %vm2056_vm5 }
 0x100   : > { %v2040_v48 = vadd.f32 %v5863_v57, %v2039_v0  ;;  %v2052_v43 = vsub.f32 1.0, %v2051_v22  ;;  %vm2070_vm7 = vweird.f32 %v5867_v9  ;;  %v2021_v16 = vsel %vm8158_vm8, %v2020_v53, %v2016_v37 }
 0x101   : > { %5301 = vst [vmem:[%s7078_s17 + $0x148] sm:$0xff] %v5045_v50  ;;  %v2030_v55 = vsel %vm8220_vm6, %v5861_v59, %v2026_v3  ;;  %v2066_v61 = vsub.f32 1.0, %v2065_v34  ;;  %v2076_v17 = vor.u32 1.1754944e-38, %v2075_v35  ;;  %v5046_v39 = vmul.f32 %v2021_v16, %v8028_v13  ;;  %v8259_v59 = vld [vmem:[%s6904_s24 + $0x1a0] sm:$0xff]  ;;  %v8307_v35 = vld [vmem:[%s6904_s24 + $0x1b8] sm:$0xff] }
 0x102   : > { %v5869_v20 = vpop.eup %5868  ;;  %v2035_v49 = vsel %vm8166_vm11, %v8162_v7, %v2030_v55  ;;  %v2044_v6 = vsel %vm8229_vm14, %v5863_v57, %v2040_v48  ;;  %v2053_v15 = vmul.f32 %v5865_v44, %v2052_v43  ;;  %vm14273_vm8 = vweird.f32 %v8164_v46 }
 0x103   : > { %v5047_v2 = vmul.f32 %v2035_v49, %v8031_v51  ;;  %v2049_v53 = vsel %vm8174_vm12, %v2048_v31, %v2044_v6  ;;  %v2067_v10 = vmul.f32 %v5867_v9, %v2066_v61  ;;  %v2079_v7 = vmul.f32 %v5869_v20, %v8171_v19  ;;  %5302 = vst [vmem:[%s7078_s17 + $0x150] sm:$0xff] %v5046_v39  ;;  %vm8266_vm11 = vmor %vm14273_vm8, %vm2070_vm7 }
 0x104   : > { %v5048_v57 = vmul.f32 %v2049_v53, %v8039_v40  ;;  %v2054_v51 = vadd.f32 %v5865_v44, %v2053_v15  ;;  %vm2084_vm12 = vweird.f32 %v5869_v20  ;;  %v2087_v28 = vand.u32 2147483647, %v8171_v19  ;;  %v8344_v15 = vld [vmem:[%s6904_s24 + $0x1d0] sm:$0xff] }
 0x105   : > { %5303 = vst [vmem:[%s7078_s17 + $0x158] sm:$0xff] %v5047_v2  ;;  %v2068_v63 = vadd.f32 %v5867_v9, %v2067_v10  ;;  %v2080_v27 = vsub.f32 1.0, %v2079_v7  ;;  %v2089_v4 = vand.u32 2147483648, %v8171_v19  ;;  %v8274_v40 = vadd.f32 1.0, %v8156_v26  ;;  %vm8297_vm13 = vmor %vm2083_vm2, %vm2084_vm12 }
 0x106   : > { %5304 = vst [vmem:[%s7078_s17 + $0x160] sm:$0xff] %v5048_v57  ;;  %v2058_v46 = vsel %vm8253_vm9, %v5865_v44, %v2054_v51  ;;  %5870 = vpow2.f32 %v8132_v42  ;;  %v752_v21 = vmul.f32 1.442695, %v446_v36  ;;  %v448_v47 = vsub.f32 0.0, %v8259_v59 }
 0x107   : > { %v2063_v25 = vsel %vm8195_vm4, %v8191_v33, %v2058_v46  ;;  %v2072_v26 = vsel %vm8266_vm11, %v5867_v9, %v2068_v63  ;;  %v2081_v32 = vmul.f32 %v5869_v20, %v2080_v27  ;;  %v2090_v33 = vor.u32 1.1754944e-38, %v2089_v4  ;;  %v8322_v9 = vld [vmem:[%s6904_s24 + $0x1c8] sm:$0xff] }
 0x108   : > { %v5049_v42 = vmul.f32 %v2063_v25, %v8042_v38  ;;  %v2077_v23 = vsel %vm8210_vm10, %v2076_v17, %v2072_v26  ;;  %5872 = vrcp.f32 %v8274_v40  ;;  %vm2088_vm15 = vcmp.eq.f32.partialorder %v2087_v28, 8.507059e+37 }
 0x109   : > { %v5050_v41 = vmul.f32 %v2077_v23, %v8063_v24  ;;  %v2082_v38 = vadd.f32 %v5869_v20, %v2081_v32  ;;  %5874 = vpow2.f32 %v752_v21  ;;  %v754_v19 = vmul.f32 1.442695, %v447_v60 }
 0x10a   : > { %5305 = vst [vmem:[%s7078_s17 + $0x168] sm:$0xff] %v5049_v42  ;;  %v756_v44 = vmul.f32 1.442695, %v448_v47  ;;  %v449_v8 = vsub.f32 0.0, %v8289_v18  ;;  %v2101_v54 = vand.u32 2147483647, %v8274_v40  ;;  %vm2097_vm0 = vweird.f32 %v8274_v40 }
 0x10b   : > { %5306 = vst [vmem:[%s7078_s17 + $0x170] sm:$0xff] %v5050_v41  ;;  %v2086_v62 = vsel %vm8297_vm13, %v5869_v20, %v2082_v38  ;;  %v450_v24 = vsub.f32 0.0, %v8303_v29  ;;  %5876 = vpow2.f32 %v754_v19  ;;  %v451_v52 = vsub.f32 0.0, %v8307_v35 }
 0x10c   : > { %v5871_v30 = vpop.eup %5870  ;;  %v2091_v14 = vsel %vm2088_vm15, %v2090_v33, %v2086_v62  ;;  %v758_v60 = vmul.f32 1.442695, %v449_v8  ;;  %5878 = vpow2.f32 %v756_v44  ;;  %v452_v34 = vsub.f32 0.0, %v8319_v58 }
 0x10d   : > { %v5051_v0 = vmul.f32 %v2091_v14, %v8076_v1  ;;  %v8326_v22 = vadd.f32 1.0, %v5871_v30  ;;  %v760_v50 = vmul.f32 1.442695, %v450_v24  ;;  %v762_v45 = vmul.f32 1.442695, %v451_v52 }
 0x10e   : > { %v5873_v3 = vpop.eup %5872  ;;  %5880 = vpow2.f32 %v758_v60  ;;  %v453_v37 = vsub.f32 0.0, %v8322_v9  ;;  %v2103_v43 = vand.u32 2147483648, %v8274_v40  ;;  %v764_v55 = vmul.f32 1.442695, %v452_v34 }
 0x10f   : > { %5307 = vst [vmem:[%s7078_s17 + $0x178] sm:$0xff] %v5051_v0  ;;  %v2093_v48 = vmul.f32 %v5873_v3, %v8274_v40  ;;  %5882 = vrcp.f32 %v8326_v22  ;;  %v5875_v1 = vpop.eup %5874  ;;  %vm2098_vm1 = vweird.f32 %v5873_v3  ;;  %v2115_v16 = vand.u32 2147483647, %v8326_v22 }
 0x110   : > { %v8336_v17 = vadd.f32 1.0, %v5875_v1  ;;  %5884 = vpow2.f32 %v760_v50  ;;  %v766_v20 = vmul.f32 1.442695, %v453_v37  ;;  %vm8338_vm2 = vcmp.eq.f32.partialorder %v2101_v54, 8.507059e+37  ;;  %vm8351_vm3 = vmor %vm2097_vm0, %vm2098_vm1 }
 0x111   : > { %v2094_v61 = vsub.f32 1.0, %v2093_v48  ;;  %v5877_v39 = vpop.eup %5876  ;;  %v2117_v6 = vand.u32 2147483648, %v8326_v22  ;;  %5886 = vpow2.f32 %v762_v45  ;;  %v2104_v13 = vor.u32 1.1754944e-38, %v2103_v43 }
 0x112   : > { %v5879_v2 = vpop.eup %5878  ;;  %vm2111_vm4 = vweird.f32 %v8326_v22  ;;  %5888 = vrcp.f32 %v8336_v17  ;;  %vm8355_vm10 = vcmp.eq.f32.partialorder %v2115_v16, 8.507059e+37  ;;  %v2129_v51 = vand.u32 2147483647, %v8336_v17 }
 0x113   : > { %v2095_v53 = vmul.f32 %v5873_v3, %v2094_v61  ;;  %v8360_v31 = vadd.f32 1.0, %v5877_v39  ;;  %v8362_v28 = vadd.f32 1.0, %v5879_v2  ;;  %5890 = vpow2.f32 %v764_v55 }
 0x114   : > { %v5881_v10 = vpop.eup %5880  ;;  %v2131_v4 = vand.u32 2147483648, %v8336_v17  ;;  %5892 = vpow2.f32 %v766_v20  ;;  %v454_v40 = vsub.f32 0.0, %v8344_v15  ;;  %v2118_v21 = vor.u32 1.1754944e-38, %v2117_v6 }
 0x115   : > { %v5883_v63 = vpop.eup %5882  ;;  %v2096_v27 = vadd.f32 %v5873_v3, %v2095_v53  ;;  %vm2125_vm6 = vweird.f32 %v8336_v17  ;;  %5894 = vrcp.f32 %v8360_v31  ;;  %v2143_v26 = vand.u32 2147483647, %v8360_v31 }
 0x116   : > { %v2107_v46 = vmul.f32 %v5883_v63, %v8326_v22  ;;  %v5885_v47 = vpop.eup %5884  ;;  %v2145_v32 = vand.u32 2147483648, %v8360_v31  ;;  %v8373_v42 = vadd.f32 1.0, %v5881_v10  ;;  %vm2112_vm14 = vweird.f32 %v5883_v63 }
 0x117   : > { %v2100_v25 = vsel %vm8351_vm3, %v5873_v3, %v2096_v27  ;;  %v5887_v23 = vpop.eup %5886  ;;  %vm8377_vm5 = vcmp.eq.f32.partialorder %v2129_v51, 8.507059e+37  ;;  %5896 = vrcp.f32 %v8362_v28  ;;  %v2132_v44 = vor.u32 1.1754944e-38, %v2131_v4  ;;  %vm8397_vm9 = vmor %vm2111_vm4, %vm2112_vm14 }
 0x118   : > { %v2105_v36 = vsel %vm8338_vm2, %v2104_v13, %v2100_v25  ;;  %v2108_v33 = vsub.f32 1.0, %v2107_v46  ;;  %v5889_v38 = vpop.eup %5888  ;;  %v2157_v8 = vand.u32 2147483647, %v8362_v28  ;;  %v8384_v62 = vmul.f32 1.442695, %v454_v40 }
 0x119   : > { %v5052_v19 = vmul.f32 %v2105_v36, %v8079_v5  ;;  %v8386_v54 = vpop.eup %5890  ;;  %v2121_v30 = vmul.f32 %v5889_v38, %v8336_v17  ;;  %vm2139_vm7 = vweird.f32 %v8360_v31  ;;  %v2159_v14 = vand.u32 2147483648, %v8362_v28  ;;  %v8562_v36 = vld [vmem:[%s6904_s24 + $0x208] sm:$0xff] }
 0x11a   : > { %v2109_v24 = vmul.f32 %v5883_v63, %v2108_v33  ;;  %v8391_v60 = vpop.eup %5892  ;;  %vm8401_vm8 = vcmp.eq.f32.partialorder %v2143_v26, 8.507059e+37  ;;  %v2146_v0 = vor.u32 1.1754944e-38, %v2145_v32  ;;  %vm2153_vm11 = vweird.f32 %v8362_v28 }
 0x11b   : > { %5308 = vst [vmem:[%s7078_s17 + $0x180] sm:$0xff] %v5052_v19  ;;  %5898 = vrcp.f32 %v8373_v42  ;;  %v5895_v50 = vpop.eup %5894  ;;  %v2122_v45 = vsub.f32 1.0, %v2121_v30  ;;  %vm2126_vm12 = vweird.f32 %v5889_v38  ;;  %vm2167_vm13 = vweird.f32 %v8373_v42 }
 0x11c   : > { %v2110_v3 = vadd.f32 %v5883_v63, %v2109_v24  ;;  %v2135_v22 = vmul.f32 %v5895_v50, %v8360_v31  ;;  %vm8409_vm15 = vcmp.eq.f32.partialorder %v2157_v8, 8.507059e+37  ;;  %v2160_v37 = vor.u32 1.1754944e-38, %v2159_v14  ;;  %vm8425_vm0 = vmor %vm2125_vm6, %vm2126_vm12 }
 0x11d   : > { %v2171_v48 = vand.u32 2147483647, %v8373_v42  ;;  %v8414_v43 = vadd.f32 1.0, %v5885_v47  ;;  %v5897_v1 = vpop.eup %5896  ;;  %v2123_v55 = vmul.f32 %v5889_v38, %v2122_v45  ;;  %v2173_v61 = vand.u32 2147483648, %v8373_v42 }
 0x11e   : > { %v2114_v16 = vsel %vm8397_vm9, %v5883_v63, %v2110_v3  ;;  %v8419_v20 = vadd.f32 1.0, %v5887_v23  ;;  %v2136_v6 = vsub.f32 1.0, %v2135_v22  ;;  %vm2140_vm1 = vweird.f32 %v5895_v50 }
 0x11f   : > { %v2119_v39 = vsel %vm8355_vm10, %v2118_v21, %v2114_v16  ;;  %v2149_v2 = vmul.f32 %v5897_v1, %v8362_v28  ;;  %v2124_v13 = vadd.f32 %v5889_v38, %v2123_v55  ;;  %vm2154_vm2 = vweird.f32 %v5897_v1  ;;  %vm8439_vm4 = vmor %vm2139_vm7, %vm2140_vm1 }
 0x120   : > { %v5053_v53 = vmul.f32 %v2119_v39, %v8097_v11  ;;  %5900 = vrcp.f32 %v8414_v43  ;;  %v2137_v7 = vmul.f32 %v5895_v50, %v2136_v6  ;;  %v2185_v51 = vand.u32 2147483647, %v8414_v43  ;;  %vm8455_vm10 = vmor %vm2153_vm11, %vm2154_vm2 }
 0x121   : > { %v5899_v10 = vpop.eup %5898  ;;  %v2150_v57 = vsub.f32 1.0, %v2149_v2  ;;  %v2187_v17 = vand.u32 2147483648, %v8414_v43  ;;  %v2128_v63 = vsel %vm8425_vm0, %v5889_v38, %v2124_v13  ;;  %vm8444_vm3 = vcmp.eq.f32.partialorder %v2171_v48, 8.507059e+37  ;;  %v8508_v48 = vld [vmem:[%s6904_s24 + $0x1e0] sm:$0xff] }
 0x122   : > { %5309 = vst [vmem:[%s7078_s17 + $0x188] sm:$0xff] %v5053_v53  ;;  %v2163_v11 = vmul.f32 %v5899_v10, %v8373_v42  ;;  %5902 = vrcp.f32 %v8419_v20  ;;  %v2133_v40 = vsel %vm8377_vm5, %v2132_v44, %v2128_v63  ;;  %v2138_v46 = vadd.f32 %v5895_v50, %v2137_v7 }
 0x123   : > { %v2151_v21 = vmul.f32 %v5897_v1, %v2150_v57  ;;  %v2174_v47 = vor.u32 1.1754944e-38, %v2173_v61  ;;  %v5054_v31 = vmul.f32 %v2133_v40, %v8115_v12  ;;  %vm2168_vm6 = vweird.f32 %v5899_v10  ;;  %v8520_v61 = vld [vmem:[%s6904_s24 + $0x1e8] sm:$0xff]  ;;  %v8540_v57 = vld [vmem:[%s6904_s24 + $0x1f0] sm:$0xff] }
 0x124   : > { %v2164_v26 = vsub.f32 1.0, %v2163_v11  ;;  %vm2181_vm14 = vweird.f32 %v8414_v43  ;;  %v2142_v32 = vsel %vm8439_vm4, %v5895_v50, %v2138_v46  ;;  %vm8462_vm5 = vcmp.eq.f32.partialorder %v2185_v51, 8.507059e+37  ;;  %vm8478_vm7 = vmor %vm2167_vm13, %vm2168_vm6  ;;  %v8550_v46 = vld [vmem:[%s6904_s24 + $0x1f8] sm:$0xff] }
 0x125   : > { %v2152_v23 = vadd.f32 %v5897_v1, %v2151_v21  ;;  %v2188_v12 = vor.u32 1.1754944e-38, %v2187_v17  ;;  %5310 = vst [vmem:[%s7078_s17 + $0x190] sm:$0xff] %v5054_v31  ;;  %v2147_v28 = vsel %vm8401_vm8, %v2146_v0, %v2142_v32  ;;  %v2199_v38 = vand.u32 2147483647, %v8419_v20  ;;  %v8553_v21 = vld [vmem:[%s6904_s24 + $0x200] sm:$0xff] }
 0x126   : > { %v5901_v33 = vpop.eup %5900  ;;  %v2165_v41 = vmul.f32 %v5899_v10, %v2164_v26  ;;  %v8471_v19 = vadd.f32 1.0, %v8386_v54  ;;  %v5055_v44 = vmul.f32 %v2147_v28, %v8118_v56  ;;  %vm2195_vm9 = vweird.f32 %v8419_v20 }
 0x127   : > { %v2156_v8 = vsel %vm8455_vm10, %v5897_v1, %v2152_v23  ;;  %v2177_v30 = vmul.f32 %v5901_v33, %v8414_v43  ;;  %v2201_v56 = vand.u32 2147483648, %v8419_v20  ;;  %v8488_v52 = vadd.f32 1.0, %v8391_v60 }
 0x128   : > { %v5903_v14 = vpop.eup %5902  ;;  %v2161_v54 = vsel %vm8409_vm15, %v2160_v37, %v2156_v8  ;;  %v2166_v5 = vadd.f32 %v5899_v10, %v2165_v41  ;;  %5311 = vst [vmem:[%s7078_s17 + $0x198] sm:$0xff] %v5055_v44  ;;  %vm2182_vm8 = vweird.f32 %v5901_v33  ;;  %vm8495_vm12 = vcmp.eq.f32.partialorder %v2199_v38, 8.507059e+37  ;;  %v8505_v37 = vld [vmem:[%s6904_s24 + $0x1d8] sm:$0xff] }
 0x129   : > { %v5056_v42 = vmul.f32 %v2161_v54, %v8259_v59  ;;  %v2178_v0 = vsub.f32 1.0, %v2177_v30  ;;  %v2191_v50 = vmul.f32 %v5903_v14, %v8419_v20  ;;  %vm2196_vm11 = vweird.f32 %v5903_v14  ;;  %vm8513_vm13 = vmor %vm2181_vm14, %vm2182_vm8 }
 0x12a   : > { %v2170_v3 = vsel %vm8478_vm7, %v5899_v10, %v2166_v5  ;;  %5904 = vrcp.f32 %v8471_v19  ;;  %v2215_v34 = vand.u32 2147483648, %v8471_v19  ;;  %v2202_v55 = vor.u32 1.1754944e-38, %v2201_v56  ;;  %vm8528_vm1 = vmor %vm2195_vm9, %vm2196_vm11 }
 0x12b   : > { %5312 = vst [vmem:[%s7078_s17 + $0x1a0] sm:$0xff] %v5056_v42  ;;  %v2175_v60 = vsel %vm8444_vm3, %v2174_v47, %v2170_v3  ;;  %v2179_v59 = vmul.f32 %v5901_v33, %v2178_v0  ;;  %v2192_v22 = vsub.f32 1.0, %v2191_v50  ;;  %vm2209_vm15 = vweird.f32 %v8471_v19 }
 0x12c   : > { %v5057_v1 = vmul.f32 %v2175_v60, %v8289_v18  ;;  %5906 = vrcp.f32 %v8488_v52  ;;  %v2213_v6 = vand.u32 2147483647, %v8471_v19  ;;  %vm2223_vm0 = vweird.f32 %v8488_v52  ;;  %v8605_v18 = vld [vmem:[%s6904_s24 + $0x210] sm:$0xff] }
 0x12d   : > { %v2180_v39 = vadd.f32 %v5901_v33, %v2179_v59  ;;  %v2193_v49 = vmul.f32 %v5903_v14, %v2192_v22  ;;  %v2216_v43 = vor.u32 1.1754944e-38, %v2215_v34  ;;  %5908 = vpow2.f32 %v8384_v62 }
 0x12e   : > { %5313 = vst [vmem:[%s7078_s17 + $0x1a8] sm:$0xff] %v5057_v1  ;;  %v455_v2 = vsub.f32 0.0, %v8505_v37  ;;  %v456_v53 = vsub.f32 0.0, %v8508_v48  ;;  %v2227_v7 = vand.u32 2147483647, %v8488_v52  ;;  %v457_v20 = vsub.f32 0.0, %v8520_v61 }
 0x12f   : > { %v2184_v13 = vsel %vm8513_vm13, %v5901_v33, %v2180_v39  ;;  %v2194_v10 = vadd.f32 %v5903_v14, %v2193_v49  ;;  %v2229_v17 = vand.u32 2147483648, %v8488_v52  ;;  %v459_v28 = vsub.f32 0.0, %v8550_v46 }
 0x130   : > { %v5905_v51 = vpop.eup %5904  ;;  %v2189_v62 = vsel %vm8462_vm5, %v2188_v12, %v2184_v13  ;;  %v770_v63 = vmul.f32 1.442695, %v455_v2  ;;  %v772_v27 = vmul.f32 1.442695, %v456_v53  ;;  %v774_v25 = vmul.f32 1.442695, %v457_v20 }
 0x131   : > { %v5058_v11 = vmul.f32 %v2189_v62, %v8303_v29  ;;  %v2198_v4 = vsel %vm8528_vm1, %v5903_v14, %v2194_v10  ;;  %v2205_v40 = vmul.f32 %v5905_v51, %v8471_v19  ;;  %vm2210_vm2 = vweird.f32 %v5905_v51 }
 0x132   : > { %v5907_v47 = vpop.eup %5906  ;;  %v2203_v31 = vsel %vm8495_vm12, %v2202_v55, %v2198_v4  ;;  %5910 = vpow2.f32 %v770_v63  ;;  %v458_v29 = vsub.f32 0.0, %v8540_v57  ;;  %v460_v41 = vsub.f32 0.0, %v8553_v21  ;;  %vm8572_vm3 = vmor %vm2209_vm15, %vm2210_vm2 }
 0x133   : > { %5314 = vst [vmem:[%s7078_s17 + $0x1b0] sm:$0xff] %v5058_v11  ;;  %v5059_v26 = vmul.f32 %v2203_v31, %v8307_v35  ;;  %v2206_v32 = vsub.f32 1.0, %v2205_v40  ;;  %v2219_v23 = vmul.f32 %v5907_v47, %v8488_v52  ;;  %vm2224_vm4 = vweird.f32 %v5907_v47  ;;  %v5909_v12 = vpop.eup %5908 }
 0x134   : > { %5912 = vpow2.f32 %v772_v27  ;;  %v776_v33 = vmul.f32 1.442695, %v458_v29  ;;  %v8567_v8 = vadd.f32 1.0, %v5909_v12  ;;  %v778_v24 = vmul.f32 1.442695, %v459_v28  ;;  %vm8581_vm6 = vmor %vm2223_vm0, %vm2224_vm4 }
 0x135   : > { %5315 = vst [vmem:[%s7078_s17 + $0x1b8] sm:$0xff] %v5059_v26  ;;  %v2207_v38 = vmul.f32 %v5905_v51, %v2206_v32  ;;  %v2220_v44 = vsub.f32 1.0, %v2219_v23  ;;  %5914 = vpow2.f32 %v774_v25  ;;  %v780_v30 = vmul.f32 1.442695, %v460_v41  ;;  %v8732_v23 = vld [vmem:[%s6904_s24 + $0x218] sm:$0xff] }
 0x136   : > { %5916 = vpow2.f32 %v776_v33  ;;  %v461_v14 = vsub.f32 0.0, %v8562_v36  ;;  %vm2214_vm10 = vcmp.eq.f32.partialorder %v2213_v6, 8.507059e+37  ;;  %vm8585_vm14 = vcmp.eq.f32.partialorder %v2227_v7, 8.507059e+37 }
 0x137   : > { %v2208_v54 = vadd.f32 %v5905_v51, %v2207_v38  ;;  %v2221_v5 = vmul.f32 %v5907_v47, %v2220_v44  ;;  %5918 = vrcp.f32 %v8567_v8  ;;  %v2230_v0 = vor.u32 1.1754944e-38, %v2229_v17 }
 0x138   : > { %v5911_v56 = vpop.eup %5910  ;;  %v782_v50 = vmul.f32 1.442695, %v461_v14  ;;  %5920 = vpow2.f32 %v778_v24  ;;  %v2241_v22 = vand.u32 2147483647, %v8567_v8  ;;  %v2243_v34 = vand.u32 2147483648, %v8567_v8 }
 0x139   : > { %v2212_v3 = vsel %vm8572_vm3, %v5905_v51, %v2208_v54  ;;  %v2222_v45 = vadd.f32 %v5907_v47, %v2221_v5  ;;  %v8591_v60 = vadd.f32 1.0, %v5911_v56  ;;  %5922 = vpow2.f32 %v780_v30 }
 0x13a   : > { %v5913_v59 = vpop.eup %5912  ;;  %v2217_v52 = vsel %vm2214_vm10, %v2216_v43, %v2212_v3  ;;  %vm2237_vm5 = vweird.f32 %v8567_v8  ;;  %vm8615_vm7 = vcmp.eq.f32.partialorder %v2241_v22, 8.507059e+37  ;;  %v2244_v20 = vor.u32 1.1754944e-38, %v2243_v34 }
 0x13b   : > { %v5915_v1 = vpop.eup %5914  ;;  %v5060_v16 = vmul.f32 %v2217_v52, %v8319_v58  ;;  %v2226_v55 = vsel %vm8581_vm6, %v5907_v47, %v2222_v45  ;;  %5924 = vrcp.f32 %v8591_v60  ;;  %v8602_v6 = vadd.f32 1.0, %v5913_v59 }
 0x13c   : > { %v5917_v39 = vpop.eup %5916  ;;  %v2231_v49 = vsel %vm8585_vm14, %v2230_v0, %v2226_v55  ;;  %5926 = vpow2.f32 %v782_v50  ;;  %v2255_v2 = vand.u32 2147483647, %v8591_v60  ;;  %v8610_v53 = vadd.f32 1.0, %v5915_v1 }
 0x13d   : > { %v5919_v43 = vpop.eup %5918  ;;  %5316 = vst [vmem:[%s7078_s17 + $0x1c0] sm:$0xff] %v5060_v16  ;;  %v5061_v58 = vmul.f32 %v2231_v49, %v8322_v9  ;;  %v8612_v13 = vadd.f32 1.0, %v5917_v39  ;;  %v2257_v51 = vand.u32 2147483648, %v8591_v60  ;;  %vm2251_vm9 = vweird.f32 %v8591_v60 }
 0x13e   : > { %v2233_v10 = vmul.f32 %v5919_v43, %v8567_v8  ;;  %v5921_v62 = vpop.eup %5920  ;;  %5928 = vrcp.f32 %v8602_v6  ;;  %v2271_v9 = vand.u32 2147483648, %v8602_v6  ;;  %v462_v17 = vsub.f32 0.0, %v8605_v18 }
 0x13f   : > { %5317 = vst [vmem:[%s7078_s17 + $0x1c8] sm:$0xff] %v5061_v58  ;;  %v5923_v63 = vpop.eup %5922  ;;  %vm2238_vm8 = vweird.f32 %v5919_v43  ;;  %v2269_v11 = vand.u32 2147483647, %v8602_v6  ;;  %5930 = vrcp.f32 %v8610_v53  ;;  %vm8627_vm11 = vcmp.eq.f32.partialorder %v2255_v2, 8.507059e+37 }
 0x140   : > { %v2234_v27 = vsub.f32 1.0, %v2233_v10  ;;  %v2283_v47 = vand.u32 2147483647, %v8610_v53  ;;  %v2285_v31 = vand.u32 2147483648, %v8610_v53  ;;  %5932 = vrcp.f32 %v8612_v13  ;;  %vm8638_vm13 = vmor %vm2237_vm5, %vm2238_vm8 }
 0x141   : > { %v5925_v4 = vpop.eup %5924  ;;  %v2258_v32 = vor.u32 1.1754944e-38, %v2257_v51  ;;  %vm2265_vm12 = vweird.f32 %v8602_v6  ;;  %v2272_v12 = vor.u32 1.1754944e-38, %v2271_v9  ;;  %vm2279_vm15 = vweird.f32 %v8610_v53 }
 0x142   : > { %v5927_v25 = vpop.eup %5926  ;;  %v2235_v29 = vmul.f32 %v5919_v43, %v2234_v27  ;;  %v2247_v26 = vmul.f32 %v5925_v4, %v8591_v60  ;;  %v2297_v33 = vand.u32 2147483647, %v8612_v13  ;;  %v2299_v28 = vand.u32 2147483648, %v8612_v13 }
 0x143   : > { %vm2252_vm0 = vweird.f32 %v5925_v4  ;;  %vm8645_vm1 = vcmp.eq.f32.partialorder %v2269_v11, 8.507059e+37  ;;  %v8649_v35 = vadd.f32 1.0, %v5921_v62  ;;  %vm8651_vm2 = vcmp.eq.f32.partialorder %v2283_v47, 8.507059e+37 }
 0x144   : > { %v2236_v41 = vadd.f32 %v5919_v43, %v2235_v29  ;;  %v2248_v38 = vsub.f32 1.0, %v2247_v26  ;;  %v5929_v8 = vpop.eup %5928  ;;  %v2286_v30 = vor.u32 1.1754944e-38, %v2285_v31  ;;  %vm2293_vm4 = vweird.f32 %v8612_v13  ;;  %vm8672_vm10 = vmor %vm2251_vm9, %vm2252_vm0 }
 0x145   : > { %v2300_v14 = vor.u32 1.1754944e-38, %v2299_v28  ;;  %v8656_v54 = vadd.f32 1.0, %v5923_v63  ;;  %v5931_v5 = vpop.eup %5930  ;;  %v2261_v42 = vmul.f32 %v5929_v8, %v8602_v6  ;;  %vm8661_vm3 = vcmp.eq.f32.partialorder %v2297_v33, 8.507059e+37 }
 0x146   : > { %v2240_v56 = vsel %vm8638_vm13, %v5919_v43, %v2236_v41  ;;  %v2249_v19 = vmul.f32 %v5925_v4, %v2248_v38  ;;  %v8665_v50 = vadd.f32 1.0, %v5927_v25  ;;  %v5933_v3 = vpop.eup %5932  ;;  %vm2266_vm6 = vweird.f32 %v5929_v8  ;;  %v8746_v38 = vld [vmem:[%s6904_s24 + $0x228] sm:$0xff] }
 0x147   : > { %v2245_v45 = vsel %vm8615_vm7, %v2244_v20, %v2240_v56  ;;  %v2275_v52 = vmul.f32 %v5931_v5, %v8610_v53  ;;  %5934 = vrcp.f32 %v8649_v35  ;;  %v2262_v1 = vsub.f32 1.0, %v2261_v42  ;;  %vm8690_vm7 = vmor %vm2265_vm12, %vm2266_vm6 }
 0x148   : > { %v5062_v22 = vmul.f32 %v2245_v45, %v8344_v15  ;;  %v2250_v34 = vadd.f32 %v5925_v4, %v2249_v19  ;;  %v2289_v16 = vmul.f32 %v5933_v3, %v8612_v13  ;;  %vm2280_vm14 = vweird.f32 %v5931_v5 }
 0x149   : > { %v2276_v55 = vsub.f32 1.0, %v2275_v52  ;;  %vm2294_vm5 = vweird.f32 %v5933_v3  ;;  %v2311_v60 = vand.u32 2147483647, %v8649_v35  ;;  %v2263_v49 = vmul.f32 %v5929_v8, %v2262_v1  ;;  %vm8699_vm9 = vmor %vm2279_vm15, %vm2280_vm14 }
 0x14a   : > { %5318 = vst [vmem:[%s7078_s17 + $0x1d0] sm:$0xff] %v5062_v22  ;;  %v2254_v39 = vsel %vm8672_vm10, %v5925_v4, %v2250_v34  ;;  %v2290_v43 = vsub.f32 1.0, %v2289_v16  ;;  %v2313_v58 = vand.u32 2147483648, %v8649_v35  ;;  %5936 = vrcp.f32 %v8656_v54  ;;  %v8776_v16 = vld [vmem:[%s6904_s24 + $0x240] sm:$0xff] }
 0x14b   : > { %v2259_v15 = vsel %vm8627_vm11, %v2258_v32, %v2254_v39  ;;  %v2277_v10 = vmul.f32 %v5931_v5, %v2276_v55  ;;  %v784_v7 = vmul.f32 1.442695, %v462_v17  ;;  %v2264_v51 = vadd.f32 %v5929_v8, %v2263_v49  ;;  %vm8707_vm11 = vmor %vm2293_vm4, %vm2294_vm5  ;;  %v8779_v55 = vld [vmem:[%s6904_s24 + $0x248] sm:$0xff] }
 0x14c   : > { %v5063_v20 = vmul.f32 %v2259_v15, %v8505_v37  ;;  %v2291_v6 = vmul.f32 %v5933_v3, %v2290_v43  ;;  %vm2307_vm8 = vweird.f32 %v8649_v35  ;;  %vm8711_vm12 = vcmp.eq.f32.partialorder %v2311_v60, 8.507059e+37 }
 0x14d   : > { %v5935_v9 = vpop.eup %5934  ;;  %v2278_v63 = vadd.f32 %v5931_v5, %v2277_v10  ;;  %v2314_v53 = vor.u32 1.1754944e-38, %v2313_v58  ;;  %v2325_v27 = vand.u32 2147483647, %v8656_v54  ;;  %v2268_v11 = vsel %vm8690_vm7, %v5929_v8, %v2264_v51 }
 0x14e   : > { %5319 = vst [vmem:[%s7078_s17 + $0x1d8] sm:$0xff] %v5063_v20  ;;  %v2292_v4 = vadd.f32 %v5933_v3, %v2291_v6  ;;  %v2303_v40 = vmul.f32 %v5935_v9, %v8649_v35  ;;  %v2327_v13 = vand.u32 2147483648, %v8656_v54  ;;  %v2273_v47 = vsel %vm8645_vm1, %v2272_v12, %v2268_v11  ;;  %v8768_v35 = vld [vmem:[%s6904_s24 + $0x238] sm:$0xff] }
 0x14f   : > { %v2282_v31 = vsel %vm8699_vm9, %v5931_v5, %v2278_v63  ;;  %vm2308_vm13 = vweird.f32 %v5935_v9  ;;  %vm2321_vm15 = vweird.f32 %v8656_v54  ;;  %v5064_v25 = vmul.f32 %v2273_v47, %v8508_v48  ;;  %v8743_v48 = vld [vmem:[%s6904_s24 + $0x220] sm:$0xff] }
 0x150   : > { %v2287_v29 = vsel %vm8651_vm2, %v2286_v30, %v2282_v31  ;;  %v2296_v26 = vsel %vm8707_vm11, %v5933_v3, %v2292_v4  ;;  %v2304_v32 = vsub.f32 1.0, %v2303_v40  ;;  %v5937_v12 = vpop.eup %5936  ;;  %vm8737_vm0 = vcmp.eq.f32.partialorder %v2325_v27, 8.507059e+37  ;;  %v8752_v30 = vld [vmem:[%s6904_s24 + $0x230] sm:$0xff]  ;;  %vm8758_vm1 = vmor %vm2307_vm8, %vm2308_vm13 }
 0x151   : > { %v5065_v33 = vmul.f32 %v2287_v29, %v8520_v61  ;;  %v2301_v28 = vsel %vm8661_vm3, %v2300_v14, %v2296_v26  ;;  %5938 = vrcp.f32 %v8665_v50  ;;  %5320 = vst [vmem:[%s7078_s17 + $0x1e0] sm:$0xff] %v5064_v25  ;;  %v2317_v61 = vmul.f32 %v5937_v12, %v8656_v54 }
 0x152   : > { %v5066_v44 = vmul.f32 %v2301_v28, %v8540_v57  ;;  %v2305_v8 = vmul.f32 %v5935_v9, %v2304_v32  ;;  %v2328_v24 = vor.u32 1.1754944e-38, %v2327_v13  ;;  %vm2322_vm2 = vweird.f32 %v5937_v12 }
 0x153   : > { %5321 = vst [vmem:[%s7078_s17 + $0x1e8] sm:$0xff] %v5065_v33  ;;  %vm2335_vm4 = vweird.f32 %v8665_v50  ;;  %5940 = vpow2.f32 %v784_v7  ;;  %v463_v57 = vsub.f32 0.0, %v8732_v23  ;;  %v2318_v56 = vsub.f32 1.0, %v2317_v61  ;;  %vm8786_vm3 = vmor %vm2321_vm15, %vm2322_vm2 }
 0x154   : > { %5322 = vst [vmem:[%s7078_s17 + $0x1f0] sm:$0xff] %v5066_v44  ;;  %v2306_v5 = vadd.f32 %v5935_v9, %v2305_v8  ;;  %v464_v19 = vsub.f32 0.0, %v8743_v48  ;;  %v465_v42 = vsub.f32 0.0, %v8746_v38  ;;  %v2339_v0 = vand.u32 2147483647, %v8665_v50 }
 0x155   : > { %v2341_v3 = vand.u32 2147483648, %v8665_v50  ;;  %v786_v45 = vmul.f32 1.442695, %v463_v57  ;;  %v466_v59 = vsub.f32 0.0, %v8752_v30  ;;  %v2319_v22 = vmul.f32 %v5937_v12, %v2318_v56 }
 0x156   : > { %v2310_v52 = vsel %vm8758_vm1, %v5935_v9, %v2306_v5  ;;  %v788_v34 = vmul.f32 1.442695, %v464_v19  ;;  %v790_v1 = vmul.f32 1.442695, %v465_v42  ;;  %v467_v58 = vsub.f32 0.0, %v8768_v35 }
 0x157   : > { %v5939_v60 = vpop.eup %5938  ;;  %v2315_v39 = vsel %vm8711_vm12, %v2314_v53, %v2310_v52  ;;  %5942 = vpow2.f32 %v786_v45  ;;  %v792_v43 = vmul.f32 1.442695, %v466_v59  ;;  %v2320_v2 = vadd.f32 %v5937_v12, %v2319_v22 }
 0x158   : > { %v5067_v15 = vmul.f32 %v2315_v39, %v8550_v46  ;;  %v2331_v10 = vmul.f32 %v5939_v60, %v8665_v50  ;;  %vm2336_vm10 = vweird.f32 %v5939_v60  ;;  %5944 = vpow2.f32 %v788_v34  ;;  %v8801_v46 = vld [vmem:[%s6904_s24 + $0x250] sm:$0xff] }
 0x159   : > { %v5941_v7 = vpop.eup %5940  ;;  %v794_v20 = vmul.f32 1.442695, %v467_v58  ;;  %v468_v54 = vsub.f32 0.0, %v8776_v16  ;;  %v469_v51 = vsub.f32 0.0, %v8779_v55  ;;  %v2324_v62 = vsel %vm8786_vm3, %v5937_v12, %v2320_v2  ;;  %vm8810_vm6 = vmor %vm2335_vm4, %vm2336_vm10  ;;  %v8825_v12 = vld [vmem:[%s6904_s24 + $0x258] sm:$0xff] }
 0x15a   : > { %5323 = vst [vmem:[%s7078_s17 + $0x1f8] sm:$0xff] %v5067_v15  ;;  %v2332_v6 = vsub.f32 1.0, %v2331_v10  ;;  %v8798_v9 = vadd.f32 1.0, %v5941_v7  ;;  %5946 = vpow2.f32 %v790_v1  ;;  %v2329_v63 = vsel %vm8737_vm0, %v2328_v24, %v2324_v62 }
 0x15b   : > { %5948 = vpow2.f32 %v792_v43  ;;  %v796_v17 = vmul.f32 1.442695, %v468_v54  ;;  %v798_v37 = vmul.f32 1.442695, %v469_v51  ;;  %v5068_v53 = vmul.f32 %v2329_v63, %v8553_v21 }
 0x15c   : > { %v2333_v27 = vmul.f32 %v5939_v60, %v2332_v6  ;;  %5950 = vrcp.f32 %v8798_v9  ;;  %v2342_v40 = vor.u32 1.1754944e-38, %v2341_v3  ;;  %v470_v13 = vsub.f32 0.0, %v8801_v46 }
 0x15d   : > { %v5943_v11 = vpop.eup %5942  ;;  %5952 = vpow2.f32 %v794_v20  ;;  %5324 = vst [vmem:[%s7078_s17 + $0x200] sm:$0xff] %v5068_v53  ;;  %vm2340_vm14 = vcmp.eq.f32.partialorder %v2339_v0, 8.507059e+37  ;;  %v2353_v25 = vand.u32 2147483647, %v8798_v9  ;;  %vm2349_vm5 = vweird.f32 %v8798_v9 }
 0x15e   : > { %v2334_v47 = vadd.f32 %v5939_v60, %v2333_v27  ;;  %v8816_v21 = vadd.f32 1.0, %v5943_v11  ;;  %5954 = vpow2.f32 %v796_v17  ;;  %v5945_v31 = vpop.eup %5944  ;;  %v800_v50 = vmul.f32 1.442695, %v470_v13 }
 0x15f   : > { %5956 = vpow2.f32 %v798_v37  ;;  %v2355_v32 = vand.u32 2147483648, %v8798_v9  ;;  %v8828_v44 = vadd.f32 1.0, %v5945_v31  ;;  %vm8837_vm7 = vcmp.eq.f32.partialorder %v2353_v25, 8.507059e+37 }
 0x160   : > { %v5947_v29 = vpop.eup %5946  ;;  %v2338_v26 = vsel %vm8810_vm6, %v5939_v60, %v2334_v47  ;;  %5958 = vrcp.f32 %v8816_v21  ;;  %v2367_v41 = vand.u32 2147483647, %v8816_v21  ;;  %v2369_v14 = vand.u32 2147483648, %v8816_v21 }
 0x161   : > { %v5949_v33 = vpop.eup %5948  ;;  %v2343_v28 = vsel %vm2340_vm14, %v2342_v40, %v2338_v26  ;;  %v8830_v8 = vadd.f32 1.0, %v5947_v29  ;;  %5960 = vpow2.f32 %v800_v50  ;;  %v471_v42 = vsub.f32 0.0, %v8825_v12 }
 0x162   : > { %v5951_v61 = vpop.eup %5950  ;;  %v5069_v24 = vmul.f32 %v2343_v28, %v8562_v36  ;;  %v8834_v57 = vadd.f32 1.0, %v5949_v33  ;;  %5962 = vrcp.f32 %v8828_v44  ;;  %v2356_v3 = vor.u32 1.1754944e-38, %v2355_v32 }
 0x163   : > { %v5953_v5 = vpop.eup %5952  ;;  %v2345_v56 = vmul.f32 %v5951_v61, %v8798_v9  ;;  %v2381_v36 = vand.u32 2147483647, %v8828_v44  ;;  %v2383_v45 = vand.u32 2147483648, %v8828_v44  ;;  %5964 = vrcp.f32 %v8830_v8 }
 0x164   : > { %v5955_v0 = vpop.eup %5954  ;;  %5325 = vst [vmem:[%s7078_s17 + $0x208] sm:$0xff] %v5069_v24  ;;  %vm2350_vm9 = vweird.f32 %v5951_v61  ;;  %v2395_v22 = vand.u32 2147483647, %v8830_v8  ;;  %v2397_v34 = vand.u32 2147483648, %v8830_v8  ;;  %vm2363_vm8 = vweird.f32 %v8816_v21 }
 0x165   : > { %v5957_v59 = vpop.eup %5956  ;;  %v2346_v52 = vsub.f32 1.0, %v2345_v56  ;;  %vm8850_vm11 = vcmp.eq.f32.partialorder %v2367_v41, 8.507059e+37  ;;  %v2370_v39 = vor.u32 1.1754944e-38, %v2369_v14  ;;  %5966 = vrcp.f32 %v8834_v57  ;;  %vm8862_vm15 = vmor %vm2349_vm5, %vm2350_vm9 }
 0x166   : > { %v5959_v1 = vpop.eup %5958  ;;  %vm2377_vm12 = vweird.f32 %v8828_v44  ;;  %vm2391_vm13 = vweird.f32 %v8830_v8  ;;  %vm8866_vm1 = vcmp.eq.f32.partialorder %v2381_v36, 8.507059e+37  ;;  %v2384_v10 = vor.u32 1.1754944e-38, %v2383_v45 }
 0x167   : > { %v2347_v49 = vmul.f32 %v5951_v61, %v2346_v52  ;;  %v2359_v43 = vmul.f32 %v5959_v1, %v8816_v21  ;;  %v8858_v58 = vpop.eup %5960  ;;  %vm2364_vm0 = vweird.f32 %v5959_v1  ;;  %vm2405_vm2 = vweird.f32 %v8834_v57 }
 0x168   : > { %v8871_v7 = vadd.f32 1.0, %v5953_v5  ;;  %v5963_v20 = vpop.eup %5962  ;;  %vm8873_vm4 = vcmp.eq.f32.partialorder %v2395_v22, 8.507059e+37  ;;  %v2398_v6 = vor.u32 1.1754944e-38, %v2397_v34  ;;  %v2409_v9 = vand.u32 2147483647, %v8834_v57  ;;  %vm8892_vm10 = vmor %vm2363_vm8, %vm2364_vm0 }
 0x169   : > { %v2348_v54 = vadd.f32 %v5951_v61, %v2347_v49  ;;  %v2360_v51 = vsub.f32 1.0, %v2359_v43  ;;  %v5965_v63 = vpop.eup %5964  ;;  %v2373_v17 = vmul.f32 %v5963_v20, %v8828_v44  ;;  %v2411_v37 = vand.u32 2147483648, %v8834_v57  ;;  %v9029_v44 = vld [vmem:[%s6904_s24 + $0x288] sm:$0xff] }
 0x16a   : > { %v8880_v53 = vadd.f32 1.0, %v5955_v0  ;;  %v8882_v27 = vadd.f32 1.0, %v5957_v59  ;;  %vm2378_vm3 = vweird.f32 %v5963_v20  ;;  %v2387_v40 = vmul.f32 %v5965_v63, %v8830_v8 }
 0x16b   : > { %v2352_v11 = vsel %vm8862_vm15, %v5951_v61, %v2348_v54  ;;  %v2361_v4 = vmul.f32 %v5959_v1, %v2360_v51  ;;  %v5967_v13 = vpop.eup %5966  ;;  %v2374_v25 = vsub.f32 1.0, %v2373_v17  ;;  %vm2392_vm6 = vweird.f32 %v5965_v63  ;;  %vm8907_vm5 = vmor %vm2377_vm12, %vm2378_vm3  ;;  %v8956_v54 = vld [vmem:[%s6904_s24 + $0x260] sm:$0xff] }
 0x16c   : > { %v2357_v47 = vsel %vm8837_vm7, %v2356_v3, %v2352_v11  ;;  %5968 = vrcp.f32 %v8871_v7  ;;  %v2388_v26 = vsub.f32 1.0, %v2387_v40  ;;  %v2401_v32 = vmul.f32 %v5967_v13, %v8834_v57  ;;  %vm8917_vm7 = vmor %vm2391_vm13, %vm2392_vm6 }
 0x16d   : > { %v5070_v50 = vmul.f32 %v2357_v47, %v8605_v18  ;;  %v2362_v29 = vadd.f32 %v5959_v1, %v2361_v4  ;;  %v2375_v33 = vmul.f32 %v5963_v20, %v2374_v25  ;;  %vm2406_vm14 = vweird.f32 %v5967_v13 }
 0x16e   : > { %v2423_v28 = vand.u32 2147483647, %v8871_v7  ;;  %v2425_v21 = vand.u32 2147483648, %v8871_v7  ;;  %v2389_v18 = vmul.f32 %v5965_v63, %v2388_v26  ;;  %v2402_v24 = vsub.f32 1.0, %v2401_v32  ;;  %v9001_v26 = vld [vmem:[%s6904_s24 + $0x268] sm:$0xff]  ;;  %v9004_v32 = vld [vmem:[%s6904_s24 + $0x270] sm:$0xff] }
 0x16f   : > { %5326 = vst [vmem:[%s7078_s17 + $0x210] sm:$0xff] %v5070_v50  ;;  %v2366_v41 = vsel %vm8892_vm10, %v5959_v1, %v2362_v29  ;;  %5970 = vrcp.f32 %v8880_v53  ;;  %v2376_v5 = vadd.f32 %v5963_v20, %v2375_v33  ;;  %vm8921_vm9 = vcmp.eq.f32.partialorder %v2409_v9, 8.507059e+37 }
 0x170   : > { %v2371_v14 = vsel %vm8850_vm11, %v2370_v39, %v2366_v41  ;;  %v2412_v19 = vor.u32 1.1754944e-38, %v2411_v37  ;;  %v2390_v3 = vadd.f32 %v5965_v63, %v2389_v18  ;;  %v2403_v36 = vmul.f32 %v5967_v13, %v2402_v24  ;;  %vm8932_vm11 = vmor %vm2405_vm2, %vm2406_vm14  ;;  %v9012_v41 = vld [vmem:[%s6904_s24 + $0x280] sm:$0xff] }
 0x171   : > { %v5071_v0 = vmul.f32 %v2371_v14, %v8732_v23  ;;  %vm2419_vm8 = vweird.f32 %v8871_v7  ;;  %v2380_v59 = vsel %vm8907_vm5, %v5963_v20, %v2376_v5  ;;  %vm8936_vm12 = vcmp.eq.f32.partialorder %v2423_v28, 8.507059e+37 }
 0x172   : > { %v5969_v45 = vpop.eup %5968  ;;  %v2426_v23 = vor.u32 1.1754944e-38, %v2425_v21  ;;  %5972 = vrcp.f32 %v8882_v27  ;;  %v2385_v22 = vsel %vm8866_vm1, %v2384_v10, %v2380_v59  ;;  %v2394_v57 = vsel %vm8917_vm7, %v5965_v63, %v2390_v3  ;;  %v9009_v21 = vld [vmem:[%s6904_s24 + $0x278] sm:$0xff] }
 0x173   : > { %5327 = vst [vmem:[%s7078_s17 + $0x218] sm:$0xff] %v5071_v0  ;;  %v2404_v34 = vadd.f32 %v5967_v13, %v2403_v36  ;;  %v2415_v1 = vmul.f32 %v5969_v45, %v8871_v7  ;;  %v5072_v60 = vmul.f32 %v2385_v22, %v8743_v48  ;;  %v2399_v39 = vsel %vm8873_vm4, %v2398_v6, %v2394_v57 }
 0x174   : > { %v2437_v49 = vand.u32 2147483647, %v8880_v53  ;;  %v2439_v43 = vand.u32 2147483648, %v8880_v53  ;;  %v5073_v2 = vmul.f32 %v2399_v39, %v8746_v38  ;;  %vm2420_vm13 = vweird.f32 %v5969_v45 }
 0x175   : > { %v5971_v15 = vpop.eup %5970  ;;  %v2408_v10 = vsel %vm8932_vm11, %v5967_v13, %v2404_v34  ;;  %v2416_v20 = vsub.f32 1.0, %v2415_v1  ;;  %5328 = vst [vmem:[%s7078_s17 + $0x220] sm:$0xff] %v5072_v60  ;;  %vm2433_vm15 = vweird.f32 %v8880_v53  ;;  %v2451_v6 = vand.u32 2147483647, %v8882_v27  ;;  %vm8969_vm1 = vmor %vm2419_vm8, %vm2420_vm13  ;;  %v9043_v1 = vld [vmem:[%s6904_s24 + $0x290] sm:$0xff]  ;;  %v9046_v60 = vld [vmem:[%s6904_s24 + $0x298] sm:$0xff] }
 0x176   : > { %v2413_v48 = vsel %vm8921_vm9, %v2412_v19, %v2408_v10  ;;  %v2429_v51 = vmul.f32 %v5971_v15, %v8880_v53  ;;  %vm2434_vm0 = vweird.f32 %v5971_v15  ;;  %5329 = vst [vmem:[%s7078_s17 + $0x228] sm:$0xff] %v5073_v2  ;;  %v2453_v9 = vand.u32 2147483648, %v8882_v27 }
 0x177   : > { %v5074_v38 = vmul.f32 %v2413_v48, %v8752_v30  ;;  %v2417_v62 = vmul.f32 %v5969_v45, %v2416_v20  ;;  %v8974_v11 = vadd.f32 1.0, %v8858_v58  ;;  %v802_v4 = vmul.f32 1.442695, %v471_v42  ;;  %vm8992_vm10 = vmor %vm2433_vm15, %vm2434_vm0 }
 0x178   : > { %v5973_v63 = vpop.eup %5972  ;;  %v2430_v37 = vsub.f32 1.0, %v2429_v51  ;;  %v472_v30 = vsub.f32 0.0, %v8956_v54  ;;  %vm8980_vm2 = vcmp.eq.f32.partialorder %v2437_v49, 8.507059e+37  ;;  %v2440_v7 = vor.u32 1.1754944e-38, %v2439_v43 }
 0x179   : > { %5330 = vst [vmem:[%s7078_s17 + $0x230] sm:$0xff] %v5074_v38  ;;  %v2418_v40 = vadd.f32 %v5969_v45, %v2417_v62  ;;  %v2443_v47 = vmul.f32 %v5973_v63, %v8882_v27  ;;  %vm2447_vm4 = vweird.f32 %v8882_v27  ;;  %vm2448_vm3 = vweird.f32 %v5973_v63  ;;  %v9059_v62 = vld [vmem:[%s6904_s24 + $0x2a0] sm:$0xff] }
 0x17a   : > { %v2431_v31 = vmul.f32 %v5971_v15, %v2430_v37  ;;  %5974 = vrcp.f32 %v8974_v11  ;;  %vm8996_vm6 = vcmp.eq.f32.partialorder %v2451_v6, 8.507059e+37  ;;  %v2454_v29 = vor.u32 1.1754944e-38, %v2453_v9  ;;  %vm9022_vm5 = vmor %vm2447_vm4, %vm2448_vm3 }
 0x17b   : > { %v2422_v42 = vsel %vm8969_vm1, %v5969_v45, %v2418_v40  ;;  %v2444_v25 = vsub.f32 1.0, %v2443_v47  ;;  %5976 = vpow2.f32 %v802_v4  ;;  %v804_v28 = vmul.f32 1.442695, %v472_v30 }
 0x17c   : > { %v2427_v33 = vsel %vm8936_vm12, %v2426_v23, %v2422_v42  ;;  %v2432_v53 = vadd.f32 %v5971_v15, %v2431_v31  ;;  %vm2461_vm14 = vweird.f32 %v8974_v11  ;;  %v2465_v24 = vand.u32 2147483647, %v8974_v11 }
 0x17d   : > { %v5075_v61 = vmul.f32 %v2427_v33, %v8768_v35  ;;  %v2445_v18 = vmul.f32 %v5973_v63, %v2444_v25  ;;  %5978 = vpow2.f32 %v804_v28  ;;  %v473_v56 = vsub.f32 0.0, %v9001_v26 }
 0x17e   : > { %v2436_v14 = vsel %vm8992_vm10, %v5971_v15, %v2432_v53  ;;  %v474_v35 = vsub.f32 0.0, %v9004_v32  ;;  %v475_v27 = vsub.f32 0.0, %v9009_v21  ;;  %v476_v3 = vsub.f32 0.0, %v9012_v41 }
 0x17f   : > { %5331 = vst [vmem:[%s7078_s17 + $0x238] sm:$0xff] %v5075_v61  ;;  %v2441_v19 = vsel %vm8980_vm2, %v2440_v7, %v2436_v14  ;;  %v2446_v0 = vadd.f32 %v5973_v63, %v2445_v18  ;;  %v2467_v59 = vand.u32 2147483648, %v8974_v11  ;;  %v806_v8 = vmul.f32 1.442695, %v473_v56 }
 0x180   : > { %v5975_v36 = vpop.eup %5974  ;;  %v5076_v45 = vmul.f32 %v2441_v19, %v8776_v16  ;;  %v808_v52 = vmul.f32 1.442695, %v474_v35  ;;  %v810_v57 = vmul.f32 1.442695, %v475_v27  ;;  %v477_v34 = vsub.f32 0.0, %v9029_v44 }
 0x181   : > { %v2450_v23 = vsel %vm9022_vm5, %v5973_v63, %v2446_v0  ;;  %v2457_v22 = vmul.f32 %v5975_v36, %v8974_v11  ;;  %v5977_v39 = vpop.eup %5976  ;;  %vm2462_vm7 = vweird.f32 %v5975_v36  ;;  %5980 = vpow2.f32 %v806_v8 }
 0x182   : > { %5332 = vst [vmem:[%s7078_s17 + $0x240] sm:$0xff] %v5076_v45  ;;  %v2455_v16 = vsel %vm8996_vm6, %v2454_v29, %v2450_v23  ;;  %v812_v49 = vmul.f32 1.442695, %v476_v3  ;;  %v9052_v2 = vadd.f32 1.0, %v5977_v39  ;;  %5982 = vpow2.f32 %v808_v52  ;;  %vm9064_vm9 = vmor %vm2461_vm14, %vm2462_vm7 }
 0x183   : > { %v5077_v43 = vmul.f32 %v2455_v16, %v8779_v55  ;;  %v2458_v15 = vsub.f32 1.0, %v2457_v22  ;;  %v5979_v10 = vpop.eup %5978  ;;  %5984 = vpow2.f32 %v810_v57  ;;  %v478_v20 = vsub.f32 0.0, %v9043_v1  ;;  %v9230_v55 = vld [vmem:[%s6904_s24 + $0x2b0] sm:$0xff] }
 0x184   : > { %v479_v48 = vsub.f32 0.0, %v9046_v60  ;;  %5986 = vrcp.f32 %v9052_v2  ;;  %v814_v38 = vmul.f32 1.442695, %v477_v34  ;;  %v2468_v6 = vor.u32 1.1754944e-38, %v2467_v59 }
 0x185   : > { %5333 = vst [vmem:[%s7078_s17 + $0x248] sm:$0xff] %v5077_v43  ;;  %v2459_v51 = vmul.f32 %v5975_v36, %v2458_v15  ;;  %v2479_v9 = vand.u32 2147483647, %v9052_v2  ;;  %v9069_v63 = vadd.f32 1.0, %v5979_v10  ;;  %v816_v17 = vmul.f32 1.442695, %v478_v20 }
 0x186   : > { %vm2466_vm8 = vcmp.eq.f32.partialorder %v2465_v24, 8.507059e+37  ;;  %v2481_v4 = vand.u32 2147483648, %v9052_v2  ;;  %5988 = vpow2.f32 %v812_v49  ;;  %vm2475_vm11 = vweird.f32 %v9052_v2 }
 0x187   : > { %v2460_v37 = vadd.f32 %v5975_v36, %v2459_v51  ;;  %v5981_v30 = vpop.eup %5980  ;;  %5990 = vrcp.f32 %v9069_v63  ;;  %v818_v11 = vmul.f32 1.442695, %v479_v48  ;;  %v480_v40 = vsub.f32 0.0, %v9059_v62 }
 0x188   : > { %v5983_v13 = vpop.eup %5982  ;;  %v2493_v47 = vand.u32 2147483647, %v9069_v63  ;;  %v9078_v31 = vadd.f32 1.0, %v5981_v30  ;;  %5992 = vpow2.f32 %v814_v38  ;;  %vm9080_vm12 = vcmp.eq.f32.partialorder %v2479_v9, 8.507059e+37 }
 0x189   : > { %v2464_v7 = vsel %vm9064_vm9, %v5975_v36, %v2460_v37  ;;  %v5985_v42 = vpop.eup %5984  ;;  %v9084_v50 = vadd.f32 1.0, %v5983_v13  ;;  %5994 = vpow2.f32 %v816_v17  ;;  %v2482_v53 = vor.u32 1.1754944e-38, %v2481_v4 }
 0x18a   : > { %v2469_v58 = vsel %vm2466_vm8, %v2468_v6, %v2464_v7  ;;  %v5987_v29 = vpop.eup %5986  ;;  %v2495_v28 = vand.u32 2147483648, %v9069_v63  ;;  %5996 = vrcp.f32 %v9078_v31  ;;  %v2507_v18 = vand.u32 2147483647, %v9078_v31 }
 0x18b   : > { %v5078_v33 = vmul.f32 %v2469_v58, %v8801_v46  ;;  %v2471_v61 = vmul.f32 %v5987_v29, %v9052_v2  ;;  %v2509_v24 = vand.u32 2147483648, %v9078_v31  ;;  %5998 = vpow2.f32 %v818_v11 }
 0x18c   : > { %v5989_v14 = vpop.eup %5988  ;;  %vm2489_vm13 = vweird.f32 %v9069_v63  ;;  %vm9094_vm15 = vcmp.eq.f32.partialorder %v2493_v47, 8.507059e+37  ;;  %6000 = vrcp.f32 %v9084_v50  ;;  %v2523_v46 = vand.u32 2147483648, %v9084_v50  ;;  %v9262_v47 = vld [vmem:[%s6904_s24 + $0x2c8] sm:$0xff] }
 0x18d   : > { %5334 = vst [vmem:[%s7078_s17 + $0x250] sm:$0xff] %v5078_v33  ;;  %v5991_v56 = vpop.eup %5990  ;;  %v2472_v35 = vsub.f32 1.0, %v2471_v61  ;;  %vm2476_vm0 = vweird.f32 %v5987_v29  ;;  %v2521_v19 = vand.u32 2147483647, %v9084_v50  ;;  %v9101_v0 = vadd.f32 1.0, %v5985_v42 }
 0x18e   : > { %v5993_v27 = vpop.eup %5992  ;;  %v2485_v3 = vmul.f32 %v5991_v56, %v9069_v63  ;;  %v2496_v36 = vor.u32 1.1754944e-38, %v2495_v28  ;;  %vm2503_vm1 = vweird.f32 %v9078_v31  ;;  %vm2517_vm2 = vweird.f32 %v9084_v50  ;;  %vm9115_vm3 = vmor %vm2475_vm11, %vm2476_vm0 }
 0x18f   : > { %v9106_v45 = vpop.eup %5994  ;;  %v2473_v59 = vmul.f32 %v5987_v29, %v2472_v35  ;;  %vm9108_vm4 = vcmp.eq.f32.partialorder %v2507_v18, 8.507059e+37  ;;  %v2510_v52 = vor.u32 1.1754944e-38, %v2509_v24  ;;  %6002 = vrcp.f32 %v9101_v0 }
 0x190   : > { %v5997_v23 = vpop.eup %5996  ;;  %v2486_v57 = vsub.f32 1.0, %v2485_v3  ;;  %vm2490_vm10 = vweird.f32 %v5991_v56  ;;  %v2524_v34 = vor.u32 1.1754944e-38, %v2523_v46  ;;  %v9119_v39 = vadd.f32 1.0, %v5989_v14 }
 0x191   : > { %v9121_v16 = vpop.eup %5998  ;;  %v2474_v49 = vadd.f32 %v5987_v29, %v2473_v59  ;;  %v2499_v43 = vmul.f32 %v5997_v23, %v9078_v31  ;;  %vm9124_vm6 = vcmp.eq.f32.partialorder %v2521_v19, 8.507059e+37  ;;  %vm2531_vm14 = vweird.f32 %v9101_v0  ;;  %vm9139_vm5 = vmor %vm2489_vm13, %vm2490_vm10 }
 0x192   : > { %v9129_v2 = vadd.f32 1.0, %v5993_v27  ;;  %v6001_v10 = vpop.eup %6000  ;;  %v2487_v20 = vmul.f32 %v5991_v56, %v2486_v57  ;;  %v2535_v48 = vand.u32 2147483647, %v9101_v0  ;;  %v2537_v51 = vand.u32 2147483648, %v9101_v0 }
 0x193   : > { %6004 = vrcp.f32 %v9119_v39  ;;  %v2478_v38 = vsel %vm9115_vm3, %v5987_v29, %v2474_v49  ;;  %v2500_v6 = vsub.f32 1.0, %v2499_v43  ;;  %vm2504_vm7 = vweird.f32 %v5997_v23 }
 0x194   : > { %v2513_v9 = vmul.f32 %v6001_v10, %v9084_v50  ;;  %v2483_v17 = vsel %vm9080_vm12, %v2482_v53, %v2478_v38  ;;  %v2488_v37 = vadd.f32 %v5991_v56, %v2487_v20  ;;  %vm2518_vm9 = vweird.f32 %v6001_v10  ;;  %vm9153_vm8 = vmor %vm2503_vm1, %vm2504_vm7  ;;  %v9227_v38 = vld [vmem:[%s6904_s24 + $0x2a8] sm:$0xff] }
 0x195   : > { %v2549_v4 = vand.u32 2147483647, %v9119_v39  ;;  %v6003_v30 = vpop.eup %6002  ;;  %v5079_v11 = vmul.f32 %v2483_v17, %v8825_v12  ;;  %v2501_v63 = vmul.f32 %v5997_v23, %v2500_v6  ;;  %6006 = vrcp.f32 %v9129_v2  ;;  %vm9170_vm12 = vmor %vm2517_vm2, %vm2518_vm9 }
 0x196   : > { %v2514_v13 = vsub.f32 1.0, %v2513_v9  ;;  %v2492_v7 = vsel %vm9139_vm5, %v5991_v56, %v2488_v37  ;;  %v2527_v42 = vmul.f32 %v6003_v30, %v9101_v0  ;;  %vm9158_vm11 = vcmp.eq.f32.partialorder %v2535_v48, 8.507059e+37 }
 0x197   : > { %v2551_v12 = vand.u32 2147483648, %v9119_v39  ;;  %5335 = vst [vmem:[%s7078_s17 + $0x258] sm:$0xff] %v5079_v11  ;;  %v2497_v25 = vsel %vm9094_vm15, %v2496_v36, %v2492_v7  ;;  %v2502_v29 = vadd.f32 %v5997_v23, %v2501_v63  ;;  %v2538_v31 = vor.u32 1.1754944e-38, %v2537_v51  ;;  %v9252_v11 = vld [vmem:[%s6904_s24 + $0x2c0] sm:$0xff] }
 0x198   : > { %v2515_v33 = vmul.f32 %v6001_v10, %v2514_v13  ;;  %v5080_v28 = vmul.f32 %v2497_v25, %v8956_v54  ;;  %v2528_v18 = vsub.f32 1.0, %v2527_v42  ;;  %vm2532_vm13 = vweird.f32 %v6003_v30 }
 0x199   : > { %v6005_v53 = vpop.eup %6004  ;;  %vm2545_vm0 = vweird.f32 %v9119_v39  ;;  %v2506_v24 = vsel %vm9153_vm8, %v5997_v23, %v2502_v29  ;;  %vm9178_vm15 = vcmp.eq.f32.partialorder %v2549_v4, 8.507059e+37  ;;  %v2552_v56 = vor.u32 1.1754944e-38, %v2551_v12  ;;  %vm9190_vm2 = vmor %vm2531_vm14, %vm2532_vm13 }
 0x19a   : > { %v2516_v14 = vadd.f32 %v6001_v10, %v2515_v33  ;;  %v2541_v5 = vmul.f32 %v6005_v53, %v9119_v39  ;;  %5336 = vst [vmem:[%s7078_s17 + $0x260] sm:$0xff] %v5080_v28  ;;  %v2511_v54 = vsel %vm9108_vm4, %v2510_v52, %v2506_v24  ;;  %v2529_v50 = vmul.f32 %v6003_v30, %v2528_v18  ;;  %v9272_v28 = vld [vmem:[%s6904_s24 + $0x2d8] sm:$0xff] }
 0x19b   : > { %vm2546_vm1 = vweird.f32 %v6005_v53  ;;  %v6007_v35 = vpop.eup %6006  ;;  %v5081_v19 = vmul.f32 %v2511_v54, %v9001_v26  ;;  %v9195_v59 = vadd.f32 1.0, %v9106_v45  ;;  %vm2559_vm4 = vweird.f32 %v9129_v2 }
 0x19c   : > { %v2520_v27 = vsel %vm9170_vm12, %v6001_v10, %v2516_v14  ;;  %v2542_v36 = vsub.f32 1.0, %v2541_v5  ;;  %v2530_v52 = vadd.f32 %v6003_v30, %v2529_v50  ;;  %v2555_v26 = vmul.f32 %v6007_v35, %v9129_v2  ;;  %vm9210_vm3 = vmor %vm2545_vm0, %vm2546_vm1 }
 0x19d   : > { %v2525_v8 = vsel %vm9124_vm6, %v2524_v34, %v2520_v27  ;;  %5337 = vst [vmem:[%s7078_s17 + $0x268] sm:$0xff] %v5081_v19  ;;  %v2565_v22 = vand.u32 2147483648, %v9129_v2  ;;  %6008 = vrcp.f32 %v9195_v59  ;;  %vm2560_vm10 = vweird.f32 %v6007_v35 }
 0x19e   : > { %v5082_v0 = vmul.f32 %v2525_v8, %v9004_v32  ;;  %v2543_v23 = vmul.f32 %v6005_v53, %v2542_v36  ;;  %v2534_v45 = vsel %vm9190_vm2, %v6003_v30, %v2530_v52  ;;  %v2556_v34 = vsub.f32 1.0, %v2555_v26  ;;  %vm9236_vm6 = vmor %vm2559_vm4, %vm2560_vm10  ;;  %v9249_v30 = vld [vmem:[%s6904_s24 + $0x2b8] sm:$0xff] }
 0x19f   : > { %v2563_v32 = vand.u32 2147483647, %v9129_v2  ;;  %v2539_v49 = vsel %vm9158_vm11, %v2538_v31, %v2534_v45  ;;  %v2577_v15 = vand.u32 2147483647, %v9195_v59  ;;  %v9220_v10 = vadd.f32 1.0, %v9121_v16 }
 0x1a0   : > { %5338 = vst [vmem:[%s7078_s17 + $0x270] sm:$0xff] %v5082_v0  ;;  %v2544_v43 = vadd.f32 %v6005_v53, %v2543_v23  ;;  %v5083_v39 = vmul.f32 %v2539_v49, %v9009_v21  ;;  %v2557_v20 = vmul.f32 %v6007_v35, %v2556_v34  ;;  %v2579_v48 = vand.u32 2147483648, %v9195_v59  ;;  %v9299_v0 = vld [vmem:[%s6904_s24 + $0x2e0] sm:$0xff] }
 0x1a1   : > { %v820_v51 = vmul.f32 1.442695, %v480_v40  ;;  %v2566_v21 = vor.u32 1.1754944e-38, %v2565_v22  ;;  %6010 = vrcp.f32 %v9220_v10  ;;  %vm2564_vm14 = vcmp.eq.f32.partialorder %v2563_v32, 8.507059e+37  ;;  %v9310_v32 = vld [vmem:[%s6904_s24 + $0x2e8] sm:$0xff] }
 0x1a2   : > { %v2548_v6 = vsel %vm9210_vm3, %v6005_v53, %v2544_v43  ;;  %5339 = vst [vmem:[%s7078_s17 + $0x278] sm:$0xff] %v5083_v39  ;;  %v2558_v9 = vadd.f32 %v6007_v35, %v2557_v20  ;;  %vm2573_vm5 = vweird.f32 %v9195_v59  ;;  %v481_v37 = vsub.f32 0.0, %v9227_v38  ;;  %v9269_v53 = vld [vmem:[%s6904_s24 + $0x2d0] sm:$0xff] }
 0x1a3   : > { %v2553_v40 = vsel %vm9178_vm15, %v2552_v56, %v2548_v6  ;;  %v6009_v17 = vpop.eup %6008  ;;  %6012 = vpow2.f32 %v820_v51  ;;  %v482_v4 = vsub.f32 0.0, %v9230_v55  ;;  %vm9257_vm7 = vcmp.eq.f32.partialorder %v2577_v15, 8.507059e+37 }
 0x1a4   : > { %v5084_v2 = vmul.f32 %v2553_v40, %v9012_v41  ;;  %v2562_v63 = vsel %vm9236_vm6, %v6007_v35, %v2558_v9  ;;  %v2569_v13 = vmul.f32 %v6009_v17, %v9195_v59  ;;  %v2580_v41 = vor.u32 1.1754944e-38, %v2579_v48 }
 0x1a5   : > { %v2567_v42 = vsel %vm2564_vm14, %v2566_v21, %v2562_v63  ;;  %vm2574_vm9 = vweird.f32 %v6009_v17  ;;  %v822_v58 = vmul.f32 1.442695, %v481_v37  ;;  %v824_v12 = vmul.f32 1.442695, %v482_v4 }
 0x1a6   : > { %5340 = vst [vmem:[%s7078_s17 + $0x280] sm:$0xff] %v5084_v2  ;;  %v5085_v25 = vmul.f32 %v2567_v42, %v9029_v44  ;;  %v2570_v29 = vsub.f32 1.0, %v2569_v13  ;;  %v483_v33 = vsub.f32 0.0, %v9249_v30  ;;  %v484_v31 = vsub.f32 0.0, %v9252_v11  ;;  %vm9283_vm11 = vmor %vm2573_vm5, %vm2574_vm9 }
 0x1a7   : > { %v6011_v61 = vpop.eup %6010  ;;  %vm2587_vm8 = vweird.f32 %v9220_v10  ;;  %v2591_v18 = vand.u32 2147483647, %v9220_v10  ;;  %6014 = vpow2.f32 %v822_v58  ;;  %v485_v24 = vsub.f32 0.0, %v9262_v47 }
 0x1a8   : > { %5341 = vst [vmem:[%s7078_s17 + $0x288] sm:$0xff] %v5085_v25  ;;  %v2571_v14 = vmul.f32 %v6009_v17, %v2570_v29  ;;  %v2583_v44 = vmul.f32 %v6011_v61, %v9220_v10  ;;  %v2593_v5 = vand.u32 2147483648, %v9220_v10  ;;  %6016 = vpow2.f32 %v824_v12 }
 0x1a9   : > { %v6013_v46 = vpop.eup %6012  ;;  %v826_v50 = vmul.f32 1.442695, %v483_v33  ;;  %v828_v56 = vmul.f32 1.442695, %v484_v31  ;;  %v486_v35 = vsub.f32 0.0, %v9269_v53  ;;  %v487_v19 = vsub.f32 0.0, %v9272_v28 }
 0x1aa   : > { %v2572_v27 = vadd.f32 %v6009_v17, %v2571_v14  ;;  %v2584_v3 = vsub.f32 1.0, %v2583_v44  ;;  %vm2588_vm12 = vweird.f32 %v6011_v61  ;;  %v9289_v36 = vadd.f32 1.0, %v6013_v46 }
 0x1ab   : > { %6018 = vpow2.f32 %v826_v50  ;;  %v830_v8 = vmul.f32 1.442695, %v485_v24  ;;  %vm9293_vm13 = vcmp.eq.f32.partialorder %v2591_v18, 8.507059e+37  ;;  %vm9305_vm0 = vmor %vm2587_vm8, %vm2588_vm12  ;;  %v2594_v57 = vor.u32 1.1754944e-38, %v2593_v5 }
 0x1ac   : > { %v2576_v59 = vsel %vm9283_vm11, %v6009_v17, %v2572_v27  ;;  %v2585_v52 = vmul.f32 %v6011_v61, %v2584_v3  ;;  %6020 = vrcp.f32 %v9289_v36  ;;  %v832_v34 = vmul.f32 1.442695, %v486_v35 }
 0x1ad   : > { %v6015_v23 = vpop.eup %6014  ;;  %v2581_v22 = vsel %vm9257_vm7, %v2580_v41, %v2576_v59  ;;  %6022 = vpow2.f32 %v828_v56  ;;  %v834_v20 = vmul.f32 1.442695, %v487_v19  ;;  %v2605_v48 = vand.u32 2147483647, %v9289_v36 }
 0x1ae   : > { %v6017_v49 = vpop.eup %6016  ;;  %v5086_v43 = vmul.f32 %v2581_v22, %v9043_v1  ;;  %v2586_v15 = vadd.f32 %v6011_v61, %v2585_v52  ;;  %v9313_v39 = vadd.f32 1.0, %v6015_v23  ;;  %6024 = vpow2.f32 %v830_v8 }
 0x1af   : > { %v9316_v51 = vadd.f32 1.0, %v6017_v49  ;;  %v488_v10 = vsub.f32 0.0, %v9299_v0  ;;  %v2607_v16 = vand.u32 2147483648, %v9289_v36  ;;  %v489_v1 = vsub.f32 0.0, %v9310_v32 }
 0x1b0   : > { %5342 = vst [vmem:[%s7078_s17 + $0x290] sm:$0xff] %v5086_v43  ;;  %v2590_v6 = vsel %vm9305_vm0, %v6011_v61, %v2586_v15  ;;  %6026 = vrcp.f32 %v9313_v39  ;;  %v2619_v9 = vand.u32 2147483647, %v9313_v39  ;;  %v2621_v17 = vand.u32 2147483648, %v9313_v39  ;;  %v9484_v15 = vld [vmem:[%s6904_s24 + $0x308] sm:$0xff] }
 0x1b1   : > { %v6019_v21 = vpop.eup %6018  ;;  %v2595_v40 = vsel %vm9293_vm13, %v2594_v57, %v2590_v6  ;;  %6028 = vrcp.f32 %v9316_v51  ;;  %vm2601_vm15 = vweird.f32 %v9289_v36  ;;  %v2633_v4 = vand.u32 2147483647, %v9316_v51 }
 0x1b2   : > { %v6021_v2 = vpop.eup %6020  ;;  %v5087_v37 = vmul.f32 %v2595_v40, %v9046_v60  ;;  %6030 = vpow2.f32 %v832_v34  ;;  %vm9334_vm1 = vcmp.eq.f32.partialorder %v2605_v48, 8.507059e+37  ;;  %v2635_v41 = vand.u32 2147483648, %v9316_v51 }
 0x1b3   : > { %v6023_v63 = vpop.eup %6022  ;;  %v2597_v13 = vmul.f32 %v6021_v2, %v9289_v36  ;;  %v9339_v42 = vadd.f32 1.0, %v6019_v21  ;;  %v2608_v58 = vor.u32 1.1754944e-38, %v2607_v16  ;;  %vm2615_vm2 = vweird.f32 %v9313_v39 }
 0x1b4   : > { %5343 = vst [vmem:[%s7078_s17 + $0x298] sm:$0xff] %v5087_v37  ;;  %vm2629_vm4 = vweird.f32 %v9316_v51  ;;  %v9344_v60 = vadd.f32 1.0, %v6023_v63  ;;  %v6025_v12 = vpop.eup %6024  ;;  %vm2602_vm3 = vweird.f32 %v6021_v2  ;;  %vm9346_vm10 = vcmp.eq.f32.partialorder %v2619_v9, 8.507059e+37 }
 0x1b5   : > { %v2598_v25 = vsub.f32 1.0, %v2597_v13  ;;  %v2622_v33 = vor.u32 1.1754944e-38, %v2621_v17  ;;  %6032 = vrcp.f32 %v9339_v42  ;;  %vm9351_vm6 = vcmp.eq.f32.partialorder %v2633_v4, 8.507059e+37  ;;  %vm9362_vm14 = vmor %vm2601_vm15, %vm2602_vm3 }
 0x1b6   : > { %v6027_v31 = vpop.eup %6026  ;;  %v2647_v18 = vand.u32 2147483647, %v9339_v42  ;;  %v2649_v24 = vand.u32 2147483648, %v9339_v42  ;;  %6034 = vrcp.f32 %v9344_v60  ;;  %v2636_v46 = vor.u32 1.1754944e-38, %v2635_v41 }
 0x1b7   : > { %v6029_v14 = vpop.eup %6028  ;;  %v2599_v44 = vmul.f32 %v6021_v2, %v2598_v25  ;;  %v2611_v5 = vmul.f32 %v6027_v31, %v9313_v39  ;;  %6036 = vpow2.f32 %v834_v20  ;;  %vm2643_vm5 = vweird.f32 %v9339_v42 }
 0x1b8   : > { %v6031_v54 = vpop.eup %6030  ;;  %v2625_v56 = vmul.f32 %v6029_v14, %v9316_v51  ;;  %vm2657_vm7 = vweird.f32 %v9344_v60  ;;  %v2661_v35 = vand.u32 2147483647, %v9344_v60  ;;  %vm2616_vm9 = vweird.f32 %v6027_v31 }
 0x1b9   : > { %v2600_v19 = vadd.f32 %v6021_v2, %v2599_v44  ;;  %v2612_v27 = vsub.f32 1.0, %v2611_v5  ;;  %v9370_v3 = vadd.f32 1.0, %v6025_v12  ;;  %vm2630_vm8 = vweird.f32 %v6029_v14  ;;  %vm9385_vm12 = vmor %vm2615_vm2, %vm2616_vm9 }
 0x1ba   : > { %v2626_v8 = vsub.f32 1.0, %v2625_v56  ;;  %vm9372_vm11 = vcmp.eq.f32.partialorder %v2647_v18, 8.507059e+37  ;;  %v2650_v59 = vor.u32 1.1754944e-38, %v2649_v24  ;;  %v9379_v22 = vadd.f32 1.0, %v6031_v54  ;;  %vm9398_vm0 = vmor %vm2629_vm4, %vm2630_vm8 }
 0x1bb   : > { %v6033_v52 = vpop.eup %6032  ;;  %v2604_v26 = vsel %vm9362_vm14, %v6021_v2, %v2600_v19  ;;  %v2613_v23 = vmul.f32 %v6027_v31, %v2612_v27  ;;  %6038 = vrcp.f32 %v9370_v3  ;;  %vm9390_vm13 = vcmp.eq.f32.partialorder %v2661_v35, 8.507059e+37  ;;  %v9456_v35 = vld [vmem:[%s6904_s24 + $0x2f0] sm:$0xff]  ;;  %v9459_v19 = vld [vmem:[%s6904_s24 + $0x2f8] sm:$0xff]  ;;  %v9462_v27 = vld [vmem:[%s6904_s24 + $0x300] sm:$0xff] }
 0x1bc   : > { %v6035_v45 = vpop.eup %6034  ;;  %v2609_v57 = vsel %vm9334_vm1, %v2608_v58, %v2604_v26  ;;  %v2627_v49 = vmul.f32 %v6029_v14, %v2626_v8  ;;  %v2639_v43 = vmul.f32 %v6033_v52, %v9339_v42  ;;  %v2663_v21 = vand.u32 2147483648, %v9344_v60 }
 0x1bd   : > { %v6037_v20 = vpop.eup %6036  ;;  %v5088_v48 = vmul.f32 %v2609_v57, %v9059_v62  ;;  %v2614_v6 = vadd.f32 %v6027_v31, %v2613_v23  ;;  %v2653_v16 = vmul.f32 %v6035_v45, %v9344_v60  ;;  %vm2644_vm15 = vweird.f32 %v6033_v52 }
 0x1be   : > { %v2628_v40 = vadd.f32 %v6029_v14, %v2627_v49  ;;  %v2640_v9 = vsub.f32 1.0, %v2639_v43  ;;  %v836_v17 = vmul.f32 1.442695, %v488_v10  ;;  %vm2658_vm1 = vweird.f32 %v6035_v45  ;;  %vm9421_vm2 = vmor %vm2643_vm5, %vm2644_vm15 }
 0x1bf   : > { %5344 = vst [vmem:[%s7078_s17 + $0x2a0] sm:$0xff] %v5088_v48  ;;  %v2618_v62 = vsel %vm9385_vm12, %v6027_v31, %v2614_v6  ;;  %v2654_v2 = vsub.f32 1.0, %v2653_v16  ;;  %6040 = vrcp.f32 %v9379_v22  ;;  %v838_v63 = vmul.f32 1.442695, %v489_v1  ;;  %vm9429_vm4 = vmor %vm2657_vm7, %vm2658_vm1 }
 0x1c0   : > { %v2623_v51 = vsel %vm9346_vm10, %v2622_v33, %v2618_v62  ;;  %v2632_v37 = vsel %vm9398_vm0, %v6029_v14, %v2628_v40  ;;  %v2641_v4 = vmul.f32 %v6033_v52, %v2640_v9  ;;  %v2675_v12 = vand.u32 2147483647, %v9370_v3 }
 0x1c1   : > { %v6039_v10 = vpop.eup %6038  ;;  %v5089_v13 = vmul.f32 %v2623_v51, %v9227_v38  ;;  %v2637_v7 = vsel %vm9351_vm6, %v2636_v46, %v2632_v37  ;;  %v2655_v58 = vmul.f32 %v6035_v45, %v2654_v2  ;;  %v2664_v38 = vor.u32 1.1754944e-38, %v2663_v21  ;;  %v9510_v37 = vld [vmem:[%s6904_s24 + $0x310] sm:$0xff] }
 0x1c2   : > { %v5090_v25 = vmul.f32 %v2637_v7, %v9230_v55  ;;  %v2642_v29 = vadd.f32 %v6033_v52, %v2641_v4  ;;  %v2667_v33 = vmul.f32 %v6039_v10, %v9370_v3  ;;  %vm2671_vm3 = vweird.f32 %v9370_v3  ;;  %v9513_v4 = vld [vmem:[%s6904_s24 + $0x318] sm:$0xff] }
 0x1c3   : > { %5345 = vst [vmem:[%s7078_s17 + $0x2a8] sm:$0xff] %v5089_v13  ;;  %v2656_v42 = vadd.f32 %v6035_v45, %v2655_v58  ;;  %vm2672_vm10 = vweird.f32 %v6039_v10  ;;  %v2677_v31 = vand.u32 2147483648, %v9370_v3  ;;  %v9440_v61 = vadd.f32 1.0, %v6037_v20 }
 0x1c4   : > { %5346 = vst [vmem:[%s7078_s17 + $0x2b0] sm:$0xff] %v5090_v25  ;;  %v2646_v55 = vsel %vm9421_vm2, %v6033_v52, %v2642_v29  ;;  %v2668_v60 = vsub.f32 1.0, %v2667_v33  ;;  %6042 = vpow2.f32 %v836_v17  ;;  %vm9446_vm6 = vcmp.eq.f32.partialorder %v2675_v12, 8.507059e+37  ;;  %vm9468_vm14 = vmor %vm2671_vm3, %vm2672_vm10  ;;  %v9521_v25 = vld [vmem:[%s6904_s24 + $0x320] sm:$0xff] }
 0x1c5   : > { %v6041_v18 = vpop.eup %6040  ;;  %v2651_v24 = vsel %vm9372_vm11, %v2650_v59, %v2646_v55  ;;  %v2660_v14 = vsel %vm9429_vm4, %v6035_v45, %v2656_v42  ;;  %v2691_v5 = vand.u32 2147483648, %v9379_v22  ;;  %v2678_v36 = vor.u32 1.1754944e-38, %v2677_v31 }
 0x1c6   : > { %v5091_v46 = vmul.f32 %v2651_v24, %v9249_v30  ;;  %v2665_v54 = vsel %vm9390_vm13, %v2664_v38, %v2660_v14  ;;  %v2669_v50 = vmul.f32 %v6039_v10, %v2668_v60  ;;  %v2681_v56 = vmul.f32 %v6041_v18, %v9379_v22 }
 0x1c7   : > { %v5092_v8 = vmul.f32 %v2665_v54, %v9252_v11  ;;  %vm2685_vm5 = vweird.f32 %v9379_v22  ;;  %6044 = vrcp.f32 %v9440_v61  ;;  %vm2686_vm7 = vweird.f32 %v6041_v18 }
 0x1c8   : > { %5347 = vst [vmem:[%s7078_s17 + $0x2b8] sm:$0xff] %v5091_v46  ;;  %v2670_v59 = vadd.f32 %v6039_v10, %v2669_v50  ;;  %v2682_v52 = vsub.f32 1.0, %v2681_v56  ;;  %v2689_v26 = vand.u32 2147483647, %v9379_v22  ;;  %6046 = vpow2.f32 %v838_v63  ;;  %vm9490_vm9 = vmor %vm2685_vm5, %vm2686_vm7 }
 0x1c9   : > { %5348 = vst [vmem:[%s7078_s17 + $0x2c0] sm:$0xff] %v5092_v8  ;;  %v490_v11 = vsub.f32 0.0, %v9456_v35  ;;  %v491_v3 = vsub.f32 0.0, %v9459_v19  ;;  %v492_v23 = vsub.f32 0.0, %v9462_v27  ;;  %v2692_v49 = vor.u32 1.1754944e-38, %v2691_v5 }
 0x1ca   : > { %v6043_v45 = vpop.eup %6042  ;;  %v2674_v57 = vsel %vm9468_vm14, %v6039_v10, %v2670_v59  ;;  %v2683_v34 = vmul.f32 %v6041_v18, %v2682_v52  ;;  %v2703_v43 = vand.u32 2147483647, %v9440_v61  ;;  %vm2690_vm8 = vcmp.eq.f32.partialorder %v2689_v26, 8.507059e+37 }
 0x1cb   : > { %v2679_v20 = vsel %vm9446_vm6, %v2678_v36, %v2674_v57  ;;  %v9494_v6 = vadd.f32 1.0, %v6043_v45  ;;  %v840_v39 = vmul.f32 1.442695, %v490_v11  ;;  %v842_v16 = vmul.f32 1.442695, %v491_v3 }
 0x1cc   : > { %v5093_v21 = vmul.f32 %v2679_v20, %v9262_v47  ;;  %v2684_v40 = vadd.f32 %v6041_v18, %v2683_v34  ;;  %vm2699_vm11 = vweird.f32 %v9440_v61  ;;  %v2705_v17 = vand.u32 2147483648, %v9440_v61 }
 0x1cd   : > { %v6045_v9 = vpop.eup %6044  ;;  %6048 = vrcp.f32 %v9494_v6  ;;  %v844_v22 = vmul.f32 1.442695, %v492_v23  ;;  %v493_v62 = vsub.f32 0.0, %v9484_v15  ;;  %vm9505_vm12 = vcmp.eq.f32.partialorder %v2703_v43, 8.507059e+37  ;;  %v9650_v43 = vld [vmem:[%s6904_s24 + $0x328] sm:$0xff] }
 0x1ce   : > { %5349 = vst [vmem:[%s7078_s17 + $0x2c8] sm:$0xff] %v5093_v21  ;;  %v2688_v2 = vsel %vm9490_vm9, %v6041_v18, %v2684_v40  ;;  %v2695_v51 = vmul.f32 %v6045_v9, %v9440_v61  ;;  %6050 = vpow2.f32 %v840_v39  ;;  %v6047_v63 = vpop.eup %6046  ;;  %v2717_v13 = vand.u32 2147483647, %v9494_v6 }
 0x1cf   : > { %v2693_v10 = vsel %vm2690_vm8, %v2692_v49, %v2688_v2  ;;  %v2719_v7 = vand.u32 2147483648, %v9494_v6  ;;  %6052 = vpow2.f32 %v842_v16  ;;  %vm2700_vm13 = vweird.f32 %v6045_v9 }
 0x1d0   : > { %v5094_v41 = vmul.f32 %v2693_v10, %v9269_v53  ;;  %v2696_v58 = vsub.f32 1.0, %v2695_v51  ;;  %v9518_v12 = vadd.f32 1.0, %v6047_v63  ;;  %6054 = vpow2.f32 %v844_v22  ;;  %vm9530_vm15 = vmor %vm2699_vm11, %vm2700_vm13 }
 0x1d1   : > { %v846_v29 = vmul.f32 1.442695, %v493_v62  ;;  %v494_v1 = vsub.f32 0.0, %v9510_v37  ;;  %v495_v38 = vsub.f32 0.0, %v9513_v4  ;;  %v2706_v42 = vor.u32 1.1754944e-38, %v2705_v17 }
 0x1d2   : > { %5350 = vst [vmem:[%s7078_s17 + $0x2d0] sm:$0xff] %v5094_v41  ;;  %v2697_v33 = vmul.f32 %v6045_v9, %v2696_v58  ;;  %vm2713_vm0 = vweird.f32 %v9494_v6  ;;  %6056 = vrcp.f32 %v9518_v12  ;;  %vm9534_vm1 = vcmp.eq.f32.partialorder %v2717_v13, 8.507059e+37  ;;  %v9686_v13 = vld [vmem:[%s6904_s24 + $0x330] sm:$0xff] }
 0x1d3   : > { %v6049_v53 = vpop.eup %6048  ;;  %6058 = vpow2.f32 %v846_v29  ;;  %v848_v60 = vmul.f32 1.442695, %v494_v1  ;;  %v496_v18 = vsub.f32 0.0, %v9521_v25  ;;  %v2720_v5 = vor.u32 1.1754944e-38, %v2719_v7 }
 0x1d4   : > { %v6051_v24 = vpop.eup %6050  ;;  %v2698_v14 = vadd.f32 %v6045_v9, %v2697_v33  ;;  %v2709_v44 = vmul.f32 %v6049_v53, %v9494_v6  ;;  %v2731_v46 = vand.u32 2147483647, %v9518_v12  ;;  %v2733_v54 = vand.u32 2147483648, %v9518_v12 }
 0x1d5   : > { %v6053_v61 = vpop.eup %6052  ;;  %v9542_v50 = vadd.f32 1.0, %v6051_v24  ;;  %6060 = vpow2.f32 %v848_v60  ;;  %v850_v56 = vmul.f32 1.442695, %v495_v38  ;;  %vm2714_vm2 = vweird.f32 %v6049_v53 }
 0x1d6   : > { %v2702_v8 = vsel %vm9530_vm15, %v6045_v9, %v2698_v14  ;;  %v2710_v30 = vsub.f32 1.0, %v2709_v44  ;;  %v9546_v36 = vadd.f32 1.0, %v6053_v61  ;;  %v6055_v59 = vpop.eup %6054  ;;  %vm2727_vm4 = vweird.f32 %v9518_v12  ;;  %vm9557_vm3 = vmor %vm2713_vm0, %vm2714_vm2 }
 0x1d7   : > { %v2707_v52 = vsel %vm9505_vm12, %v2706_v42, %v2702_v8  ;;  %6062 = vrcp.f32 %v9542_v50  ;;  %v852_v26 = vmul.f32 1.442695, %v496_v18  ;;  %v2745_v45 = vand.u32 2147483647, %v9542_v50 }
 0x1d8   : > { %v6057_v11 = vpop.eup %6056  ;;  %v5095_v3 = vmul.f32 %v2707_v52, %v9272_v28  ;;  %v2711_v23 = vmul.f32 %v6049_v53, %v2710_v30  ;;  %6064 = vrcp.f32 %v9546_v36  ;;  %vm9562_vm10 = vcmp.eq.f32.partialorder %v2731_v46, 8.507059e+37 }
 0x1d9   : > { %v6059_v57 = vpop.eup %6058  ;;  %v2723_v49 = vmul.f32 %v6057_v11, %v9518_v12  ;;  %v2734_v20 = vor.u32 1.1754944e-38, %v2733_v54  ;;  %v2747_v28 = vand.u32 2147483648, %v9542_v50  ;;  %vm2741_vm6 = vweird.f32 %v9542_v50  ;;  %v9726_v54 = vld [vmem:[%s6904_s24 + $0x350] sm:$0xff] }
 0x1da   : > { %5351 = vst [vmem:[%s7078_s17 + $0x2d8] sm:$0xff] %v5095_v3  ;;  %v2712_v48 = vadd.f32 %v6049_v53, %v2711_v23  ;;  %v2759_v39 = vand.u32 2147483647, %v9546_v36  ;;  %6066 = vpow2.f32 %v850_v56  ;;  %vm2728_vm14 = vweird.f32 %v6057_v11 }
 0x1db   : > { %v6061_v6 = vpop.eup %6060  ;;  %v2724_v16 = vsub.f32 1.0, %v2723_v49  ;;  %v2761_v21 = vand.u32 2147483648, %v9546_v36  ;;  %v9571_v40 = vadd.f32 1.0, %v6055_v59  ;;  %vm9575_vm5 = vcmp.eq.f32.partialorder %v2745_v45, 8.507059e+37  ;;  %vm9589_vm9 = vmor %vm2727_vm4, %vm2728_vm14 }
 0x1dc   : > { %v2716_v9 = vsel %vm9557_vm3, %v6049_v53, %v2712_v48  ;;  %vm2755_vm7 = vweird.f32 %v9546_v36  ;;  %v9580_v22 = vadd.f32 1.0, %v6059_v57  ;;  %6068 = vpow2.f32 %v852_v26 }
 0x1dd   : > { %v6063_v62 = vpop.eup %6062  ;;  %v2721_v2 = vsel %vm9534_vm1, %v2720_v5, %v2716_v9  ;;  %v2725_v51 = vmul.f32 %v6057_v11, %v2724_v16  ;;  %v2748_v47 = vor.u32 1.1754944e-38, %v2747_v28  ;;  %6070 = vrcp.f32 %v9571_v40 }
 0x1de   : > { %v6065_v63 = vpop.eup %6064  ;;  %v5096_v10 = vmul.f32 %v2721_v2, %v9299_v0  ;;  %v2737_v7 = vmul.f32 %v6063_v62, %v9542_v50  ;;  %vm9594_vm8 = vcmp.eq.f32.partialorder %v2759_v39, 8.507059e+37  ;;  %v9598_v58 = vadd.f32 1.0, %v6061_v6 }
 0x1df   : > { %v2726_v29 = vadd.f32 %v6057_v11, %v2725_v51  ;;  %v2751_v1 = vmul.f32 %v6065_v63, %v9546_v36  ;;  %v2762_v38 = vor.u32 1.1754944e-38, %v2761_v21  ;;  %v2773_v0 = vand.u32 2147483647, %v9571_v40 }
 0x1e0   : > { %v6067_v33 = vpop.eup %6066  ;;  %5352 = vst [vmem:[%s7078_s17 + $0x2e0] sm:$0xff] %v5096_v10  ;;  %v2738_v12 = vsub.f32 1.0, %v2737_v7  ;;  %vm2742_vm11 = vweird.f32 %v6063_v62  ;;  %v2775_v42 = vand.u32 2147483648, %v9571_v40  ;;  %6072 = vrcp.f32 %v9580_v22 }
 0x1e1   : > { %v2730_v53 = vsel %vm9589_vm9, %v6057_v11, %v2726_v29  ;;  %v2752_v31 = vsub.f32 1.0, %v2751_v1  ;;  %vm2756_vm12 = vweird.f32 %v6065_v63  ;;  %v2787_v55 = vand.u32 2147483647, %v9580_v22  ;;  %vm9615_vm13 = vmor %vm2741_vm6, %vm2742_vm11 }
 0x1e2   : > { %v6069_v60 = vpop.eup %6068  ;;  %v2735_v18 = vsel %vm9562_vm10, %v2734_v20, %v2730_v53  ;;  %v2739_v24 = vmul.f32 %v6063_v62, %v2738_v12  ;;  %v2789_v14 = vand.u32 2147483648, %v9580_v22  ;;  %6074 = vrcp.f32 %v9598_v58  ;;  %vm9626_vm1 = vmor %vm2755_vm7, %vm2756_vm12 }
 0x1e3   : > { %v6071_v44 = vpop.eup %6070  ;;  %v5097_v5 = vmul.f32 %v2735_v18, %v9310_v32  ;;  %v2753_v61 = vmul.f32 %v6065_v63, %v2752_v31  ;;  %vm2769_vm0 = vweird.f32 %v9571_v40  ;;  %vm9620_vm15 = vcmp.eq.f32.partialorder %v2773_v0, 8.507059e+37 }
 0x1e4   : > { %v2740_v56 = vadd.f32 %v6063_v62, %v2739_v24  ;;  %v2765_v32 = vmul.f32 %v6071_v44, %v9571_v40  ;;  %v2776_v50 = vor.u32 1.1754944e-38, %v2775_v42  ;;  %vm2783_vm2 = vweird.f32 %v9580_v22 }
 0x1e5   : > { %5353 = vst [vmem:[%s7078_s17 + $0x2e8] sm:$0xff] %v5097_v5  ;;  %v2754_v30 = vadd.f32 %v6065_v63, %v2753_v61  ;;  %vm2770_vm4 = vweird.f32 %v6071_v44  ;;  %vm9633_vm3 = vcmp.eq.f32.partialorder %v2787_v55, 8.507059e+37  ;;  %v2790_v52 = vor.u32 1.1754944e-38, %v2789_v14  ;;  %v9723_v61 = vld [vmem:[%s6904_s24 + $0x348] sm:$0xff] }
 0x1e6   : > { %vm2797_vm10 = vweird.f32 %v9598_v58  ;;  %v6073_v36 = vpop.eup %6072  ;;  %v2744_v26 = vsel %vm9615_vm13, %v6063_v62, %v2740_v56  ;;  %v2766_v11 = vsub.f32 1.0, %v2765_v32  ;;  %v2801_v3 = vand.u32 2147483647, %v9598_v58  ;;  %vm9661_vm6 = vmor %vm2769_vm0, %vm2770_vm4 }
 0x1e7   : > { %v9641_v23 = vadd.f32 1.0, %v6067_v33  ;;  %v2749_v45 = vsel %vm9575_vm5, %v2748_v47, %v2744_v26  ;;  %v2758_v57 = vsel %vm9626_vm1, %v6065_v63, %v2754_v30  ;;  %v2779_v34 = vmul.f32 %v6073_v36, %v9580_v22  ;;  %v9692_v22 = vld [vmem:[%s6904_s24 + $0x338] sm:$0xff] }
 0x1e8   : > { %v2803_v49 = vand.u32 2147483648, %v9598_v58  ;;  %v6075_v20 = vpop.eup %6074  ;;  %v5098_v28 = vmul.f32 %v2749_v45, %v9456_v35  ;;  %v2763_v48 = vsel %vm9594_vm8, %v2762_v38, %v2758_v57  ;;  %v2767_v39 = vmul.f32 %v6071_v44, %v2766_v11  ;;  %v9695_v38 = vld [vmem:[%s6904_s24 + $0x340] sm:$0xff] }
 0x1e9   : > { %v9655_v6 = vadd.f32 1.0, %v6069_v60  ;;  %v5099_v16 = vmul.f32 %v2763_v48, %v9459_v19  ;;  %v2780_v9 = vsub.f32 1.0, %v2779_v34  ;;  %vm2784_vm14 = vweird.f32 %v6073_v36 }
 0x1ea   : > { %v2793_v17 = vmul.f32 %v6075_v20, %v9598_v58  ;;  %5354 = vst [vmem:[%s7078_s17 + $0x2f0] sm:$0xff] %v5098_v28  ;;  %v2768_v35 = vadd.f32 %v6071_v44, %v2767_v39  ;;  %vm9667_vm5 = vcmp.eq.f32.partialorder %v2801_v3, 8.507059e+37  ;;  %6076 = vrcp.f32 %v9641_v23  ;;  %vm9679_vm9 = vmor %vm2783_vm2, %vm2784_vm14 }
 0x1eb   : > { %v497_v19 = vsub.f32 0.0, %v9650_v43  ;;  %5355 = vst [vmem:[%s7078_s17 + $0x2f8] sm:$0xff] %v5099_v16  ;;  %v2781_v40 = vmul.f32 %v6073_v36, %v2780_v9  ;;  %vm2798_vm7 = vweird.f32 %v6075_v20  ;;  %v2817_v51 = vand.u32 2147483648, %v9641_v23  ;;  %v9756_v9 = vld [vmem:[%s6904_s24 + $0x368] sm:$0xff] }
 0x1ec   : > { %v2794_v2 = vsub.f32 1.0, %v2793_v17  ;;  %v2772_v47 = vsel %vm9661_vm6, %v6071_v44, %v2768_v35  ;;  %v2804_v10 = vor.u32 1.1754944e-38, %v2803_v49  ;;  %vm2811_vm8 = vweird.f32 %v9641_v23  ;;  %vm9701_vm11 = vmor %vm2797_vm10, %vm2798_vm7 }
 0x1ed   : > { %6078 = vrcp.f32 %v9655_v6  ;;  %v2777_v7 = vsel %vm9620_vm15, %v2776_v50, %v2772_v47  ;;  %v2782_v41 = vadd.f32 %v6073_v36, %v2781_v40  ;;  %v2815_v1 = vand.u32 2147483647, %v9641_v23  ;;  %v9770_v40 = vld [vmem:[%s6904_s24 + $0x370] sm:$0xff] }
 0x1ee   : > { %v2795_v29 = vmul.f32 %v6075_v20, %v2794_v2  ;;  %v5100_v0 = vmul.f32 %v2777_v7, %v9462_v27  ;;  %v9705_v12 = vor.u32 1.1754944e-38, %v2817_v51  ;;  %vm2825_vm12 = vweird.f32 %v9655_v6 }
 0x1ef   : > { %v2829_v42 = vand.u32 2147483647, %v9655_v6  ;;  %v2786_v53 = vsel %vm9679_vm9, %v6073_v36, %v2782_v41  ;;  %v854_v27 = vmul.f32 1.442695, %v497_v19  ;;  %v498_v55 = vsub.f32 0.0, %v9686_v13  ;;  %v9737_v36 = vld [vmem:[%s6904_s24 + $0x360] sm:$0xff] }
 0x1f0   : > { %v2796_v31 = vadd.f32 %v6075_v20, %v2795_v29  ;;  %v6077_v58 = vpop.eup %6076  ;;  %5356 = vst [vmem:[%s7078_s17 + $0x300] sm:$0xff] %v5100_v0  ;;  %v2791_v60 = vsel %vm9633_vm3, %v2790_v52, %v2786_v53  ;;  %v2831_v18 = vand.u32 2147483648, %v9655_v6  ;;  %v499_v24 = vsub.f32 0.0, %v9692_v22  ;;  %v9786_v0 = vld [vmem:[%s6904_s24 + $0x378] sm:$0xff] }
 0x1f1   : > { %v500_v14 = vsub.f32 0.0, %v9695_v38  ;;  %v5101_v44 = vmul.f32 %v2791_v60, %v9484_v15  ;;  %v2807_v46 = vmul.f32 %v6077_v58, %v9641_v23  ;;  %vm2812_vm13 = vweird.f32 %v6077_v58  ;;  %v9731_v15 = vld [vmem:[%s6904_s24 + $0x358] sm:$0xff] }
 0x1f2   : > { %v2800_v5 = vsel %vm9701_vm11, %v6075_v20, %v2796_v31  ;;  %6080 = vpow2.f32 %v854_v27  ;;  %v856_v32 = vmul.f32 1.442695, %v498_v55  ;;  %v858_v50 = vmul.f32 1.442695, %v499_v24  ;;  %vm9746_vm15 = vmor %vm2811_vm8, %vm2812_vm13 }
 0x1f3   : > { %v6079_v56 = vpop.eup %6078  ;;  %v2805_v8 = vsel %vm9667_vm5, %v2804_v10, %v2800_v5  ;;  %5357 = vst [vmem:[%s7078_s17 + $0x308] sm:$0xff] %v5101_v44  ;;  %v2808_v59 = vsub.f32 1.0, %v2807_v46  ;;  %v860_v26 = vmul.f32 1.442695, %v500_v14  ;;  %v501_v11 = vsub.f32 0.0, %v9723_v61 }
 0x1f4   : > { %v5102_v30 = vmul.f32 %v2805_v8, %v9510_v37  ;;  %v2821_v52 = vmul.f32 %v6079_v56, %v9655_v6  ;;  %vm2826_vm0 = vweird.f32 %v6079_v56  ;;  %6082 = vpow2.f32 %v856_v32 }
 0x1f5   : > { %v502_v3 = vsub.f32 0.0, %v9726_v54  ;;  %v2809_v45 = vmul.f32 %v6077_v58, %v2808_v59  ;;  %6084 = vpow2.f32 %v858_v50  ;;  %v503_v34 = vsub.f32 0.0, %v9731_v15  ;;  %vm9761_vm2 = vmor %vm2825_vm12, %vm2826_vm0 }
 0x1f6   : > { %5358 = vst [vmem:[%s7078_s17 + $0x310] sm:$0xff] %v5102_v30  ;;  %v2822_v57 = vsub.f32 1.0, %v2821_v52  ;;  %6086 = vpow2.f32 %v860_v26  ;;  %v862_v49 = vmul.f32 1.442695, %v501_v11  ;;  %v504_v28 = vsub.f32 0.0, %v9737_v36 }
 0x1f7   : > { %v864_v20 = vmul.f32 1.442695, %v502_v3  ;;  %v2810_v48 = vadd.f32 %v6077_v58, %v2809_v45  ;;  %vm9751_vm1 = vcmp.eq.f32.partialorder %v2815_v1, 8.507059e+37  ;;  %v866_v21 = vmul.f32 1.442695, %v503_v34 }
 0x1f8   : > { %v2823_v16 = vmul.f32 %v6079_v56, %v2822_v57  ;;  %v6081_v23 = vpop.eup %6080  ;;  %vm9765_vm4 = vcmp.eq.f32.partialorder %v2829_v42, 8.507059e+37  ;;  %v2832_v62 = vor.u32 1.1754944e-38, %v2831_v18  ;;  %6088 = vpow2.f32 %v862_v49 }
 0x1f9   : > { %v868_v19 = vmul.f32 1.442695, %v504_v28  ;;  %v2814_v2 = vsel %vm9746_vm15, %v6077_v58, %v2810_v48  ;;  %v9774_v47 = vadd.f32 1.0, %v6081_v23  ;;  %6090 = vpow2.f32 %v864_v20 }
 0x1fa   : > { %v2824_v51 = vadd.f32 %v6079_v56, %v2823_v16  ;;  %v6083_v6 = vpop.eup %6082  ;;  %v2819_v63 = vsel %vm9751_vm1, %v9705_v12, %v2814_v2  ;;  %6092 = vpow2.f32 %v866_v21  ;;  %v505_v10 = vsub.f32 0.0, %v9756_v9 }
 0x1fb   : > { %v6085_v7 = vpop.eup %6084  ;;  %v5103_v41 = vmul.f32 %v2819_v63, %v9513_v4  ;;  %6094 = vrcp.f32 %v9774_v47  ;;  %v506_v1 = vsub.f32 0.0, %v9770_v40  ;;  %v2843_v42 = vand.u32 2147483647, %v9774_v47 }
 0x1fc   : > { %v2828_v29 = vsel %vm9761_vm2, %v6079_v56, %v2824_v51  ;;  %v6087_v33 = vpop.eup %6086  ;;  %v2845_v53 = vand.u32 2147483648, %v9774_v47  ;;  %v9792_v31 = vadd.f32 1.0, %v6083_v6  ;;  %v9796_v27 = vadd.f32 1.0, %v6085_v7 }
 0x1fd   : > { %v2833_v12 = vsel %vm9765_vm4, %v2832_v62, %v2828_v29  ;;  %5359 = vst [vmem:[%s7078_s17 + $0x318] sm:$0xff] %v5103_v41  ;;  %v9798_v55 = vadd.f32 1.0, %v6087_v33  ;;  %6096 = vpow2.f32 %v868_v19  ;;  %v870_v60 = vmul.f32 1.442695, %v505_v10 }
 0x1fe   : > { %v5104_v4 = vmul.f32 %v2833_v12, %v9521_v25  ;;  %v6089_v58 = vpop.eup %6088  ;;  %6098 = vrcp.f32 %v9792_v31  ;;  %v507_v18 = vsub.f32 0.0, %v9786_v0  ;;  %v2857_v14 = vand.u32 2147483647, %v9792_v31 }
 0x1ff   : > { %v6091_v24 = vpop.eup %6090  ;;  %v2859_v44 = vand.u32 2147483648, %v9792_v31  ;;  %6100 = vrcp.f32 %v9796_v27  ;;  %v9806_v25 = vmul.f32 1.442695, %v506_v1  ;;  %vm2839_vm3 = vweird.f32 %v9774_v47 }
 0x200   : > { %5360 = vst [vmem:[%s7078_s17 + $0x320] sm:$0xff] %v5104_v4  ;;  %v6093_v5 = vpop.eup %6092  ;;  %v2871_v46 = vand.u32 2147483647, %v9796_v27  ;;  %v2873_v56 = vand.u32 2147483648, %v9796_v27  ;;  %6102 = vrcp.f32 %v9798_v55  ;;  %vm9812_vm10 = vcmp.eq.f32.partialorder %v2843_v42, 8.507059e+37 }
 0x201   : > { %v6095_v8 = vpop.eup %6094  ;;  %v2846_v50 = vor.u32 1.1754944e-38, %v2845_v53  ;;  %v2885_v30 = vand.u32 2147483647, %v9798_v55  ;;  %v2887_v59 = vand.u32 2147483648, %v9798_v55  ;;  %vm2853_vm6 = vweird.f32 %v9792_v31 }
 0x202   : > { %v2835_v52 = vmul.f32 %v6095_v8, %v9774_v47  ;;  %vm2867_vm14 = vweird.f32 %v9796_v27  ;;  %vm2881_vm5 = vweird.f32 %v9798_v55  ;;  %vm2840_vm7 = vweird.f32 %v6095_v8 }
 0x203   : > { %v6097_v26 = vpop.eup %6096  ;;  %vm9822_vm9 = vcmp.eq.f32.partialorder %v2857_v14, 8.507059e+37  ;;  %v2860_v3 = vor.u32 1.1754944e-38, %v2859_v44  ;;  %v9826_v45 = vadd.f32 1.0, %v6089_v58  ;;  %vm9828_vm8 = vcmp.eq.f32.partialorder %v2871_v46, 8.507059e+37  ;;  %vm9849_vm12 = vmor %vm2839_vm3, %vm2840_vm7 }
 0x204   : > { %v6099_v57 = vpop.eup %6098  ;;  %v2836_v34 = vsub.f32 1.0, %v2835_v52  ;;  %v2874_v49 = vor.u32 1.1754944e-38, %v2873_v56  ;;  %v2888_v20 = vor.u32 1.1754944e-38, %v2887_v59  ;;  %v9832_v28 = vadd.f32 1.0, %v6091_v24 }
 0x205   : > { %v6101_v48 = vpop.eup %6100  ;;  %v2849_v39 = vmul.f32 %v6099_v57, %v9792_v31  ;;  %vm9835_vm11 = vcmp.eq.f32.partialorder %v2885_v30, 8.507059e+37  ;;  %6104 = vrcp.f32 %v9826_v45  ;;  %v9840_v21 = vadd.f32 1.0, %v6093_v5  ;;  %v9984_v5 = vld [vmem:[%s6904_s24 + $0x3a0] sm:$0xff] }
 0x206   : > { %v9842_v23 = vadd.f32 1.0, %v6097_v26  ;;  %v6103_v17 = vpop.eup %6102  ;;  %v2837_v35 = vmul.f32 %v6095_v8, %v2836_v34  ;;  %v2863_v62 = vmul.f32 %v6101_v48, %v9796_v27  ;;  %v2899_v19 = vand.u32 2147483647, %v9826_v45 }
 0x207   : > { %6106 = vpow2.f32 %v870_v60  ;;  %v2850_v51 = vsub.f32 1.0, %v2849_v39  ;;  %vm2854_vm13 = vweird.f32 %v6099_v57  ;;  %v2877_v6 = vmul.f32 %v6103_v17, %v9798_v55 }
 0x208   : > { %v2901_v63 = vand.u32 2147483648, %v9826_v45  ;;  %v2838_v10 = vadd.f32 %v6095_v8, %v2837_v35  ;;  %v2864_v7 = vsub.f32 1.0, %v2863_v62  ;;  %vm2868_vm0 = vweird.f32 %v6101_v48  ;;  %vm9861_vm2 = vmor %vm2853_vm6, %vm2854_vm13 }
 0x209   : > { %6108 = vrcp.f32 %v9832_v28  ;;  %v2851_v41 = vmul.f32 %v6099_v57, %v2850_v51  ;;  %v2878_v29 = vsub.f32 1.0, %v2877_v6  ;;  %vm2882_vm15 = vweird.f32 %v6103_v17  ;;  %vm9873_vm3 = vmor %vm2867_vm14, %vm2868_vm0 }
 0x20a   : > { %vm2895_vm1 = vweird.f32 %v9826_v45  ;;  %v2842_v47 = vsel %vm9849_vm12, %v6095_v8, %v2838_v10  ;;  %v2865_v33 = vmul.f32 %v6101_v48, %v2864_v7  ;;  %vm9865_vm4 = vcmp.eq.f32.partialorder %v2899_v19, 8.507059e+37  ;;  %vm9882_vm6 = vmor %vm2881_vm5, %vm2882_vm15 }
 0x20b   : > { %v2902_v42 = vor.u32 1.1754944e-38, %v2901_v63  ;;  %v6105_v53 = vpop.eup %6104  ;;  %v2847_v4 = vsel %vm9812_vm10, %v2846_v50, %v2842_v47  ;;  %v2852_v58 = vadd.f32 %v6099_v57, %v2851_v41  ;;  %v2879_v60 = vmul.f32 %v6103_v17, %v2878_v29 }
 0x20c   : > { %6110 = vrcp.f32 %v9840_v21  ;;  %v5105_v14 = vmul.f32 %v2847_v4, %v9650_v43  ;;  %v2866_v44 = vadd.f32 %v6101_v48, %v2865_v33  ;;  %v2891_v27 = vmul.f32 %v6105_v53, %v9826_v45  ;;  %v9972_v4 = vld [vmem:[%s6904_s24 + $0x390] sm:$0xff] }
 0x20d   : > { %v6107_v24 = vpop.eup %6106  ;;  %v2913_v46 = vand.u32 2147483647, %v9832_v28  ;;  %v2856_v56 = vsel %vm9861_vm2, %v6099_v57, %v2852_v58  ;;  %v2880_v8 = vadd.f32 %v6103_v17, %v2879_v60  ;;  %vm2909_vm10 = vweird.f32 %v9832_v28 }
 0x20e   : > { %v2915_v43 = vand.u32 2147483648, %v9832_v28  ;;  %5361 = vst [vmem:[%s7078_s17 + $0x328] sm:$0xff] %v5105_v14  ;;  %v2861_v55 = vsel %vm9822_vm9, %v2860_v3, %v2856_v56  ;;  %v2870_v50 = vsel %vm9873_vm3, %v6101_v48, %v2866_v44  ;;  %v2892_v30 = vsub.f32 1.0, %v2891_v27  ;;  %v9978_v14 = vld [vmem:[%s6904_s24 + $0x398] sm:$0xff] }
 0x20f   : > { %v6109_v32 = vpop.eup %6108  ;;  %vm2896_vm14 = vweird.f32 %v6105_v53  ;;  %v5106_v59 = vmul.f32 %v2861_v55, %v9686_v13  ;;  %v2875_v52 = vsel %vm9828_vm8, %v2874_v49, %v2870_v50  ;;  %v2884_v26 = vsel %vm9882_vm6, %v6103_v17, %v2880_v8 }
 0x210   : > { %v2905_v57 = vmul.f32 %v6109_v32, %v9832_v28  ;;  %v5107_v34 = vmul.f32 %v2875_v52, %v9692_v22  ;;  %v2889_v11 = vsel %vm9835_vm11, %v2888_v20, %v2884_v26  ;;  %v2893_v3 = vmul.f32 %v6105_v53, %v2892_v30  ;;  %vm9914_vm7 = vmor %vm2895_vm1, %vm2896_vm14 }
 0x211   : > { %vm9906_vm5 = vcmp.eq.f32.partialorder %v2913_v46, 8.507059e+37  ;;  %5362 = vst [vmem:[%s7078_s17 + $0x330] sm:$0xff] %v5106_v59  ;;  %v5108_v37 = vmul.f32 %v2889_v11, %v9695_v38  ;;  %vm2910_vm9 = vweird.f32 %v6109_v32  ;;  %v2916_v39 = vor.u32 1.1754944e-38, %v2915_v43 }
 0x212   : > { %v6111_v13 = vpop.eup %6110  ;;  %v2906_v22 = vsub.f32 1.0, %v2905_v57  ;;  %5363 = vst [vmem:[%s7078_s17 + $0x338] sm:$0xff] %v5107_v34  ;;  %v2894_v20 = vadd.f32 %v6105_v53, %v2893_v3  ;;  %v2927_v17 = vand.u32 2147483647, %v9840_v21  ;;  %6112 = vrcp.f32 %v9842_v23  ;;  %vm9929_vm12 = vmor %vm2909_vm10, %vm2910_vm9 }
 0x213   : > { %v2919_v16 = vmul.f32 %v6111_v13, %v9840_v21  ;;  %5364 = vst [vmem:[%s7078_s17 + $0x340] sm:$0xff] %v5108_v37  ;;  %vm2923_vm8 = vweird.f32 %v9840_v21  ;;  %vm2924_vm11 = vweird.f32 %v6111_v13  ;;  %v2929_v38 = vand.u32 2147483648, %v9840_v21 }
 0x214   : > { %v2907_v35 = vmul.f32 %v6109_v32, %v2906_v22  ;;  %v2898_v45 = vsel %vm9914_vm7, %v6105_v53, %v2894_v20  ;;  %v2941_v2 = vand.u32 2147483647, %v9842_v23  ;;  %v2943_v51 = vand.u32 2147483648, %v9842_v23  ;;  %vm9950_vm0 = vmor %vm2923_vm8, %vm2924_vm11  ;;  %v9969_v53 = vld [vmem:[%s6904_s24 + $0x388] sm:$0xff] }
 0x215   : > { %v2920_v19 = vsub.f32 1.0, %v2919_v16  ;;  %v2903_v6 = vsel %vm9865_vm4, %v2902_v42, %v2898_v45  ;;  %v9937_v10 = vadd.f32 1.0, %v6107_v24  ;;  %6114 = vpow2.f32 %v9806_v25 }
 0x216   : > { %v2908_v63 = vadd.f32 %v6109_v32, %v2907_v35  ;;  %v5109_v28 = vmul.f32 %v2903_v6, %v9723_v61  ;;  %vm9941_vm13 = vcmp.eq.f32.partialorder %v2927_v17, 8.507059e+37  ;;  %v2930_v25 = vor.u32 1.1754944e-38, %v2929_v38  ;;  %v9957_v61 = vld [vmem:[%s6904_s24 + $0x380] sm:$0xff] }
 0x217   : > { %v2921_v7 = vmul.f32 %v6111_v13, %v2920_v19  ;;  %vm2937_vm15 = vweird.f32 %v9842_v23  ;;  %6116 = vrcp.f32 %v9937_v10  ;;  %vm9962_vm1 = vcmp.eq.f32.partialorder %v2941_v2, 8.507059e+37 }
 0x218   : > { %v2912_v29 = vsel %vm9929_vm12, %v6109_v32, %v2908_v63  ;;  %v6113_v1 = vpop.eup %6112  ;;  %5365 = vst [vmem:[%s7078_s17 + $0x348] sm:$0xff] %v5109_v28  ;;  %v874_v42 = vmul.f32 1.442695, %v507_v18  ;;  %v2944_v60 = vor.u32 1.1754944e-38, %v2943_v51  ;;  %v2955_v24 = vand.u32 2147483647, %v9937_v10 }
 0x219   : > { %v2917_v33 = vsel %vm9906_vm5, %v2916_v39, %v2912_v29  ;;  %v2922_v12 = vadd.f32 %v6111_v13, %v2921_v7  ;;  %v2933_v31 = vmul.f32 %v6113_v1, %v9842_v23  ;;  %vm2938_vm2 = vweird.f32 %v6113_v1 }
 0x21a   : > { %v5110_v58 = vmul.f32 %v2917_v33, %v9726_v54  ;;  %6118 = vpow2.f32 %v874_v42  ;;  %v508_v18 = vsub.f32 0.0, %v9957_v61  ;;  %v509_v56 = vsub.f32 0.0, %v9969_v53  ;;  %vm10001_vm3 = vmor %vm2937_vm15, %vm2938_vm2  ;;  %v10052_v42 = vld [vmem:[%s6904_s24 + $0x3b0] sm:$0xff] }
 0x21b   : > { %v2926_v44 = vsel %vm9950_vm0, %v6111_v13, %v2922_v12  ;;  %v6115_v27 = vpop.eup %6114  ;;  %v2934_v46 = vsub.f32 1.0, %v2933_v31  ;;  %v510_v8 = vsub.f32 0.0, %v9972_v4  ;;  %v511_v50 = vsub.f32 0.0, %v9978_v14  ;;  %v10013_v13 = vld [vmem:[%s6904_s24 + $0x3a8] sm:$0xff] }
 0x21c   : > { %5366 = vst [vmem:[%s7078_s17 + $0x350] sm:$0xff] %v5110_v58  ;;  %v2931_v54 = vsel %vm9941_vm13, %v2930_v25, %v2926_v44  ;;  %v9992_v32 = vadd.f32 1.0, %v6115_v27  ;;  %v876_v55 = vmul.f32 1.442695, %v508_v18  ;;  %vm2951_vm4 = vweird.f32 %v9937_v10 }
 0x21d   : > { %v5111_v43 = vmul.f32 %v2931_v54, %v9731_v15  ;;  %v6117_v30 = vpop.eup %6116  ;;  %v2935_v59 = vmul.f32 %v6113_v1, %v2934_v46  ;;  %v878_v52 = vmul.f32 1.442695, %v509_v56  ;;  %v512_v26 = vsub.f32 0.0, %v9984_v5 }
 0x21e   : > { %v2947_v15 = vmul.f32 %v6117_v30, %v9937_v10  ;;  %v2957_v34 = vand.u32 2147483648, %v9937_v10  ;;  %6120 = vrcp.f32 %v9992_v32  ;;  %v880_v11 = vmul.f32 1.442695, %v510_v8 }
 0x21f   : > { %5367 = vst [vmem:[%s7078_s17 + $0x358] sm:$0xff] %v5111_v43  ;;  %v2936_v3 = vadd.f32 %v6113_v1, %v2935_v59  ;;  %vm2952_vm6 = vweird.f32 %v6117_v30  ;;  %vm10008_vm10 = vcmp.eq.f32.partialorder %v2955_v24, 8.507059e+37  ;;  %6122 = vpow2.f32 %v876_v55 }
 0x220   : > { %v6119_v23 = vpop.eup %6118  ;;  %v2948_v37 = vsub.f32 1.0, %v2947_v15  ;;  %v2969_v49 = vand.u32 2147483647, %v9992_v32  ;;  %6124 = vpow2.f32 %v878_v52  ;;  %v882_v22 = vmul.f32 1.442695, %v511_v50  ;;  %vm10028_vm14 = vmor %vm2951_vm4, %vm2952_vm6 }
 0x221   : > { %v2940_v39 = vsel %vm10001_vm3, %v6113_v1, %v2936_v3  ;;  %v2971_v20 = vand.u32 2147483648, %v9992_v32  ;;  %v10019_v16 = vadd.f32 1.0, %v6119_v23  ;;  %v884_v17 = vmul.f32 1.442695, %v512_v26 }
 0x222   : > { %v2945_v35 = vsel %vm9962_vm1, %v2944_v60, %v2940_v39  ;;  %v2949_v38 = vmul.f32 %v6117_v30, %v2948_v37  ;;  %6126 = vpow2.f32 %v880_v11  ;;  %v513_v45 = vsub.f32 0.0, %v10013_v13 }
 0x223   : > { %v5112_v62 = vmul.f32 %v2945_v35, %v9737_v36  ;;  %v2958_v2 = vor.u32 1.1754944e-38, %v2957_v34  ;;  %vm2965_vm5 = vweird.f32 %v9992_v32  ;;  %6128 = vrcp.f32 %v10019_v16 }
 0x224   : > { %v6121_v51 = vpop.eup %6120  ;;  %v2950_v6 = vadd.f32 %v6117_v30, %v2949_v38  ;;  %v2983_v63 = vand.u32 2147483647, %v10019_v16  ;;  %v2985_v28 = vand.u32 2147483648, %v10019_v16  ;;  %6130 = vpow2.f32 %v882_v22 }
 0x225   : > { %v6123_v36 = vpop.eup %6122  ;;  %5368 = vst [vmem:[%s7078_s17 + $0x360] sm:$0xff] %v5112_v62  ;;  %v2961_v10 = vmul.f32 %v6121_v51, %v9992_v32  ;;  %vm10038_vm7 = vcmp.eq.f32.partialorder %v2969_v49, 8.507059e+37  ;;  %v2972_v41 = vor.u32 1.1754944e-38, %v2971_v20  ;;  %6132 = vpow2.f32 %v884_v17 }
 0x226   : > { %v6125_v29 = vpop.eup %6124  ;;  %v2954_v47 = vsel %vm10028_vm14, %v6117_v30, %v2950_v6  ;;  %vm2979_vm9 = vweird.f32 %v10019_v16  ;;  %v10045_v25 = vadd.f32 1.0, %v6123_v36  ;;  %v886_v1 = vmul.f32 1.442695, %v513_v45 }
 0x227   : > { %v2959_v33 = vsel %vm10008_vm10, %v2958_v2, %v2954_v47  ;;  %v2962_v12 = vsub.f32 1.0, %v2961_v10  ;;  %vm2966_vm8 = vweird.f32 %v6121_v51  ;;  %v10049_v21 = vadd.f32 1.0, %v6125_v29 }
 0x228   : > { %v6127_v58 = vpop.eup %6126  ;;  %v5113_v31 = vmul.f32 %v2959_v33, %v9756_v9  ;;  %vm10055_vm11 = vcmp.eq.f32.partialorder %v2983_v63, 8.507059e+37  ;;  %v2986_v24 = vor.u32 1.1754944e-38, %v2985_v28  ;;  %6134 = vrcp.f32 %v10045_v25  ;;  %vm10067_vm12 = vmor %vm2965_vm5, %vm2966_vm8 }
 0x229   : > { %v6129_v44 = vpop.eup %6128  ;;  %v2963_v18 = vmul.f32 %v6121_v51, %v2962_v12  ;;  %v2997_v27 = vand.u32 2147483647, %v10045_v25  ;;  %v2999_v54 = vand.u32 2147483648, %v10045_v25  ;;  %6136 = vrcp.f32 %v10049_v21 }
 0x22a   : > { %v6131_v46 = vpop.eup %6130  ;;  %5369 = vst [vmem:[%s7078_s17 + $0x368] sm:$0xff] %v5113_v31  ;;  %v2975_v56 = vmul.f32 %v6129_v44, %v10019_v16  ;;  %v3011_v8 = vand.u32 2147483647, %v10049_v21  ;;  %6138 = vpow2.f32 %v886_v1  ;;  %v514_v43 = vsub.f32 0.0, %v10052_v42 }
 0x22b   : > { %v6133_v55 = vpop.eup %6132  ;;  %v2964_v50 = vadd.f32 %v6121_v51, %v2963_v18  ;;  %vm2993_vm13 = vweird.f32 %v10045_v25  ;;  %vm3007_vm0 = vweird.f32 %v10049_v21  ;;  %v10076_v30 = vadd.f32 1.0, %v6127_v58 }
 0x22c   : > { %v2976_v32 = vsub.f32 1.0, %v2975_v56  ;;  %vm2980_vm15 = vweird.f32 %v6129_v44  ;;  %v3013_v59 = vand.u32 2147483648, %v10049_v21  ;;  %v10079_v52 = vadd.f32 1.0, %v6131_v46 }
 0x22d   : > { %v2968_v26 = vsel %vm10067_vm12, %v6121_v51, %v2964_v50  ;;  %vm10083_vm1 = vcmp.eq.f32.partialorder %v2997_v27, 8.507059e+37  ;;  %v3000_v15 = vor.u32 1.1754944e-38, %v2999_v54  ;;  %6140 = vrcp.f32 %v10076_v30  ;;  %vm10101_vm4 = vmor %vm2979_vm9, %vm2980_vm15 }
 0x22e   : > { %v6135_v34 = vpop.eup %6134  ;;  %v2973_v11 = vsel %vm10038_vm7, %v2972_v41, %v2968_v26  ;;  %v2977_v3 = vmul.f32 %v6129_v44, %v2976_v32  ;;  %vm10090_vm2 = vcmp.eq.f32.partialorder %v3011_v8, 8.507059e+37  ;;  %v3025_v23 = vand.u32 2147483647, %v10076_v30 }
 0x22f   : > { %v10095_v37 = vadd.f32 1.0, %v6133_v55  ;;  %v6137_v49 = vpop.eup %6136  ;;  %v5114_v22 = vmul.f32 %v2973_v11, %v9770_v40  ;;  %v2989_v20 = vmul.f32 %v6135_v34, %v10045_v25  ;;  %v3027_v17 = vand.u32 2147483648, %v10076_v30 }
 0x230   : > { %6142 = vrcp.f32 %v10079_v52  ;;  %v6139_v35 = vpop.eup %6138  ;;  %v2978_v38 = vadd.f32 %v6129_v44, %v2977_v3  ;;  %v3003_v45 = vmul.f32 %v6137_v49, %v10049_v21  ;;  %v3014_v62 = vor.u32 1.1754944e-38, %v3013_v59  ;;  %v10167_v59 = vld [vmem:[%s6904_s24 + $0x3b8] sm:$0xff] }
 0x231   : > { %vm3021_vm3 = vweird.f32 %v10076_v30  ;;  %5370 = vst [vmem:[%s7078_s17 + $0x370] sm:$0xff] %v5114_v22  ;;  %v2990_v40 = vsub.f32 1.0, %v2989_v20  ;;  %vm2994_vm6 = vweird.f32 %v6135_v34  ;;  %vm3008_vm10 = vweird.f32 %v6137_v49 }
 0x232   : > { %v3039_v16 = vand.u32 2147483647, %v10079_v52  ;;  %v2982_v19 = vsel %vm10101_vm4, %v6129_v44, %v2978_v38  ;;  %v3004_v2 = vsub.f32 1.0, %v3003_v45  ;;  %vm10114_vm14 = vcmp.eq.f32.partialorder %v3025_v23, 8.507059e+37  ;;  %vm10125_vm7 = vmor %vm2993_vm13, %vm2994_vm6  ;;  %v10190_v23 = vld [vmem:[%s6904_s24 + $0x3c0] sm:$0xff] }
 0x233   : > { %6144 = vrcp.f32 %v10095_v37  ;;  %v6141_v6 = vpop.eup %6140  ;;  %v2987_v63 = vsel %vm10055_vm11, %v2986_v24, %v2982_v19  ;;  %v2991_v28 = vmul.f32 %v6135_v34, %v2990_v40  ;;  %v3028_v36 = vor.u32 1.1754944e-38, %v3027_v17  ;;  %vm10134_vm9 = vmor %vm3007_vm0, %vm3008_vm10  ;;  %v10200_v17 = vld [vmem:[%s6904_s24 + $0x3d0] sm:$0xff] }
 0x234   : > { %vm3035_vm5 = vweird.f32 %v10079_v52  ;;  %v5115_v10 = vmul.f32 %v2987_v63, %v9786_v0  ;;  %v3005_v41 = vmul.f32 %v6137_v49, %v3004_v2  ;;  %v3017_v29 = vmul.f32 %v6141_v6, %v10076_v30  ;;  %v10224_v63 = vld [vmem:[%s6904_s24 + $0x3e0] sm:$0xff]  ;;  %v10239_v0 = vld [vmem:[%s6904_s24 + $0x3f0] sm:$0xff] }
 0x235   : > { %v3041_v47 = vand.u32 2147483648, %v10079_v52  ;;  %v2992_v33 = vadd.f32 %v6135_v34, %v2991_v28  ;;  %vm3022_vm8 = vweird.f32 %v6141_v6  ;;  %vm10138_vm11 = vcmp.eq.f32.partialorder %v3039_v16, 8.507059e+37 }
 0x236   : > { %v6143_v1 = vpop.eup %6142  ;;  %vm3049_vm12 = vweird.f32 %v10095_v37  ;;  %5371 = vst [vmem:[%s7078_s17 + $0x378] sm:$0xff] %v5115_v10  ;;  %v3006_v25 = vadd.f32 %v6137_v49, %v3005_v41  ;;  %v3018_v58 = vsub.f32 1.0, %v3017_v29  ;;  %v3053_v60 = vand.u32 2147483647, %v10095_v37  ;;  %vm10161_vm0 = vmor %vm3021_vm3, %vm3022_vm8  ;;  %v10231_v41 = vld [vmem:[%s6904_s24 + $0x3e8] sm:$0xff] }
 0x237   : > { %v3031_v31 = vmul.f32 %v6143_v1, %v10079_v52  ;;  %v2996_v21 = vsel %vm10125_vm7, %v6135_v34, %v2992_v33  ;;  %vm3036_vm13 = vweird.f32 %v6143_v1  ;;  %v3055_v24 = vand.u32 2147483648, %v10095_v37 }
 0x238   : > { %v10149_v44 = vadd.f32 1.0, %v6139_v35  ;;  %v3001_v27 = vsel %vm10083_vm1, %v3000_v15, %v2996_v21  ;;  %v3010_v54 = vsel %vm10134_vm9, %v6137_v49, %v3006_v25  ;;  %v3019_v46 = vmul.f32 %v6141_v6, %v3018_v58  ;;  %vm10175_vm15 = vmor %vm3035_vm5, %vm3036_vm13  ;;  %v10193_v49 = vld [vmem:[%s6904_s24 + $0x3c8] sm:$0xff] }
 0x239   : > { %v6145_v18 = vpop.eup %6144  ;;  %v3032_v9 = vsub.f32 1.0, %v3031_v31  ;;  %v5116_v56 = vmul.f32 %v3001_v27, %v9957_v61  ;;  %v3015_v8 = vsel %vm10090_vm2, %v3014_v62, %v3010_v54  ;;  %v3042_v50 = vor.u32 1.1754944e-38, %v3041_v47  ;;  %v10213_v62 = vld [vmem:[%s6904_s24 + $0x3d8] sm:$0xff] }
 0x23a   : > { %v3045_v32 = vmul.f32 %v6145_v18, %v10095_v37  ;;  %v5117_v26 = vmul.f32 %v3015_v8, %v9969_v53  ;;  %v3020_v61 = vadd.f32 %v6141_v6, %v3019_v46  ;;  %6146 = vrcp.f32 %v10149_v44  ;;  %v10243_v31 = vld [vmem:[%s6904_s24 + $0x3f8] sm:$0xff] }
 0x23b   : > { %v3033_v57 = vmul.f32 %v6143_v1, %v3032_v9  ;;  %5372 = vst [vmem:[%s7078_s17 + $0x380] sm:$0xff] %v5116_v56  ;;  %vm3050_vm1 = vweird.f32 %v6145_v18  ;;  %vm10179_vm2 = vcmp.eq.f32.partialorder %v3053_v60, 8.507059e+37  ;;  %v3056_v53 = vor.u32 1.1754944e-38, %v3055_v24 }
 0x23c   : > { %v3046_v15 = vsub.f32 1.0, %v3045_v32  ;;  %5373 = vst [vmem:[%s7078_s17 + $0x388] sm:$0xff] %v5117_v26  ;;  %v3024_v11 = vsel %vm10161_vm0, %v6141_v6, %v3020_v61  ;;  %v888_v52 = vmul.f32 1.442695, %v514_v43  ;;  %v515_v48 = vsub.f32 0.0, %v10167_v59  ;;  %vm10208_vm3 = vmor %vm3049_vm12, %vm3050_vm1 }
 0x23d   : > { %v3034_v3 = vadd.f32 %v6143_v1, %v3033_v57  ;;  %v3029_v22 = vsel %vm10114_vm14, %v3028_v36, %v3024_v11  ;;  %vm3063_vm4 = vweird.f32 %v10149_v44  ;;  %v3067_v20 = vand.u32 2147483647, %v10149_v44 }
 0x23e   : > { %v3047_v39 = vmul.f32 %v6145_v18, %v3046_v15  ;;  %v5118_v35 = vmul.f32 %v3029_v22, %v9972_v4  ;;  %6148 = vpow2.f32 %v888_v52  ;;  %v890_v45 = vmul.f32 1.442695, %v515_v48 }
 0x23f   : > { %v3038_v43 = vsel %vm10175_vm15, %v6143_v1, %v3034_v3  ;;  %v516_v16 = vsub.f32 0.0, %v10190_v23  ;;  %v517_v19 = vsub.f32 0.0, %v10193_v49  ;;  %v3069_v51 = vand.u32 2147483648, %v10149_v44 }
 0x240   : > { %v3043_v40 = vsel %vm10138_vm11, %v3042_v50, %v3038_v43  ;;  %v3048_v4 = vadd.f32 %v6145_v18, %v3047_v39  ;;  %v6147_v2 = vpop.eup %6146  ;;  %5374 = vst [vmem:[%s7078_s17 + $0x390] sm:$0xff] %v5118_v35  ;;  %6150 = vpow2.f32 %v890_v45  ;;  %v518_v6 = vsub.f32 0.0, %v10200_v17  ;;  %v10292_v43 = vld [vmem:[%s6904_s24 + $0x408] sm:$0xff] }
 0x241   : > { %v5119_v37 = vmul.f32 %v3043_v40, %v9978_v14  ;;  %v3059_v36 = vmul.f32 %v6147_v2, %v10149_v44  ;;  %v892_v10 = vmul.f32 1.442695, %v516_v16  ;;  %v519_v7 = vsub.f32 0.0, %v10213_v62 }
 0x242   : > { %v3052_v28 = vsel %vm10208_vm3, %v6145_v18, %v3048_v4  ;;  %vm3064_vm6 = vweird.f32 %v6147_v2  ;;  %v894_v29 = vmul.f32 1.442695, %v517_v19  ;;  %v896_v47 = vmul.f32 1.442695, %v518_v6  ;;  %v10249_v18 = vld [vmem:[%s6904_s24 + $0x400] sm:$0xff] }
 0x243   : > { %5375 = vst [vmem:[%s7078_s17 + $0x398] sm:$0xff] %v5119_v37  ;;  %v3057_v14 = vsel %vm10179_vm2, %v3056_v53, %v3052_v28  ;;  %v3060_v33 = vsub.f32 1.0, %v3059_v36  ;;  %6152 = vpow2.f32 %v892_v10  ;;  %v520_v12 = vsub.f32 0.0, %v10224_v63  ;;  %vm10254_vm10 = vmor %vm3063_vm4, %vm3064_vm6 }
 0x244   : > { %v5120_v1 = vmul.f32 %v3057_v14, %v9984_v5  ;;  %v6149_v25 = vpop.eup %6148  ;;  %6154 = vpow2.f32 %v894_v29  ;;  %v521_v58 = vsub.f32 0.0, %v10231_v41  ;;  %v898_v24 = vmul.f32 1.442695, %v519_v7 }
 0x245   : > { %v3061_v60 = vmul.f32 %v6147_v2, %v3060_v33  ;;  %v10246_v21 = vadd.f32 1.0, %v6149_v25  ;;  %6156 = vpow2.f32 %v896_v47  ;;  %vm10258_vm14 = vcmp.eq.f32.partialorder %v3067_v20, 8.507059e+37 }
 0x246   : > { %5376 = vst [vmem:[%s7078_s17 + $0x3a0] sm:$0xff] %v5120_v1  ;;  %v6151_v5 = vpop.eup %6150  ;;  %v3070_v46 = vor.u32 1.1754944e-38, %v3069_v51  ;;  %v522_v9 = vsub.f32 0.0, %v10239_v0  ;;  %v900_v8 = vmul.f32 1.442695, %v520_v12  ;;  %v523_v55 = vsub.f32 0.0, %v10243_v31 }
 0x247   : > { %v3062_v56 = vadd.f32 %v6147_v2, %v3061_v60  ;;  %6158 = vrcp.f32 %v10246_v21  ;;  %v3081_v50 = vand.u32 2147483647, %v10246_v21  ;;  %v10266_v44 = vadd.f32 1.0, %v6151_v5 }
 0x248   : > { %v902_v32 = vmul.f32 1.442695, %v521_v58  ;;  %v524_v26 = vsub.f32 0.0, %v10249_v18  ;;  %v3083_v30 = vand.u32 2147483648, %v10246_v21  ;;  %6160 = vpow2.f32 %v898_v24 }
 0x249   : > { %v6153_v61 = vpop.eup %6152  ;;  %v3066_v57 = vsel %vm10254_vm10, %v6147_v2, %v3062_v56  ;;  %vm3077_vm5 = vweird.f32 %v10246_v21  ;;  %6162 = vrcp.f32 %v10266_v44  ;;  %v904_v53 = vmul.f32 1.442695, %v522_v9 }
 0x24a   : > { %v6155_v15 = vpop.eup %6154  ;;  %v3071_v34 = vsel %vm10258_vm14, %v3070_v46, %v3066_v57  ;;  %v10277_v52 = vadd.f32 1.0, %v6153_v61  ;;  %6164 = vpow2.f32 %v900_v8  ;;  %v10279_v48 = vmul.f32 1.442695, %v523_v55 }
 0x24b   : > { %v6157_v11 = vpop.eup %6156  ;;  %v5121_v3 = vmul.f32 %v3071_v34, %v10013_v13  ;;  %vm10281_vm7 = vcmp.eq.f32.partialorder %v3081_v50, 8.507059e+37  ;;  %v10285_v39 = vadd.f32 1.0, %v6155_v15  ;;  %6166 = vpow2.f32 %v902_v32 }
 0x24c   : > { %v10287_v20 = vadd.f32 1.0, %v6157_v11  ;;  %v10289_v35 = vmul.f32 1.442695, %v524_v26  ;;  %v3084_v13 = vor.u32 1.1754944e-38, %v3083_v30  ;;  %v3095_v45 = vand.u32 2147483647, %v10266_v44 }
 0x24d   : > { %v6159_v38 = vpop.eup %6158  ;;  %5377 = vst [vmem:[%s7078_s17 + $0x3a8] sm:$0xff] %v5121_v3  ;;  %v3097_v40 = vand.u32 2147483648, %v10266_v44  ;;  %6168 = vrcp.f32 %v10277_v52  ;;  %v3109_v16 = vand.u32 2147483647, %v10277_v52  ;;  %v3111_v19 = vand.u32 2147483648, %v10277_v52 }
 0x24e   : > { %v3073_v4 = vmul.f32 %v6159_v38, %v10246_v21  ;;  %6170 = vpow2.f32 %v904_v53  ;;  %v6161_v2 = vpop.eup %6160  ;;  %vm3091_vm9 = vweird.f32 %v10266_v44  ;;  %v3125_v37 = vand.u32 2147483648, %v10285_v39 }
 0x24f   : > { %6172 = vrcp.f32 %v10285_v39  ;;  %v525_v51 = vsub.f32 0.0, %v10292_v43  ;;  %v6163_v6 = vpop.eup %6162  ;;  %vm3078_vm8 = vweird.f32 %v6159_v38  ;;  %v3123_v36 = vand.u32 2147483647, %v10285_v39 }
 0x250   : > { %v3074_v28 = vsub.f32 1.0, %v3073_v4  ;;  %6174 = vrcp.f32 %v10287_v20  ;;  %v6165_v10 = vpop.eup %6164  ;;  %v3087_v7 = vmul.f32 %v6163_v6, %v10266_v44  ;;  %vm10308_vm11 = vcmp.eq.f32.partialorder %v3095_v45, 8.507059e+37  ;;  %vm10320_vm15 = vmor %vm3077_vm5, %vm3078_vm8 }
 0x251   : > { %v3098_v29 = vor.u32 1.1754944e-38, %v3097_v40  ;;  %vm3105_vm12 = vweird.f32 %v10277_v52  ;;  %v6167_v47 = vpop.eup %6166  ;;  %vm10313_vm13 = vcmp.eq.f32.partialorder %v3109_v16, 8.507059e+37  ;;  %v3112_v12 = vor.u32 1.1754944e-38, %v3111_v19 }
 0x252   : > { %v3075_v1 = vmul.f32 %v6159_v38, %v3074_v28  ;;  %vm3119_vm0 = vweird.f32 %v10285_v39  ;;  %v3088_v60 = vsub.f32 1.0, %v3087_v7  ;;  %vm3092_vm1 = vweird.f32 %v6163_v6 }
 0x253   : > { %v6169_v25 = vpop.eup %6168  ;;  %v3126_v24 = vor.u32 1.1754944e-38, %v3125_v37  ;;  %v10324_v5 = vadd.f32 1.0, %v6161_v2  ;;  %vm10329_vm2 = vcmp.eq.f32.partialorder %v3123_v36, 8.507059e+37  ;;  %vm3133_vm4 = vweird.f32 %v10287_v20  ;;  %vm10344_vm3 = vmor %vm3091_vm9, %vm3092_vm1  ;;  %v10473_v2 = vld [vmem:[%s6904_s24 + $0x428] sm:$0xff] }
 0x254   : > { %v10326_v27 = vpop.eup %6170  ;;  %v3076_v54 = vadd.f32 %v6159_v38, %v3075_v1  ;;  %v3101_v46 = vmul.f32 %v6169_v25, %v10277_v52  ;;  %v3137_v21 = vand.u32 2147483647, %v10287_v20  ;;  %v3089_v8 = vmul.f32 %v6163_v6, %v3088_v60 }
 0x255   : > { %v6173_v56 = vpop.eup %6172  ;;  %v3139_v55 = vand.u32 2147483648, %v10287_v20  ;;  %6176 = vrcp.f32 %v10324_v5  ;;  %v10337_v50 = vadd.f32 1.0, %v6165_v10  ;;  %vm3106_vm6 = vweird.f32 %v6169_v25 }
 0x256   : > { %v6175_v32 = vpop.eup %6174  ;;  %v3080_v26 = vsel %vm10320_vm15, %v6159_v38, %v3076_v54  ;;  %v3102_v57 = vsub.f32 1.0, %v3101_v46  ;;  %v3115_v30 = vmul.f32 %v6173_v56, %v10285_v39  ;;  %v3090_v34 = vadd.f32 %v6163_v6, %v3089_v8  ;;  %vm10359_vm14 = vmor %vm3105_vm12, %vm3106_vm6 }
 0x257   : > { %v3085_v15 = vsel %vm10281_vm7, %v3084_v13, %v3080_v26  ;;  %v3129_v53 = vmul.f32 %v6175_v32, %v10287_v20  ;;  %v10352_v11 = vadd.f32 1.0, %v6167_v47  ;;  %vm3120_vm10 = vweird.f32 %v6173_v56 }
 0x258   : > { %v5122_v3 = vmul.f32 %v3085_v15, %v10052_v42  ;;  %v3103_v44 = vmul.f32 %v6169_v25, %v3102_v57  ;;  %v3116_v38 = vsub.f32 1.0, %v3115_v30  ;;  %v3094_v45 = vsel %vm10344_vm3, %v6163_v6, %v3090_v34  ;;  %vm10374_vm9 = vmor %vm3119_vm0, %vm3120_vm10  ;;  %v10443_v34 = vld [vmem:[%s6904_s24 + $0x418] sm:$0xff] }
 0x259   : > { %v3130_v22 = vsub.f32 1.0, %v3129_v53  ;;  %vm3134_vm5 = vweird.f32 %v6175_v32  ;;  %6178 = vrcp.f32 %v10337_v50  ;;  %v3099_v42 = vsel %vm10308_vm11, %v3098_v29, %v3094_v45 }
 0x25a   : > { %5378 = vst [vmem:[%s7078_s17 + $0x3b0] sm:$0xff] %v5122_v3  ;;  %v3104_v13 = vadd.f32 %v6169_v25, %v3103_v44  ;;  %v3117_v4 = vmul.f32 %v6173_v56, %v3116_v38  ;;  %vm10367_vm7 = vcmp.eq.f32.partialorder %v3137_v21, 8.507059e+37  ;;  %v5123_v19 = vmul.f32 %v3099_v42, %v10167_v59  ;;  %vm10384_vm8 = vmor %vm3133_vm4, %vm3134_vm5  ;;  %v10460_v42 = vld [vmem:[%s6904_s24 + $0x420] sm:$0xff] }
 0x25b   : > { %v6177_v52 = vpop.eup %6176  ;;  %v3131_v37 = vmul.f32 %v6175_v32, %v3130_v22  ;;  %v3140_v6 = vor.u32 1.1754944e-38, %v3139_v55  ;;  %v3151_v28 = vand.u32 2147483647, %v10324_v5  ;;  %vm3147_vm11 = vweird.f32 %v10324_v5 }
 0x25c   : > { %v3108_v36 = vsel %vm10359_vm14, %v6169_v25, %v3104_v13  ;;  %v3118_v10 = vadd.f32 %v6173_v56, %v3117_v4  ;;  %v3143_v59 = vmul.f32 %v6177_v52, %v10324_v5  ;;  %5379 = vst [vmem:[%s7078_s17 + $0x3b8] sm:$0xff] %v5123_v19  ;;  %vm3148_vm12 = vweird.f32 %v6177_v52 }
 0x25d   : > { %v3113_v39 = vsel %vm10313_vm13, %v3112_v12, %v3108_v36  ;;  %v3132_v14 = vadd.f32 %v6175_v32, %v3131_v37  ;;  %v3153_v29 = vand.u32 2147483648, %v10324_v5  ;;  %6180 = vrcp.f32 %v10352_v11  ;;  %vm10419_vm0 = vmor %vm3147_vm11, %vm3148_vm12 }
 0x25e   : > { %v5124_v20 = vmul.f32 %v3113_v39, %v10190_v23  ;;  %v3122_v47 = vsel %vm10374_vm9, %v6173_v56, %v3118_v10  ;;  %v3144_v1 = vsub.f32 1.0, %v3143_v59  ;;  %vm10402_vm13 = vcmp.eq.f32.partialorder %v3151_v28, 8.507059e+37 }
 0x25f   : > { %v6179_v25 = vpop.eup %6178  ;;  %v3127_v58 = vsel %vm10329_vm2, %v3126_v24, %v3122_v47  ;;  %v3136_v33 = vsel %vm10384_vm8, %v6175_v32, %v3132_v14  ;;  %v3165_v23 = vand.u32 2147483647, %v10337_v50  ;;  %v10413_v24 = vld [vmem:[%s6904_s24 + $0x410] sm:$0xff]  ;;  %v3154_v8 = vor.u32 1.1754944e-38, %v3153_v29 }
 0x260   : > { %5380 = vst [vmem:[%s7078_s17 + $0x3c0] sm:$0xff] %v5124_v20  ;;  %v5125_v60 = vmul.f32 %v3127_v58, %v10193_v49  ;;  %v3141_v54 = vsel %vm10367_vm7, %v3140_v6, %v3136_v33  ;;  %v3145_v46 = vmul.f32 %v6177_v52, %v3144_v1  ;;  %v3157_v9 = vmul.f32 %v6179_v25, %v10337_v50 }
 0x261   : > { %v5126_v21 = vmul.f32 %v3141_v54, %v10200_v17  ;;  %vm3161_vm15 = vweird.f32 %v10337_v50  ;;  %v3167_v49 = vand.u32 2147483648, %v10337_v50  ;;  %vm3162_vm1 = vweird.f32 %v6179_v25 }
 0x262   : > { %5381 = vst [vmem:[%s7078_s17 + $0x3c8] sm:$0xff] %v5125_v60  ;;  %v3146_v55 = vadd.f32 %v6177_v52, %v3145_v46  ;;  %v3158_v32 = vsub.f32 1.0, %v3157_v9  ;;  %v10427_v26 = vadd.f32 1.0, %v10326_v27  ;;  %vm10430_vm2 = vcmp.eq.f32.partialorder %v3165_v23, 8.507059e+37  ;;  %vm10449_vm4 = vmor %vm3161_vm15, %vm3162_vm1 }
 0x263   : > { %5382 = vst [vmem:[%s7078_s17 + $0x3d0] sm:$0xff] %v5126_v21  ;;  %v3179_v5 = vand.u32 2147483647, %v10352_v11  ;;  %6182 = vpow2.f32 %v10279_v48  ;;  %v526_v61 = vsub.f32 0.0, %v10413_v24  ;;  %v6181_v57 = vpop.eup %6180  ;;  %v910_v27 = vmul.f32 1.442695, %v525_v51 }
 0x264   : > { %v3150_v30 = vsel %vm10419_vm0, %v6177_v52, %v3146_v55  ;;  %v3159_v15 = vmul.f32 %v6179_v25, %v3158_v32  ;;  %6184 = vrcp.f32 %v10427_v26  ;;  %v3168_v3 = vor.u32 1.1754944e-38, %v3167_v49 }
 0x265   : > { %v3155_v53 = vsel %vm10402_vm13, %v3154_v8, %v3150_v30  ;;  %v3171_v44 = vmul.f32 %v6181_v57, %v10352_v11  ;;  %vm3175_vm3 = vweird.f32 %v10352_v11  ;;  %vm3176_vm6 = vweird.f32 %v6181_v57 }
 0x266   : > { %v5127_v38 = vmul.f32 %v3155_v53, %v10213_v62  ;;  %v3160_v51 = vadd.f32 %v6179_v25, %v3159_v15  ;;  %v3181_v45 = vand.u32 2147483648, %v10352_v11  ;;  %6186 = vpow2.f32 %v10289_v35  ;;  %vm10479_vm14 = vmor %vm3175_vm3, %vm3176_vm6 }
 0x267   : > { %v3172_v40 = vsub.f32 1.0, %v3171_v44  ;;  %v912_v50 = vmul.f32 1.442695, %v526_v61  ;;  %v527_v22 = vsub.f32 0.0, %v10443_v34  ;;  %vm10465_vm10 = vcmp.eq.f32.partialorder %v3179_v5, 8.507059e+37 }
 0x268   : > { %5383 = vst [vmem:[%s7078_s17 + $0x3d8] sm:$0xff] %v5127_v38  ;;  %v3164_v13 = vsel %vm10449_vm4, %v6179_v25, %v3160_v51  ;;  %v3193_v62 = vand.u32 2147483647, %v10427_v26  ;;  %6188 = vpow2.f32 %v910_v27  ;;  %v3182_v36 = vor.u32 1.1754944e-38, %v3181_v45  ;;  %v10643_v51 = vld [vmem:[%s6904_s24 + $0x440] sm:$0xff] }
 0x269   : > { %v6183_v16 = vpop.eup %6182  ;;  %v3169_v35 = vsel %vm10430_vm2, %v3168_v3, %v3164_v13  ;;  %v3173_v52 = vmul.f32 %v6181_v57, %v3172_v40  ;;  %6190 = vpow2.f32 %v912_v50  ;;  %v914_v19 = vmul.f32 1.442695, %v527_v22  ;;  %v10545_v40 = vld [vmem:[%s6904_s24 + $0x430] sm:$0xff] }
 0x26a   : > { %v6185_v37 = vpop.eup %6184  ;;  %v5128_v6 = vmul.f32 %v3169_v35, %v10224_v63  ;;  %v10483_v10 = vadd.f32 1.0, %v6183_v16  ;;  %v528_v7 = vsub.f32 0.0, %v10460_v42  ;;  %vm3189_vm5 = vweird.f32 %v10427_v26 }
 0x26b   : > { %v3174_v59 = vadd.f32 %v6181_v57, %v3173_v52  ;;  %v3185_v39 = vmul.f32 %v6185_v37, %v10427_v26  ;;  %v3195_v14 = vand.u32 2147483648, %v10427_v26  ;;  %vm3190_vm7 = vweird.f32 %v6185_v37 }
 0x26c   : > { %5384 = vst [vmem:[%s7078_s17 + $0x3e0] sm:$0xff] %v5128_v6  ;;  %vm10490_vm9 = vcmp.eq.f32.partialorder %v3193_v62, 8.507059e+37  ;;  %6192 = vrcp.f32 %v10483_v10  ;;  %v529_v11 = vsub.f32 0.0, %v10473_v2  ;;  %v6187_v29 = vpop.eup %6186  ;;  %v916_v1 = vmul.f32 1.442695, %v528_v7  ;;  %vm10510_vm8 = vmor %vm3189_vm5, %vm3190_vm7 }
 0x26d   : > { %v3178_v20 = vsel %vm10479_vm14, %v6181_v57, %v3174_v59  ;;  %v3186_v47 = vsub.f32 1.0, %v3185_v39  ;;  %6194 = vpow2.f32 %v914_v19  ;;  %v3207_v33 = vand.u32 2147483647, %v10483_v10 }
 0x26e   : > { %v6189_v25 = vpop.eup %6188  ;;  %v3183_v58 = vsel %vm10465_vm10, %v3182_v36, %v3178_v20  ;;  %v3209_v12 = vand.u32 2147483648, %v10483_v10  ;;  %v10502_v23 = vadd.f32 1.0, %v6187_v29  ;;  %6196 = vpow2.f32 %v916_v1 }
 0x26f   : > { %v6191_v60 = vpop.eup %6190  ;;  %v5129_v54 = vmul.f32 %v3183_v58, %v10231_v41  ;;  %v3187_v46 = vmul.f32 %v6185_v37, %v3186_v47  ;;  %v10505_v9 = vadd.f32 1.0, %v6189_v25  ;;  %v3196_v56 = vor.u32 1.1754944e-38, %v3195_v14  ;;  %v10694_v25 = vld [vmem:[%s6904_s24 + $0x468] sm:$0xff] }
 0x270   : > { %vm3203_vm11 = vweird.f32 %v10483_v10  ;;  %6198 = vrcp.f32 %v10502_v23  ;;  %v3223_v8 = vand.u32 2147483648, %v10502_v23  ;;  %v3221_v49 = vand.u32 2147483647, %v10502_v23 }
 0x271   : > { %5385 = vst [vmem:[%s7078_s17 + $0x3e8] sm:$0xff] %v5129_v54  ;;  %v3188_v41 = vadd.f32 %v6185_v37, %v3187_v46  ;;  %6200 = vrcp.f32 %v10505_v9  ;;  %v918_v55 = vmul.f32 1.442695, %v529_v11  ;;  %vm10520_vm12 = vcmp.eq.f32.partialorder %v3207_v33, 8.507059e+37 }
 0x272   : > { %v6193_v32 = vpop.eup %6192  ;;  %v3210_v17 = vor.u32 1.1754944e-38, %v3209_v12  ;;  %v3235_v5 = vand.u32 2147483647, %v10505_v9  ;;  %v10525_v61 = vadd.f32 1.0, %v6191_v60  ;;  %vm3217_vm13 = vweird.f32 %v10502_v23 }
 0x273   : > { %v6195_v57 = vpop.eup %6194  ;;  %v3192_v30 = vsel %vm10510_vm8, %v6185_v37, %v3188_v41  ;;  %v3199_v15 = vmul.f32 %v6193_v32, %v10483_v10  ;;  %v3237_v27 = vand.u32 2147483648, %v10505_v9  ;;  %v10534_v48 = vor.u32 1.1754944e-38, %v3223_v8 }
 0x274   : > { %v3197_v53 = vsel %vm10490_vm9, %v3196_v56, %v3192_v30  ;;  %vm3231_vm0 = vweird.f32 %v10505_v9  ;;  %6202 = vrcp.f32 %v10525_v61  ;;  %v6197_v3 = vpop.eup %6196  ;;  %vm3204_vm15 = vweird.f32 %v6193_v32 }
 0x275   : > { %v5130_v44 = vmul.f32 %v3197_v53, %v10239_v0  ;;  %v3200_v38 = vsub.f32 1.0, %v3199_v15  ;;  %vm10539_vm1 = vcmp.eq.f32.partialorder %v3221_v49, 8.507059e+37  ;;  %v3249_v45 = vand.u32 2147483647, %v10525_v61  ;;  %vm10562_vm3 = vmor %vm3203_vm11, %vm3204_vm15 }
 0x276   : > { %v6199_v50 = vpop.eup %6198  ;;  %vm10547_vm2 = vcmp.eq.f32.partialorder %v3235_v5, 8.507059e+37  ;;  %v3251_v13 = vand.u32 2147483648, %v10525_v61  ;;  %v10552_v4 = vadd.f32 1.0, %v6195_v57  ;;  %v10554_v0 = vadd.f32 1.0, %v6197_v3  ;;  %v10722_v5 = vld [vmem:[%s6904_s24 + $0x478] sm:$0xff] }
 0x277   : > { %6204 = vpow2.f32 %v918_v55  ;;  %v6201_v62 = vpop.eup %6200  ;;  %5386 = vst [vmem:[%s7078_s17 + $0x3f0] sm:$0xff] %v5130_v44  ;;  %v3201_v16 = vmul.f32 %v6193_v32, %v3200_v38  ;;  %v3213_v35 = vmul.f32 %v6199_v50, %v10502_v23  ;;  %v3238_v52 = vor.u32 1.1754944e-38, %v3237_v27 }
 0x278   : > { %vm3245_vm4 = vweird.f32 %v10525_v61  ;;  %vm3218_vm6 = vweird.f32 %v6199_v50  ;;  %v3227_v37 = vmul.f32 %v6201_v62, %v10505_v9  ;;  %6206 = vrcp.f32 %v10552_v4 }
 0x279   : > { %v530_v6 = vsub.f32 0.0, %v10545_v40  ;;  %v3202_v28 = vadd.f32 %v6193_v32, %v3201_v16  ;;  %v3214_v36 = vsub.f32 1.0, %v3213_v35  ;;  %vm3232_vm10 = vweird.f32 %v6201_v62  ;;  %vm10585_vm7 = vmor %vm3217_vm13, %vm3218_vm6  ;;  %v10663_v16 = vld [vmem:[%s6904_s24 + $0x458] sm:$0xff] }
 0x27a   : > { %vm10569_vm14 = vcmp.eq.f32.partialorder %v3249_v45, 8.507059e+37  ;;  %v3263_v10 = vand.u32 2147483647, %v10552_v4  ;;  %v6203_v59 = vpop.eup %6202  ;;  %v3228_v39 = vsub.f32 1.0, %v3227_v37  ;;  %v3252_v14 = vor.u32 1.1754944e-38, %v3251_v13  ;;  %vm10594_vm11 = vmor %vm3231_vm0, %vm3232_vm10  ;;  %v10646_v45 = vld [vmem:[%s6904_s24 + $0x448] sm:$0xff] }
 0x27b   : > { %v3265_v63 = vand.u32 2147483648, %v10552_v4  ;;  %6208 = vrcp.f32 %v10554_v0  ;;  %v3206_v11 = vsel %vm10562_vm3, %v6193_v32, %v3202_v28  ;;  %v3215_v29 = vmul.f32 %v6199_v50, %v3214_v36 }
 0x27c   : > { %v3241_v20 = vmul.f32 %v6203_v59, %v10525_v61  ;;  %vm3259_vm5 = vweird.f32 %v10552_v4  ;;  %v3211_v1 = vsel %vm10520_vm12, %v3210_v17, %v3206_v11  ;;  %v3229_v58 = vmul.f32 %v6201_v62, %v3228_v39 }
 0x27d   : > { %v6205_v47 = vpop.eup %6204  ;;  %vm3246_vm9 = vweird.f32 %v6203_v59  ;;  %vm3273_vm8 = vweird.f32 %v10554_v0  ;;  %v5131_v33 = vmul.f32 %v3211_v1, %v10243_v31  ;;  %v3216_v12 = vadd.f32 %v6199_v50, %v3215_v29  ;;  %v10691_v1 = vld [vmem:[%s6904_s24 + $0x460] sm:$0xff] }
 0x27e   : > { %v3242_v54 = vsub.f32 1.0, %v3241_v20  ;;  %vm10598_vm12 = vcmp.eq.f32.partialorder %v3263_v10, 8.507059e+37  ;;  %v6207_v46 = vpop.eup %6206  ;;  %v3230_v21 = vadd.f32 %v6201_v62, %v3229_v58  ;;  %v3266_v56 = vor.u32 1.1754944e-38, %v3265_v63  ;;  %vm10620_vm13 = vmor %vm3245_vm4, %vm3246_vm9 }
 0x27f   : > { %v3277_v8 = vand.u32 2147483647, %v10554_v0  ;;  %v10603_v41 = vadd.f32 1.0, %v6205_v47  ;;  %5387 = vst [vmem:[%s7078_s17 + $0x3f8] sm:$0xff] %v5131_v33  ;;  %v3220_v31 = vsel %vm10585_vm7, %v6199_v50, %v3216_v12  ;;  %v3255_v49 = vmul.f32 %v6207_v46, %v10552_v4 }
 0x280   : > { %v3243_v9 = vmul.f32 %v6203_v59, %v3242_v54  ;;  %v3279_v55 = vand.u32 2147483648, %v10554_v0  ;;  %v3225_v26 = vsel %vm10539_vm1, %v10534_v48, %v3220_v31  ;;  %v3234_v17 = vsel %vm10594_vm11, %v6201_v62, %v3230_v21  ;;  %v10660_v62 = vld [vmem:[%s6904_s24 + $0x450] sm:$0xff] }
 0x281   : > { %v10610_v32 = vpop.eup %6208  ;;  %vm3260_vm0 = vweird.f32 %v6207_v46  ;;  %v920_v57 = vmul.f32 1.442695, %v530_v6  ;;  %v5132_v30 = vmul.f32 %v3225_v26, %v10249_v18  ;;  %v3239_v15 = vsel %vm10547_vm2, %v3238_v52, %v3234_v17  ;;  %v10636_v18 = vld [vmem:[%s6904_s24 + $0x438] sm:$0xff] }
 0x282   : > { %v3244_v27 = vadd.f32 %v6203_v59, %v3243_v9  ;;  %v3256_v53 = vsub.f32 1.0, %v3255_v49  ;;  %v5133_v48 = vmul.f32 %v3239_v15, %v10292_v43  ;;  %v3269_v61 = vmul.f32 %v10610_v32, %v10554_v0  ;;  %vm10654_vm2 = vmor %vm3259_vm5, %vm3260_vm0  ;;  %v10709_v9 = vld [vmem:[%s6904_s24 + $0x470] sm:$0xff] }
 0x283   : > { %vm10630_vm15 = vcmp.eq.f32.partialorder %v3277_v8, 8.507059e+37  ;;  %6210 = vrcp.f32 %v10603_v41  ;;  %5388 = vst [vmem:[%s7078_s17 + $0x400] sm:$0xff] %v5132_v30  ;;  %vm3274_vm1 = vweird.f32 %v10610_v32  ;;  %v3280_v43 = vor.u32 1.1754944e-38, %v3279_v55 }
 0x284   : > { %v3248_v44 = vsel %vm10620_vm13, %v6203_v59, %v3244_v27  ;;  %v3257_v38 = vmul.f32 %v6207_v46, %v3256_v53  ;;  %5389 = vst [vmem:[%s7078_s17 + $0x408] sm:$0xff] %v5133_v48  ;;  %v3270_v13 = vsub.f32 1.0, %v3269_v61  ;;  %vm3287_vm4 = vweird.f32 %v10603_v41  ;;  %vm10679_vm3 = vmor %vm3273_vm8, %vm3274_vm1  ;;  %v10733_v61 = vld [vmem:[%s6904_s24 + $0x480] sm:$0xff] }
 0x285   : > { %v3253_v50 = vsel %vm10569_vm14, %v3252_v14, %v3248_v44  ;;  %6212 = vpow2.f32 %v920_v57  ;;  %v3291_v19 = vand.u32 2147483647, %v10603_v41  ;;  %v531_v37 = vsub.f32 0.0, %v10636_v18 }
 0x286   : > { %v5134_v35 = vmul.f32 %v3253_v50, %v10413_v24  ;;  %v3258_v52 = vadd.f32 %v6207_v46, %v3257_v38  ;;  %v3271_v4 = vmul.f32 %v10610_v32, %v3270_v13  ;;  %v3293_v6 = vand.u32 2147483648, %v10603_v41 }
 0x287   : > { %v532_v28 = vsub.f32 0.0, %v10643_v51  ;;  %v533_v36 = vsub.f32 0.0, %v10646_v45  ;;  %v922_v10 = vmul.f32 1.442695, %v531_v37  ;;  %v534_v59 = vsub.f32 0.0, %v10660_v62 }
 0x288   : > { %5390 = vst [vmem:[%s7078_s17 + $0x410] sm:$0xff] %v5134_v35  ;;  %v3262_v7 = vsel %vm10654_vm2, %v6207_v46, %v3258_v52  ;;  %v535_v39 = vsub.f32 0.0, %v10663_v16  ;;  %v3272_v11 = vadd.f32 %v10610_v32, %v3271_v4  ;;  %v536_v21 = vsub.f32 0.0, %v10691_v1 }
 0x289   : > { %v6211_v14 = vpop.eup %6210  ;;  %v3267_v63 = vsel %vm10598_vm12, %v3266_v56, %v3262_v7  ;;  %v924_v29 = vmul.f32 1.442695, %v532_v28  ;;  %v926_v20 = vmul.f32 1.442695, %v533_v36  ;;  %6214 = vpow2.f32 %v922_v10 }
 0x28a   : > { %v5135_v0 = vmul.f32 %v3267_v63, %v10443_v34  ;;  %v3283_v47 = vmul.f32 %v6211_v14, %v10603_v41  ;;  %vm3288_vm6 = vweird.f32 %v6211_v14  ;;  %v3276_v33 = vsel %vm10679_vm3, %v10610_v32, %v3272_v11 }
 0x28b   : > { %v6213_v58 = vpop.eup %6212  ;;  %6216 = vpow2.f32 %v924_v29  ;;  %v928_v12 = vmul.f32 1.442695, %v534_v59  ;;  %v930_v60 = vmul.f32 1.442695, %v535_v39  ;;  %v3281_v34 = vsel %vm10630_vm15, %v3280_v43, %v3276_v33  ;;  %vm10715_vm10 = vmor %vm3287_vm4, %vm3288_vm6 }
 0x28c   : > { %5391 = vst [vmem:[%s7078_s17 + $0x418] sm:$0xff] %v5135_v0  ;;  %v3284_v54 = vsub.f32 1.0, %v3283_v47  ;;  %v10702_v23 = vadd.f32 1.0, %v6213_v58  ;;  %6218 = vpow2.f32 %v926_v20  ;;  %v5136_v46 = vmul.f32 %v3281_v34, %v10460_v42 }
 0x28d   : > { %6220 = vpow2.f32 %v928_v12  ;;  %v537_v56 = vsub.f32 0.0, %v10694_v25  ;;  %v3294_v31 = vor.u32 1.1754944e-38, %v3293_v6  ;;  %v932_v32 = vmul.f32 1.442695, %v536_v21 }
 0x28e   : > { %v3285_v8 = vmul.f32 %v6211_v14, %v3284_v54  ;;  %6222 = vrcp.f32 %v10702_v23  ;;  %5392 = vst [vmem:[%s7078_s17 + $0x420] sm:$0xff] %v5136_v46  ;;  %v3305_v42 = vand.u32 2147483647, %v10702_v23  ;;  %v3307_v55 = vand.u32 2147483648, %v10702_v23 }
 0x28f   : > { %6224 = vpow2.f32 %v930_v60  ;;  %v6215_v26 = vpop.eup %6214  ;;  %vm3292_vm14 = vcmp.eq.f32.partialorder %v3291_v19, 8.507059e+37  ;;  %vm3301_vm5 = vweird.f32 %v10702_v23  ;;  %v934_v30 = vmul.f32 1.442695, %v537_v56 }
 0x290   : > { %v3286_v17 = vadd.f32 %v6211_v14, %v3285_v8  ;;  %v10725_v41 = vadd.f32 1.0, %v6215_v26  ;;  %6226 = vpow2.f32 %v932_v32  ;;  %v538_v48 = vsub.f32 0.0, %v10709_v9 }
 0x291   : > { %v6217_v57 = vpop.eup %6216  ;;  %vm10735_vm7 = vcmp.eq.f32.partialorder %v3305_v42, 8.507059e+37  ;;  %v3308_v43 = vor.u32 1.1754944e-38, %v3307_v55  ;;  %v539_v50 = vsub.f32 0.0, %v10722_v5  ;;  %v540_v6 = vsub.f32 0.0, %v10733_v61 }
 0x292   : > { %v6219_v15 = vpop.eup %6218  ;;  %v3290_v27 = vsel %vm10715_vm10, %v6211_v14, %v3286_v17  ;;  %v10729_v53 = vadd.f32 1.0, %v6217_v57  ;;  %6228 = vrcp.f32 %v10725_v41  ;;  %v3319_v35 = vand.u32 2147483647, %v10725_v41 }
 0x293   : > { %v6221_v3 = vpop.eup %6220  ;;  %v3295_v44 = vsel %vm3292_vm14, %v3294_v31, %v3290_v27  ;;  %v3321_v52 = vand.u32 2147483648, %v10725_v41  ;;  %v10750_v36 = vadd.f32 1.0, %v6219_v15  ;;  %v936_v7 = vmul.f32 1.442695, %v538_v48 }
 0x294   : > { %v6223_v22 = vpop.eup %6222  ;;  %v5137_v13 = vmul.f32 %v3295_v44, %v10473_v2  ;;  %6230 = vrcp.f32 %v10729_v53  ;;  %v3333_v4 = vand.u32 2147483647, %v10729_v53  ;;  %v3335_v28 = vand.u32 2147483648, %v10729_v53 }
 0x295   : > { %v6225_v19 = vpop.eup %6224  ;;  %v3297_v37 = vmul.f32 %v6223_v22, %v10702_v23  ;;  %6232 = vpow2.f32 %v934_v30  ;;  %v10752_v2 = vadd.f32 1.0, %v6221_v3  ;;  %vm3302_vm9 = vweird.f32 %v6223_v22  ;;  %v10902_v30 = vld [vmem:[%s6904_s24 + $0x498] sm:$0xff] }
 0x296   : > { %5393 = vst [vmem:[%s7078_s17 + $0x428] sm:$0xff] %v5137_v13  ;;  %vm3315_vm8 = vweird.f32 %v10725_v41  ;;  %vm3329_vm11 = vweird.f32 %v10729_v53  ;;  %v6227_v10 = vpop.eup %6226  ;;  %vm10756_vm12 = vcmp.eq.f32.partialorder %v3319_v35, 8.507059e+37  ;;  %v3322_v39 = vor.u32 1.1754944e-38, %v3321_v52  ;;  %vm10773_vm0 = vmor %vm3301_vm5, %vm3302_vm9 }
 0x297   : > { %v3298_v24 = vsub.f32 1.0, %v3297_v37  ;;  %6234 = vrcp.f32 %v10750_v36  ;;  %v10761_v14 = vadd.f32 1.0, %v6225_v19  ;;  %vm10763_vm13 = vcmp.eq.f32.partialorder %v3333_v4, 8.507059e+37 }
 0x298   : > { %v6229_v63 = vpop.eup %6228  ;;  %v3347_v20 = vand.u32 2147483647, %v10750_v36  ;;  %v3349_v0 = vand.u32 2147483648, %v10750_v36  ;;  %6236 = vrcp.f32 %v10752_v2  ;;  %v3336_v12 = vor.u32 1.1754944e-38, %v3335_v28 }
 0x299   : > { %v3299_v11 = vmul.f32 %v6223_v22, %v3298_v24  ;;  %v3311_v33 = vmul.f32 %v6229_v63, %v10725_v41  ;;  %v3361_v60 = vand.u32 2147483647, %v10752_v2  ;;  %6238 = vpow2.f32 %v936_v7 }
 0x29a   : > { %v6231_v47 = vpop.eup %6230  ;;  %vm3343_vm15 = vweird.f32 %v10750_v36  ;;  %vm3357_vm1 = vweird.f32 %v10752_v2  ;;  %vm3316_vm2 = vweird.f32 %v6229_v63  ;;  %v3363_v23 = vand.u32 2147483648, %v10752_v2 }
 0x29b   : > { %v6233_v34 = vpop.eup %6232  ;;  %v3300_v54 = vadd.f32 %v6223_v22, %v3299_v11  ;;  %v3325_v46 = vmul.f32 %v6231_v47, %v10729_v53  ;;  %v3312_v21 = vsub.f32 1.0, %v3311_v33  ;;  %6240 = vrcp.f32 %v10761_v14  ;;  %vm10801_vm14 = vmor %vm3315_vm8, %vm3316_vm2 }
 0x29c   : > { %vm3330_vm4 = vweird.f32 %v6231_v47  ;;  %vm10786_vm3 = vcmp.eq.f32.partialorder %v3347_v20, 8.507059e+37  ;;  %v3350_v49 = vor.u32 1.1754944e-38, %v3349_v0  ;;  %vm10792_vm6 = vcmp.eq.f32.partialorder %v3361_v60, 8.507059e+37 }
 0x29d   : > { %v3304_v56 = vsel %vm10773_vm0, %v6223_v22, %v3300_v54  ;;  %v3326_v8 = vsub.f32 1.0, %v3325_v46  ;;  %v6235_v42 = vpop.eup %6234  ;;  %v3313_v32 = vmul.f32 %v6229_v63, %v3312_v21  ;;  %vm3371_vm10 = vweird.f32 %v10761_v14  ;;  %vm10810_vm5 = vmor %vm3329_vm11, %vm3330_vm4 }
 0x29e   : > { %v3309_v55 = vsel %vm10735_vm7, %v3308_v43, %v3304_v56  ;;  %v6237_v17 = vpop.eup %6236  ;;  %v3339_v27 = vmul.f32 %v6235_v42, %v10750_v36  ;;  %v3375_v48 = vand.u32 2147483647, %v10761_v14  ;;  %v3364_v41 = vor.u32 1.1754944e-38, %v3363_v23 }
 0x29f   : > { %v5138_v57 = vmul.f32 %v3309_v55, %v10545_v40  ;;  %v3327_v15 = vmul.f32 %v6231_v47, %v3326_v8  ;;  %v6239_v3 = vpop.eup %6238  ;;  %v3314_v44 = vadd.f32 %v6229_v63, %v3313_v32  ;;  %v3353_v40 = vmul.f32 %v6237_v17, %v10752_v2 }
 0x2a0   : > { %v3377_v43 = vand.u32 2147483648, %v10761_v14  ;;  %v3340_v13 = vsub.f32 1.0, %v3339_v27  ;;  %vm3344_vm7 = vweird.f32 %v6235_v42  ;;  %v10817_v35 = vadd.f32 1.0, %v6227_v10 }
 0x2a1   : > { %5394 = vst [vmem:[%s7078_s17 + $0x430] sm:$0xff] %v5138_v57  ;;  %v3328_v22 = vadd.f32 %v6231_v47, %v3327_v15  ;;  %v6241_v52 = vpop.eup %6240  ;;  %v3318_v19 = vsel %vm10801_vm14, %v6229_v63, %v3314_v44  ;;  %v3354_v53 = vsub.f32 1.0, %v3353_v40  ;;  %vm3358_vm9 = vweird.f32 %v6237_v17  ;;  %vm10833_vm8 = vmor %vm3343_vm15, %vm3344_vm7  ;;  %v10899_v57 = vld [vmem:[%s6904_s24 + $0x490] sm:$0xff]  ;;  %v10909_v44 = vld [vmem:[%s6904_s24 + $0x4a0] sm:$0xff] }
 0x2a2   : > { %v10821_v37 = vadd.f32 1.0, %v6233_v34  ;;  %v3323_v4 = vsel %vm10756_vm12, %v3322_v39, %v3318_v19  ;;  %v3341_v7 = vmul.f32 %v6235_v42, %v3340_v13  ;;  %v3367_v24 = vmul.f32 %v6241_v52, %v10761_v14  ;;  %vm10840_vm12 = vmor %vm3357_vm1, %vm3358_vm9  ;;  %v10970_v14 = vld [vmem:[%s6904_s24 + $0x4b0] sm:$0xff] }
 0x2a3   : > { %v3332_v28 = vsel %vm10810_vm5, %v6231_v47, %v3328_v22  ;;  %v5139_v10 = vmul.f32 %v3323_v4, %v10636_v18  ;;  %v3355_v59 = vmul.f32 %v6237_v17, %v3354_v53  ;;  %vm3372_vm11 = vweird.f32 %v6241_v52  ;;  %v10920_v53 = vld [vmem:[%s6904_s24 + $0x4a8] sm:$0xff] }
 0x2a4   : > { %v3337_v63 = vsel %vm10763_vm13, %v3336_v12, %v3332_v28  ;;  %v3342_v20 = vadd.f32 %v6235_v42, %v3341_v7  ;;  %v3368_v18 = vsub.f32 1.0, %v3367_v24  ;;  %6242 = vrcp.f32 %v10817_v35  ;;  %vm10865_vm0 = vmor %vm3371_vm10, %vm3372_vm11 }
 0x2a5   : > { %v5140_v39 = vmul.f32 %v3337_v63, %v10643_v51  ;;  %5395 = vst [vmem:[%s7078_s17 + $0x438] sm:$0xff] %v5139_v10  ;;  %v3356_v36 = vadd.f32 %v6237_v17, %v3355_v59  ;;  %vm10846_vm13 = vcmp.eq.f32.partialorder %v3375_v48, 8.507059e+37  ;;  %v3389_v47 = vand.u32 2147483647, %v10817_v35 }
 0x2a6   : > { %v10851_v58 = vadd.f32 1.0, %v6239_v3  ;;  %v3346_v51 = vsel %vm10833_vm8, %v6235_v42, %v3342_v20  ;;  %v3369_v2 = vmul.f32 %v6241_v52, %v3368_v18  ;;  %v3391_v33 = vand.u32 2147483648, %v10817_v35 }
 0x2a7   : > { %5396 = vst [vmem:[%s7078_s17 + $0x440] sm:$0xff] %v5140_v39  ;;  %6244 = vrcp.f32 %v10821_v37  ;;  %v3351_v12 = vsel %vm10786_vm3, %v3350_v49, %v3346_v51  ;;  %v3360_v60 = vsel %vm10840_vm12, %v6237_v17, %v3356_v36  ;;  %v3378_v54 = vor.u32 1.1754944e-38, %v3377_v43 }
 0x2a8   : > { %vm3385_vm15 = vweird.f32 %v10817_v35  ;;  %v5141_v46 = vmul.f32 %v3351_v12, %v10646_v45  ;;  %v3365_v21 = vsel %vm10792_vm6, %v3364_v41, %v3360_v60  ;;  %v3370_v23 = vadd.f32 %v6241_v52, %v3369_v2 }
 0x2a9   : > { %v3403_v56 = vand.u32 2147483647, %v10821_v37  ;;  %v5142_v8 = vmul.f32 %v3365_v21, %v10660_v62  ;;  %vm10875_vm1 = vcmp.eq.f32.partialorder %v3389_v47, 8.507059e+37  ;;  %vm3399_vm2 = vweird.f32 %v10821_v37  ;;  %v10887_v62 = vld [vmem:[%s6904_s24 + $0x488] sm:$0xff] }
 0x2aa   : > { %6246 = vrcp.f32 %v10851_v58  ;;  %v6243_v31 = vpop.eup %6242  ;;  %5397 = vst [vmem:[%s7078_s17 + $0x448] sm:$0xff] %v5141_v46  ;;  %v3374_v45 = vsel %vm10865_vm0, %v6241_v52, %v3370_v23  ;;  %v3392_v49 = vor.u32 1.1754944e-38, %v3391_v33  ;;  %v3405_v42 = vand.u32 2147483648, %v10821_v37 }
 0x2ab   : > { %vm3413_vm4 = vweird.f32 %v10851_v58  ;;  %5398 = vst [vmem:[%s7078_s17 + $0x450] sm:$0xff] %v5142_v8  ;;  %v3379_v55 = vsel %vm10846_vm13, %v3378_v54, %v3374_v45  ;;  %v3381_v32 = vmul.f32 %v6243_v31, %v10817_v35  ;;  %vm10893_vm3 = vcmp.eq.f32.partialorder %v3403_v56, 8.507059e+37 }
 0x2ac   : > { %v3417_v17 = vand.u32 2147483647, %v10851_v58  ;;  %v5143_v27 = vmul.f32 %v3379_v55, %v10663_v16  ;;  %vm3386_vm6 = vweird.f32 %v6243_v31  ;;  %v3419_v48 = vand.u32 2147483648, %v10851_v58 }
 0x2ad   : > { %v6245_v15 = vpop.eup %6244  ;;  %v938_v3 = vmul.f32 1.442695, %v539_v50  ;;  %v3382_v38 = vsub.f32 1.0, %v3381_v32  ;;  %v940_v41 = vmul.f32 1.442695, %v540_v6  ;;  %v541_v16 = vsub.f32 0.0, %v10887_v62  ;;  %vm10925_vm14 = vmor %vm3385_vm15, %vm3386_vm6 }
 0x2ae   : > { %v3395_v40 = vmul.f32 %v6245_v15, %v10821_v37  ;;  %vm3400_vm10 = vweird.f32 %v6245_v15  ;;  %5399 = vst [vmem:[%s7078_s17 + $0x458] sm:$0xff] %v5143_v27  ;;  %v542_v43 = vsub.f32 0.0, %v10899_v57  ;;  %v543_v22 = vsub.f32 0.0, %v10902_v30 }
 0x2af   : > { %6248 = vpow2.f32 %v938_v3  ;;  %v3383_v50 = vmul.f32 %v6243_v31, %v3382_v38  ;;  %v544_v19 = vsub.f32 0.0, %v10909_v44  ;;  %v3406_v4 = vor.u32 1.1754944e-38, %v3405_v42  ;;  %vm10933_vm7 = vmor %vm3399_vm2, %vm3400_vm10 }
 0x2b0   : > { %v6247_v13 = vpop.eup %6246  ;;  %v3396_v52 = vsub.f32 1.0, %v3395_v40  ;;  %6250 = vpow2.f32 %v940_v41  ;;  %v942_v7 = vmul.f32 1.442695, %v541_v16  ;;  %v944_v24 = vmul.f32 1.442695, %v542_v43 }
 0x2b1   : > { %v3409_v28 = vmul.f32 %v6247_v13, %v10851_v58  ;;  %v3384_v10 = vadd.f32 %v6243_v31, %v3383_v50  ;;  %vm3414_vm5 = vweird.f32 %v6247_v13  ;;  %v946_v11 = vmul.f32 1.442695, %v543_v22 }
 0x2b2   : > { %v3397_v63 = vmul.f32 %v6245_v15, %v3396_v52  ;;  %6252 = vpow2.f32 %v942_v7  ;;  %v948_v39 = vmul.f32 1.442695, %v544_v19  ;;  %v545_v20 = vsub.f32 0.0, %v10920_v53  ;;  %vm10952_vm8 = vmor %vm3413_vm4, %vm3414_vm5 }
 0x2b3   : > { %v3410_v35 = vsub.f32 1.0, %v3409_v28  ;;  %v3388_v0 = vsel %vm10925_vm14, %v6243_v31, %v3384_v10  ;;  %vm10940_vm9 = vcmp.eq.f32.partialorder %v3417_v17, 8.507059e+37  ;;  %6254 = vpow2.f32 %v944_v24  ;;  %v10973_v31 = vld [vmem:[%s6904_s24 + $0x4b8] sm:$0xff] }
 0x2b4   : > { %v3398_v18 = vadd.f32 %v6245_v15, %v3397_v63  ;;  %v3393_v29 = vsel %vm10875_vm1, %v3392_v49, %v3388_v0  ;;  %v3420_v51 = vor.u32 1.1754944e-38, %v3419_v48  ;;  %6256 = vpow2.f32 %v946_v11 }
 0x2b5   : > { %v6249_v37 = vpop.eup %6248  ;;  %v3411_v47 = vmul.f32 %v6247_v13, %v3410_v35  ;;  %v5144_v33 = vmul.f32 %v3393_v29, %v10691_v1  ;;  %v950_v54 = vmul.f32 1.442695, %v545_v20  ;;  %6258 = vpow2.f32 %v948_v39 }
 0x2b6   : > { %v6251_v2 = vpop.eup %6250  ;;  %v3402_v12 = vsel %vm10933_vm7, %v6245_v15, %v3398_v18  ;;  %v10956_v34 = vadd.f32 1.0, %v6249_v37  ;;  %v546_v27 = vsub.f32 0.0, %v10970_v14  ;;  %v547_v48 = vsub.f32 0.0, %v10973_v31 }
 0x2b7   : > { %v3407_v46 = vsel %vm10893_vm3, %v3406_v4, %v3402_v12  ;;  %v3412_v1 = vadd.f32 %v6247_v13, %v3411_v47  ;;  %v10960_v21 = vadd.f32 1.0, %v6251_v2  ;;  %5400 = vst [vmem:[%s7078_s17 + $0x460] sm:$0xff] %v5144_v33 }
 0x2b8   : > { %v5145_v23 = vmul.f32 %v3407_v46, %v10694_v25  ;;  %6260 = vrcp.f32 %v10956_v34  ;;  %v6253_v58 = vpop.eup %6252  ;;  %v3431_v8 = vand.u32 2147483647, %v10956_v34  ;;  %v3433_v49 = vand.u32 2147483648, %v10956_v34 }
 0x2b9   : > { %v3416_v56 = vsel %vm10952_vm8, %v6247_v13, %v3412_v1  ;;  %6262 = vrcp.f32 %v10960_v21  ;;  %v6255_v45 = vpop.eup %6254  ;;  %v3445_v42 = vand.u32 2147483647, %v10960_v21  ;;  %v3447_v26 = vand.u32 2147483648, %v10960_v21 }
 0x2ba   : > { %5401 = vst [vmem:[%s7078_s17 + $0x468] sm:$0xff] %v5145_v23  ;;  %v3421_v25 = vsel %vm10940_vm9, %v3420_v51, %v3416_v56  ;;  %6264 = vpow2.f32 %v950_v54  ;;  %v6257_v55 = vpop.eup %6256  ;;  %v10982_v17 = vadd.f32 1.0, %v6253_v58  ;;  %v10984_v15 = vadd.f32 1.0, %v6255_v45 }
 0x2bb   : > { %v5146_v32 = vmul.f32 %v3421_v25, %v10709_v9  ;;  %vm3427_vm11 = vweird.f32 %v10956_v34  ;;  %vm3441_vm12 = vweird.f32 %v10960_v21  ;;  %v6259_v3 = vpop.eup %6258  ;;  %vm10991_vm13 = vcmp.eq.f32.partialorder %v3431_v8, 8.507059e+37 }
 0x2bc   : > { %6266 = vrcp.f32 %v10982_v17  ;;  %v3461_v9 = vand.u32 2147483648, %v10982_v17  ;;  %v10997_v40 = vadd.f32 1.0, %v6257_v55  ;;  %v3434_v16 = vor.u32 1.1754944e-38, %v3433_v49 }
 0x2bd   : > { %5402 = vst [vmem:[%s7078_s17 + $0x470] sm:$0xff] %v5146_v32  ;;  %vm10999_vm0 = vcmp.eq.f32.partialorder %v3445_v42, 8.507059e+37  ;;  %v3459_v22 = vand.u32 2147483647, %v10982_v17  ;;  %6268 = vrcp.f32 %v10984_v15  ;;  %v3448_v52 = vor.u32 1.1754944e-38, %v3447_v26 }
 0x2be   : > { %v6261_v41 = vpop.eup %6260  ;;  %v3473_v19 = vand.u32 2147483647, %v10984_v15  ;;  %v3475_v6 = vand.u32 2147483648, %v10984_v15  ;;  %vm3455_vm15 = vweird.f32 %v10982_v17  ;;  %vm3469_vm1 = vweird.f32 %v10984_v15 }
 0x2bf   : > { %v6263_v13 = vpop.eup %6262  ;;  %v3423_v50 = vmul.f32 %v6261_v41, %v10956_v34  ;;  %v952_v7 = vmul.f32 1.442695, %v546_v27  ;;  %vm3428_vm2 = vweird.f32 %v6261_v41  ;;  %v3462_v10 = vor.u32 1.1754944e-38, %v3461_v9 }
 0x2c0   : > { %v6265_v4 = vpop.eup %6264  ;;  %v3437_v28 = vmul.f32 %v6263_v13, %v10960_v21  ;;  %6270 = vrcp.f32 %v10997_v40  ;;  %vm3442_vm4 = vweird.f32 %v6263_v13  ;;  %vm11012_vm3 = vcmp.eq.f32.partialorder %v3459_v22, 8.507059e+37  ;;  %vm11029_vm14 = vmor %vm3427_vm11, %vm3428_vm2 }
 0x2c1   : > { %v3424_v24 = vsub.f32 1.0, %v3423_v50  ;;  %v3487_v59 = vand.u32 2147483647, %v10997_v40  ;;  %v11017_v35 = vadd.f32 1.0, %v6259_v3  ;;  %vm11019_vm6 = vcmp.eq.f32.partialorder %v3473_v19, 8.507059e+37  ;;  %vm11038_vm5 = vmor %vm3441_vm12, %vm3442_vm4 }
 0x2c2   : > { %v3438_v63 = vsub.f32 1.0, %v3437_v28  ;;  %v6267_v39 = vpop.eup %6266  ;;  %v3476_v18 = vor.u32 1.1754944e-38, %v3475_v6  ;;  %vm3483_vm10 = vweird.f32 %v10997_v40  ;;  %v11024_v36 = vadd.f32 1.0, %v6265_v4 }
 0x2c3   : > { %v3425_v20 = vmul.f32 %v6261_v41, %v3424_v24  ;;  %v6269_v37 = vpop.eup %6268  ;;  %v3451_v51 = vmul.f32 %v6267_v39, %v10982_v17  ;;  %v3489_v2 = vand.u32 2147483648, %v10997_v40  ;;  %6272 = vpow2.f32 %v952_v7 }
 0x2c4   : > { %v3439_v47 = vmul.f32 %v6263_v13, %v3438_v63  ;;  %v3465_v60 = vmul.f32 %v6269_v37, %v10984_v15  ;;  %6274 = vrcp.f32 %v11017_v35  ;;  %v954_v34 = vmul.f32 1.442695, %v547_v48  ;;  %v11101_v63 = vld [vmem:[%s6904_s24 + $0x4c8] sm:$0xff] }
 0x2c5   : > { %v3426_v33 = vadd.f32 %v6261_v41, %v3425_v20  ;;  %v3452_v46 = vsub.f32 1.0, %v3451_v51  ;;  %vm3456_vm7 = vweird.f32 %v6267_v39  ;;  %vm3470_vm9 = vweird.f32 %v6269_v37  ;;  %v11127_v51 = vld [vmem:[%s6904_s24 + $0x4d8] sm:$0xff] }
 0x2c6   : > { %v3440_v54 = vadd.f32 %v6263_v13, %v3439_v47  ;;  %vm11044_vm8 = vcmp.eq.f32.partialorder %v3487_v59, 8.507059e+37  ;;  %v6271_v23 = vpop.eup %6270  ;;  %v3466_v58 = vsub.f32 1.0, %v3465_v60  ;;  %v3503_v56 = vand.u32 2147483648, %v11017_v35  ;;  %vm11062_vm11 = vmor %vm3455_vm15, %vm3456_vm7  ;;  %v11124_v47 = vld [vmem:[%s6904_s24 + $0x4d0] sm:$0xff] }
 0x2c7   : > { %v3430_v21 = vsel %vm11029_vm14, %v6261_v41, %v3426_v33  ;;  %6276 = vrcp.f32 %v11024_v36  ;;  %v3453_v25 = vmul.f32 %v6267_v39, %v3452_v46  ;;  %v3479_v49 = vmul.f32 %v6271_v23, %v10997_v40  ;;  %vm11070_vm12 = vmor %vm3469_vm1, %vm3470_vm9 }
 0x2c8   : > { %v3435_v8 = vsel %vm10991_vm13, %v3434_v16, %v3430_v21  ;;  %v3444_v45 = vsel %vm11038_vm5, %v6263_v13, %v3440_v54  ;;  %v3467_v26 = vmul.f32 %v6269_v37, %v3466_v58  ;;  %v3490_v27 = vor.u32 1.1754944e-38, %v3489_v2 }
 0x2c9   : > { %v5147_v42 = vmul.f32 %v3435_v8, %v10722_v5  ;;  %v3449_v55 = vsel %vm10999_vm0, %v3448_v52, %v3444_v45  ;;  %v6273_v48 = vpop.eup %6272  ;;  %v3454_v38 = vadd.f32 %v6267_v39, %v3453_v25  ;;  %v3480_v9 = vsub.f32 1.0, %v3479_v49  ;;  %v11148_v8 = vld [vmem:[%s6904_s24 + $0x4e8] sm:$0xff] }
 0x2ca   : > { %v5148_v3 = vmul.f32 %v3449_v55, %v10733_v61  ;;  %vm3484_vm13 = vweird.f32 %v6271_v23  ;;  %v6275_v17 = vpop.eup %6274  ;;  %v3468_v41 = vadd.f32 %v6269_v37, %v3467_v26  ;;  %vm3497_vm0 = vweird.f32 %v11017_v35  ;;  %v11157_v26 = vld [vmem:[%s6904_s24 + $0x4f0] sm:$0xff] }
 0x2cb   : > { %5403 = vst [vmem:[%s7078_s17 + $0x478] sm:$0xff] %v5147_v42  ;;  %v3501_v16 = vand.u32 2147483647, %v11017_v35  ;;  %v3504_v43 = vor.u32 1.1754944e-38, %v3503_v56  ;;  %v3458_v61 = vsel %vm11062_vm11, %v6267_v39, %v3454_v38  ;;  %v3481_v15 = vmul.f32 %v6271_v23, %v3480_v9  ;;  %vm11089_vm1 = vmor %vm3483_vm10, %vm3484_vm13 }
 0x2cc   : > { %5404 = vst [vmem:[%s7078_s17 + $0x480] sm:$0xff] %v5148_v3  ;;  %v3493_v22 = vmul.f32 %v6275_v17, %v11017_v35  ;;  %vm3511_vm15 = vweird.f32 %v11024_v36  ;;  %v3463_v50 = vsel %vm11012_vm3, %v3462_v10, %v3458_v61  ;;  %v3472_v52 = vsel %vm11070_vm12, %v6269_v37, %v3468_v41  ;;  %v11098_v10 = vld [vmem:[%s6904_s24 + $0x4c0] sm:$0xff] }
 0x2cd   : > { %v6277_v13 = vpop.eup %6276  ;;  %vm3498_vm2 = vweird.f32 %v6275_v17  ;;  %v3515_v6 = vand.u32 2147483647, %v11024_v36  ;;  %v5149_v4 = vmul.f32 %v3463_v50, %v10887_v62  ;;  %v3477_v28 = vsel %vm11019_vm6, %v3476_v18, %v3472_v52  ;;  %v11179_v50 = vld [vmem:[%s6904_s24 + $0x500] sm:$0xff] }
 0x2ce   : > { %v3482_v7 = vadd.f32 %v6271_v23, %v3481_v15  ;;  %v3494_v24 = vsub.f32 1.0, %v3493_v22  ;;  %v5150_v40 = vmul.f32 %v3477_v28, %v10899_v57  ;;  %v3507_v11 = vmul.f32 %v6277_v13, %v11024_v36  ;;  %vm11117_vm3 = vmor %vm3497_vm0, %vm3498_vm2 }
 0x2cf   : > { %vm3512_vm4 = vweird.f32 %v6277_v13  ;;  %v3517_v59 = vand.u32 2147483648, %v11024_v36  ;;  %5405 = vst [vmem:[%s7078_s17 + $0x488] sm:$0xff] %v5149_v4  ;;  %v11109_v20 = vadd.f32 1.0, %v6273_v48  ;;  %6278 = vpow2.f32 %v954_v34 }
 0x2d0   : > { %v3486_v62 = vsel %vm11089_vm1, %v6271_v23, %v3482_v7  ;;  %v3495_v39 = vmul.f32 %v6275_v17, %v3494_v24  ;;  %5406 = vst [vmem:[%s7078_s17 + $0x490] sm:$0xff] %v5150_v40  ;;  %v3508_v18 = vsub.f32 1.0, %v3507_v11  ;;  %v548_v37 = vsub.f32 0.0, %v11098_v10  ;;  %vm11137_vm10 = vmor %vm3511_vm15, %vm3512_vm4  ;;  %v11144_v23 = vld [vmem:[%s6904_s24 + $0x4e0] sm:$0xff] }
 0x2d1   : > { %v3491_v0 = vsel %vm11044_vm8, %v3490_v27, %v3486_v62  ;;  %v549_v29 = vsub.f32 0.0, %v11101_v63  ;;  %vm3502_vm6 = vcmp.eq.f32.partialorder %v3501_v16, 8.507059e+37  ;;  %6280 = vrcp.f32 %v11109_v20  ;;  %v11170_v16 = vld [vmem:[%s6904_s24 + $0x4f8] sm:$0xff] }
 0x2d2   : > { %v5151_v2 = vmul.f32 %v3491_v0, %v10902_v30  ;;  %v3496_v33 = vadd.f32 %v6275_v17, %v3495_v39  ;;  %v3509_v35 = vmul.f32 %v6277_v13, %v3508_v18  ;;  %v3518_v12 = vor.u32 1.1754944e-38, %v3517_v59  ;;  %v11197_v59 = vld [vmem:[%s6904_s24 + $0x508] sm:$0xff] }
 0x2d3   : > { %v956_v60 = vmul.f32 1.442695, %v548_v37  ;;  %v958_v30 = vmul.f32 1.442695, %v549_v29  ;;  %v550_v46 = vsub.f32 0.0, %v11124_v47  ;;  %v551_v1 = vsub.f32 0.0, %v11127_v51 }
 0x2d4   : > { %5407 = vst [vmem:[%s7078_s17 + $0x498] sm:$0xff] %v5151_v2  ;;  %v3500_v34 = vsel %vm11117_vm3, %v6275_v17, %v3496_v33  ;;  %v3510_v58 = vadd.f32 %v6277_v13, %v3509_v35  ;;  %vm3516_vm14 = vcmp.eq.f32.partialorder %v3515_v6, 8.507059e+37  ;;  %v3529_v56 = vand.u32 2147483647, %v11109_v20 }
 0x2d5   : > { %v3505_v21 = vsel %vm3502_vm6, %v3504_v43, %v3500_v34  ;;  %v6279_v36 = vpop.eup %6278  ;;  %6282 = vpow2.f32 %v956_v60  ;;  %v960_v25 = vmul.f32 1.442695, %v550_v46  ;;  %v962_v49 = vmul.f32 1.442695, %v551_v1 }
 0x2d6   : > { %v5152_v45 = vmul.f32 %v3505_v21, %v10909_v44  ;;  %v3514_v42 = vsel %vm11137_vm10, %v6277_v13, %v3510_v58  ;;  %v11153_v55 = vadd.f32 1.0, %v6279_v36  ;;  %6284 = vpow2.f32 %v958_v30 }
 0x2d7   : > { %v552_v32 = vsub.f32 0.0, %v11144_v23  ;;  %v6281_v27 = vpop.eup %6280  ;;  %v3519_v48 = vsel %vm3516_vm14, %v3518_v12, %v3514_v42  ;;  %v3531_v44 = vand.u32 2147483648, %v11109_v20  ;;  %6286 = vpow2.f32 %v960_v25 }
 0x2d8   : > { %5408 = vst [vmem:[%s7078_s17 + $0x4a0] sm:$0xff] %v5152_v45  ;;  %v553_v3 = vsub.f32 0.0, %v11148_v8  ;;  %v5153_v38 = vmul.f32 %v3519_v48, %v10920_v53  ;;  %v3521_v5 = vmul.f32 %v6281_v27, %v11109_v20  ;;  %vm3525_vm5 = vweird.f32 %v11109_v20 }
 0x2d9   : > { %6288 = vrcp.f32 %v11153_v55  ;;  %v3543_v9 = vand.u32 2147483647, %v11153_v55  ;;  %v3545_v17 = vand.u32 2147483648, %v11153_v55  ;;  %v554_v41 = vsub.f32 0.0, %v11157_v26 }
 0x2da   : > { %6290 = vpow2.f32 %v962_v49  ;;  %5409 = vst [vmem:[%s7078_s17 + $0x4a8] sm:$0xff] %v5153_v38  ;;  %v3522_v43 = vsub.f32 1.0, %v3521_v5  ;;  %vm3526_vm7 = vweird.f32 %v6281_v27  ;;  %v964_v53 = vmul.f32 1.442695, %v552_v32 }
 0x2db   : > { %v966_v61 = vmul.f32 1.442695, %v553_v3  ;;  %v6283_v15 = vpop.eup %6282  ;;  %vm11173_vm9 = vcmp.eq.f32.partialorder %v3529_v56, 8.507059e+37  ;;  %v3532_v13 = vor.u32 1.1754944e-38, %v3531_v44  ;;  %vm3539_vm8 = vweird.f32 %v11153_v55  ;;  %vm11186_vm11 = vmor %vm3525_vm5, %vm3526_vm7 }
 0x2dc   : > { %v6285_v52 = vpop.eup %6284  ;;  %v3523_v19 = vmul.f32 %v6281_v27, %v3522_v43  ;;  %v11181_v6 = vadd.f32 1.0, %v6283_v15  ;;  %6292 = vpow2.f32 %v964_v53  ;;  %v555_v4 = vsub.f32 0.0, %v11170_v16 }
 0x2dd   : > { %v6287_v28 = vpop.eup %6286  ;;  %vm11190_vm12 = vcmp.eq.f32.partialorder %v3543_v9, 8.507059e+37  ;;  %v3546_v40 = vor.u32 1.1754944e-38, %v3545_v17  ;;  %v11194_v11 = vadd.f32 1.0, %v6285_v52  ;;  %6294 = vpow2.f32 %v966_v61 }
 0x2de   : > { %v3524_v39 = vadd.f32 %v6281_v27, %v3523_v19  ;;  %6296 = vrcp.f32 %v11181_v6  ;;  %v968_v0 = vmul.f32 1.442695, %v554_v41  ;;  %v556_v20 = vsub.f32 0.0, %v11179_v50 }
 0x2df   : > { %v6289_v62 = vpop.eup %6288  ;;  %v3557_v37 = vand.u32 2147483647, %v11181_v6  ;;  %v3559_v29 = vand.u32 2147483648, %v11181_v6  ;;  %6298 = vrcp.f32 %v11194_v11  ;;  %v3571_v33 = vand.u32 2147483647, %v11194_v11 }
 0x2e0   : > { %v6291_v57 = vpop.eup %6290  ;;  %v3535_v18 = vmul.f32 %v6289_v62, %v11153_v55  ;;  %v3528_v2 = vsel %vm11186_vm11, %v6281_v27, %v3524_v39  ;;  %v11208_v35 = vmul.f32 1.442695, %v555_v4  ;;  %v557_v12 = vsub.f32 0.0, %v11197_v59 }
 0x2e1   : > { %v3533_v60 = vsel %vm11173_vm9, %v3532_v13, %v3528_v2  ;;  %vm3540_vm13 = vweird.f32 %v6289_v62  ;;  %v3573_v54 = vand.u32 2147483648, %v11194_v11  ;;  %vm3553_vm0 = vweird.f32 %v11181_v6 }
 0x2e2   : > { %v3536_v34 = vsub.f32 1.0, %v3535_v18  ;;  %v6293_v30 = vpop.eup %6292  ;;  %v5154_v46 = vmul.f32 %v3533_v60, %v10970_v14  ;;  %v11216_v1 = vadd.f32 1.0, %v6287_v28  ;;  %v11218_v21 = vadd.f32 1.0, %v6291_v57  ;;  %vm11228_vm2 = vmor %vm3539_vm8, %vm3540_vm13 }
 0x2e3   : > { %v6295_v58 = vpop.eup %6294  ;;  %vm11220_vm15 = vcmp.eq.f32.partialorder %v3557_v37, 8.507059e+37  ;;  %v3560_v45 = vor.u32 1.1754944e-38, %v3559_v29  ;;  %vm3567_vm1 = vweird.f32 %v11194_v11  ;;  %vm11232_vm4 = vcmp.eq.f32.partialorder %v3571_v33, 8.507059e+37 }
 0x2e4   : > { %v3537_v56 = vmul.f32 %v6289_v62, %v3536_v34  ;;  %v6297_v25 = vpop.eup %6296  ;;  %5410 = vst [vmem:[%s7078_s17 + $0x4b0] sm:$0xff] %v5154_v46  ;;  %v3574_v42 = vor.u32 1.1754944e-38, %v3573_v54  ;;  %6300 = vrcp.f32 %v11216_v1  ;;  %v3585_v32 = vand.u32 2147483647, %v11216_v1 }
 0x2e5   : > { %v11238_v27 = vadd.f32 1.0, %v6293_v30  ;;  %v6299_v48 = vpop.eup %6298  ;;  %v3549_v3 = vmul.f32 %v6297_v25, %v11181_v6  ;;  %v3587_v55 = vand.u32 2147483648, %v11216_v1  ;;  %6302 = vrcp.f32 %v11218_v21 }
 0x2e6   : > { %v3538_v44 = vadd.f32 %v6289_v62, %v3537_v56  ;;  %vm3554_vm3 = vweird.f32 %v6297_v25  ;;  %v3563_v38 = vmul.f32 %v6299_v48, %v11194_v11  ;;  %vm3581_vm6 = vweird.f32 %v11216_v1 }
 0x2e7   : > { %6304 = vpow2.f32 %v968_v0  ;;  %v3550_v9 = vsub.f32 1.0, %v3549_v3  ;;  %vm3568_vm10 = vweird.f32 %v6299_v48  ;;  %v3599_v17 = vand.u32 2147483647, %v11218_v21  ;;  %vm11260_vm5 = vmor %vm3553_vm0, %vm3554_vm3 }
 0x2e8   : > { %v3542_v5 = vsel %vm11228_vm2, %v6289_v62, %v3538_v44  ;;  %v3564_v43 = vsub.f32 1.0, %v3563_v38  ;;  %v3601_v53 = vand.u32 2147483648, %v11218_v21  ;;  %6306 = vrcp.f32 %v11238_v27  ;;  %vm11274_vm11 = vmor %vm3567_vm1, %vm3568_vm10 }
 0x2e9   : > { %v3547_v41 = vsel %vm11190_vm12, %v3546_v40, %v3542_v5  ;;  %v3551_v15 = vmul.f32 %v6297_v25, %v3550_v9  ;;  %vm11253_vm14 = vcmp.eq.f32.partialorder %v3585_v32, 8.507059e+37  ;;  %v3588_v13 = vor.u32 1.1754944e-38, %v3587_v55 }
 0x2ea   : > { %v5155_v61 = vmul.f32 %v3547_v41, %v10973_v31  ;;  %v6301_v52 = vpop.eup %6300  ;;  %v3565_v4 = vmul.f32 %v6299_v48, %v3564_v43  ;;  %vm3595_vm7 = vweird.f32 %v11218_v21  ;;  %vm11265_vm9 = vcmp.eq.f32.partialorder %v3599_v17, 8.507059e+37  ;;  %v11338_v17 = vld [vmem:[%s6904_s24 + $0x510] sm:$0xff] }
 0x2eb   : > { %vm3609_vm8 = vweird.f32 %v11238_v27  ;;  %v6303_v31 = vpop.eup %6302  ;;  %v3552_v7 = vadd.f32 %v6297_v25, %v3551_v15  ;;  %v3577_v24 = vmul.f32 %v6301_v52, %v11216_v1  ;;  %v3602_v40 = vor.u32 1.1754944e-38, %v3601_v53 }
 0x2ec   : > { %5411 = vst [vmem:[%s7078_s17 + $0x4b8] sm:$0xff] %v5155_v61  ;;  %v11279_v62 = vadd.f32 1.0, %v6295_v58  ;;  %v3566_v0 = vadd.f32 %v6299_v48, %v3565_v4  ;;  %v3591_v57 = vmul.f32 %v6303_v31, %v11218_v21  ;;  %v3613_v18 = vand.u32 2147483647, %v11238_v27 }
 0x2ed   : > { %v6305_v39 = vpop.eup %6304  ;;  %v3615_v37 = vand.u32 2147483648, %v11238_v27  ;;  %v3556_v11 = vsel %vm11260_vm5, %v6297_v25, %v3552_v7  ;;  %v3578_v29 = vsub.f32 1.0, %v3577_v24  ;;  %vm3582_vm12 = vweird.f32 %v6301_v52 }
 0x2ee   : > { %6308 = vrcp.f32 %v11279_v62  ;;  %v6307_v2 = vpop.eup %6306  ;;  %v3561_v33 = vsel %vm11220_vm15, %v3560_v45, %v3556_v11  ;;  %v3570_v60 = vsel %vm11274_vm11, %v6299_v48, %v3566_v0  ;;  %v3592_v34 = vsub.f32 1.0, %v3591_v57  ;;  %vm11298_vm0 = vmor %vm3581_vm6, %vm3582_vm12 }
 0x2ef   : > { %vm3596_vm13 = vweird.f32 %v6303_v31  ;;  %v5156_v54 = vmul.f32 %v3561_v33, %v11098_v10  ;;  %v3575_v30 = vsel %vm11232_vm4, %v3574_v42, %v3570_v60  ;;  %v3579_v46 = vmul.f32 %v6301_v52, %v3578_v29 }
 0x2f0   : > { %v3605_v58 = vmul.f32 %v6307_v2, %v11238_v27  ;;  %v5157_v56 = vmul.f32 %v3575_v30, %v11101_v63  ;;  %v3593_v45 = vmul.f32 %v6303_v31, %v3592_v34  ;;  %vm3610_vm15 = vweird.f32 %v6307_v2  ;;  %vm11309_vm2 = vmor %vm3595_vm7, %vm3596_vm13 }
 0x2f1   : > { %vm11302_vm1 = vcmp.eq.f32.partialorder %v3613_v18, 8.507059e+37  ;;  %5412 = vst [vmem:[%s7078_s17 + $0x4c0] sm:$0xff] %v5156_v54  ;;  %v3580_v10 = vadd.f32 %v6301_v52, %v3579_v46  ;;  %v3627_v1 = vand.u32 2147483647, %v11279_v62  ;;  %v11314_v49 = vadd.f32 1.0, %v6305_v39  ;;  %vm11331_vm4 = vmor %vm3609_vm8, %vm3610_vm15 }
 0x2f2   : > { %v3606_v63 = vsub.f32 1.0, %v3605_v58  ;;  %5413 = vst [vmem:[%s7078_s17 + $0x4c8] sm:$0xff] %v5157_v56  ;;  %v3594_v42 = vadd.f32 %v6303_v31, %v3593_v45  ;;  %v3616_v32 = vor.u32 1.1754944e-38, %v3615_v37  ;;  %v3629_v48 = vand.u32 2147483648, %v11279_v62  ;;  %v11398_v56 = vld [vmem:[%s6904_s24 + $0x530] sm:$0xff] }
 0x2f3   : > { %6310 = vpow2.f32 %v11208_v35  ;;  %v3584_v21 = vsel %vm11298_vm0, %v6301_v52, %v3580_v10  ;;  %v972_v55 = vmul.f32 1.442695, %v556_v20  ;;  %vm3623_vm3 = vweird.f32 %v11279_v62  ;;  %v11355_v52 = vld [vmem:[%s6904_s24 + $0x518] sm:$0xff] }
 0x2f4   : > { %v6309_v44 = vpop.eup %6308  ;;  %v3607_v3 = vmul.f32 %v6307_v2, %v3606_v63  ;;  %6312 = vrcp.f32 %v11314_v49  ;;  %v3589_v38 = vsel %vm11253_vm14, %v3588_v13, %v3584_v21  ;;  %v3598_v5 = vsel %vm11309_vm2, %v6303_v31, %v3594_v42 }
 0x2f5   : > { %v3619_v9 = vmul.f32 %v6309_v44, %v11279_v62  ;;  %v5158_v20 = vmul.f32 %v3589_v38, %v11124_v47  ;;  %v3603_v41 = vsel %vm11265_vm9, %v3602_v40, %v3598_v5  ;;  %vm11343_vm6 = vcmp.eq.f32.partialorder %v3627_v1, 8.507059e+37 }
 0x2f6   : > { %v3608_v43 = vadd.f32 %v6307_v2, %v3607_v3  ;;  %v5159_v53 = vmul.f32 %v3603_v41, %v11127_v51  ;;  %vm3624_vm10 = vweird.f32 %v6309_v44  ;;  %v3630_v15 = vor.u32 1.1754944e-38, %v3629_v48 }
 0x2f7   : > { %v3620_v61 = vsub.f32 1.0, %v3619_v9  ;;  %5414 = vst [vmem:[%s7078_s17 + $0x4d0] sm:$0xff] %v5158_v20  ;;  %6314 = vpow2.f32 %v972_v55  ;;  %v974_v47 = vmul.f32 1.442695, %v557_v12  ;;  %v558_v13 = vsub.f32 0.0, %v11338_v17  ;;  %vm11366_vm5 = vmor %vm3623_vm3, %vm3624_vm10 }
 0x2f8   : > { %v3612_v22 = vsel %vm11331_vm4, %v6307_v2, %v3608_v43  ;;  %5415 = vst [vmem:[%s7078_s17 + $0x4d8] sm:$0xff] %v5159_v53  ;;  %vm3637_vm14 = vweird.f32 %v11314_v49  ;;  %v3641_v28 = vand.u32 2147483647, %v11314_v49  ;;  %v3643_v0 = vand.u32 2147483648, %v11314_v49  ;;  %v11385_v2 = vld [vmem:[%s6904_s24 + $0x528] sm:$0xff] }
 0x2f9   : > { %v6311_v19 = vpop.eup %6310  ;;  %v3617_v51 = vsel %vm11302_vm1, %v3616_v32, %v3612_v22  ;;  %v3621_v4 = vmul.f32 %v6309_v44, %v3620_v61  ;;  %6316 = vpow2.f32 %v974_v47  ;;  %v976_v24 = vmul.f32 1.442695, %v558_v13 }
 0x2fa   : > { %v6313_v31 = vpop.eup %6312  ;;  %v5160_v7 = vmul.f32 %v3617_v51, %v11144_v23  ;;  %v11370_v6 = vadd.f32 1.0, %v6311_v19  ;;  %v559_v57 = vsub.f32 0.0, %v11355_v52  ;;  %v11376_v23 = vld [vmem:[%s6904_s24 + $0x520] sm:$0xff]  ;;  %vm11389_vm9 = vcmp.eq.f32.partialorder %v3641_v28, 8.507059e+37 }
 0x2fb   : > { %v3622_v40 = vadd.f32 %v6309_v44, %v3621_v4  ;;  %v3633_v39 = vmul.f32 %v6313_v31, %v11314_v49  ;;  %vm3638_vm7 = vweird.f32 %v6313_v31  ;;  %v560_v54 = vsub.f32 0.0, %v11376_v23  ;;  %v11416_v49 = vld [vmem:[%s6904_s24 + $0x538] sm:$0xff] }
 0x2fc   : > { %5416 = vst [vmem:[%s7078_s17 + $0x4e0] sm:$0xff] %v5160_v7  ;;  %6318 = vrcp.f32 %v11370_v6  ;;  %v3655_v62 = vand.u32 2147483647, %v11370_v6  ;;  %v3657_v18 = vand.u32 2147483648, %v11370_v6  ;;  %v978_v29 = vmul.f32 1.442695, %v559_v57  ;;  %vm11403_vm8 = vmor %vm3637_vm14, %vm3638_vm7 }
 0x2fd   : > { %v3626_v37 = vsel %vm11366_vm5, %v6309_v44, %v3622_v40  ;;  %v3634_v11 = vsub.f32 1.0, %v3633_v39  ;;  %6320 = vpow2.f32 %v976_v24  ;;  %v6315_v33 = vpop.eup %6314  ;;  %v3644_v25 = vor.u32 1.1754944e-38, %v3643_v0 }
 0x2fe   : > { %v3631_v60 = vsel %vm11343_vm6, %v3630_v15, %v3626_v37  ;;  %v11395_v58 = vadd.f32 1.0, %v6315_v33  ;;  %6322 = vpow2.f32 %v978_v29  ;;  %vm3651_vm11 = vweird.f32 %v11370_v6 }
 0x2ff   : > { %v5161_v30 = vmul.f32 %v3631_v60, %v11148_v8  ;;  %v3635_v46 = vmul.f32 %v6313_v31, %v3634_v11  ;;  %v6317_v36 = vpop.eup %6316  ;;  %v980_v10 = vmul.f32 1.442695, %v560_v54  ;;  %v561_v8 = vsub.f32 0.0, %v11385_v2 }
 0x300   : > { %vm11410_vm12 = vcmp.eq.f32.partialorder %v3655_v62, 8.507059e+37  ;;  %v3658_v1 = vor.u32 1.1754944e-38, %v3657_v18  ;;  %6324 = vrcp.f32 %v11395_v58  ;;  %v3669_v32 = vand.u32 2147483647, %v11395_v58 }
 0x301   : > { %5417 = vst [vmem:[%s7078_s17 + $0x4e8] sm:$0xff] %v5161_v30  ;;  %v3636_v14 = vadd.f32 %v6313_v31, %v3635_v46  ;;  %v11419_v48 = vadd.f32 1.0, %v6317_v36  ;;  %v982_v44 = vmul.f32 1.442695, %v561_v8  ;;  %v562_v21 = vsub.f32 0.0, %v11398_v56 }
 0x302   : > { %v6319_v42 = vpop.eup %6318  ;;  %v3671_v5 = vand.u32 2147483648, %v11395_v58  ;;  %6326 = vpow2.f32 %v980_v10  ;;  %v563_v9 = vsub.f32 0.0, %v11416_v49  ;;  %vm3665_vm0 = vweird.f32 %v11395_v58 }
 0x303   : > { %v6321_v3 = vpop.eup %6320  ;;  %v3640_v55 = vsel %vm11403_vm8, %v6313_v31, %v3636_v14  ;;  %v3647_v38 = vmul.f32 %v6319_v42, %v11370_v6  ;;  %vm3652_vm13 = vweird.f32 %v6319_v42  ;;  %6328 = vrcp.f32 %v11419_v48 }
 0x304   : > { %v3645_v35 = vsel %vm11389_vm9, %v3644_v25, %v3640_v55  ;;  %v6323_v20 = vpop.eup %6322  ;;  %v3683_v27 = vand.u32 2147483647, %v11419_v48  ;;  %v3685_v53 = vand.u32 2147483648, %v11419_v48  ;;  %v11434_v61 = vadd.f32 1.0, %v6321_v3  ;;  %vm11447_vm2 = vmor %vm3651_vm11, %vm3652_vm13 }
 0x305   : > { %v5162_v41 = vmul.f32 %v3645_v35, %v11157_v26  ;;  %v3648_v43 = vsub.f32 1.0, %v3647_v38  ;;  %v11436_v15 = vadd.f32 1.0, %v6323_v20  ;;  %6330 = vpow2.f32 %v982_v44  ;;  %v11504_v44 = vld [vmem:[%s6904_s24 + $0x540] sm:$0xff] }
 0x306   : > { %v6325_v22 = vpop.eup %6324  ;;  %vm11439_vm15 = vcmp.eq.f32.partialorder %v3669_v32, 8.507059e+37  ;;  %v3672_v26 = vor.u32 1.1754944e-38, %v3671_v5  ;;  %vm3679_vm1 = vweird.f32 %v11419_v48  ;;  %v3686_v4 = vor.u32 1.1754944e-38, %v3685_v53 }
 0x307   : > { %5418 = vst [vmem:[%s7078_s17 + $0x4f0] sm:$0xff] %v5162_v41  ;;  %v3649_v47 = vmul.f32 %v6319_v42, %v3648_v43  ;;  %v3661_v51 = vmul.f32 %v6325_v22, %v11395_v58  ;;  %6332 = vrcp.f32 %v11434_v61  ;;  %v984_v28 = vmul.f32 1.442695, %v562_v21 }
 0x308   : > { %v6327_v31 = vpop.eup %6326  ;;  %vm11453_vm4 = vcmp.eq.f32.partialorder %v3683_v27, 8.507059e+37  ;;  %v3697_v24 = vand.u32 2147483647, %v11434_v61  ;;  %v3699_v6 = vand.u32 2147483648, %v11434_v61  ;;  %6334 = vrcp.f32 %v11436_v15 }
 0x309   : > { %v3650_v7 = vadd.f32 %v6319_v42, %v3649_v47  ;;  %v6329_v40 = vpop.eup %6328  ;;  %v3662_v39 = vsub.f32 1.0, %v3661_v51  ;;  %vm3666_vm3 = vweird.f32 %v6325_v22  ;;  %v3711_v0 = vand.u32 2147483647, %v11436_v15 }
 0x30a   : > { %v11461_v57 = vmul.f32 1.442695, %v563_v9  ;;  %v3675_v18 = vmul.f32 %v6329_v40, %v11419_v48  ;;  %vm3693_vm6 = vweird.f32 %v11434_v61  ;;  %v3713_v37 = vand.u32 2147483648, %v11436_v15  ;;  %vm11474_vm5 = vmor %vm3665_vm0, %vm3666_vm3 }
 0x30b   : > { %v3654_v62 = vsel %vm11447_vm2, %v6319_v42, %v3650_v7  ;;  %v6331_v11 = vpop.eup %6330  ;;  %v3663_v33 = vmul.f32 %v6325_v22, %v3662_v39  ;;  %vm3680_vm10 = vweird.f32 %v6329_v40  ;;  %vm3707_vm14 = vweird.f32 %v11436_v15 }
 0x30c   : > { %v3659_v29 = vsel %vm11410_vm12, %v3658_v1, %v3654_v62  ;;  %v3676_v54 = vsub.f32 1.0, %v3675_v18  ;;  %vm11478_vm7 = vcmp.eq.f32.partialorder %v3697_v24, 8.507059e+37  ;;  %v3700_v46 = vor.u32 1.1754944e-38, %v3699_v6  ;;  %vm11498_vm8 = vmor %vm3679_vm1, %vm3680_vm10 }
 0x30d   : > { %v5163_v60 = vmul.f32 %v3659_v29, %v11170_v16  ;;  %v11482_v36 = vadd.f32 1.0, %v6327_v31  ;;  %v6333_v45 = vpop.eup %6332  ;;  %v3664_v25 = vadd.f32 %v6325_v22, %v3663_v33  ;;  %vm11484_vm9 = vcmp.eq.f32.partialorder %v3711_v0, 8.507059e+37  ;;  %v11557_v0 = vld [vmem:[%s6904_s24 + $0x548] sm:$0xff]  ;;  %v11568_v29 = vld [vmem:[%s6904_s24 + $0x558] sm:$0xff] }
 0x30e   : > { %v11488_v16 = vadd.f32 1.0, %v6331_v11  ;;  %6336 = vpow2.f32 %v984_v28  ;;  %v6335_v58 = vpop.eup %6334  ;;  %v3677_v8 = vmul.f32 %v6329_v40, %v3676_v54  ;;  %v3689_v14 = vmul.f32 %v6333_v45, %v11434_v61  ;;  %v11565_v11 = vld [vmem:[%s6904_s24 + $0x550] sm:$0xff]  ;;  %v11573_v54 = vld [vmem:[%s6904_s24 + $0x560] sm:$0xff] }
 0x30f   : > { %5419 = vst [vmem:[%s7078_s17 + $0x4f8] sm:$0xff] %v5163_v60  ;;  %v3714_v63 = vor.u32 1.1754944e-38, %v3713_v37  ;;  %6338 = vrcp.f32 %v11482_v36  ;;  %v3668_v1 = vsel %vm11474_vm5, %v6325_v22, %v3664_v25  ;;  %vm3694_vm11 = vweird.f32 %v6333_v45 }
 0x310   : > { %v3703_v32 = vmul.f32 %v6335_v58, %v11436_v15  ;;  %vm3708_vm12 = vweird.f32 %v6335_v58  ;;  %v3673_v21 = vsel %vm11439_vm15, %v3672_v26, %v3668_v1  ;;  %v3678_v3 = vadd.f32 %v6329_v40, %v3677_v8  ;;  %vm11522_vm0 = vmor %vm3693_vm6, %vm3694_vm11 }
 0x311   : > { %v3690_v55 = vsub.f32 1.0, %v3689_v14  ;;  %v3725_v38 = vand.u32 2147483647, %v11482_v36  ;;  %v5164_v48 = vmul.f32 %v3673_v21, %v11179_v50  ;;  %v3727_v35 = vand.u32 2147483648, %v11482_v36  ;;  %vm11535_vm1 = vmor %vm3707_vm14, %vm3708_vm12  ;;  %v11601_v21 = vld [vmem:[%s6904_s24 + $0x568] sm:$0xff] }
 0x312   : > { %v3704_v5 = vsub.f32 1.0, %v3703_v32  ;;  %6340 = vrcp.f32 %v11488_v16  ;;  %v3682_v9 = vsel %vm11498_vm8, %v6329_v40, %v3678_v3  ;;  %vm3721_vm13 = vweird.f32 %v11482_v36  ;;  %v11604_v3 = vld [vmem:[%s6904_s24 + $0x570] sm:$0xff] }
 0x313   : > { %v3691_v20 = vmul.f32 %v6333_v45, %v3690_v55  ;;  %v564_v41 = vsub.f32 0.0, %v11504_v44  ;;  %5420 = vst [vmem:[%s7078_s17 + $0x500] sm:$0xff] %v5164_v48  ;;  %v3687_v27 = vsel %vm11453_vm4, %v3686_v4, %v3682_v9  ;;  %vm11526_vm15 = vcmp.eq.f32.partialorder %v3725_v38, 8.507059e+37 }
 0x314   : > { %v6337_v43 = vpop.eup %6336  ;;  %v3705_v53 = vmul.f32 %v6335_v58, %v3704_v5  ;;  %v3739_v47 = vand.u32 2147483647, %v11488_v16  ;;  %v5165_v26 = vmul.f32 %v3687_v27, %v11197_v59  ;;  %v3741_v51 = vand.u32 2147483648, %v11488_v16 }
 0x315   : > { %v6339_v13 = vpop.eup %6338  ;;  %v3692_v19 = vadd.f32 %v6333_v45, %v3691_v20  ;;  %v11540_v4 = vadd.f32 1.0, %v6337_v43  ;;  %v3728_v7 = vor.u32 1.1754944e-38, %v3727_v35  ;;  %vm3735_vm2 = vweird.f32 %v11488_v16 }
 0x316   : > { %v3706_v28 = vadd.f32 %v6335_v58, %v3705_v53  ;;  %v3717_v31 = vmul.f32 %v6339_v13, %v11482_v36  ;;  %5421 = vst [vmem:[%s7078_s17 + $0x508] sm:$0xff] %v5165_v26  ;;  %vm3722_vm4 = vweird.f32 %v6339_v13  ;;  %vm11547_vm3 = vcmp.eq.f32.partialorder %v3739_v47, 8.507059e+37 }
 0x317   : > { %v3696_v59 = vsel %vm11522_vm0, %v6333_v45, %v3692_v19  ;;  %6342 = vrcp.f32 %v11540_v4  ;;  %v3742_v39 = vor.u32 1.1754944e-38, %v3741_v51  ;;  %vm3749_vm6 = vweird.f32 %v11540_v4  ;;  %vm11579_vm14 = vmor %vm3721_vm13, %vm3722_vm4 }
 0x318   : > { %v6341_v12 = vpop.eup %6340  ;;  %v3701_v24 = vsel %vm11478_vm7, %v3700_v46, %v3696_v59  ;;  %v3710_v6 = vsel %vm11535_vm1, %v6335_v58, %v3706_v28  ;;  %v3718_v40 = vsub.f32 1.0, %v3717_v31  ;;  %v3753_v34 = vand.u32 2147483647, %v11540_v4 }
 0x319   : > { %v5166_v62 = vmul.f32 %v3701_v24, %v11338_v17  ;;  %v3715_v18 = vsel %vm11484_vm9, %v3714_v63, %v3710_v6  ;;  %v3731_v37 = vmul.f32 %v6341_v12, %v11488_v16  ;;  %vm3736_vm10 = vweird.f32 %v6341_v12 }
 0x31a   : > { %v5167_v33 = vmul.f32 %v3715_v18, %v11355_v52  ;;  %v3719_v60 = vmul.f32 %v6339_v13, %v3718_v40  ;;  %6344 = vpow2.f32 %v11461_v57  ;;  %v988_v46 = vmul.f32 1.442695, %v564_v41  ;;  %vm11595_vm5 = vmor %vm3735_vm2, %vm3736_vm10 }
 0x31b   : > { %5422 = vst [vmem:[%s7078_s17 + $0x510] sm:$0xff] %v5166_v62  ;;  %v3732_v30 = vsub.f32 1.0, %v3731_v37  ;;  %v565_v52 = vsub.f32 0.0, %v11557_v0  ;;  %v3755_v25 = vand.u32 2147483648, %v11540_v4  ;;  %v566_v10 = vsub.f32 0.0, %v11565_v11 }
 0x31c   : > { %5423 = vst [vmem:[%s7078_s17 + $0x518] sm:$0xff] %v5167_v33  ;;  %v3720_v45 = vadd.f32 %v6339_v13, %v3719_v60  ;;  %v567_v36 = vsub.f32 0.0, %v11568_v29  ;;  %6346 = vpow2.f32 %v988_v46  ;;  %v568_v63 = vsub.f32 0.0, %v11573_v54 }
 0x31d   : > { %v6343_v58 = vpop.eup %6342  ;;  %v3733_v8 = vmul.f32 %v6341_v12, %v3732_v30  ;;  %v990_v14 = vmul.f32 1.442695, %v565_v52  ;;  %v992_v32 = vmul.f32 1.442695, %v566_v10  ;;  %v569_v41 = vsub.f32 0.0, %v11601_v21 }
 0x31e   : > { %v3724_v57 = vsel %vm11579_vm14, %v6339_v13, %v3720_v45  ;;  %v3745_v42 = vmul.f32 %v6343_v58, %v11540_v4  ;;  %vm3750_vm7 = vweird.f32 %v6343_v58  ;;  %v994_v16 = vmul.f32 1.442695, %v567_v36 }
 0x31f   : > { %v3729_v55 = vsel %vm11526_vm15, %v3728_v7, %v3724_v57  ;;  %v3734_v38 = vadd.f32 %v6341_v12, %v3733_v8  ;;  %6348 = vpow2.f32 %v990_v14  ;;  %v996_v35 = vmul.f32 1.442695, %v568_v63  ;;  %vm11625_vm9 = vmor %vm3749_vm6, %vm3750_vm7 }
 0x320   : > { %v5168_v48 = vmul.f32 %v3729_v55, %v11376_v23  ;;  %v3746_v5 = vsub.f32 1.0, %v3745_v42  ;;  %6350 = vpow2.f32 %v992_v32  ;;  %v6345_v9 = vpop.eup %6344  ;;  %v570_v43 = vsub.f32 0.0, %v11604_v3  ;;  %v11619_v23 = vld [vmem:[%s6904_s24 + $0x578] sm:$0xff] }
 0x321   : > { %v3738_v20 = vsel %vm11595_vm5, %v6341_v12, %v3734_v38  ;;  %6352 = vpow2.f32 %v994_v16  ;;  %v11616_v53 = vadd.f32 1.0, %v6345_v9  ;;  %v3756_v26 = vor.u32 1.1754944e-38, %v3755_v25 }
 0x322   : > { %5424 = vst [vmem:[%s7078_s17 + $0x520] sm:$0xff] %v5168_v48  ;;  %v3743_v27 = vsel %vm11547_vm3, %v3742_v39, %v3738_v20  ;;  %v3747_v50 = vmul.f32 %v6343_v58, %v3746_v5  ;;  %v6347_v22 = vpop.eup %6346  ;;  %6354 = vpow2.f32 %v996_v35  ;;  %v998_v19 = vmul.f32 1.442695, %v569_v41 }
 0x323   : > { %v5169_v47 = vmul.f32 %v3743_v27, %v11385_v2  ;;  %vm3754_vm8 = vcmp.eq.f32.partialorder %v3753_v34, 8.507059e+37  ;;  %6356 = vrcp.f32 %v11616_v53  ;;  %v1000_v51 = vmul.f32 1.442695, %v570_v43 }
 0x324   : > { %v3748_v61 = vadd.f32 %v6343_v58, %v3747_v50  ;;  %v3767_v31 = vand.u32 2147483647, %v11616_v53  ;;  %v11632_v2 = vadd.f32 1.0, %v6347_v22  ;;  %v571_v4 = vsub.f32 0.0, %v11619_v23 }
 0x325   : > { %v6349_v28 = vpop.eup %6348  ;;  %5425 = vst [vmem:[%s7078_s17 + $0x528] sm:$0xff] %v5169_v47  ;;  %v3769_v15 = vand.u32 2147483648, %v11616_v53  ;;  %6358 = vpow2.f32 %v998_v19  ;;  %vm3763_vm11 = vweird.f32 %v11616_v53 }
 0x326   : > { %v6351_v7 = vpop.eup %6350  ;;  %v3752_v59 = vsel %vm11625_vm9, %v6343_v58, %v3748_v61  ;;  %v11638_v12 = vadd.f32 1.0, %v6349_v28  ;;  %6360 = vrcp.f32 %v11632_v2  ;;  %v3781_v39 = vand.u32 2147483647, %v11632_v2 }
 0x327   : > { %v6353_v24 = vpop.eup %6352  ;;  %v3757_v6 = vsel %vm3754_vm8, %v3756_v26, %v3752_v59  ;;  %v3783_v62 = vand.u32 2147483648, %v11632_v2  ;;  %v11648_v60 = vadd.f32 1.0, %v6351_v7  ;;  %v11650_v34 = vmul.f32 1.442695, %v571_v4 }
 0x328   : > { %v5170_v40 = vmul.f32 %v3757_v6, %v11398_v56  ;;  %6362 = vrcp.f32 %v11638_v12  ;;  %v6355_v18 = vpop.eup %6354  ;;  %v3795_v37 = vand.u32 2147483647, %v11638_v12  ;;  %v3797_v33 = vand.u32 2147483648, %v11638_v12 }
 0x329   : > { %v6357_v17 = vpop.eup %6356  ;;  %vm11653_vm12 = vcmp.eq.f32.partialorder %v3767_v31, 8.507059e+37  ;;  %v3770_v56 = vor.u32 1.1754944e-38, %v3769_v15  ;;  %v11657_v46 = vadd.f32 1.0, %v6353_v24  ;;  %6364 = vpow2.f32 %v1000_v51  ;;  %v11825_v24 = vld [vmem:[%s6904_s24 + $0x5b0] sm:$0xff] }
 0x32a   : > { %5426 = vst [vmem:[%s7078_s17 + $0x530] sm:$0xff] %v5170_v40  ;;  %v3759_v52 = vmul.f32 %v6357_v17, %v11616_v53  ;;  %vm3777_vm13 = vweird.f32 %v11632_v2  ;;  %v3784_v45 = vor.u32 1.1754944e-38, %v3783_v62  ;;  %vm3791_vm0 = vweird.f32 %v11638_v12 }
 0x32b   : > { %v6359_v25 = vpop.eup %6358  ;;  %vm3764_vm15 = vweird.f32 %v6357_v17  ;;  %vm11662_vm1 = vcmp.eq.f32.partialorder %v3781_v39, 8.507059e+37  ;;  %6366 = vrcp.f32 %v11648_v60  ;;  %v3811_v36 = vand.u32 2147483648, %v11648_v60 }
 0x32c   : > { %v11668_v58 = vadd.f32 1.0, %v6355_v18  ;;  %v6361_v8 = vpop.eup %6360  ;;  %v3760_v14 = vsub.f32 1.0, %v3759_v52  ;;  %vm11670_vm2 = vcmp.eq.f32.partialorder %v3795_v37, 8.507059e+37  ;;  %v3798_v57 = vor.u32 1.1754944e-38, %v3797_v33  ;;  %vm11686_vm10 = vmor %vm3763_vm11, %vm3764_vm15 }
 0x32d   : > { %v3809_v1 = vand.u32 2147483647, %v11648_v60  ;;  %6368 = vrcp.f32 %v11657_v46  ;;  %v3773_v32 = vmul.f32 %v6361_v8, %v11632_v2  ;;  %vm3805_vm4 = vweird.f32 %v11648_v60 }
 0x32e   : > { %v6363_v42 = vpop.eup %6362  ;;  %vm3819_vm3 = vweird.f32 %v11657_v46  ;;  %v3823_v55 = vand.u32 2147483647, %v11657_v46  ;;  %v3761_v38 = vmul.f32 %v6357_v17, %v3760_v14  ;;  %vm3778_vm6 = vweird.f32 %v6361_v8 }
 0x32f   : > { %v3787_v16 = vmul.f32 %v6363_v42, %v11638_v12  ;;  %v11681_v48 = vor.u32 1.1754944e-38, %v3811_v36  ;;  %v6365_v5 = vpop.eup %6364  ;;  %v3774_v9 = vsub.f32 1.0, %v3773_v32  ;;  %vm3792_vm14 = vweird.f32 %v6363_v42  ;;  %vm11710_vm8 = vmor %vm3777_vm13, %vm3778_vm6 }
 0x330   : > { %v3825_v20 = vand.u32 2147483648, %v11657_v46  ;;  %6370 = vrcp.f32 %v11668_v58  ;;  %v3762_v41 = vadd.f32 %v6357_v17, %v3761_v38  ;;  %vm11692_vm5 = vcmp.eq.f32.partialorder %v3809_v1, 8.507059e+37  ;;  %vm11722_vm11 = vmor %vm3791_vm0, %vm3792_vm14 }
 0x331   : > { %v3788_v43 = vsub.f32 1.0, %v3787_v16  ;;  %vm3833_vm7 = vweird.f32 %v11668_v58  ;;  %v3837_v50 = vand.u32 2147483647, %v11668_v58  ;;  %v6367_v53 = vpop.eup %6366  ;;  %v3775_v22 = vmul.f32 %v6361_v8, %v3774_v9 }
 0x332   : > { %vm11698_vm9 = vcmp.eq.f32.partialorder %v3823_v55, 8.507059e+37  ;;  %v3826_v13 = vor.u32 1.1754944e-38, %v3825_v20  ;;  %v3839_v26 = vand.u32 2147483648, %v11668_v58  ;;  %v11703_v19 = vadd.f32 1.0, %v6359_v25  ;;  %v11792_v20 = vld [vmem:[%s6904_s24 + $0x588] sm:$0xff]  ;;  %v11869_v55 = vld [vmem:[%s6904_s24 + $0x5c0] sm:$0xff] }
 0x333   : > { %v6369_v61 = vpop.eup %6368  ;;  %v3766_v51 = vsel %vm11686_vm10, %v6357_v17, %v3762_v41  ;;  %v3789_v31 = vmul.f32 %v6363_v42, %v3788_v43  ;;  %v3801_v4 = vmul.f32 %v6367_v53, %v11648_v60  ;;  %v11715_v7 = vadd.f32 1.0, %v6365_v5  ;;  %v11785_v5 = vld [vmem:[%s6904_s24 + $0x580] sm:$0xff]  ;;  %v11795_v41 = vld [vmem:[%s6904_s24 + $0x590] sm:$0xff] }
 0x334   : > { %v3771_v59 = vsel %vm11653_vm12, %v3770_v56, %v3766_v51  ;;  %v3776_v15 = vadd.f32 %v6361_v8, %v3775_v22  ;;  %vm3806_vm13 = vweird.f32 %v6367_v53  ;;  %v3815_v2 = vmul.f32 %v6369_v61, %v11657_v46  ;;  %v11814_v51 = vld [vmem:[%s6904_s24 + $0x598] sm:$0xff] }
 0x335   : > { %v5171_v6 = vmul.f32 %v3771_v59, %v11416_v49  ;;  %v3790_v40 = vadd.f32 %v6363_v42, %v3789_v31  ;;  %v3802_v39 = vsub.f32 1.0, %v3801_v4  ;;  %vm3820_vm15 = vweird.f32 %v6369_v61  ;;  %vm11747_vm0 = vmor %vm3805_vm4, %vm3806_vm13 }
 0x336   : > { %v6371_v62 = vpop.eup %6370  ;;  %v3780_v18 = vsel %vm11710_vm8, %v6361_v8, %v3776_v15  ;;  %v3816_v37 = vsub.f32 1.0, %v3815_v2  ;;  %vm11730_vm12 = vcmp.eq.f32.partialorder %v3837_v50, 8.507059e+37  ;;  %6372 = vrcp.f32 %v11703_v19  ;;  %v11822_v15 = vld [vmem:[%s6904_s24 + $0x5a8] sm:$0xff]  ;;  %v11828_v2 = vld [vmem:[%s6904_s24 + $0x5b8] sm:$0xff] }
 0x337   : > { %5427 = vst [vmem:[%s7078_s17 + $0x538] sm:$0xff] %v5171_v6  ;;  %v3785_v12 = vsel %vm11662_vm1, %v3784_v45, %v3780_v18  ;;  %v3794_v49 = vsel %vm11722_vm11, %v6363_v42, %v3790_v40  ;;  %v3803_v17 = vmul.f32 %v6367_v53, %v3802_v39  ;;  %v3829_v30 = vmul.f32 %v6371_v62, %v11668_v58  ;;  %vm11755_vm1 = vmor %vm3819_vm3, %vm3820_vm15 }
 0x338   : > { %v5172_v56 = vmul.f32 %v3785_v12, %v11504_v44  ;;  %v3799_v52 = vsel %vm11670_vm2, %v3798_v57, %v3794_v49  ;;  %v3817_v45 = vmul.f32 %v6369_v61, %v3816_v37  ;;  %v3840_v10 = vor.u32 1.1754944e-38, %v3839_v26 }
 0x339   : > { %v5173_v36 = vmul.f32 %v3799_v52, %v11557_v0  ;;  %v3804_v8 = vadd.f32 %v6367_v53, %v3803_v17  ;;  %v3830_v14 = vsub.f32 1.0, %v3829_v30  ;;  %vm3834_vm2 = vweird.f32 %v6371_v62 }
 0x33a   : > { %5428 = vst [vmem:[%s7078_s17 + $0x540] sm:$0xff] %v5172_v56  ;;  %v3818_v60 = vadd.f32 %v6369_v61, %v3817_v45  ;;  %v3851_v63 = vand.u32 2147483647, %v11703_v19  ;;  %v3853_v57 = vand.u32 2147483648, %v11703_v19  ;;  %6374 = vrcp.f32 %v11715_v7  ;;  %vm11775_vm6 = vmor %vm3833_vm7, %vm3834_vm2 }
 0x33b   : > { %5429 = vst [vmem:[%s7078_s17 + $0x548] sm:$0xff] %v5173_v36  ;;  %v3808_v0 = vsel %vm11747_vm0, %v6367_v53, %v3804_v8  ;;  %v3831_v46 = vmul.f32 %v6371_v62, %v3830_v14  ;;  %vm3847_vm4 = vweird.f32 %v11703_v19  ;;  %vm3861_vm3 = vweird.f32 %v11715_v7 }
 0x33c   : > { %v6373_v1 = vpop.eup %6372  ;;  %v3813_v42 = vsel %vm11692_vm5, %v11681_v48, %v3808_v0  ;;  %v3822_v32 = vsel %vm11755_vm1, %v6369_v61, %v3818_v60  ;;  %vm11779_vm10 = vcmp.eq.f32.partialorder %v3851_v63, 8.507059e+37  ;;  %v3865_v16 = vand.u32 2147483647, %v11715_v7 }
 0x33d   : > { %v5174_v48 = vmul.f32 %v3813_v42, %v11565_v11  ;;  %v3827_v35 = vsel %vm11698_vm9, %v3826_v13, %v3822_v32  ;;  %v3832_v9 = vadd.f32 %v6371_v62, %v3831_v46  ;;  %v3843_v58 = vmul.f32 %v6373_v1, %v11703_v19 }
 0x33e   : > { %v5175_v43 = vmul.f32 %v3827_v35, %v11568_v29  ;;  %vm3848_vm14 = vweird.f32 %v6373_v1  ;;  %v3854_v27 = vor.u32 1.1754944e-38, %v3853_v57  ;;  %v3867_v50 = vand.u32 2147483648, %v11715_v7 }
 0x33f   : > { %5430 = vst [vmem:[%s7078_s17 + $0x550] sm:$0xff] %v5174_v48  ;;  %v3836_v11 = vsel %vm11775_vm6, %v6371_v62, %v3832_v9  ;;  %v3844_v53 = vsub.f32 1.0, %v3843_v58  ;;  %6376 = vpow2.f32 %v11650_v34  ;;  %v572_v22 = vsub.f32 0.0, %v11785_v5  ;;  %v11817_v34 = vld [vmem:[%s6904_s24 + $0x5a0] sm:$0xff]  ;;  %vm11833_vm7 = vmor %vm3847_vm4, %vm3848_vm14  ;;  %v11875_v48 = vld [vmem:[%s6904_s24 + $0x5c8] sm:$0xff] }
 0x340   : > { %v6375_v47 = vpop.eup %6374  ;;  %5431 = vst [vmem:[%s7078_s17 + $0x558] sm:$0xff] %v5175_v43  ;;  %v3841_v29 = vsel %vm11730_vm12, %v3840_v10, %v3836_v11  ;;  %vm11807_vm5 = vcmp.eq.f32.partialorder %v3865_v16, 8.507059e+37  ;;  %v573_v26 = vsub.f32 0.0, %v11792_v20  ;;  %v574_v61 = vsub.f32 0.0, %v11795_v41  ;;  %v11885_v43 = vld [vmem:[%s6904_s24 + $0x5d0] sm:$0xff] }
 0x341   : > { %v5176_v28 = vmul.f32 %v3841_v29, %v11573_v54  ;;  %v3845_v31 = vmul.f32 %v6373_v1, %v3844_v53  ;;  %v3857_v4 = vmul.f32 %v6375_v47, %v11715_v7  ;;  %v3868_v59 = vor.u32 1.1754944e-38, %v3867_v50 }
 0x342   : > { %vm3862_vm9 = vweird.f32 %v6375_v47  ;;  %v1004_v40 = vmul.f32 1.442695, %v572_v22  ;;  %v1006_v54 = vmul.f32 1.442695, %v573_v26  ;;  %v1008_v39 = vmul.f32 1.442695, %v574_v61 }
 0x343   : > { %5432 = vst [vmem:[%s7078_s17 + $0x560] sm:$0xff] %v5176_v28  ;;  %v3846_v62 = vadd.f32 %v6373_v1, %v3845_v31  ;;  %v3858_v18 = vsub.f32 1.0, %v3857_v4  ;;  %v575_v37 = vsub.f32 0.0, %v11814_v51  ;;  %v576_v33 = vsub.f32 0.0, %v11817_v34  ;;  %vm11850_vm8 = vmor %vm3861_vm3, %vm3862_vm9 }
 0x344   : > { %6378 = vpow2.f32 %v1004_v40  ;;  %v577_v12 = vsub.f32 0.0, %v11822_v15  ;;  %v578_v19 = vsub.f32 0.0, %v11825_v24  ;;  %v579_v49 = vsub.f32 0.0, %v11828_v2 }
 0x345   : > { %v6377_v17 = vpop.eup %6376  ;;  %v3850_v30 = vsel %vm11833_vm7, %v6373_v1, %v3846_v62  ;;  %v3859_v56 = vmul.f32 %v6375_v47, %v3858_v18  ;;  %6380 = vpow2.f32 %v1006_v54  ;;  %v1010_v52 = vmul.f32 1.442695, %v575_v37 }
 0x346   : > { %v3855_v25 = vsel %vm11779_vm10, %v3854_v27, %v3850_v30  ;;  %v11854_v10 = vadd.f32 1.0, %v6377_v17  ;;  %6382 = vpow2.f32 %v1008_v39  ;;  %v1012_v36 = vmul.f32 1.442695, %v576_v33 }
 0x347   : > { %v5177_v8 = vmul.f32 %v3855_v25, %v11601_v21  ;;  %v3860_v44 = vadd.f32 %v6375_v47, %v3859_v56  ;;  %6384 = vpow2.f32 %v1010_v52  ;;  %v1014_v14 = vmul.f32 1.442695, %v577_v12 }
 0x348   : > { %6386 = vrcp.f32 %v11854_v10  ;;  %v3879_v60 = vand.u32 2147483647, %v11854_v10  ;;  %v3881_v63 = vand.u32 2147483648, %v11854_v10  ;;  %v1016_v57 = vmul.f32 1.442695, %v578_v19 }
 0x349   : > { %5433 = vst [vmem:[%s7078_s17 + $0x568] sm:$0xff] %v5177_v8  ;;  %v3864_v7 = vsel %vm11850_vm8, %v6375_v47, %v3860_v44  ;;  %6388 = vpow2.f32 %v1012_v36  ;;  %v1018_v32 = vmul.f32 1.442695, %v579_v49  ;;  %vm3875_vm11 = vweird.f32 %v11854_v10 }
 0x34a   : > { %v6379_v0 = vpop.eup %6378  ;;  %v3869_v21 = vsel %vm11807_vm5, %v3868_v59, %v3864_v7  ;;  %6390 = vpow2.f32 %v1014_v14  ;;  %vm11878_vm13 = vcmp.eq.f32.partialorder %v3879_v60, 8.507059e+37  ;;  %v580_v53 = vsub.f32 0.0, %v11869_v55 }
 0x34b   : > { %v6381_v46 = vpop.eup %6380  ;;  %v5178_v1 = vmul.f32 %v3869_v21, %v11604_v3  ;;  %v11866_v42 = vadd.f32 1.0, %v6379_v0  ;;  %6392 = vpow2.f32 %v1016_v57  ;;  %v3882_v3 = vor.u32 1.1754944e-38, %v3881_v63 }
 0x34c   : > { %v6383_v38 = vpop.eup %6382  ;;  %v11872_v16 = vadd.f32 1.0, %v6381_v46  ;;  %v581_v13 = vsub.f32 0.0, %v11875_v48  ;;  %v582_v31 = vsub.f32 0.0, %v11885_v43  ;;  %v11931_v52 = vmul.f32 1.442695, %v580_v53  ;;  %v12054_v46 = vld [vmem:[%s6904_s24 + $0x5d8] sm:$0xff] }
 0x34d   : > { %v6385_v35 = vpop.eup %6384  ;;  %5434 = vst [vmem:[%s7078_s17 + $0x570] sm:$0xff] %v5178_v1  ;;  %6394 = vrcp.f32 %v11866_v42  ;;  %v3895_v58 = vand.u32 2147483648, %v11866_v42  ;;  %v3893_v50 = vand.u32 2147483647, %v11866_v42  ;;  %vm3889_vm15 = vweird.f32 %v11866_v42 }
 0x34e   : > { %v6387_v27 = vpop.eup %6386  ;;  %6396 = vrcp.f32 %v11872_v16  ;;  %v3909_v11 = vand.u32 2147483648, %v11872_v16  ;;  %v3907_v29 = vand.u32 2147483647, %v11872_v16  ;;  %v11895_v61 = vadd.f32 1.0, %v6383_v38 }
 0x34f   : > { %v6389_v22 = vpop.eup %6388  ;;  %v3871_v47 = vmul.f32 %v6387_v27, %v11854_v10  ;;  %6398 = vpow2.f32 %v1018_v32  ;;  %v11897_v28 = vadd.f32 1.0, %v6385_v35  ;;  %vm3876_vm12 = vweird.f32 %v6387_v27  ;;  %v12061_v35 = vld [vmem:[%s6904_s24 + $0x5e0] sm:$0xff] }
 0x350   : > { %v6391_v26 = vpop.eup %6390  ;;  %v3896_v59 = vor.u32 1.1754944e-38, %v3895_v58  ;;  %vm3903_vm0 = vweird.f32 %v11872_v16  ;;  %vm11903_vm1 = vcmp.eq.f32.partialorder %v3893_v50, 8.507059e+37  ;;  %v11907_v54 = vor.u32 1.1754944e-38, %v3909_v11  ;;  %vm11924_vm4 = vmor %vm3875_vm11, %vm3876_vm12 }
 0x351   : > { %v3872_v4 = vsub.f32 1.0, %v3871_v47  ;;  %v11901_v6 = vpop.eup %6392  ;;  %6400 = vrcp.f32 %v11895_v61  ;;  %v3923_v39 = vand.u32 2147483648, %v11895_v61  ;;  %v11911_v62 = vadd.f32 1.0, %v6389_v22 }
 0x352   : > { %vm11913_vm2 = vcmp.eq.f32.partialorder %v3907_v29, 8.507059e+37  ;;  %v3921_v12 = vand.u32 2147483647, %v11895_v61  ;;  %6402 = vrcp.f32 %v11897_v28  ;;  %v11919_v19 = vadd.f32 1.0, %v6391_v26 }
 0x353   : > { %v6395_v18 = vpop.eup %6394  ;;  %v3873_v37 = vmul.f32 %v6387_v27, %v3872_v4  ;;  %vm3917_vm3 = vweird.f32 %v11895_v61  ;;  %v3935_v56 = vand.u32 2147483647, %v11897_v28  ;;  %vm3931_vm10 = vweird.f32 %v11897_v28 }
 0x354   : > { %v6397_v49 = vpop.eup %6396  ;;  %v3885_v30 = vmul.f32 %v6395_v18, %v11866_v42  ;;  %vm3890_vm6 = vweird.f32 %v6395_v18  ;;  %v3924_v8 = vor.u32 1.1754944e-38, %v3923_v39  ;;  %v3937_v44 = vand.u32 2147483648, %v11897_v28 }
 0x355   : > { %v11933_v25 = vpop.eup %6398  ;;  %v3874_v45 = vadd.f32 %v6387_v27, %v3873_v37  ;;  %v3899_v36 = vmul.f32 %v6397_v49, %v11872_v16  ;;  %6404 = vrcp.f32 %v11911_v62  ;;  %vm3904_vm14 = vweird.f32 %v6397_v49  ;;  %vm11958_vm9 = vmor %vm3889_vm15, %vm3890_vm6 }
 0x356   : > { %v3886_v10 = vsub.f32 1.0, %v3885_v30  ;;  %vm11941_vm5 = vcmp.eq.f32.partialorder %v3921_v12, 8.507059e+37  ;;  %v3949_v63 = vand.u32 2147483647, %v11911_v62  ;;  %vm11948_vm7 = vcmp.eq.f32.partialorder %v3935_v56, 8.507059e+37  ;;  %vm11967_vm11 = vmor %vm3903_vm0, %vm3904_vm14 }
 0x357   : > { %v3878_v14 = vsel %vm11924_vm4, %v6387_v27, %v3874_v45  ;;  %v3900_v60 = vsub.f32 1.0, %v3899_v36  ;;  %v6401_v57 = vpop.eup %6400  ;;  %v3951_v1 = vand.u32 2147483648, %v11911_v62  ;;  %6406 = vrcp.f32 %v11919_v19  ;;  %v12073_v27 = vld [vmem:[%s6904_s24 + $0x5f0] sm:$0xff] }
 0x358   : > { %v3883_v0 = vsel %vm11878_vm13, %v3882_v3, %v3878_v14  ;;  %v3887_v21 = vmul.f32 %v6395_v18, %v3886_v10  ;;  %v6403_v32 = vpop.eup %6402  ;;  %v3913_v3 = vmul.f32 %v6401_v57, %v11895_v61  ;;  %vm3945_vm8 = vweird.f32 %v11911_v62 }
 0x359   : > { %v5179_v38 = vmul.f32 %v3883_v0, %v11619_v23  ;;  %v3901_v9 = vmul.f32 %v6397_v49, %v3900_v60  ;;  %vm3918_vm13 = vweird.f32 %v6401_v57  ;;  %v3927_v23 = vmul.f32 %v6403_v32, %v11897_v28 }
 0x35a   : > { %v3888_v58 = vadd.f32 %v6395_v18, %v3887_v21  ;;  %v3938_v42 = vor.u32 1.1754944e-38, %v3937_v44  ;;  %v3914_v11 = vsub.f32 1.0, %v3913_v3  ;;  %vm3932_vm15 = vweird.f32 %v6403_v32  ;;  %vm11992_vm4 = vmor %vm3917_vm3, %vm3918_vm13 }
 0x35b   : > { %5435 = vst [vmem:[%s7078_s17 + $0x578] sm:$0xff] %v5179_v38  ;;  %v3902_v50 = vadd.f32 %v6397_v49, %v3901_v9  ;;  %vm11973_vm12 = vcmp.eq.f32.partialorder %v3949_v63, 8.507059e+37  ;;  %v6405_v22 = vpop.eup %6404  ;;  %v3928_v47 = vsub.f32 1.0, %v3927_v23  ;;  %v3952_v29 = vor.u32 1.1754944e-38, %v3951_v1  ;;  %vm12000_vm6 = vmor %vm3931_vm10, %vm3932_vm15  ;;  %v12064_v9 = vld [vmem:[%s6904_s24 + $0x5e8] sm:$0xff] }
 0x35c   : > { %v3892_v16 = vsel %vm11958_vm9, %v6395_v18, %v3888_v58  ;;  %vm3959_vm0 = vweird.f32 %v11919_v19  ;;  %v3915_v39 = vmul.f32 %v6401_v57, %v3914_v11  ;;  %v3941_v37 = vmul.f32 %v6405_v22, %v11911_v62 }
 0x35d   : > { %v3897_v26 = vsel %vm11903_vm1, %v3896_v59, %v3892_v16  ;;  %v3906_v4 = vsel %vm11967_vm11, %v6397_v49, %v3902_v50  ;;  %v6407_v12 = vpop.eup %6406  ;;  %v3929_v59 = vmul.f32 %v6403_v32, %v3928_v47  ;;  %vm3946_vm1 = vweird.f32 %v6405_v22 }
 0x35e   : > { %v5180_v17 = vmul.f32 %v3897_v26, %v11785_v5  ;;  %v3911_v18 = vsel %vm11913_vm2, %v11907_v54, %v3906_v4  ;;  %v3916_v30 = vadd.f32 %v6401_v57, %v3915_v39  ;;  %v3942_v54 = vsub.f32 1.0, %v3941_v37  ;;  %vm12021_vm3 = vmor %vm3945_vm8, %vm3946_vm1 }
 0x35f   : > { %v5181_v49 = vmul.f32 %v3911_v18, %v11792_v20  ;;  %v3955_v33 = vmul.f32 %v6407_v12, %v11919_v19  ;;  %v3930_v61 = vadd.f32 %v6403_v32, %v3929_v59  ;;  %vm3960_vm2 = vweird.f32 %v6407_v12 }
 0x360   : > { %5436 = vst [vmem:[%s7078_s17 + $0x580] sm:$0xff] %v5180_v17  ;;  %v3963_v56 = vand.u32 2147483647, %v11919_v19  ;;  %v3965_v45 = vand.u32 2147483648, %v11919_v19  ;;  %v3920_v20 = vsel %vm11992_vm4, %v6401_v57, %v3916_v30  ;;  %v3943_v36 = vmul.f32 %v6405_v22, %v3942_v54  ;;  %vm12036_vm10 = vmor %vm3959_vm0, %vm3960_vm2 }
 0x361   : > { %5437 = vst [vmem:[%s7078_s17 + $0x588] sm:$0xff] %v5181_v49  ;;  %v3956_v28 = vsub.f32 1.0, %v3955_v33  ;;  %v12012_v10 = vadd.f32 1.0, %v11901_v6  ;;  %v3925_v44 = vsel %vm11941_vm5, %v3924_v8, %v3920_v20  ;;  %v3934_v14 = vsel %vm12000_vm6, %v6403_v32, %v3930_v61  ;;  %v12110_v20 = vld [vmem:[%s6904_s24 + $0x5f8] sm:$0xff] }
 0x362   : > { %v12026_v63 = vadd.f32 1.0, %v11933_v25  ;;  %6408 = vpow2.f32 %v11931_v52  ;;  %v5182_v6 = vmul.f32 %v3925_v44, %v11795_v41  ;;  %v3939_v8 = vsel %vm11948_vm7, %v3938_v42, %v3934_v14 }
 0x363   : > { %v3944_v7 = vadd.f32 %v6405_v22, %v3943_v36  ;;  %v3957_v57 = vmul.f32 %v6407_v12, %v3956_v28  ;;  %v5183_v62 = vmul.f32 %v3939_v8, %v11814_v51  ;;  %vm12040_vm14 = vcmp.eq.f32.partialorder %v3963_v56, 8.507059e+37 }
 0x364   : > { %v3966_v41 = vor.u32 1.1754944e-38, %v3965_v45  ;;  %6410 = vrcp.f32 %v12012_v10  ;;  %5438 = vst [vmem:[%s7078_s17 + $0x590] sm:$0xff] %v5182_v6  ;;  %v3977_v19 = vand.u32 2147483647, %v12012_v10  ;;  %v3979_v38 = vand.u32 2147483648, %v12012_v10 }
 0x365   : > { %v3948_v51 = vsel %vm12021_vm3, %v6405_v22, %v3944_v7  ;;  %v3958_v0 = vadd.f32 %v6407_v12, %v3957_v57  ;;  %6412 = vrcp.f32 %v12026_v63  ;;  %5439 = vst [vmem:[%s7078_s17 + $0x598] sm:$0xff] %v5183_v62  ;;  %vm3973_vm5 = vweird.f32 %v12012_v10  ;;  %v12131_v62 = vld [vmem:[%s6904_s24 + $0x600] sm:$0xff] }
 0x366   : > { %v3953_v21 = vsel %vm11973_vm12, %v3952_v29, %v3948_v51  ;;  %vm3987_vm7 = vweird.f32 %v12026_v63  ;;  %vm12077_vm9 = vcmp.eq.f32.partialorder %v3977_v19, 8.507059e+37  ;;  %v1024_v11 = vmul.f32 1.442695, %v582_v31 }
 0x367   : > { %v5184_v1 = vmul.f32 %v3953_v21, %v11817_v34  ;;  %v3962_v32 = vsel %vm12036_vm10, %v6407_v12, %v3958_v0  ;;  %v1022_v34 = vmul.f32 1.442695, %v581_v13  ;;  %v583_v53 = vsub.f32 0.0, %v12054_v46  ;;  %v12139_v0 = vld [vmem:[%s6904_s24 + $0x608] sm:$0xff] }
 0x368   : > { %v6409_v3 = vpop.eup %6408  ;;  %v3967_v58 = vsel %vm12040_vm14, %v3966_v41, %v3962_v32  ;;  %v3991_v16 = vand.u32 2147483647, %v12026_v63  ;;  %v584_v13 = vsub.f32 0.0, %v12061_v35  ;;  %v585_v47 = vsub.f32 0.0, %v12064_v9 }
 0x369   : > { %5440 = vst [vmem:[%s7078_s17 + $0x5a0] sm:$0xff] %v5184_v1  ;;  %v5185_v23 = vmul.f32 %v3967_v58, %v11822_v15  ;;  %v12081_v50 = vadd.f32 1.0, %v6409_v3  ;;  %6414 = vpow2.f32 %v1022_v34  ;;  %v3980_v26 = vor.u32 1.1754944e-38, %v3979_v38 }
 0x36a   : > { %v6411_v22 = vpop.eup %6410  ;;  %v586_v4 = vsub.f32 0.0, %v12073_v27  ;;  %v3993_v39 = vand.u32 2147483648, %v12026_v63  ;;  %v1026_v17 = vmul.f32 1.442695, %v583_v53  ;;  %v1028_v18 = vmul.f32 1.442695, %v584_v13 }
 0x36b   : > { %v6413_v15 = vpop.eup %6412  ;;  %5441 = vst [vmem:[%s7078_s17 + $0x5a8] sm:$0xff] %v5185_v23  ;;  %v3969_v29 = vmul.f32 %v6411_v22, %v12012_v10  ;;  %6416 = vrcp.f32 %v12081_v50  ;;  %vm3974_vm8 = vweird.f32 %v6411_v22  ;;  %v4005_v37 = vand.u32 2147483647, %v12081_v50 }
 0x36c   : > { %v3983_v31 = vmul.f32 %v6413_v15, %v12026_v63  ;;  %6418 = vpow2.f32 %v1024_v11  ;;  %vm3988_vm11 = vweird.f32 %v6413_v15  ;;  %v4007_v59 = vand.u32 2147483648, %v12081_v50  ;;  %vm12104_vm15 = vmor %vm3973_vm5, %vm3974_vm8 }
 0x36d   : > { %v3970_v12 = vsub.f32 1.0, %v3969_v29  ;;  %v1030_v49 = vmul.f32 1.442695, %v585_v47  ;;  %vm12097_vm13 = vcmp.eq.f32.partialorder %v3991_v16, 8.507059e+37  ;;  %6420 = vpow2.f32 %v1026_v17  ;;  %vm12115_vm0 = vmor %vm3987_vm7, %vm3988_vm11 }
 0x36e   : > { %v3984_v40 = vsub.f32 1.0, %v3983_v31  ;;  %v1032_v54 = vmul.f32 1.442695, %v586_v4  ;;  %v3994_v45 = vor.u32 1.1754944e-38, %v3993_v39  ;;  %vm4001_vm12 = vweird.f32 %v12081_v50 }
 0x36f   : > { %v3971_v30 = vmul.f32 %v6411_v22, %v3970_v12  ;;  %v6415_v33 = vpop.eup %6414  ;;  %6422 = vpow2.f32 %v1028_v18  ;;  %vm12119_vm4 = vcmp.eq.f32.partialorder %v4005_v37, 8.507059e+37  ;;  %v4008_v8 = vor.u32 1.1754944e-38, %v4007_v59 }
 0x370   : > { %v3985_v56 = vmul.f32 %v6413_v15, %v3984_v40  ;;  %v12123_v14 = vadd.f32 1.0, %v6415_v33  ;;  %6424 = vpow2.f32 %v1030_v49  ;;  %v587_v57 = vsub.f32 0.0, %v12110_v20 }
 0x371   : > { %v6417_v36 = vpop.eup %6416  ;;  %v3972_v28 = vadd.f32 %v6411_v22, %v3971_v30  ;;  %6426 = vpow2.f32 %v1032_v54  ;;  %v588_v42 = vsub.f32 0.0, %v12131_v62 }
 0x372   : > { %v3986_v60 = vadd.f32 %v6413_v15, %v3985_v56  ;;  %v3997_v6 = vmul.f32 %v6417_v36, %v12081_v50  ;;  %v6419_v7 = vpop.eup %6418  ;;  %vm4002_vm1 = vweird.f32 %v6417_v36  ;;  %6428 = vrcp.f32 %v12123_v14 }
 0x373   : > { %v3976_v63 = vsel %vm12104_vm15, %v6411_v22, %v3972_v28  ;;  %v4019_v51 = vand.u32 2147483647, %v12123_v14  ;;  %v6421_v19 = vpop.eup %6420  ;;  %v4021_v32 = vand.u32 2147483648, %v12123_v14  ;;  %v12145_v38 = vadd.f32 1.0, %v6419_v7  ;;  %vm12155_vm6 = vmor %vm4001_vm12, %vm4002_vm1 }
 0x374   : > { %v3981_v25 = vsel %vm12077_vm9, %v3980_v26, %v3976_v63  ;;  %v3990_v52 = vsel %vm12115_vm0, %v6413_v15, %v3986_v60  ;;  %v3998_v41 = vsub.f32 1.0, %v3997_v6  ;;  %v12148_v23 = vadd.f32 1.0, %v6421_v19 }
 0x375   : > { %v5186_v21 = vmul.f32 %v3981_v25, %v11825_v24  ;;  %v3995_v1 = vsel %vm12097_vm13, %v3994_v45, %v3990_v52  ;;  %v6423_v3 = vpop.eup %6422  ;;  %6430 = vrcp.f32 %v12145_v38  ;;  %v4035_v53 = vand.u32 2147483648, %v12145_v38 }
 0x376   : > { %v5187_v58 = vmul.f32 %v3995_v1, %v11828_v2  ;;  %v3999_v34 = vmul.f32 %v6417_v36, %v3998_v41  ;;  %v6425_v11 = vpop.eup %6424  ;;  %v1034_v22 = vmul.f32 1.442695, %v587_v57  ;;  %v589_v2 = vsub.f32 0.0, %v12139_v0 }
 0x377   : > { %5442 = vst [vmem:[%s7078_s17 + $0x5b0] sm:$0xff] %v5186_v21  ;;  %v6427_v16 = vpop.eup %6426  ;;  %vm4015_vm2 = vweird.f32 %v12123_v14  ;;  %v4033_v47 = vand.u32 2147483647, %v12145_v38  ;;  %6432 = vrcp.f32 %v12148_v23  ;;  %vm12166_vm3 = vcmp.eq.f32.partialorder %v4019_v51, 8.507059e+37 }
 0x378   : > { %5443 = vst [vmem:[%s7078_s17 + $0x5b8] sm:$0xff] %v5187_v58  ;;  %v4000_v13 = vadd.f32 %v6417_v36, %v3999_v34  ;;  %v6429_v50 = vpop.eup %6428  ;;  %v4022_v29 = vor.u32 1.1754944e-38, %v4021_v32  ;;  %vm4029_vm10 = vweird.f32 %v12145_v38  ;;  %v12171_v26 = vadd.f32 1.0, %v6423_v3 }
 0x379   : > { %v4011_v31 = vmul.f32 %v6429_v50, %v12123_v14  ;;  %v4047_v39 = vand.u32 2147483647, %v12148_v23  ;;  %v4049_v37 = vand.u32 2147483648, %v12148_v23  ;;  %v4036_v17 = vor.u32 1.1754944e-38, %v4035_v53 }
 0x37a   : > { %v4004_v4 = vsel %vm12155_vm6, %v6417_v36, %v4000_v13  ;;  %vm4043_vm14 = vweird.f32 %v12148_v23  ;;  %6434 = vrcp.f32 %v12171_v26  ;;  %vm4016_vm5 = vweird.f32 %v6429_v50 }
 0x37b   : > { %v4009_v12 = vsel %vm12119_vm4, %v4008_v8, %v4004_v4  ;;  %v4012_v40 = vsub.f32 1.0, %v4011_v31  ;;  %vm12183_vm7 = vcmp.eq.f32.partialorder %v4033_v47, 8.507059e+37  ;;  %v4061_v49 = vand.u32 2147483647, %v12171_v26  ;;  %v6431_v30 = vpop.eup %6430  ;;  %vm12201_vm8 = vmor %vm4015_vm2, %vm4016_vm5 }
 0x37c   : > { %v5188_v18 = vmul.f32 %v4009_v12, %v11869_v55  ;;  %v4063_v5 = vand.u32 2147483648, %v12171_v26  ;;  %v12189_v54 = vadd.f32 1.0, %v6425_v11  ;;  %v12191_v33 = vadd.f32 1.0, %v6427_v16 }
 0x37d   : > { %6436 = vpow2.f32 %v1034_v22  ;;  %v6433_v61 = vpop.eup %6432  ;;  %v4013_v56 = vmul.f32 %v6429_v50, %v4012_v40  ;;  %v4025_v55 = vmul.f32 %v6431_v30, %v12145_v38  ;;  %vm12195_vm9 = vcmp.eq.f32.partialorder %v4047_v39, 8.507059e+37  ;;  %v12268_v40 = vld [vmem:[%s6904_s24 + $0x610] sm:$0xff] }
 0x37e   : > { %5444 = vst [vmem:[%s7078_s17 + $0x5c0] sm:$0xff] %v5188_v18  ;;  %v4050_v36 = vor.u32 1.1754944e-38, %v4049_v37  ;;  %v4039_v44 = vmul.f32 %v6433_v61, %v12148_v23  ;;  %vm4057_vm11 = vweird.f32 %v12171_v26  ;;  %6438 = vrcp.f32 %v12189_v54 }
 0x37f   : > { %v1036_v10 = vmul.f32 1.442695, %v588_v42  ;;  %v4014_v60 = vadd.f32 %v6429_v50, %v4013_v56  ;;  %v4026_v6 = vsub.f32 1.0, %v4025_v55  ;;  %vm4030_vm13 = vweird.f32 %v6431_v30 }
 0x380   : > { %vm12208_vm15 = vcmp.eq.f32.partialorder %v4061_v49, 8.507059e+37  ;;  %v6435_v7 = vpop.eup %6434  ;;  %v4040_v14 = vsub.f32 1.0, %v4039_v44  ;;  %vm4044_vm12 = vweird.f32 %v6433_v61  ;;  %v4064_v63 = vor.u32 1.1754944e-38, %v4063_v5  ;;  %vm12221_vm0 = vmor %vm4029_vm10, %vm4030_vm13 }
 0x381   : > { %6440 = vrcp.f32 %v12191_v33  ;;  %v4018_v57 = vsel %vm12201_vm8, %v6429_v50, %v4014_v60  ;;  %v4027_v25 = vmul.f32 %v6431_v30, %v4026_v6  ;;  %v4053_v52 = vmul.f32 %v6435_v7, %v12171_v26  ;;  %vm12231_vm1 = vmor %vm4043_vm14, %vm4044_vm12  ;;  %v12304_v60 = vld [vmem:[%s6904_s24 + $0x618] sm:$0xff] }
 0x382   : > { %v4075_v41 = vand.u32 2147483647, %v12189_v54  ;;  %v4023_v19 = vsel %vm12166_vm3, %v4022_v29, %v4018_v57  ;;  %v4041_v1 = vmul.f32 %v6433_v61, %v4040_v14  ;;  %vm4071_vm4 = vweird.f32 %v12189_v54  ;;  %v12310_v14 = vld [vmem:[%s6904_s24 + $0x620] sm:$0xff] }
 0x383   : > { %v6437_v51 = vpop.eup %6436  ;;  %v4077_v32 = vand.u32 2147483648, %v12189_v54  ;;  %v5189_v3 = vmul.f32 %v4023_v19, %v11875_v48  ;;  %v4028_v58 = vadd.f32 %v6431_v30, %v4027_v25  ;;  %v4054_v38 = vsub.f32 1.0, %v4053_v52 }
 0x384   : > { %vm4058_vm6 = vweird.f32 %v6435_v7  ;;  %v6439_v42 = vpop.eup %6438  ;;  %v4042_v11 = vadd.f32 %v6433_v61, %v4041_v1  ;;  %vm4085_vm2 = vweird.f32 %v12191_v33  ;;  %v12236_v24 = vadd.f32 1.0, %v6437_v51  ;;  %v12322_v51 = vld [vmem:[%s6904_s24 + $0x630] sm:$0xff] }
 0x385   : > { %6442 = vpow2.f32 %v1036_v10  ;;  %5445 = vst [vmem:[%s7078_s17 + $0x5c8] sm:$0xff] %v5189_v3  ;;  %v4032_v48 = vsel %vm12221_vm0, %v6431_v30, %v4028_v58  ;;  %v4055_v53 = vmul.f32 %v6435_v7, %v4054_v38  ;;  %v4067_v23 = vmul.f32 %v6439_v42, %v12189_v54  ;;  %vm12252_vm10 = vmor %vm4057_vm11, %vm4058_vm6  ;;  %v12333_v58 = vld [vmem:[%s6904_s24 + $0x638] sm:$0xff] }
 0x386   : > { %vm12242_vm3 = vcmp.eq.f32.partialorder %v4075_v41, 8.507059e+37  ;;  %v4037_v13 = vsel %vm12183_vm7, %v4036_v17, %v4032_v48  ;;  %v4046_v47 = vsel %vm12231_vm1, %v6433_v61, %v4042_v11  ;;  %vm4072_vm14 = vweird.f32 %v6439_v42 }
 0x387   : > { %v6441_v16 = vpop.eup %6440  ;;  %v4078_v15 = vor.u32 1.1754944e-38, %v4077_v32  ;;  %v5190_v29 = vmul.f32 %v4037_v13, %v11885_v43  ;;  %v4051_v4 = vsel %vm12195_vm9, %v4050_v36, %v4046_v47  ;;  %v4056_v31 = vadd.f32 %v6435_v7, %v4055_v53  ;;  %vm12276_vm7 = vmor %vm4071_vm4, %vm4072_vm14 }
 0x388   : > { %v4068_v39 = vsub.f32 1.0, %v4067_v23  ;;  %v5191_v37 = vmul.f32 %v4051_v4, %v12054_v46  ;;  %v4081_v12 = vmul.f32 %v6441_v16, %v12191_v33  ;;  %v4089_v26 = vand.u32 2147483647, %v12191_v33 }
 0x389   : > { %6444 = vrcp.f32 %v12236_v24  ;;  %5446 = vst [vmem:[%s7078_s17 + $0x5d0] sm:$0xff] %v5190_v29  ;;  %v4060_v17 = vsel %vm12252_vm10, %v6435_v7, %v4056_v31  ;;  %vm4086_vm5 = vweird.f32 %v6441_v16  ;;  %v4091_v43 = vand.u32 2147483648, %v12191_v33 }
 0x38a   : > { %v4069_v18 = vmul.f32 %v6439_v42, %v4068_v39  ;;  %5447 = vst [vmem:[%s7078_s17 + $0x5d8] sm:$0xff] %v5191_v37  ;;  %v4065_v46 = vsel %vm12208_vm15, %v4064_v63, %v4060_v17  ;;  %v4082_v30 = vsub.f32 1.0, %v4081_v12  ;;  %v4103_v5 = vand.u32 2147483647, %v12236_v24  ;;  %vm12294_vm9 = vmor %vm4085_vm2, %vm4086_vm5  ;;  %v12313_v63 = vld [vmem:[%s6904_s24 + $0x628] sm:$0xff] }
 0x38b   : > { %v6443_v59 = vpop.eup %6442  ;;  %v1038_v61 = vmul.f32 1.442695, %v589_v2  ;;  %v5192_v56 = vmul.f32 %v4065_v46, %v12061_v35  ;;  %v4105_v45 = vand.u32 2147483648, %v12236_v24  ;;  %v590_v28 = vsub.f32 0.0, %v12268_v40 }
 0x38c   : > { %v4070_v55 = vadd.f32 %v6439_v42, %v4069_v18  ;;  %v12285_v36 = vadd.f32 1.0, %v6443_v59  ;;  %v4083_v54 = vmul.f32 %v6441_v16, %v4082_v30  ;;  %vm12298_vm8 = vcmp.eq.f32.partialorder %v4089_v26, 8.507059e+37 }
 0x38d   : > { %6446 = vpow2.f32 %v1038_v61  ;;  %5448 = vst [vmem:[%s7078_s17 + $0x5e0] sm:$0xff] %v5192_v56  ;;  %v4092_v10 = vor.u32 1.1754944e-38, %v4091_v43  ;;  %vm4099_vm11 = vweird.f32 %v12236_v24  ;;  %v1040_v7 = vmul.f32 1.442695, %v590_v28  ;;  %v12379_v56 = vld [vmem:[%s6904_s24 + $0x640] sm:$0xff] }
 0x38e   : > { %v4074_v44 = vsel %vm12276_vm7, %v6439_v42, %v4070_v55  ;;  %6448 = vrcp.f32 %v12285_v36  ;;  %v4084_v33 = vadd.f32 %v6441_v16, %v4083_v54  ;;  %vm12317_vm13 = vcmp.eq.f32.partialorder %v4103_v5, 8.507059e+37 }
 0x38f   : > { %v6445_v6 = vpop.eup %6444  ;;  %v4079_v8 = vsel %vm12242_vm3, %v4078_v15, %v4074_v44  ;;  %v4106_v41 = vor.u32 1.1754944e-38, %v4105_v45  ;;  %6450 = vpow2.f32 %v1040_v7  ;;  %v591_v21 = vsub.f32 0.0, %v12304_v60  ;;  %v12398_v7 = vld [vmem:[%s6904_s24 + $0x650] sm:$0xff] }
 0x390   : > { %v5193_v57 = vmul.f32 %v4079_v8, %v12064_v9  ;;  %v4095_v25 = vmul.f32 %v6445_v6, %v12236_v24  ;;  %v4088_v19 = vsel %vm12294_vm9, %v6441_v16, %v4084_v33  ;;  %vm4100_vm15 = vweird.f32 %v6445_v6 }
 0x391   : > { %v4093_v9 = vsel %vm12298_vm8, %v4092_v10, %v4088_v19  ;;  %v592_v32 = vsub.f32 0.0, %v12310_v14  ;;  %v593_v3 = vsub.f32 0.0, %v12313_v63  ;;  %vm4113_vm12 = vweird.f32 %v12285_v36  ;;  %vm12344_vm0 = vmor %vm4099_vm11, %vm4100_vm15  ;;  %v12391_v10 = vld [vmem:[%s6904_s24 + $0x648] sm:$0xff] }
 0x392   : > { %5449 = vst [vmem:[%s7078_s17 + $0x5e8] sm:$0xff] %v5193_v57  ;;  %v4096_v1 = vsub.f32 1.0, %v4095_v25  ;;  %v5194_v38 = vmul.f32 %v4093_v9, %v12073_v27  ;;  %v1042_v42 = vmul.f32 1.442695, %v591_v21  ;;  %v594_v11 = vsub.f32 0.0, %v12322_v51 }
 0x393   : > { %v6447_v34 = vpop.eup %6446  ;;  %v1044_v22 = vmul.f32 1.442695, %v592_v32  ;;  %v1046_v16 = vmul.f32 1.442695, %v593_v3  ;;  %v595_v50 = vsub.f32 0.0, %v12333_v58  ;;  %v4119_v4 = vand.u32 2147483648, %v12285_v36 }
 0x394   : > { %v6449_v48 = vpop.eup %6448  ;;  %v4097_v53 = vmul.f32 %v6445_v6, %v4096_v1  ;;  %v12338_v23 = vadd.f32 1.0, %v6447_v34  ;;  %5450 = vst [vmem:[%s7078_s17 + $0x5f0] sm:$0xff] %v5194_v38  ;;  %6452 = vpow2.f32 %v1042_v42  ;;  %v1048_v47 = vmul.f32 1.442695, %v594_v11 }
 0x395   : > { %v4109_v27 = vmul.f32 %v6449_v48, %v12285_v36  ;;  %v4117_v29 = vand.u32 2147483647, %v12285_v36  ;;  %v6451_v31 = vpop.eup %6450  ;;  %vm4114_vm4 = vweird.f32 %v6449_v48  ;;  %v1050_v43 = vmul.f32 1.442695, %v595_v50 }
 0x396   : > { %v4098_v15 = vadd.f32 %v6445_v6, %v4097_v53  ;;  %6454 = vrcp.f32 %v12338_v23  ;;  %v4131_v24 = vand.u32 2147483647, %v12338_v23  ;;  %v4133_v12 = vand.u32 2147483648, %v12338_v23  ;;  %vm12364_vm1 = vmor %vm4113_vm12, %vm4114_vm4 }
 0x397   : > { %v4110_v39 = vsub.f32 1.0, %v4109_v27  ;;  %6456 = vpow2.f32 %v1044_v22  ;;  %v12357_v26 = vadd.f32 1.0, %v6451_v31  ;;  %v4120_v49 = vor.u32 1.1754944e-38, %v4119_v4 }
 0x398   : > { %v4102_v37 = vsel %vm12344_vm0, %v6445_v6, %v4098_v15  ;;  %6458 = vpow2.f32 %v1046_v16  ;;  %vm12369_vm6 = vcmp.eq.f32.partialorder %v4117_v29, 8.507059e+37  ;;  %vm4127_vm2 = vweird.f32 %v12338_v23 }
 0x399   : > { %v4107_v17 = vsel %vm12317_vm13, %v4106_v41, %v4102_v37  ;;  %v4111_v18 = vmul.f32 %v6449_v48, %v4110_v39  ;;  %6460 = vpow2.f32 %v1048_v47  ;;  %vm12374_vm3 = vcmp.eq.f32.partialorder %v4131_v24, 8.507059e+37  ;;  %v12539_v37 = vld [vmem:[%s6904_s24 + $0x660] sm:$0xff] }
 0x39a   : > { %v5195_v59 = vmul.f32 %v4107_v17, %v12110_v20  ;;  %6462 = vrcp.f32 %v12357_v26  ;;  %v6453_v30 = vpop.eup %6452  ;;  %v4134_v45 = vor.u32 1.1754944e-38, %v4133_v12  ;;  %vm4141_vm10 = vweird.f32 %v12357_v26 }
 0x39b   : > { %v4112_v5 = vadd.f32 %v6449_v48, %v4111_v18  ;;  %v4145_v36 = vand.u32 2147483647, %v12357_v26  ;;  %v12384_v54 = vadd.f32 1.0, %v6453_v30  ;;  %v4147_v2 = vand.u32 2147483648, %v12357_v26 }
 0x39c   : > { %v6455_v55 = vpop.eup %6454  ;;  %5451 = vst [vmem:[%s7078_s17 + $0x5f8] sm:$0xff] %v5195_v59  ;;  %6464 = vpow2.f32 %v1050_v43  ;;  %v596_v33 = vsub.f32 0.0, %v12379_v56  ;;  %v597_v3 = vsub.f32 0.0, %v12391_v10  ;;  %v598_v42 = vsub.f32 0.0, %v12398_v7 }
 0x39d   : > { %v6457_v28 = vpop.eup %6456  ;;  %v4116_v44 = vsel %vm12364_vm1, %v6449_v48, %v4112_v5  ;;  %v4123_v35 = vmul.f32 %v6455_v55, %v12338_v23  ;;  %vm4128_vm14 = vweird.f32 %v6455_v55  ;;  %6466 = vrcp.f32 %v12384_v54 }
 0x39e   : > { %v6459_v6 = vpop.eup %6458  ;;  %v4121_v8 = vsel %vm12369_vm6, %v4120_v49, %v4116_v44  ;;  %v4159_v41 = vand.u32 2147483647, %v12384_v54  ;;  %v12402_v19 = vadd.f32 1.0, %v6457_v28  ;;  %vm12404_vm5 = vcmp.eq.f32.partialorder %v4145_v36, 8.507059e+37  ;;  %vm12418_vm7 = vmor %vm4127_vm2, %vm4128_vm14 }
 0x39f   : > { %v6461_v57 = vpop.eup %6460  ;;  %v5196_v25 = vmul.f32 %v4121_v8, %v12131_v62  ;;  %v4124_v52 = vsub.f32 1.0, %v4123_v35  ;;  %v4161_v1 = vand.u32 2147483648, %v12384_v54  ;;  %v12409_v32 = vadd.f32 1.0, %v6459_v6 }
 0x3a0   : > { %v6463_v21 = vpop.eup %6462  ;;  %v4148_v38 = vor.u32 1.1754944e-38, %v4147_v2  ;;  %vm4155_vm8 = vweird.f32 %v12384_v54  ;;  %6468 = vrcp.f32 %v12402_v19  ;;  %v12424_v48 = vadd.f32 1.0, %v6461_v57 }
 0x3a1   : > { %5452 = vst [vmem:[%s7078_s17 + $0x600] sm:$0xff] %v5196_v25  ;;  %v4125_v34 = vmul.f32 %v6455_v55, %v4124_v52  ;;  %v4137_v62 = vmul.f32 %v6463_v21, %v12357_v26  ;;  %vm4142_vm9 = vweird.f32 %v6463_v21  ;;  %vm12426_vm11 = vcmp.eq.f32.partialorder %v4159_v41, 8.507059e+37 }
 0x3a2   : > { %v6465_v53 = vpop.eup %6464  ;;  %v4173_v23 = vand.u32 2147483647, %v12402_v19  ;;  %6470 = vrcp.f32 %v12409_v32  ;;  %v4162_v47 = vor.u32 1.1754944e-38, %v4161_v1  ;;  %v4175_v50 = vand.u32 2147483648, %v12402_v19  ;;  %vm12443_vm15 = vmor %vm4141_vm10, %vm4142_vm9 }
 0x3a3   : > { %v4126_v22 = vadd.f32 %v6455_v55, %v4125_v34  ;;  %v4138_v16 = vsub.f32 1.0, %v4137_v62  ;;  %v6467_v27 = vpop.eup %6466  ;;  %v4187_v15 = vand.u32 2147483647, %v12409_v32  ;;  %v1052_v29 = vmul.f32 1.442695, %v596_v33 }
 0x3a4   : > { %v4151_v39 = vmul.f32 %v6467_v27, %v12384_v54  ;;  %vm4169_vm13 = vweird.f32 %v12402_v19  ;;  %vm4183_vm12 = vweird.f32 %v12409_v32  ;;  %v4189_v12 = vand.u32 2147483648, %v12409_v32 }
 0x3a5   : > { %v4130_v4 = vsel %vm12418_vm7, %v6455_v55, %v4126_v22  ;;  %v4139_v31 = vmul.f32 %v6463_v21, %v4138_v16  ;;  %6472 = vrcp.f32 %v12424_v48  ;;  %vm4156_vm0 = vweird.f32 %v6467_v27 }
 0x3a6   : > { %v4135_v24 = vsel %vm12374_vm3, %v4134_v45, %v4130_v4  ;;  %v4152_v43 = vsub.f32 1.0, %v4151_v39  ;;  %vm12451_vm4 = vcmp.eq.f32.partialorder %v4173_v23, 8.507059e+37  ;;  %v6469_v26 = vpop.eup %6468  ;;  %v4176_v46 = vor.u32 1.1754944e-38, %v4175_v50  ;;  %vm12470_vm6 = vmor %vm4155_vm8, %vm4156_vm0  ;;  %v12532_v4 = vld [vmem:[%s6904_s24 + $0x658] sm:$0xff] }
 0x3a7   : > { %v5197_v17 = vmul.f32 %v4135_v24, %v12139_v0  ;;  %v4140_v18 = vadd.f32 %v6463_v21, %v4139_v31  ;;  %vm12455_vm1 = vcmp.eq.f32.partialorder %v4187_v15, 8.507059e+37  ;;  %v12459_v30 = vadd.f32 1.0, %v6465_v53 }
 0x3a8   : > { %6474 = vpow2.f32 %v1052_v29  ;;  %v6471_v5 = vpop.eup %6470  ;;  %v4153_v61 = vmul.f32 %v6467_v27, %v4152_v43  ;;  %v4165_v20 = vmul.f32 %v6469_v26, %v12402_v19  ;;  %v4201_v55 = vand.u32 2147483647, %v12424_v48  ;;  %v12547_v43 = vld [vmem:[%s6904_s24 + $0x670] sm:$0xff] }
 0x3a9   : > { %5453 = vst [vmem:[%s7078_s17 + $0x608] sm:$0xff] %v5197_v17  ;;  %v4144_v0 = vsel %vm12443_vm15, %v6463_v21, %v4140_v18  ;;  %v4179_v28 = vmul.f32 %v6471_v5, %v12409_v32  ;;  %v4190_v44 = vor.u32 1.1754944e-38, %v4189_v12  ;;  %vm4197_vm2 = vweird.f32 %v12424_v48  ;;  %v12542_v12 = vld [vmem:[%s6904_s24 + $0x668] sm:$0xff] }
 0x3aa   : > { %v4149_v45 = vsel %vm12404_vm5, %v4148_v38, %v4144_v0  ;;  %v4154_v2 = vadd.f32 %v6467_v27, %v4153_v61  ;;  %v4166_v6 = vsub.f32 1.0, %v4165_v20  ;;  %vm4170_vm3 = vweird.f32 %v6469_v26 }
 0x3ab   : > { %v5198_v35 = vmul.f32 %v4149_v45, %v12268_v40  ;;  %v6473_v8 = vpop.eup %6472  ;;  %v4180_v33 = vsub.f32 1.0, %v4179_v28  ;;  %vm4184_vm10 = vweird.f32 %v6471_v5  ;;  %v4203_v57 = vand.u32 2147483648, %v12424_v48  ;;  %vm12491_vm5 = vmor %vm4169_vm13, %vm4170_vm3 }
 0x3ac   : > { %6476 = vrcp.f32 %v12459_v30  ;;  %v4158_v54 = vsel %vm12470_vm6, %v6467_v27, %v4154_v2  ;;  %v4167_v25 = vmul.f32 %v6469_v26, %v4166_v6  ;;  %v4193_v52 = vmul.f32 %v6473_v8, %v12424_v48  ;;  %vm12500_vm9 = vmor %vm4183_vm12, %vm4184_vm10 }
 0x3ad   : > { %5454 = vst [vmem:[%s7078_s17 + $0x610] sm:$0xff] %v5198_v35  ;;  %vm12483_vm14 = vcmp.eq.f32.partialorder %v4201_v55, 8.507059e+37  ;;  %v4163_v21 = vsel %vm12426_vm11, %v4162_v47, %v4158_v54  ;;  %v4181_v1 = vmul.f32 %v6471_v5, %v4180_v33  ;;  %vm4198_vm7 = vweird.f32 %v6473_v8  ;;  %v12576_v33 = vld [vmem:[%s6904_s24 + $0x680] sm:$0xff] }
 0x3ae   : > { %v6475_v40 = vpop.eup %6474  ;;  %v4215_v34 = vand.u32 2147483647, %v12459_v30  ;;  %v5199_v62 = vmul.f32 %v4163_v21, %v12304_v60  ;;  %v4168_v38 = vadd.f32 %v6469_v26, %v4167_v25  ;;  %v4194_v53 = vsub.f32 1.0, %v4193_v52  ;;  %vm12521_vm11 = vmor %vm4197_vm2, %vm4198_vm7 }
 0x3af   : > { %v12504_v19 = vadd.f32 1.0, %v6475_v40  ;;  %v4182_v22 = vadd.f32 %v6471_v5, %v4181_v1  ;;  %v4204_v16 = vor.u32 1.1754944e-38, %v4203_v57  ;;  %vm4211_vm8 = vweird.f32 %v12459_v30  ;;  %v12585_v1 = vld [vmem:[%s6904_s24 + $0x688] sm:$0xff] }
 0x3b0   : > { %v4217_v13 = vand.u32 2147483648, %v12459_v30  ;;  %5455 = vst [vmem:[%s7078_s17 + $0x618] sm:$0xff] %v5199_v62  ;;  %v4172_v60 = vsel %vm12491_vm5, %v6469_v26, %v4168_v38  ;;  %v4195_v32 = vmul.f32 %v6473_v8, %v4194_v53  ;;  %v1054_v23 = vmul.f32 1.442695, %v597_v3 }
 0x3b1   : > { %6478 = vrcp.f32 %v12504_v19  ;;  %v4177_v47 = vsel %vm12451_vm4, %v4176_v46, %v4172_v60  ;;  %v4186_v50 = vsel %vm12500_vm9, %v6471_v5, %v4182_v22  ;;  %vm12525_vm13 = vcmp.eq.f32.partialorder %v4215_v34, 8.507059e+37  ;;  %v12559_v5 = vld [vmem:[%s6904_s24 + $0x678] sm:$0xff] }
 0x3b2   : > { %v6477_v27 = vpop.eup %6476  ;;  %v1056_v3 = vmul.f32 1.442695, %v598_v42  ;;  %v5200_v31 = vmul.f32 %v4177_v47, %v12310_v14  ;;  %v4191_v48 = vsel %vm12455_vm1, %v4190_v44, %v4186_v50  ;;  %v4196_v39 = vadd.f32 %v6473_v8, %v4195_v32 }
 0x3b3   : > { %v4207_v24 = vmul.f32 %v6477_v27, %v12459_v30  ;;  %v5201_v17 = vmul.f32 %v4191_v48, %v12313_v63  ;;  %vm4212_vm15 = vweird.f32 %v6477_v27  ;;  %v4218_v42 = vor.u32 1.1754944e-38, %v4217_v13 }
 0x3b4   : > { %v4231_v18 = vand.u32 2147483648, %v12504_v19  ;;  %5456 = vst [vmem:[%s7078_s17 + $0x620] sm:$0xff] %v5200_v31  ;;  %v4200_v14 = vsel %vm12521_vm11, %v6473_v8, %v4196_v39  ;;  %6480 = vpow2.f32 %v1054_v23  ;;  %v599_v26 = vsub.f32 0.0, %v12532_v4  ;;  %vm12566_vm12 = vmor %vm4211_vm8, %vm4212_vm15 }
 0x3b5   : > { %v4208_v59 = vsub.f32 1.0, %v4207_v24  ;;  %5457 = vst [vmem:[%s7078_s17 + $0x628] sm:$0xff] %v5201_v17  ;;  %v4205_v46 = vsel %vm12483_vm14, %v4204_v16, %v4200_v14  ;;  %6482 = vpow2.f32 %v1056_v3  ;;  %v600_v63 = vsub.f32 0.0, %v12539_v37 }
 0x3b6   : > { %v601_v49 = vsub.f32 0.0, %v12542_v12  ;;  %v5202_v61 = vmul.f32 %v4205_v46, %v12322_v51  ;;  %v1058_v55 = vmul.f32 1.442695, %v599_v26  ;;  %v602_v45 = vsub.f32 0.0, %v12547_v43 }
 0x3b7   : > { %v6479_v0 = vpop.eup %6478  ;;  %v4209_v20 = vmul.f32 %v6477_v27, %v4208_v59  ;;  %vm4225_vm0 = vweird.f32 %v12504_v19  ;;  %v1060_v44 = vmul.f32 1.442695, %v600_v63  ;;  %v603_v6 = vsub.f32 0.0, %v12559_v5 }
 0x3b8   : > { %v4221_v28 = vmul.f32 %v6479_v0, %v12504_v19  ;;  %v1062_v35 = vmul.f32 1.442695, %v601_v49  ;;  %5458 = vst [vmem:[%s7078_s17 + $0x630] sm:$0xff] %v5202_v61  ;;  %6484 = vpow2.f32 %v1058_v55  ;;  %v1064_v2 = vmul.f32 1.442695, %v602_v45 }
 0x3b9   : > { %v4210_v51 = vadd.f32 %v6477_v27, %v4209_v20  ;;  %vm4226_vm4 = vweird.f32 %v6479_v0  ;;  %v4229_v30 = vand.u32 2147483647, %v12504_v19  ;;  %6486 = vpow2.f32 %v1060_v44 }
 0x3ba   : > { %v4222_v8 = vsub.f32 1.0, %v4221_v28  ;;  %v6481_v57 = vpop.eup %6480  ;;  %v4232_v25 = vor.u32 1.1754944e-38, %v4231_v18  ;;  %6488 = vpow2.f32 %v1062_v35  ;;  %v1066_v52 = vmul.f32 1.442695, %v603_v6  ;;  %vm12591_vm1 = vmor %vm4225_vm0, %vm4226_vm4 }
 0x3bb   : > { %v4214_v54 = vsel %vm12566_vm12, %v6477_v27, %v4210_v51  ;;  %v6483_v41 = vpop.eup %6482  ;;  %v12582_v9 = vadd.f32 1.0, %v6481_v57  ;;  %6490 = vpow2.f32 %v1064_v2  ;;  %v604_v11 = vsub.f32 0.0, %v12576_v33 }
 0x3bc   : > { %v4219_v40 = vsel %vm12525_vm13, %v4218_v42, %v4214_v54  ;;  %v4223_v21 = vmul.f32 %v6479_v0, %v4222_v8  ;;  %v12595_v38 = vadd.f32 1.0, %v6483_v41  ;;  %6492 = vpow2.f32 %v1066_v52  ;;  %v12775_v41 = vld [vmem:[%s6904_s24 + $0x6a8] sm:$0xff] }
 0x3bd   : > { %v5203_v34 = vmul.f32 %v4219_v40, %v12333_v58  ;;  %vm4230_vm6 = vcmp.eq.f32.partialorder %v4229_v30, 8.507059e+37  ;;  %6494 = vrcp.f32 %v12582_v9  ;;  %v4243_v58 = vand.u32 2147483647, %v12582_v9 }
 0x3be   : > { %v4224_v53 = vadd.f32 %v6479_v0, %v4223_v21  ;;  %v6485_v22 = vpop.eup %6484  ;;  %6496 = vrcp.f32 %v12595_v38  ;;  %v605_v19 = vsub.f32 0.0, %v12585_v1  ;;  %v4245_v60 = vand.u32 2147483648, %v12582_v9 }
 0x3bf   : > { %5459 = vst [vmem:[%s7078_s17 + $0x638] sm:$0xff] %v5203_v34  ;;  %v6487_v16 = vpop.eup %6486  ;;  %v4257_v32 = vand.u32 2147483647, %v12595_v38  ;;  %v12607_v23 = vadd.f32 1.0, %v6485_v22  ;;  %v4259_v50 = vand.u32 2147483648, %v12595_v38  ;;  %vm4239_vm2 = vweird.f32 %v12582_v9 }
 0x3c0   : > { %v4228_v13 = vsel %vm12591_vm1, %v6479_v0, %v4224_v53  ;;  %v6489_v27 = vpop.eup %6488  ;;  %v12610_v15 = vadd.f32 1.0, %v6487_v16  ;;  %v1068_v29 = vmul.f32 1.442695, %v604_v11  ;;  %vm4253_vm3 = vweird.f32 %v12595_v38 }
 0x3c1   : > { %v4233_v47 = vsel %vm4230_vm6, %v4232_v25, %v4228_v13  ;;  %v6491_v3 = vpop.eup %6490  ;;  %6498 = vrcp.f32 %v12607_v23  ;;  %vm12616_vm10 = vcmp.eq.f32.partialorder %v4243_v58, 8.507059e+37  ;;  %v4271_v24 = vand.u32 2147483647, %v12607_v23 }
 0x3c2   : > { %v5204_v31 = vmul.f32 %v4233_v47, %v12379_v56  ;;  %v6493_v48 = vpop.eup %6492  ;;  %v4273_v17 = vand.u32 2147483648, %v12607_v23  ;;  %6500 = vrcp.f32 %v12610_v15  ;;  %v4246_v56 = vor.u32 1.1754944e-38, %v4245_v60 }
 0x3c3   : > { %v6495_v42 = vpop.eup %6494  ;;  %vm12624_vm14 = vcmp.eq.f32.partialorder %v4257_v32, 8.507059e+37  ;;  %v12628_v14 = vadd.f32 1.0, %v6489_v27  ;;  %v12630_v59 = vadd.f32 1.0, %v6491_v3  ;;  %v4260_v63 = vor.u32 1.1754944e-38, %v4259_v50 }
 0x3c4   : > { %5460 = vst [vmem:[%s7078_s17 + $0x640] sm:$0xff] %v5204_v31  ;;  %v6497_v26 = vpop.eup %6496  ;;  %v4235_v46 = vmul.f32 %v6495_v42, %v12582_v9  ;;  %v4285_v49 = vand.u32 2147483647, %v12610_v15  ;;  %v4287_v0 = vand.u32 2147483648, %v12610_v15  ;;  %vm4240_vm5 = vweird.f32 %v6495_v42 }
 0x3c5   : > { %v4249_v61 = vmul.f32 %v6497_v26, %v12595_v38  ;;  %vm4267_vm7 = vweird.f32 %v12607_v23  ;;  %vm4281_vm9 = vweird.f32 %v12610_v15  ;;  %vm4254_vm8 = vweird.f32 %v6497_v26  ;;  %vm12654_vm15 = vmor %vm4239_vm2, %vm4240_vm5 }
 0x3c6   : > { %v4236_v20 = vsub.f32 1.0, %v4235_v46  ;;  %vm12638_vm11 = vcmp.eq.f32.partialorder %v4271_v24, 8.507059e+37  ;;  %v4274_v45 = vor.u32 1.1754944e-38, %v4273_v17  ;;  %6502 = vrcp.f32 %v12628_v14  ;;  %vm12664_vm4 = vmor %vm4253_vm3, %vm4254_vm8 }
 0x3c7   : > { %v6499_v36 = vpop.eup %6498  ;;  %v4250_v28 = vsub.f32 1.0, %v4249_v61  ;;  %v4299_v44 = vand.u32 2147483647, %v12628_v14  ;;  %v4301_v35 = vand.u32 2147483648, %v12628_v14  ;;  %6504 = vrcp.f32 %v12630_v59 }
 0x3c8   : > { %v6501_v51 = vpop.eup %6500  ;;  %v4237_v2 = vmul.f32 %v6495_v42, %v4236_v20  ;;  %v4263_v6 = vmul.f32 %v6499_v36, %v12607_v23  ;;  %vm12647_vm13 = vcmp.eq.f32.partialorder %v4285_v49, 8.507059e+37  ;;  %v4288_v30 = vor.u32 1.1754944e-38, %v4287_v0  ;;  %v12731_v20 = vld [vmem:[%s6904_s24 + $0x698] sm:$0xff] }
 0x3c9   : > { %v4251_v54 = vmul.f32 %v6497_v26, %v4250_v28  ;;  %v4277_v25 = vmul.f32 %v6501_v51, %v12610_v15  ;;  %vm4295_vm12 = vweird.f32 %v12628_v14  ;;  %vm4309_vm0 = vweird.f32 %v12630_v59 }
 0x3ca   : > { %v4238_v52 = vadd.f32 %v6495_v42, %v4237_v2  ;;  %v4264_v40 = vsub.f32 1.0, %v4263_v6  ;;  %vm4268_vm1 = vweird.f32 %v6499_v36  ;;  %vm4282_vm6 = vweird.f32 %v6501_v51 }
 0x3cb   : > { %v4252_v21 = vadd.f32 %v6497_v26, %v4251_v54  ;;  %v4278_v9 = vsub.f32 1.0, %v4277_v25  ;;  %vm12668_vm2 = vcmp.eq.f32.partialorder %v4299_v44, 8.507059e+37  ;;  %v4302_v62 = vor.u32 1.1754944e-38, %v4301_v35  ;;  %vm12686_vm3 = vmor %vm4267_vm7, %vm4268_vm1 }
 0x3cc   : > { %6506 = vpow2.f32 %v1068_v29  ;;  %v6503_v11 = vpop.eup %6502  ;;  %v4242_v53 = vsel %vm12654_vm15, %v6495_v42, %v4238_v52  ;;  %v4265_v38 = vmul.f32 %v6499_v36, %v4264_v40  ;;  %v4313_v22 = vand.u32 2147483647, %v12630_v59  ;;  %v12778_v40 = vld [vmem:[%s6904_s24 + $0x6b0] sm:$0xff] }
 0x3cd   : > { %v12675_v58 = vadd.f32 1.0, %v6493_v48  ;;  %v12677_v16 = vpop.eup %6504  ;;  %v4247_v13 = vsel %vm12616_vm10, %v4246_v56, %v4242_v53  ;;  %v4256_v60 = vsel %vm12664_vm4, %v6497_v26, %v4252_v21  ;;  %v4279_v27 = vmul.f32 %v6501_v51, %v4278_v9  ;;  %vm12697_vm10 = vmor %vm4281_vm9, %vm4282_vm6  ;;  %v12716_v26 = vld [vmem:[%s6904_s24 + $0x690] sm:$0xff]  ;;  %v12781_v21 = vld [vmem:[%s6904_s24 + $0x6b8] sm:$0xff] }
 0x3ce   : > { %v4291_v47 = vmul.f32 %v6503_v11, %v12628_v14  ;;  %v5205_v50 = vmul.f32 %v4247_v13, %v12391_v10  ;;  %v4261_v29 = vsel %vm12624_vm14, %v4260_v63, %v4256_v60  ;;  %v4266_v3 = vadd.f32 %v6499_v36, %v4265_v38  ;;  %v12793_v13 = vld [vmem:[%s6904_s24 + $0x6c0] sm:$0xff] }
 0x3cf   : > { %vm4296_vm5 = vweird.f32 %v6503_v11  ;;  %v5206_v23 = vmul.f32 %v4261_v29, %v12398_v7  ;;  %v4280_v48 = vadd.f32 %v6501_v51, %v4279_v27  ;;  %v4305_v10 = vmul.f32 %v12677_v16, %v12630_v59 }
 0x3d0   : > { %v4292_v39 = vsub.f32 1.0, %v4291_v47  ;;  %5461 = vst [vmem:[%s7078_s17 + $0x648] sm:$0xff] %v5205_v50  ;;  %v4270_v24 = vsel %vm12686_vm3, %v6499_v36, %v4266_v3  ;;  %vm4310_vm14 = vweird.f32 %v12677_v16  ;;  %v4315_v15 = vand.u32 2147483648, %v12630_v59  ;;  %vm12724_vm7 = vmor %vm4295_vm12, %vm4296_vm5 }
 0x3d1   : > { %6508 = vrcp.f32 %v12675_v58  ;;  %5462 = vst [vmem:[%s7078_s17 + $0x650] sm:$0xff] %v5206_v23  ;;  %v4275_v7 = vsel %vm12638_vm11, %v4274_v45, %v4270_v24  ;;  %v4284_v42 = vsel %vm12697_vm10, %v6501_v51, %v4280_v48  ;;  %v4306_v18 = vsub.f32 1.0, %v4305_v10  ;;  %vm12742_vm9 = vmor %vm4309_vm0, %vm4310_vm14 }
 0x3d2   : > { %v6507_v17 = vpop.eup %6506  ;;  %v4293_v56 = vmul.f32 %v6503_v11, %v4292_v39  ;;  %v5207_v46 = vmul.f32 %v4275_v7, %v12532_v4  ;;  %v4289_v63 = vsel %vm12647_vm13, %v4288_v30, %v4284_v42  ;;  %v4327_v0 = vand.u32 2147483647, %v12675_v58  ;;  %v12767_v30 = vld [vmem:[%s6904_s24 + $0x6a0] sm:$0xff] }
 0x3d3   : > { %v4329_v61 = vand.u32 2147483648, %v12675_v58  ;;  %v5208_v55 = vmul.f32 %v4289_v63, %v12539_v37  ;;  %v4307_v45 = vmul.f32 %v12677_v16, %v4306_v18  ;;  %v12735_v36 = vadd.f32 1.0, %v6507_v17 }
 0x3d4   : > { %v4294_v4 = vadd.f32 %v6503_v11, %v4293_v56  ;;  %5463 = vst [vmem:[%s7078_s17 + $0x658] sm:$0xff] %v5207_v46  ;;  %vm12746_vm8 = vcmp.eq.f32.partialorder %v4313_v22, 8.507059e+37  ;;  %v4316_v37 = vor.u32 1.1754944e-38, %v4315_v15  ;;  %v1070_v44 = vmul.f32 1.442695, %v605_v19  ;;  %v12819_v46 = vld [vmem:[%s6904_s24 + $0x6c8] sm:$0xff] }
 0x3d5   : > { %v606_v35 = vsub.f32 0.0, %v12716_v26  ;;  %5464 = vst [vmem:[%s7078_s17 + $0x660] sm:$0xff] %v5208_v55  ;;  %v4308_v51 = vadd.f32 %v12677_v16, %v4307_v45  ;;  %6510 = vrcp.f32 %v12735_v36  ;;  %v607_v2 = vsub.f32 0.0, %v12731_v20 }
 0x3d6   : > { %v4298_v59 = vsel %vm12724_vm7, %v6503_v11, %v4294_v4  ;;  %vm4323_vm11 = vweird.f32 %v12675_v58  ;;  %vm12762_vm13 = vcmp.eq.f32.partialorder %v4327_v0, 8.507059e+37  ;;  %6512 = vpow2.f32 %v1070_v44 }
 0x3d7   : > { %v6509_v6 = vpop.eup %6508  ;;  %v4303_v8 = vsel %vm12668_vm2, %v4302_v62, %v4298_v59  ;;  %v4312_v54 = vsel %vm12742_vm9, %v12677_v16, %v4308_v51  ;;  %v4330_v52 = vor.u32 1.1754944e-38, %v4329_v61  ;;  %vm4337_vm12 = vweird.f32 %v12735_v36 }
 0x3d8   : > { %v5209_v57 = vmul.f32 %v4303_v8, %v12542_v12  ;;  %v4319_v25 = vmul.f32 %v6509_v6, %v12675_v58  ;;  %v4317_v9 = vsel %vm12746_vm8, %v4316_v37, %v4312_v54  ;;  %vm4324_vm15 = vweird.f32 %v6509_v6 }
 0x3d9   : > { %v1072_v12 = vmul.f32 1.442695, %v606_v35  ;;  %v5210_v34 = vmul.f32 %v4317_v9, %v12547_v43  ;;  %v1074_v11 = vmul.f32 1.442695, %v607_v2  ;;  %v608_v53 = vsub.f32 0.0, %v12767_v30  ;;  %vm12800_vm0 = vmor %vm4323_vm11, %vm4324_vm15 }
 0x3da   : > { %5465 = vst [vmem:[%s7078_s17 + $0x668] sm:$0xff] %v5209_v57  ;;  %v4320_v62 = vsub.f32 1.0, %v4319_v25  ;;  %v609_v38 = vsub.f32 0.0, %v12775_v41  ;;  %v610_v22 = vsub.f32 0.0, %v12778_v40  ;;  %v611_v16 = vsub.f32 0.0, %v12781_v21 }
 0x3db   : > { %6514 = vpow2.f32 %v1072_v12  ;;  %v6511_v60 = vpop.eup %6510  ;;  %5466 = vst [vmem:[%s7078_s17 + $0x670] sm:$0xff] %v5210_v34  ;;  %v4341_v27 = vand.u32 2147483647, %v12735_v36  ;;  %v1076_v43 = vmul.f32 1.442695, %v608_v53  ;;  %v4343_v3 = vand.u32 2147483648, %v12735_v36 }
 0x3dc   : > { %v4321_v32 = vmul.f32 %v6509_v6, %v4320_v62  ;;  %6516 = vpow2.f32 %v1074_v11  ;;  %v6513_v47 = vpop.eup %6512  ;;  %v4333_v29 = vmul.f32 %v6511_v60, %v12735_v36  ;;  %v1078_v31 = vmul.f32 1.442695, %v609_v38  ;;  %v12865_v53 = vld [vmem:[%s6904_s24 + $0x6d0] sm:$0xff] }
 0x3dd   : > { %v1080_v23 = vmul.f32 1.442695, %v610_v22  ;;  %v12806_v39 = vadd.f32 1.0, %v6513_v47  ;;  %6518 = vpow2.f32 %v1076_v43  ;;  %v612_v10 = vsub.f32 0.0, %v12793_v13 }
 0x3de   : > { %v4322_v48 = vadd.f32 %v6509_v6, %v4321_v32  ;;  %v4334_v24 = vsub.f32 1.0, %v4333_v29  ;;  %vm4338_vm4 = vweird.f32 %v6511_v60  ;;  %6520 = vpow2.f32 %v1078_v31 }
 0x3df   : > { %v1082_v58 = vmul.f32 1.442695, %v611_v16  ;;  %vm12811_vm1 = vcmp.eq.f32.partialorder %v4341_v27, 8.507059e+37  ;;  %6522 = vrcp.f32 %v12806_v39  ;;  %v4344_v18 = vor.u32 1.1754944e-38, %v4343_v3  ;;  %vm12824_vm6 = vmor %vm4337_vm12, %vm4338_vm4 }
 0x3e0   : > { %v4326_v15 = vsel %vm12800_vm0, %v6509_v6, %v4322_v48  ;;  %v4335_v56 = vmul.f32 %v6511_v60, %v4334_v24  ;;  %6524 = vpow2.f32 %v1080_v23  ;;  %v4355_v61 = vand.u32 2147483647, %v12806_v39 }
 0x3e1   : > { %v6515_v7 = vpop.eup %6514  ;;  %v4331_v42 = vsel %vm12762_vm13, %v4330_v52, %v4326_v15  ;;  %v1084_v4 = vmul.f32 1.442695, %v612_v10  ;;  %v4357_v14 = vand.u32 2147483648, %v12806_v39  ;;  %6526 = vpow2.f32 %v1082_v58 }
 0x3e2   : > { %v6517_v63 = vpop.eup %6516  ;;  %v5211_v49 = vmul.f32 %v4331_v42, %v12559_v5  ;;  %v12829_v55 = vadd.f32 1.0, %v6515_v7  ;;  %v4336_v45 = vadd.f32 %v6511_v60, %v4335_v56  ;;  %vm4351_vm2 = vweird.f32 %v12806_v39  ;;  %v12989_v42 = vld [vmem:[%s6904_s24 + $0x6e8] sm:$0xff] }
 0x3e3   : > { %v12832_v28 = vadd.f32 1.0, %v6517_v63  ;;  %v6519_v37 = vpop.eup %6518  ;;  %v613_v5 = vsub.f32 0.0, %v12819_v46  ;;  %vm12845_vm3 = vcmp.eq.f32.partialorder %v4355_v61, 8.507059e+37  ;;  %v4358_v52 = vor.u32 1.1754944e-38, %v4357_v14 }
 0x3e4   : > { %5467 = vst [vmem:[%s7078_s17 + $0x678] sm:$0xff] %v5211_v49  ;;  %6528 = vrcp.f32 %v12829_v55  ;;  %v6521_v36 = vpop.eup %6520  ;;  %v4340_v44 = vsel %vm12824_vm6, %v6511_v60, %v4336_v45  ;;  %v4369_v35 = vand.u32 2147483647, %v12829_v55  ;;  %v4371_v59 = vand.u32 2147483648, %v12829_v55 }
 0x3e5   : > { %6530 = vrcp.f32 %v12832_v28  ;;  %v6523_v51 = vpop.eup %6522  ;;  %v4345_v2 = vsel %vm12811_vm1, %v4344_v18, %v4340_v44  ;;  %v4383_v8 = vand.u32 2147483647, %v12832_v28  ;;  %v4385_v19 = vand.u32 2147483648, %v12832_v28 }
 0x3e6   : > { %v6525_v57 = vpop.eup %6524  ;;  %v5212_v54 = vmul.f32 %v4345_v2, %v12576_v33  ;;  %v4347_v25 = vmul.f32 %v6523_v51, %v12806_v39  ;;  %6532 = vpow2.f32 %v1084_v4  ;;  %vm4365_vm10 = vweird.f32 %v12829_v55 }
 0x3e7   : > { %vm4379_vm5 = vweird.f32 %v12832_v28  ;;  %v12855_v9 = vadd.f32 1.0, %v6519_v37  ;;  %v12857_v12 = vadd.f32 1.0, %v6521_v36  ;;  %v6527_v34 = vpop.eup %6526  ;;  %vm4352_vm14 = vweird.f32 %v6523_v51 }
 0x3e8   : > { %5468 = vst [vmem:[%s7078_s17 + $0x680] sm:$0xff] %v5212_v54  ;;  %v4348_v62 = vsub.f32 1.0, %v4347_v25  ;;  %vm12860_vm7 = vcmp.eq.f32.partialorder %v4369_v35, 8.507059e+37  ;;  %v4372_v33 = vor.u32 1.1754944e-38, %v4371_v59  ;;  %vm12867_vm9 = vcmp.eq.f32.partialorder %v4383_v8, 8.507059e+37  ;;  %vm12881_vm8 = vmor %vm4351_vm2, %vm4352_vm14 }
 0x3e9   : > { %v4386_v16 = vor.u32 1.1754944e-38, %v4385_v19  ;;  %6534 = vrcp.f32 %v12855_v9  ;;  %v4397_v60 = vand.u32 2147483647, %v12855_v9  ;;  %v12873_v32 = vadd.f32 1.0, %v6525_v57 }
 0x3ea   : > { %v6529_v38 = vpop.eup %6528  ;;  %v4349_v43 = vmul.f32 %v6523_v51, %v4348_v62  ;;  %v4399_v50 = vand.u32 2147483648, %v12855_v9  ;;  %6536 = vrcp.f32 %v12857_v12  ;;  %v12886_v31 = vadd.f32 1.0, %v6527_v34 }
 0x3eb   : > { %v6531_v27 = vpop.eup %6530  ;;  %v4361_v47 = vmul.f32 %v6529_v38, %v12829_v55  ;;  %v1086_v23 = vmul.f32 1.442695, %v613_v5  ;;  %v614_v48 = vsub.f32 0.0, %v12865_v53  ;;  %vm4366_vm11 = vweird.f32 %v6529_v38 }
 0x3ec   : > { %v4375_v3 = vmul.f32 %v6531_v27, %v12832_v28  ;;  %v6533_v10 = vpop.eup %6532  ;;  %v4350_v24 = vadd.f32 %v6523_v51, %v4349_v43  ;;  %vm4393_vm13 = vweird.f32 %v12855_v9  ;;  %vm4380_vm15 = vweird.f32 %v6531_v27  ;;  %vm12902_vm0 = vmor %vm4365_vm10, %vm4366_vm11 }
 0x3ed   : > { %v4362_v58 = vsub.f32 1.0, %v4361_v47  ;;  %v4411_v39 = vand.u32 2147483647, %v12857_v12  ;;  %6538 = vrcp.f32 %v12873_v32  ;;  %vm12894_vm12 = vcmp.eq.f32.partialorder %v4397_v60, 8.507059e+37  ;;  %vm12912_vm1 = vmor %vm4379_vm5, %vm4380_vm15 }
 0x3ee   : > { %v4376_v15 = vsub.f32 1.0, %v4375_v3  ;;  %v4354_v17 = vsel %vm12881_vm8, %v6523_v51, %v4350_v24  ;;  %v4400_v56 = vor.u32 1.1754944e-38, %v4399_v50  ;;  %vm4407_vm4 = vweird.f32 %v12857_v12 }
 0x3ef   : > { %v4363_v7 = vmul.f32 %v6529_v38, %v4362_v58  ;;  %v6535_v18 = vpop.eup %6534  ;;  %v4359_v63 = vsel %vm12845_vm3, %v4358_v52, %v4354_v17  ;;  %v4413_v61 = vand.u32 2147483648, %v12857_v12  ;;  %vm4421_vm6 = vweird.f32 %v12873_v32 }
 0x3f0   : > { %v4377_v0 = vmul.f32 %v6531_v27, %v4376_v15  ;;  %v6537_v4 = vpop.eup %6536  ;;  %v5213_v45 = vmul.f32 %v4359_v63, %v12585_v1  ;;  %v4389_v55 = vmul.f32 %v6535_v18, %v12855_v9  ;;  %vm12919_vm2 = vcmp.eq.f32.partialorder %v4411_v39, 8.507059e+37 }
 0x3f1   : > { %v4364_v14 = vadd.f32 %v6529_v38, %v4363_v7  ;;  %v4403_v36 = vmul.f32 %v6537_v4, %v12857_v12  ;;  %v4427_v1 = vand.u32 2147483648, %v12873_v32  ;;  %vm4394_vm3 = vweird.f32 %v6535_v18 }
 0x3f2   : > { %v4378_v5 = vadd.f32 %v6531_v27, %v4377_v0  ;;  %5469 = vst [vmem:[%s7078_s17 + $0x688] sm:$0xff] %v5213_v45  ;;  %v4390_v35 = vsub.f32 1.0, %v4389_v55  ;;  %6540 = vrcp.f32 %v12886_v31  ;;  %vm4408_vm10 = vweird.f32 %v6537_v4  ;;  %vm12939_vm5 = vmor %vm4393_vm13, %vm4394_vm3 }
 0x3f3   : > { %v4368_v28 = vsel %vm12902_vm0, %v6529_v38, %v4364_v14  ;;  %v6539_v59 = vpop.eup %6538  ;;  %v4404_v6 = vsub.f32 1.0, %v4403_v36  ;;  %v4414_v62 = vor.u32 1.1754944e-38, %v4413_v61  ;;  %v4425_v11 = vand.u32 2147483647, %v12873_v32  ;;  %vm12947_vm14 = vmor %vm4407_vm4, %vm4408_vm10 }
 0x3f4   : > { %v4373_v51 = vsel %vm12860_vm7, %v4372_v33, %v4368_v28  ;;  %v4382_v2 = vsel %vm12912_vm1, %v6531_v27, %v4378_v5  ;;  %v4391_v57 = vmul.f32 %v6535_v18, %v4390_v35  ;;  %v4417_v54 = vmul.f32 %v6539_v59, %v12873_v32  ;;  %v13016_v35 = vld [vmem:[%s6904_s24 + $0x6f0] sm:$0xff] }
 0x3f5   : > { %v5214_v8 = vmul.f32 %v4373_v51, %v12716_v26  ;;  %v4387_v19 = vsel %vm12867_vm9, %v4386_v16, %v4382_v2  ;;  %v4405_v34 = vmul.f32 %v6537_v4, %v4404_v6  ;;  %vm4422_vm7 = vweird.f32 %v6539_v59 }
 0x3f6   : > { %v5215_v25 = vmul.f32 %v4387_v19, %v12731_v20  ;;  %v4392_v26 = vadd.f32 %v6535_v18, %v4391_v57  ;;  %v4418_v38 = vsub.f32 1.0, %v4417_v54  ;;  %v12951_v20 = vadd.f32 1.0, %v6533_v10  ;;  %vm12966_vm9 = vmor %vm4421_vm6, %vm4422_vm7  ;;  %v12973_v10 = vld [vmem:[%s6904_s24 + $0x6d8] sm:$0xff] }
 0x3f7   : > { %5470 = vst [vmem:[%s7078_s17 + $0x690] sm:$0xff] %v5214_v8  ;;  %v4406_v9 = vadd.f32 %v6537_v4, %v4405_v34  ;;  %v4428_v22 = vor.u32 1.1754944e-38, %v4427_v1  ;;  %v4439_v16 = vand.u32 2147483647, %v12886_v31  ;;  %6542 = vpow2.f32 %v1086_v23 }
 0x3f8   : > { %5471 = vst [vmem:[%s7078_s17 + $0x698] sm:$0xff] %v5215_v25  ;;  %v6541_v60 = vpop.eup %6540  ;;  %v4396_v12 = vsel %vm12939_vm5, %v6535_v18, %v4392_v26  ;;  %v4419_v27 = vmul.f32 %v6539_v59, %v4418_v38  ;;  %6544 = vrcp.f32 %v12951_v20  ;;  %v1088_v43 = vmul.f32 1.442695, %v614_v48  ;;  %v12976_v48 = vld [vmem:[%s6904_s24 + $0x6e0] sm:$0xff] }
 0x3f9   : > { %v4401_v47 = vsel %vm12894_vm12, %v4400_v56, %v4396_v12  ;;  %v4410_v50 = vsel %vm12947_vm14, %v6537_v4, %v4406_v9  ;;  %v4431_v3 = vmul.f32 %v6541_v60, %v12886_v31  ;;  %v4441_v23 = vand.u32 2147483648, %v12886_v31  ;;  %v13029_v25 = vld [vmem:[%s6904_s24 + $0x700] sm:$0xff] }
 0x3fa   : > { %v5216_v24 = vmul.f32 %v4401_v47, %v12767_v30  ;;  %v4415_v58 = vsel %vm12919_vm2, %v4414_v62, %v4410_v50  ;;  %v4420_v32 = vadd.f32 %v6539_v59, %v4419_v27  ;;  %vm4426_vm8 = vcmp.eq.f32.partialorder %v4425_v11, 8.507059e+37  ;;  %v13058_v47 = vld [vmem:[%s6904_s24 + $0x708] sm:$0xff]  ;;  %v13061_v50 = vld [vmem:[%s6904_s24 + $0x710] sm:$0xff] }
 0x3fb   : > { %v5217_v15 = vmul.f32 %v4415_v58, %v12775_v41  ;;  %v4432_v39 = vsub.f32 1.0, %v4431_v3  ;;  %vm4435_vm11 = vweird.f32 %v12886_v31  ;;  %vm4436_vm13 = vweird.f32 %v6541_v60 }
 0x3fc   : > { %5472 = vst [vmem:[%s7078_s17 + $0x6a0] sm:$0xff] %v5216_v24  ;;  %v4424_v17 = vsel %vm12966_vm9, %v6539_v59, %v4420_v32  ;;  %6546 = vpow2.f32 %v1088_v43  ;;  %v615_v7 = vsub.f32 0.0, %v12973_v10  ;;  %v616_v30 = vsub.f32 0.0, %v12976_v48  ;;  %vm13000_vm12 = vmor %vm4435_vm11, %vm4436_vm13  ;;  %v13019_v59 = vld [vmem:[%s6904_s24 + $0x6f8] sm:$0xff] }
 0x3fd   : > { %v6543_v56 = vpop.eup %6542  ;;  %5473 = vst [vmem:[%s7078_s17 + $0x6a8] sm:$0xff] %v5217_v15  ;;  %v4429_v18 = vsel %vm4426_vm8, %v4428_v22, %v4424_v17  ;;  %v4433_v41 = vmul.f32 %v6541_v60, %v4432_v39  ;;  %vm12992_vm15 = vcmp.eq.f32.partialorder %v4439_v16, 8.507059e+37  ;;  %v4442_v49 = vor.u32 1.1754944e-38, %v4441_v23 }
 0x3fe   : > { %v6545_v0 = vpop.eup %6544  ;;  %v5218_v61 = vmul.f32 %v4429_v18, %v12778_v40  ;;  %v13004_v45 = vadd.f32 1.0, %v6543_v56  ;;  %v1090_v14 = vmul.f32 1.442695, %v615_v7  ;;  %v1092_v37 = vmul.f32 1.442695, %v616_v30 }
 0x3ff   : > { %v4434_v55 = vadd.f32 %v6541_v60, %v4433_v41  ;;  %v4445_v5 = vmul.f32 %v6545_v0, %v12951_v20  ;;  %vm4449_vm0 = vweird.f32 %v12951_v20  ;;  %v617_v40 = vsub.f32 0.0, %v12989_v42 }
 0x400   : > { %5474 = vst [vmem:[%s7078_s17 + $0x6b0] sm:$0xff] %v5218_v61  ;;  %vm4450_vm4 = vweird.f32 %v6545_v0  ;;  %v4453_v31 = vand.u32 2147483647, %v12951_v20  ;;  %v4455_v36 = vand.u32 2147483648, %v12951_v20  ;;  %6548 = vrcp.f32 %v13004_v45 }
 0x401   : > { %v4438_v44 = vsel %vm13000_vm12, %v6541_v60, %v4434_v55  ;;  %v4446_v1 = vsub.f32 1.0, %v4445_v5  ;;  %6550 = vpow2.f32 %v1090_v14  ;;  %v1094_v28 = vmul.f32 1.442695, %v617_v40  ;;  %vm13034_vm1 = vmor %vm4449_vm0, %vm4450_vm4  ;;  %v13096_v5 = vld [vmem:[%s6904_s24 + $0x718] sm:$0xff] }
 0x402   : > { %v6547_v51 = vpop.eup %6546  ;;  %v4443_v2 = vsel %vm12992_vm15, %v4442_v49, %v4438_v44  ;;  %v4467_v6 = vand.u32 2147483647, %v13004_v45  ;;  %v4469_v8 = vand.u32 2147483648, %v13004_v45  ;;  %6552 = vpow2.f32 %v1092_v37 }
 0x403   : > { %v5219_v19 = vmul.f32 %v4443_v2, %v12781_v21  ;;  %v4447_v57 = vmul.f32 %v6545_v0, %v4446_v1  ;;  %v13026_v54 = vadd.f32 1.0, %v6547_v51  ;;  %v4456_v34 = vor.u32 1.1754944e-38, %v4455_v36 }
 0x404   : > { %6554 = vpow2.f32 %v1094_v28  ;;  %v618_v62 = vsub.f32 0.0, %v13016_v35  ;;  %v619_v11 = vsub.f32 0.0, %v13019_v59  ;;  %vm13041_vm6 = vcmp.eq.f32.partialorder %v4453_v31, 8.507059e+37 }
 0x405   : > { %5475 = vst [vmem:[%s7078_s17 + $0x6b8] sm:$0xff] %v5219_v19  ;;  %v4448_v21 = vadd.f32 %v6545_v0, %v4447_v57  ;;  %vm4463_vm2 = vweird.f32 %v13004_v45  ;;  %6556 = vrcp.f32 %v13026_v54  ;;  %vm13047_vm3 = vcmp.eq.f32.partialorder %v4467_v6, 8.507059e+37 }
 0x406   : > { %v6549_v33 = vpop.eup %6548  ;;  %v4470_v20 = vor.u32 1.1754944e-38, %v4469_v8  ;;  %v1096_v9 = vmul.f32 1.442695, %v618_v62  ;;  %v620_v22 = vsub.f32 0.0, %v13029_v25  ;;  %v4481_v27 = vand.u32 2147483647, %v13026_v54 }
 0x407   : > { %v6551_v16 = vpop.eup %6550  ;;  %v4452_v60 = vsel %vm13034_vm1, %v6545_v0, %v4448_v21  ;;  %v4459_v12 = vmul.f32 %v6549_v33, %v13004_v45  ;;  %v4483_v43 = vand.u32 2147483648, %v13026_v54  ;;  %v1098_v24 = vmul.f32 1.442695, %v619_v11 }
 0x408   : > { %v6553_v29 = vpop.eup %6552  ;;  %v4457_v3 = vsel %vm13041_vm6, %v4456_v34, %v4452_v60  ;;  %v13065_v23 = vadd.f32 1.0, %v6551_v16  ;;  %6558 = vpow2.f32 %v1096_v9  ;;  %vm4464_vm10 = vweird.f32 %v6549_v33 }
 0x409   : > { %v5220_v58 = vmul.f32 %v4457_v3, %v12793_v13  ;;  %v4460_v32 = vsub.f32 1.0, %v4459_v12  ;;  %v13068_v15 = vadd.f32 1.0, %v6553_v29  ;;  %vm4477_vm5 = vweird.f32 %v13026_v54  ;;  %vm13080_vm14 = vmor %vm4463_vm2, %vm4464_vm10 }
 0x40a   : > { %v6555_v39 = vpop.eup %6554  ;;  %6560 = vrcp.f32 %v13065_v23  ;;  %v621_v17 = vsub.f32 0.0, %v13058_v47  ;;  %v622_v7 = vsub.f32 0.0, %v13061_v50  ;;  %v4495_v18 = vand.u32 2147483647, %v13065_v23 }
 0x40b   : > { %v6557_v30 = vpop.eup %6556  ;;  %5476 = vst [vmem:[%s7078_s17 + $0x6c0] sm:$0xff] %v5220_v58  ;;  %v4461_v56 = vmul.f32 %v6549_v33, %v4460_v32  ;;  %v4497_v13 = vand.u32 2147483648, %v13065_v23  ;;  %6562 = vrcp.f32 %v13068_v15  ;;  %vm13085_vm7 = vcmp.eq.f32.partialorder %v4481_v27, 8.507059e+37 }
 0x40c   : > { %v4473_v63 = vmul.f32 %v6557_v30, %v13026_v54  ;;  %v4509_v0 = vand.u32 2147483647, %v13068_v15  ;;  %6564 = vpow2.f32 %v1098_v24  ;;  %v4484_v4 = vor.u32 1.1754944e-38, %v4483_v43 }
 0x40d   : > { %v4462_v61 = vadd.f32 %v6549_v33, %v4461_v56  ;;  %vm4491_vm9 = vweird.f32 %v13065_v23  ;;  %v13091_v14 = vadd.f32 1.0, %v6555_v39  ;;  %vm4478_vm8 = vweird.f32 %v6557_v30 }
 0x40e   : > { %v6559_v45 = vpop.eup %6558  ;;  %v4474_v37 = vsub.f32 1.0, %v4473_v63  ;;  %vm4505_vm11 = vweird.f32 %v13068_v15  ;;  %v4511_v55 = vand.u32 2147483648, %v13068_v15  ;;  %vm13100_vm13 = vcmp.eq.f32.partialorder %v4495_v18, 8.507059e+37  ;;  %vm13115_vm12 = vmor %vm4477_vm5, %vm4478_vm8 }
 0x40f   : > { %v4466_v40 = vsel %vm13080_vm14, %v6549_v33, %v4462_v61  ;;  %v4498_v36 = vor.u32 1.1754944e-38, %v4497_v13  ;;  %6566 = vrcp.f32 %v13091_v14  ;;  %vm13107_vm15 = vcmp.eq.f32.partialorder %v4509_v0, 8.507059e+37  ;;  %v13168_v0 = vld [vmem:[%s6904_s24 + $0x720] sm:$0xff] }
 0x410   : > { %v6561_v44 = vpop.eup %6560  ;;  %v4471_v1 = vsel %vm13047_vm3, %v4470_v20, %v4466_v40  ;;  %v4475_v28 = vmul.f32 %v6557_v30, %v4474_v37  ;;  %v1100_v2 = vmul.f32 1.442695, %v620_v22  ;;  %v1102_v6 = vmul.f32 1.442695, %v621_v17 }
 0x411   : > { %v6563_v8 = vpop.eup %6562  ;;  %v5221_v19 = vmul.f32 %v4471_v1, %v12819_v46  ;;  %v4487_v52 = vmul.f32 %v6561_v44, %v13065_v23  ;;  %v13120_v34 = vadd.f32 1.0, %v6559_v45  ;;  %v623_v62 = vsub.f32 0.0, %v13096_v5 }
 0x412   : > { %v6565_v11 = vpop.eup %6564  ;;  %v4476_v21 = vadd.f32 %v6557_v30, %v4475_v28  ;;  %v4501_v26 = vmul.f32 %v6563_v8, %v13068_v15  ;;  %v4512_v33 = vor.u32 1.1754944e-38, %v4511_v55  ;;  %v4523_v46 = vand.u32 2147483647, %v13091_v14 }
 0x413   : > { %5477 = vst [vmem:[%s7078_s17 + $0x6c8] sm:$0xff] %v5221_v19  ;;  %v4488_v38 = vsub.f32 1.0, %v4487_v52  ;;  %vm4492_vm0 = vweird.f32 %v6561_v44  ;;  %vm4519_vm4 = vweird.f32 %v13091_v14  ;;  %6568 = vrcp.f32 %v13120_v34  ;;  %v13206_v52 = vld [vmem:[%s6904_s24 + $0x728] sm:$0xff] }
 0x414   : > { %v4480_v54 = vsel %vm13115_vm12, %v6557_v30, %v4476_v21  ;;  %v4502_v20 = vsub.f32 1.0, %v4501_v26  ;;  %vm4506_vm1 = vweird.f32 %v6563_v8  ;;  %v4525_v9 = vand.u32 2147483648, %v13091_v14  ;;  %vm13138_vm6 = vmor %vm4491_vm9, %vm4492_vm0 }
 0x415   : > { %v6567_v22 = vpop.eup %6566  ;;  %v4485_v16 = vsel %vm13085_vm7, %v4484_v4, %v4480_v54  ;;  %v4489_v60 = vmul.f32 %v6561_v44, %v4488_v38  ;;  %v13133_v12 = vadd.f32 1.0, %v6565_v11  ;;  %6570 = vpow2.f32 %v1100_v2  ;;  %vm13149_vm3 = vmor %vm4505_vm11, %vm4506_vm1 }
 0x416   : > { %v5222_v27 = vmul.f32 %v4485_v16, %v12865_v53  ;;  %v4503_v29 = vmul.f32 %v6563_v8, %v4502_v20  ;;  %v4515_v3 = vmul.f32 %v6567_v22, %v13091_v14  ;;  %vm13143_vm2 = vcmp.eq.f32.partialorder %v4523_v46, 8.507059e+37  ;;  %v13221_v20 = vld [vmem:[%s6904_s24 + $0x730] sm:$0xff] }
 0x417   : > { %v4490_v58 = vadd.f32 %v6561_v44, %v4489_v60  ;;  %v4537_v53 = vand.u32 2147483647, %v13120_v34  ;;  %v4539_v23 = vand.u32 2147483648, %v13120_v34  ;;  %6572 = vrcp.f32 %v13133_v12 }
 0x418   : > { %5478 = vst [vmem:[%s7078_s17 + $0x6d0] sm:$0xff] %v5222_v27  ;;  %v4504_v39 = vadd.f32 %v6563_v8, %v4503_v29  ;;  %v4516_v17 = vsub.f32 1.0, %v4515_v3  ;;  %vm4520_vm10 = vweird.f32 %v6567_v22  ;;  %v4526_v30 = vor.u32 1.1754944e-38, %v4525_v9 }
 0x419   : > { %v6569_v56 = vpop.eup %6568  ;;  %v4494_v15 = vsel %vm13138_vm6, %v6561_v44, %v4490_v58  ;;  %vm4533_vm5 = vweird.f32 %v13120_v34  ;;  %6574 = vpow2.f32 %v1102_v6  ;;  %v1104_v18 = vmul.f32 1.442695, %v622_v7  ;;  %vm13176_vm14 = vmor %vm4519_vm4, %vm4520_vm10 }
 0x41a   : > { %v4499_v13 = vsel %vm13100_vm13, %v4498_v36, %v4494_v15  ;;  %v4508_v41 = vsel %vm13149_vm3, %v6563_v8, %v4504_v39  ;;  %v4517_v63 = vmul.f32 %v6567_v22, %v4516_v17  ;;  %v4529_v49 = vmul.f32 %v6569_v56, %v13120_v34  ;;  %v13249_v17 = vld [vmem:[%s6904_s24 + $0x738] sm:$0xff] }
 0x41b   : > { %v6571_v61 = vpop.eup %6570  ;;  %v5223_v4 = vmul.f32 %v4499_v13, %v12973_v10  ;;  %v4513_v45 = vsel %vm13107_vm15, %v4512_v33, %v4508_v41  ;;  %vm13180_vm7 = vcmp.eq.f32.partialorder %v4537_v53, 8.507059e+37  ;;  %v4540_v55 = vor.u32 1.1754944e-38, %v4539_v23 }
 0x41c   : > { %v5224_v40 = vmul.f32 %v4513_v45, %v12976_v48  ;;  %v4518_v31 = vadd.f32 %v6567_v22, %v4517_v63  ;;  %v4530_v36 = vsub.f32 1.0, %v4529_v49  ;;  %vm4534_vm9 = vweird.f32 %v6569_v56 }
 0x41d   : > { %v6573_v10 = vpop.eup %6572  ;;  %5479 = vst [vmem:[%s7078_s17 + $0x6d8] sm:$0xff] %v5223_v4  ;;  %v13186_v44 = vadd.f32 1.0, %v6571_v61  ;;  %6576 = vpow2.f32 %v1104_v18  ;;  %v1106_v14 = vmul.f32 1.442695, %v623_v62  ;;  %v624_v1 = vsub.f32 0.0, %v13168_v0  ;;  %vm13198_vm8 = vmor %vm4533_vm5, %vm4534_vm9 }
 0x41e   : > { %5480 = vst [vmem:[%s7078_s17 + $0x6e0] sm:$0xff] %v5224_v40  ;;  %v4522_v28 = vsel %vm13176_vm14, %v6567_v22, %v4518_v31  ;;  %v4531_v51 = vmul.f32 %v6569_v56, %v4530_v36  ;;  %v4543_v2 = vmul.f32 %v6573_v10, %v13133_v12  ;;  %v4551_v48 = vand.u32 2147483647, %v13133_v12 }
 0x41f   : > { %v6575_v6 = vpop.eup %6574  ;;  %v4527_v8 = vsel %vm13143_vm2, %v4526_v30, %v4522_v28  ;;  %vm4547_vm11 = vweird.f32 %v13133_v12  ;;  %v4553_v57 = vand.u32 2147483648, %v13133_v12  ;;  %6578 = vrcp.f32 %v13186_v44 }
 0x420   : > { %v5225_v62 = vmul.f32 %v4527_v8, %v12989_v42  ;;  %v4532_v11 = vadd.f32 %v6569_v56, %v4531_v51  ;;  %v4544_v21 = vsub.f32 1.0, %v4543_v2  ;;  %vm4548_vm13 = vweird.f32 %v6573_v10 }
 0x421   : > { %v4565_v34 = vand.u32 2147483647, %v13186_v44  ;;  %v13210_v26 = vadd.f32 1.0, %v6575_v6  ;;  %6580 = vpow2.f32 %v1106_v14  ;;  %v1108_v33 = vmul.f32 1.442695, %v624_v1  ;;  %vm13227_vm12 = vmor %vm4547_vm11, %vm4548_vm13 }
 0x422   : > { %5481 = vst [vmem:[%s7078_s17 + $0x6e8] sm:$0xff] %v5225_v62  ;;  %v4536_v46 = vsel %vm13198_vm8, %v6569_v56, %v4532_v11  ;;  %v4545_v38 = vmul.f32 %v6573_v10, %v4544_v21  ;;  %vm13215_vm15 = vcmp.eq.f32.partialorder %v4551_v48, 8.507059e+37  ;;  %v625_v42 = vsub.f32 0.0, %v13206_v52 }
 0x423   : > { %v6577_v9 = vpop.eup %6576  ;;  %v4541_v22 = vsel %vm13180_vm7, %v4540_v55, %v4536_v46  ;;  %v4554_v60 = vor.u32 1.1754944e-38, %v4553_v57  ;;  %v4567_v27 = vand.u32 2147483648, %v13186_v44  ;;  %6582 = vrcp.f32 %v13210_v26  ;;  %v13267_v55 = vld [vmem:[%s6904_s24 + $0x740] sm:$0xff] }
 0x424   : > { %v5226_v43 = vmul.f32 %v4541_v22, %v13016_v35  ;;  %v4546_v29 = vadd.f32 %v6573_v10, %v4545_v38  ;;  %vm4561_vm0 = vweird.f32 %v13186_v44  ;;  %v13235_v3 = vadd.f32 1.0, %v6577_v9 }
 0x425   : > { %v6579_v24 = vpop.eup %6578  ;;  %vm13237_vm4 = vcmp.eq.f32.partialorder %v4565_v34, 8.507059e+37  ;;  %6584 = vpow2.f32 %v1108_v33  ;;  %v1110_v58 = vmul.f32 1.442695, %v625_v42  ;;  %v626_v32 = vsub.f32 0.0, %v13221_v20 }
 0x426   : > { %5482 = vst [vmem:[%s7078_s17 + $0x6f0] sm:$0xff] %v5226_v43  ;;  %v4550_v53 = vsel %vm13227_vm12, %v6573_v10, %v4546_v29  ;;  %v4557_v35 = vmul.f32 %v6579_v24, %v13186_v44  ;;  %v4579_v23 = vand.u32 2147483647, %v13210_v26  ;;  %v4581_v39 = vand.u32 2147483648, %v13210_v26  ;;  %v13313_v43 = vld [vmem:[%s6904_s24 + $0x748] sm:$0xff] }
 0x427   : > { %v6581_v30 = vpop.eup %6580  ;;  %v4555_v56 = vsel %vm13215_vm15, %v4554_v60, %v4550_v53  ;;  %v4568_v15 = vor.u32 1.1754944e-38, %v4567_v27  ;;  %vm4575_vm1 = vweird.f32 %v13210_v26  ;;  %6586 = vrcp.f32 %v13235_v3 }
 0x428   : > { %v5227_v18 = vmul.f32 %v4555_v56, %v13019_v59  ;;  %v4558_v13 = vsub.f32 1.0, %v4557_v35  ;;  %vm4562_vm6 = vweird.f32 %v6579_v24  ;;  %v13256_v41 = vadd.f32 1.0, %v6581_v30 }
 0x429   : > { %v6583_v63 = vpop.eup %6582  ;;  %v4593_v49 = vand.u32 2147483647, %v13235_v3  ;;  %6588 = vpow2.f32 %v1110_v58  ;;  %v1112_v61 = vmul.f32 1.442695, %v626_v32  ;;  %v627_v4 = vsub.f32 0.0, %v13249_v17  ;;  %vm13271_vm3 = vmor %vm4561_vm0, %vm4562_vm6 }
 0x42a   : > { %5483 = vst [vmem:[%s7078_s17 + $0x6f8] sm:$0xff] %v5227_v18  ;;  %v4559_v45 = vmul.f32 %v6579_v24, %v4558_v13  ;;  %v4571_v7 = vmul.f32 %v6583_v63, %v13210_v26  ;;  %vm13262_vm2 = vcmp.eq.f32.partialorder %v4579_v23, 8.507059e+37  ;;  %v4582_v59 = vor.u32 1.1754944e-38, %v4581_v39 }
 0x42b   : > { %v6585_v40 = vpop.eup %6584  ;;  %vm4576_vm10 = vweird.f32 %v6583_v63  ;;  %vm4589_vm5 = vweird.f32 %v13235_v3  ;;  %v4595_v36 = vand.u32 2147483648, %v13235_v3  ;;  %6590 = vrcp.f32 %v13256_v41 }
 0x42c   : > { %v4560_v10 = vadd.f32 %v6579_v24, %v4559_v45  ;;  %v4572_v14 = vsub.f32 1.0, %v4571_v7  ;;  %v13278_v1 = vadd.f32 1.0, %v6585_v40  ;;  %6592 = vpow2.f32 %v1112_v61  ;;  %vm13295_vm7 = vmor %vm4575_vm1, %vm4576_vm10 }
 0x42d   : > { %v6587_v28 = vpop.eup %6586  ;;  %vm13280_vm14 = vcmp.eq.f32.partialorder %v4593_v49, 8.507059e+37  ;;  %v4607_v44 = vand.u32 2147483647, %v13256_v41  ;;  %v1114_v2 = vmul.f32 1.442695, %v627_v4  ;;  %v628_v48 = vsub.f32 0.0, %v13267_v55 }
 0x42e   : > { %v4564_v6 = vsel %vm13271_vm3, %v6579_v24, %v4560_v10  ;;  %v4573_v8 = vmul.f32 %v6583_v63, %v4572_v14  ;;  %v4585_v19 = vmul.f32 %v6587_v28, %v13235_v3  ;;  %v4609_v57 = vand.u32 2147483648, %v13256_v41 }
 0x42f   : > { %v6589_v62 = vpop.eup %6588  ;;  %v4569_v11 = vsel %vm13237_vm4, %v4568_v15, %v4564_v6  ;;  %v4596_v34 = vor.u32 1.1754944e-38, %v4595_v36  ;;  %vm4603_vm9 = vweird.f32 %v13256_v41  ;;  %6594 = vrcp.f32 %v13278_v1 }
 0x430   : > { %v5228_v33 = vmul.f32 %v4569_v11, %v13029_v25  ;;  %v4574_v46 = vadd.f32 %v6583_v63, %v4573_v8  ;;  %v4586_v38 = vsub.f32 1.0, %v4585_v19  ;;  %vm4590_vm8 = vweird.f32 %v6587_v28 }
 0x431   : > { %v6591_v54 = vpop.eup %6590  ;;  %vm13302_vm11 = vcmp.eq.f32.partialorder %v4607_v44, 8.507059e+37  ;;  %v13306_v26 = vadd.f32 1.0, %v6589_v62  ;;  %6596 = vpow2.f32 %v1114_v2  ;;  %v1116_v9 = vmul.f32 1.442695, %v628_v48  ;;  %vm13319_vm13 = vmor %vm4589_vm5, %vm4590_vm8 }
 0x432   : > { %v6593_v22 = vpop.eup %6592  ;;  %5484 = vst [vmem:[%s7078_s17 + $0x700] sm:$0xff] %v5228_v33  ;;  %v4578_v16 = vsel %vm13295_vm7, %v6583_v63, %v4574_v46  ;;  %v4587_v60 = vmul.f32 %v6587_v28, %v4586_v38  ;;  %v4599_v25 = vmul.f32 %v6591_v54, %v13256_v41  ;;  %v4610_v27 = vor.u32 1.1754944e-38, %v4609_v57  ;;  %v13386_v33 = vld [vmem:[%s6904_s24 + $0x758] sm:$0xff] }
 0x433   : > { %v4583_v29 = vsel %vm13262_vm2, %v4582_v59, %v4578_v16  ;;  %v4621_v12 = vand.u32 2147483647, %v13278_v1  ;;  %v4623_v58 = vand.u32 2147483648, %v13278_v1  ;;  %6598 = vrcp.f32 %v13306_v26 }
 0x434   : > { %v5229_v32 = vmul.f32 %v4583_v29, %v13058_v47  ;;  %v4588_v53 = vadd.f32 %v6587_v28, %v4587_v60  ;;  %v4600_v35 = vsub.f32 1.0, %v4599_v25  ;;  %vm4604_vm15 = vweird.f32 %v6591_v54 }
 0x435   : > { %v6595_v23 = vpop.eup %6594  ;;  %vm4617_vm12 = vweird.f32 %v13278_v1  ;;  %v13328_v39 = vadd.f32 1.0, %v6593_v22  ;;  %6600 = vpow2.f32 %v1116_v9  ;;  %v629_v3 = vsub.f32 0.0, %v13313_v43  ;;  %vm13340_vm0 = vmor %vm4603_vm9, %vm4604_vm15 }
 0x436   : > { %5485 = vst [vmem:[%s7078_s17 + $0x708] sm:$0xff] %v5229_v32  ;;  %v4592_v30 = vsel %vm13319_vm13, %v6587_v28, %v4588_v53  ;;  %v4601_v56 = vmul.f32 %v6591_v54, %v4600_v35  ;;  %v4613_v15 = vmul.f32 %v6595_v23, %v13278_v1  ;;  %v4635_v47 = vand.u32 2147483647, %v13306_v26  ;;  %v13418_v32 = vld [vmem:[%s6904_s24 + $0x768] sm:$0xff] }
 0x437   : > { %v6597_v18 = vpop.eup %6596  ;;  %v4597_v13 = vsel %vm13280_vm14, %v4596_v34, %v4592_v30  ;;  %vm13344_vm4 = vcmp.eq.f32.partialorder %v4621_v12, 8.507059e+37  ;;  %v4624_v61 = vor.u32 1.1754944e-38, %v4623_v58  ;;  %6602 = vrcp.f32 %v13328_v39  ;;  %v13415_v58 = vld [vmem:[%s6904_s24 + $0x760] sm:$0xff] }
 0x438   : > { %v5230_v4 = vmul.f32 %v4597_v13, %v13061_v50  ;;  %v4602_v45 = vadd.f32 %v6591_v54, %v4601_v56  ;;  %v4614_v7 = vsub.f32 1.0, %v4613_v15  ;;  %vm4618_vm1 = vweird.f32 %v6595_v23  ;;  %v13456_v50 = vld [vmem:[%s6904_s24 + $0x778] sm:$0xff] }
 0x439   : > { %v6599_v37 = vpop.eup %6598  ;;  %vm4631_vm6 = vweird.f32 %v13306_v26  ;;  %v4637_v41 = vand.u32 2147483648, %v13306_v26  ;;  %v13352_v59 = vadd.f32 1.0, %v6597_v18  ;;  %v1118_v40 = vmul.f32 1.442695, %v629_v3  ;;  %vm13366_vm3 = vmor %vm4617_vm12, %vm4618_vm1 }
 0x43a   : > { %5486 = vst [vmem:[%s7078_s17 + $0x710] sm:$0xff] %v5230_v4  ;;  %v4606_v31 = vsel %vm13340_vm0, %v6591_v54, %v4602_v45  ;;  %v4615_v36 = vmul.f32 %v6595_v23, %v4614_v7  ;;  %v4627_v10 = vmul.f32 %v6599_v37, %v13306_v26  ;;  %vm13358_vm2 = vcmp.eq.f32.partialorder %v4635_v47, 8.507059e+37 }
 0x43b   : > { %v6601_v14 = vpop.eup %6600  ;;  %v4611_v28 = vsel %vm13302_vm11, %v4610_v27, %v4606_v31  ;;  %v4649_v44 = vand.u32 2147483647, %v13328_v39  ;;  %v4651_v2 = vand.u32 2147483648, %v13328_v39  ;;  %6604 = vrcp.f32 %v13352_v59 }
 0x43c   : > { %v5231_v48 = vmul.f32 %v4611_v28, %v13096_v5  ;;  %v4616_v6 = vadd.f32 %v6595_v23, %v4615_v36  ;;  %v4628_v8 = vsub.f32 1.0, %v4627_v10  ;;  %vm4632_vm10 = vweird.f32 %v6599_v37  ;;  %v13383_v5 = vld [vmem:[%s6904_s24 + $0x750] sm:$0xff] }
 0x43d   : > { %v6603_v19 = vpop.eup %6602  ;;  %v4638_v57 = vor.u32 1.1754944e-38, %v4637_v41  ;;  %vm4645_vm5 = vweird.f32 %v13328_v39  ;;  %v13375_v1 = vadd.f32 1.0, %v6601_v14  ;;  %6606 = vpow2.f32 %v1118_v40  ;;  %vm13392_vm14 = vmor %vm4631_vm6, %vm4632_vm10  ;;  %v13452_v40 = vld [vmem:[%s6904_s24 + $0x770] sm:$0xff] }
 0x43e   : > { %5487 = vst [vmem:[%s7078_s17 + $0x718] sm:$0xff] %v5231_v48  ;;  %v4620_v62 = vsel %vm13366_vm3, %v6595_v23, %v4616_v6  ;;  %v4629_v11 = vmul.f32 %v6599_v37, %v4628_v8  ;;  %v4641_v21 = vmul.f32 %v6603_v19, %v13328_v39  ;;  %v4663_v34 = vand.u32 2147483647, %v13352_v59 }
 0x43f   : > { %v4625_v46 = vsel %vm13344_vm4, %v4624_v61, %v4620_v62  ;;  %vm13396_vm7 = vcmp.eq.f32.partialorder %v4649_v44, 8.507059e+37  ;;  %v4652_v42 = vor.u32 1.1754944e-38, %v4651_v2  ;;  %6608 = vrcp.f32 %v13375_v1 }
 0x440   : > { %v5232_v9 = vmul.f32 %v4625_v46, %v13168_v0  ;;  %v4630_v22 = vadd.f32 %v6599_v37, %v4629_v11  ;;  %v4642_v16 = vsub.f32 1.0, %v4641_v21  ;;  %vm4646_vm9 = vweird.f32 %v6603_v19 }
 0x441   : > { %v6605_v60 = vpop.eup %6604  ;;  %vm4659_vm8 = vweird.f32 %v13352_v59  ;;  %v4665_v26 = vand.u32 2147483648, %v13352_v59  ;;  %v630_v25 = vsub.f32 0.0, %v13383_v5  ;;  %v631_v27 = vsub.f32 0.0, %v13386_v33  ;;  %vm13425_vm13 = vmor %vm4645_vm5, %vm4646_vm9 }
 0x442   : > { %5488 = vst [vmem:[%s7078_s17 + $0x720] sm:$0xff] %v5232_v9  ;;  %v4634_v29 = vsel %vm13392_vm14, %v6599_v37, %v4630_v22  ;;  %v4643_v24 = vmul.f32 %v6603_v19, %v4642_v16  ;;  %v4655_v12 = vmul.f32 %v6605_v60, %v13352_v59  ;;  %vm13410_vm11 = vcmp.eq.f32.partialorder %v4663_v34, 8.507059e+37  ;;  %v13459_v59 = vld [vmem:[%s6904_s24 + $0x780] sm:$0xff] }
 0x443   : > { %v6607_v53 = vpop.eup %6606  ;;  %v4639_v35 = vsel %vm13358_vm2, %v4638_v57, %v4634_v29  ;;  %vm4660_vm15 = vweird.f32 %v6605_v60  ;;  %v4677_v3 = vand.u32 2147483647, %v13375_v1  ;;  %v1120_v30 = vmul.f32 1.442695, %v630_v25  ;;  %v13494_v25 = vld [vmem:[%s6904_s24 + $0x788] sm:$0xff] }
 0x444   : > { %v5233_v56 = vmul.f32 %v4639_v35, %v13206_v52  ;;  %v4644_v15 = vadd.f32 %v6603_v19, %v4643_v24  ;;  %v4656_v47 = vsub.f32 1.0, %v4655_v12  ;;  %v13431_v18 = vadd.f32 1.0, %v6607_v53  ;;  %vm13445_vm12 = vmor %vm4659_vm8, %vm4660_vm15 }
 0x445   : > { %v6609_v13 = vpop.eup %6608  ;;  %6610 = vpow2.f32 %v1120_v30  ;;  %v1122_v63 = vmul.f32 1.442695, %v631_v27  ;;  %v632_v39 = vsub.f32 0.0, %v13415_v58  ;;  %v633_v49 = vsub.f32 0.0, %v13418_v32 }
 0x446   : > { %5489 = vst [vmem:[%s7078_s17 + $0x728] sm:$0xff] %v5233_v56  ;;  %v4648_v61 = vsel %vm13425_vm13, %v6603_v19, %v4644_v15  ;;  %v4657_v4 = vmul.f32 %v6605_v60, %v4656_v47  ;;  %v4669_v52 = vmul.f32 %v6609_v13, %v13375_v1  ;;  %v4679_v45 = vand.u32 2147483648, %v13375_v1  ;;  %v13740_v19 = vld [vmem:[%s6904_s24 + $0x7d8] sm:$0xff] }
 0x447   : > { %v4653_v7 = vsel %vm13396_vm7, %v4652_v42, %v4648_v61  ;;  %v4666_v41 = vor.u32 1.1754944e-38, %v4665_v26  ;;  %vm4673_vm0 = vweird.f32 %v13375_v1  ;;  %6612 = vrcp.f32 %v13431_v18 }
 0x448   : > { %v5234_v31 = vmul.f32 %v4653_v7, %v13221_v20  ;;  %v4658_v36 = vadd.f32 %v6605_v60, %v4657_v4  ;;  %v4670_v10 = vsub.f32 1.0, %v4669_v52  ;;  %vm4674_vm4 = vweird.f32 %v6609_v13  ;;  %v13529_v4 = vld [vmem:[%s6904_s24 + $0x790] sm:$0xff] }
 0x449   : > { %vm13461_vm1 = vcmp.eq.f32.partialorder %v4677_v3, 8.507059e+37  ;;  %6614 = vpow2.f32 %v1122_v63  ;;  %v1124_v28 = vmul.f32 1.442695, %v632_v39  ;;  %v1126_v51 = vmul.f32 1.442695, %v633_v49  ;;  %vm13473_vm6 = vmor %vm4673_vm0, %vm4674_vm4 }
 0x44a   : > { %5490 = vst [vmem:[%s7078_s17 + $0x730] sm:$0xff] %v5234_v31  ;;  %v4662_v44 = vsel %vm13445_vm12, %v6605_v60, %v4658_v36  ;;  %v4671_v2 = vmul.f32 %v6609_v13, %v4670_v10  ;;  %v4680_v20 = vor.u32 1.1754944e-38, %v4679_v45  ;;  %v634_v48 = vsub.f32 0.0, %v13452_v40 }
 0x44b   : > { %v6611_v6 = vpop.eup %6610  ;;  %v4667_v8 = vsel %vm13410_vm11, %v4666_v41, %v4662_v44  ;;  %6616 = vpow2.f32 %v1124_v28  ;;  %v635_v57 = vsub.f32 0.0, %v13456_v50  ;;  %v636_v62 = vsub.f32 0.0, %v13459_v59 }
 0x44c   : > { %v5235_v11 = vmul.f32 %v4667_v8, %v13249_v17  ;;  %v4672_v21 = vadd.f32 %v6609_v13, %v4671_v2  ;;  %v13480_v34 = vadd.f32 1.0, %v6611_v6  ;;  %6618 = vpow2.f32 %v1126_v51 }
 0x44d   : > { %v6613_v46 = vpop.eup %6612  ;;  %vm4687_vm2 = vweird.f32 %v13431_v18  ;;  %v4691_v1 = vand.u32 2147483647, %v13431_v18  ;;  %v1128_v38 = vmul.f32 1.442695, %v634_v48  ;;  %v1130_v54 = vmul.f32 1.442695, %v635_v57 }
 0x44e   : > { %5491 = vst [vmem:[%s7078_s17 + $0x738] sm:$0xff] %v5235_v11  ;;  %v4676_v42 = vsel %vm13473_vm6, %v6609_v13, %v4672_v21  ;;  %v4683_v9 = vmul.f32 %v6613_v46, %v13431_v18  ;;  %v4693_v17 = vand.u32 2147483648, %v13431_v18  ;;  %6620 = vrcp.f32 %v13480_v34 }
 0x44f   : > { %v6615_v22 = vpop.eup %6614  ;;  %v4681_v16 = vsel %vm13461_vm1, %v4680_v20, %v4676_v42  ;;  %vm4688_vm3 = vweird.f32 %v6613_v46  ;;  %v4705_v60 = vand.u32 2147483647, %v13480_v34  ;;  %v1132_v26 = vmul.f32 1.442695, %v636_v62 }
 0x450   : > { %v5236_v27 = vmul.f32 %v4681_v16, %v13267_v55  ;;  %v4684_v29 = vsub.f32 1.0, %v4683_v9  ;;  %v13497_v24 = vadd.f32 1.0, %v6615_v22  ;;  %6622 = vpow2.f32 %v1128_v38  ;;  %vm13510_vm5 = vmor %vm4687_vm2, %vm4688_vm3 }
 0x451   : > { %v6617_v12 = vpop.eup %6616  ;;  %vm13499_vm10 = vcmp.eq.f32.partialorder %v4691_v1, 8.507059e+37  ;;  %v4707_v53 = vand.u32 2147483648, %v13480_v34  ;;  %6624 = vpow2.f32 %v1130_v54  ;;  %v4694_v3 = vor.u32 1.1754944e-38, %v4693_v17 }
 0x452   : > { %v6619_v35 = vpop.eup %6618  ;;  %5492 = vst [vmem:[%s7078_s17 + $0x740] sm:$0xff] %v5236_v27  ;;  %v4685_v23 = vmul.f32 %v6613_v46, %v4684_v29  ;;  %6626 = vrcp.f32 %v13497_v24  ;;  %v637_v55 = vsub.f32 0.0, %v13494_v25  ;;  %v4719_v56 = vand.u32 2147483647, %v13497_v24 }
 0x453   : > { %v13515_v15 = vadd.f32 1.0, %v6617_v12  ;;  %v13517_v47 = vadd.f32 1.0, %v6619_v35  ;;  %6628 = vpow2.f32 %v1132_v26  ;;  %vm4701_vm14 = vweird.f32 %v13480_v34 }
 0x454   : > { %v6621_v13 = vpop.eup %6620  ;;  %v4686_v63 = vadd.f32 %v6613_v46, %v4685_v23  ;;  %vm13520_vm7 = vcmp.eq.f32.partialorder %v4705_v60, 8.507059e+37  ;;  %v4721_v18 = vand.u32 2147483648, %v13497_v24  ;;  %v4708_v61 = vor.u32 1.1754944e-38, %v4707_v53 }
 0x455   : > { %v4697_v49 = vmul.f32 %v6621_v13, %v13480_v34  ;;  %vm4715_vm9 = vweird.f32 %v13497_v24  ;;  %6630 = vrcp.f32 %v13515_v15  ;;  %v4733_v7 = vand.u32 2147483647, %v13515_v15 }
 0x456   : > { %v6623_v52 = vpop.eup %6622  ;;  %v4690_v45 = vsel %vm13510_vm5, %v6613_v46, %v4686_v63  ;;  %v4735_v37 = vand.u32 2147483648, %v13515_v15  ;;  %v1134_v41 = vmul.f32 1.442695, %v637_v55  ;;  %vm4702_vm8 = vweird.f32 %v6621_v13 }
 0x457   : > { %v6625_v31 = vpop.eup %6624  ;;  %v4695_v36 = vsel %vm13499_vm10, %v4694_v3, %v4690_v45  ;;  %v4698_v10 = vsub.f32 1.0, %v4697_v49  ;;  %vm13537_vm11 = vcmp.eq.f32.partialorder %v4719_v56, 8.507059e+37  ;;  %6632 = vrcp.f32 %v13517_v47  ;;  %vm13551_vm12 = vmor %vm4701_vm14, %vm4702_vm8  ;;  %v13708_v49 = vld [vmem:[%s6904_s24 + $0x7c8] sm:$0xff] }
 0x458   : > { %v6627_v28 = vpop.eup %6626  ;;  %v5237_v51 = vmul.f32 %v4695_v36, %v13313_v43  ;;  %v4722_v44 = vor.u32 1.1754944e-38, %v4721_v18  ;;  %v4747_v2 = vand.u32 2147483647, %v13517_v47  ;;  %v638_v20 = vsub.f32 0.0, %v13529_v4 }
 0x459   : > { %v6629_v48 = vpop.eup %6628  ;;  %v4699_v6 = vmul.f32 %v6621_v13, %v4698_v10  ;;  %v4711_v8 = vmul.f32 %v6627_v28, %v13497_v24  ;;  %vm4729_vm13 = vweird.f32 %v13515_v15  ;;  %vm4743_vm15 = vweird.f32 %v13517_v47 }
 0x45a   : > { %5493 = vst [vmem:[%s7078_s17 + $0x748] sm:$0xff] %v5237_v51  ;;  %vm4716_vm0 = vweird.f32 %v6627_v28  ;;  %vm13555_vm4 = vcmp.eq.f32.partialorder %v4733_v7, 8.507059e+37  ;;  %v4736_v57 = vor.u32 1.1754944e-38, %v4735_v37  ;;  %v13559_v62 = vadd.f32 1.0, %v6623_v52 }
 0x45b   : > { %v6631_v11 = vpop.eup %6630  ;;  %v4700_v21 = vadd.f32 %v6621_v13, %v4699_v6  ;;  %v4712_v46 = vsub.f32 1.0, %v4711_v8  ;;  %v4749_v1 = vand.u32 2147483648, %v13517_v47  ;;  %6634 = vpow2.f32 %v1134_v41  ;;  %vm13581_vm6 = vmor %vm4715_vm9, %vm4716_vm0 }
 0x45c   : > { %v4725_v34 = vmul.f32 %v6631_v11, %v13515_v15  ;;  %vm13563_vm1 = vcmp.eq.f32.partialorder %v4747_v2, 8.507059e+37  ;;  %6636 = vrcp.f32 %v13559_v62  ;;  %v13568_v54 = vadd.f32 1.0, %v6625_v31 }
 0x45d   : > { %v13570_v42 = vadd.f32 1.0, %v6629_v48  ;;  %v6633_v9 = vpop.eup %6632  ;;  %v4704_v17 = vsel %vm13551_vm12, %v6621_v13, %v4700_v21  ;;  %v4713_v22 = vmul.f32 %v6627_v28, %v4712_v46  ;;  %v4761_v16 = vand.u32 2147483647, %v13559_v62  ;;  %v13656_v21 = vld [vmem:[%s6904_s24 + $0x7a0] sm:$0xff] }
 0x45e   : > { %v4763_v60 = vand.u32 2147483648, %v13559_v62  ;;  %v4709_v26 = vsel %vm13520_vm7, %v4708_v61, %v4704_v17  ;;  %v4726_v29 = vsub.f32 1.0, %v4725_v34  ;;  %vm4730_vm2 = vweird.f32 %v6631_v11 }
 0x45f   : > { %v4739_v12 = vmul.f32 %v6633_v9, %v13517_v47  ;;  %v5238_v0 = vmul.f32 %v4709_v26, %v13383_v5  ;;  %v4714_v53 = vadd.f32 %v6627_v28, %v4713_v22  ;;  %v4750_v35 = vor.u32 1.1754944e-38, %v4749_v1  ;;  %vm13594_vm5 = vmor %vm4729_vm13, %vm4730_vm2  ;;  %v13665_v22 = vld [vmem:[%s6904_s24 + $0x7a8] sm:$0xff] }
 0x460   : > { %vm4757_vm3 = vweird.f32 %v13559_v62  ;;  %v4727_v23 = vmul.f32 %v6631_v11, %v4726_v29  ;;  %vm4744_vm10 = vweird.f32 %v6633_v9  ;;  %6638 = vrcp.f32 %v13568_v54 }
 0x461   : > { %v4740_v3 = vsub.f32 1.0, %v4739_v12  ;;  %v6635_v24 = vpop.eup %6634  ;;  %5494 = vst [vmem:[%s7078_s17 + $0x750] sm:$0xff] %v5238_v0  ;;  %v4718_v55 = vsel %vm13581_vm6, %v6627_v28, %v4714_v53  ;;  %vm13598_vm14 = vcmp.eq.f32.partialorder %v4761_v16, 8.507059e+37  ;;  %v4764_v56 = vor.u32 1.1754944e-38, %v4763_v60  ;;  %vm13610_vm9 = vmor %vm4743_vm15, %vm4744_vm10  ;;  %v13668_v16 = vld [vmem:[%s6904_s24 + $0x7b0] sm:$0xff]  ;;  %v13681_v12 = vld [vmem:[%s6904_s24 + $0x7b8] sm:$0xff] }
 0x462   : > { %6640 = vrcp.f32 %v13570_v42  ;;  %v6637_v13 = vpop.eup %6636  ;;  %v4723_v63 = vsel %vm13537_vm11, %v4722_v44, %v4718_v55  ;;  %v4728_v39 = vadd.f32 %v6631_v11, %v4727_v23  ;;  %vm4771_vm7 = vweird.f32 %v13568_v54  ;;  %v13684_v0 = vld [vmem:[%s6904_s24 + $0x7c0] sm:$0xff] }
 0x463   : > { %v4741_v18 = vmul.f32 %v6633_v9, %v4740_v3  ;;  %v5239_v15 = vmul.f32 %v4723_v63, %v13386_v33  ;;  %v4753_v61 = vmul.f32 %v6637_v13, %v13559_v62  ;;  %v4775_v52 = vand.u32 2147483647, %v13568_v54 }
 0x464   : > { %v4777_v45 = vand.u32 2147483648, %v13568_v54  ;;  %v4732_v7 = vsel %vm13594_vm5, %v6631_v11, %v4728_v39  ;;  %vm4785_vm8 = vweird.f32 %v13570_v42  ;;  %v4789_v33 = vand.u32 2147483647, %v13570_v42  ;;  %v13653_v11 = vld [vmem:[%s6904_s24 + $0x798] sm:$0xff] }
 0x465   : > { %v4742_v37 = vadd.f32 %v6633_v9, %v4741_v18  ;;  %5495 = vst [vmem:[%s7078_s17 + $0x758] sm:$0xff] %v5239_v15  ;;  %v4737_v47 = vsel %vm13555_vm4, %v4736_v57, %v4732_v7  ;;  %v4754_v41 = vsub.f32 1.0, %v4753_v61  ;;  %vm4758_vm11 = vweird.f32 %v6637_v13 }
 0x466   : > { %v13624_v31 = vadd.f32 1.0, %v6635_v24  ;;  %v6639_v36 = vpop.eup %6638  ;;  %v5240_v10 = vmul.f32 %v4737_v47, %v13415_v58  ;;  %v4791_v28 = vand.u32 2147483648, %v13570_v42  ;;  %v1136_v51 = vmul.f32 1.442695, %v638_v20  ;;  %vm13643_vm15 = vmor %vm4757_vm3, %vm4758_vm11 }
 0x467   : > { %v4746_v14 = vsel %vm13610_vm9, %v6633_v9, %v4742_v37  ;;  %v4755_v48 = vmul.f32 %v6637_v13, %v4754_v41  ;;  %v4767_v6 = vmul.f32 %v6639_v36, %v13568_v54  ;;  %vm13635_vm13 = vcmp.eq.f32.partialorder %v4775_v52, 8.507059e+37 }
 0x468   : > { %v6641_v44 = vpop.eup %6640  ;;  %v4751_v2 = vsel %vm13563_vm1, %v4750_v35, %v4746_v14  ;;  %5496 = vst [vmem:[%s7078_s17 + $0x760] sm:$0xff] %v5240_v10  ;;  %v4778_v20 = vor.u32 1.1754944e-38, %v4777_v45  ;;  %vm13648_vm12 = vcmp.eq.f32.partialorder %v4789_v33, 8.507059e+37  ;;  %vm4772_vm0 = vweird.f32 %v6639_v36 }
 0x469   : > { %v5241_v58 = vmul.f32 %v4751_v2, %v13418_v32  ;;  %v4781_v43 = vmul.f32 %v6641_v44, %v13570_v42  ;;  %v4756_v32 = vadd.f32 %v6637_v13, %v4755_v48  ;;  %v4768_v46 = vsub.f32 1.0, %v4767_v6  ;;  %vm13674_vm1 = vmor %vm4771_vm7, %vm4772_vm0  ;;  %v13730_v2 = vld [vmem:[%s6904_s24 + $0x7d0] sm:$0xff] }
 0x46a   : > { %6642 = vrcp.f32 %v13624_v31  ;;  %vm4786_vm4 = vweird.f32 %v6641_v44  ;;  %v4792_v1 = vor.u32 1.1754944e-38, %v4791_v28  ;;  %v639_v9 = vsub.f32 0.0, %v13653_v11 }
 0x46b   : > { %5497 = vst [vmem:[%s7078_s17 + $0x768] sm:$0xff] %v5241_v58  ;;  %v4782_v62 = vsub.f32 1.0, %v4781_v43  ;;  %6644 = vpow2.f32 %v1136_v51  ;;  %v4760_v34 = vsel %vm13643_vm15, %v6637_v13, %v4756_v32  ;;  %v4769_v38 = vmul.f32 %v6639_v36, %v4768_v46  ;;  %vm13690_vm2 = vmor %vm4785_vm8, %vm4786_vm4 }
 0x46c   : > { %v640_v17 = vsub.f32 0.0, %v13656_v21  ;;  %v4765_v60 = vsel %vm13598_vm14, %v4764_v56, %v4760_v34  ;;  %vm4799_vm6 = vweird.f32 %v13624_v31  ;;  %v4803_v29 = vand.u32 2147483647, %v13624_v31 }
 0x46d   : > { %v4783_v27 = vmul.f32 %v6641_v44, %v4782_v62  ;;  %v5242_v53 = vmul.f32 %v4765_v60, %v13452_v40  ;;  %v4770_v35 = vadd.f32 %v6639_v36, %v4769_v38  ;;  %v1138_v23 = vmul.f32 1.442695, %v639_v9  ;;  %v13754_v62 = vld [vmem:[%s6904_s24 + $0x7e8] sm:$0xff] }
 0x46e   : > { %v1140_v3 = vmul.f32 1.442695, %v640_v17  ;;  %v4805_v55 = vand.u32 2147483648, %v13624_v31  ;;  %v641_v30 = vsub.f32 0.0, %v13665_v22  ;;  %v642_v5 = vsub.f32 0.0, %v13668_v16 }
 0x46f   : > { %v4784_v24 = vadd.f32 %v6641_v44, %v4783_v27  ;;  %5498 = vst [vmem:[%s7078_s17 + $0x770] sm:$0xff] %v5242_v53  ;;  %v4774_v40 = vsel %vm13674_vm1, %v6639_v36, %v4770_v35  ;;  %6646 = vpow2.f32 %v1138_v23  ;;  %v643_v42 = vsub.f32 0.0, %v13681_v12 }
 0x470   : > { %v6643_v56 = vpop.eup %6642  ;;  %v644_v13 = vsub.f32 0.0, %v13684_v0  ;;  %v4779_v39 = vsel %vm13635_vm13, %v4778_v20, %v4774_v40  ;;  %6648 = vpow2.f32 %v1140_v3  ;;  %v1142_v33 = vmul.f32 1.442695, %v641_v30  ;;  %v13743_v20 = vld [vmem:[%s6904_s24 + $0x7e0] sm:$0xff] }
 0x471   : > { %v6645_v63 = vpop.eup %6644  ;;  %v4788_v18 = vsel %vm13690_vm2, %v6641_v44, %v4784_v24  ;;  %v4795_v15 = vmul.f32 %v6643_v56, %v13624_v31  ;;  %vm4800_vm3 = vweird.f32 %v6643_v56  ;;  %v5243_v61 = vmul.f32 %v4779_v39, %v13456_v50 }
 0x472   : > { %v4793_v52 = vsel %vm13648_vm12, %v4792_v1, %v4788_v18  ;;  %v13713_v45 = vadd.f32 1.0, %v6645_v63  ;;  %v1144_v47 = vmul.f32 1.442695, %v642_v5  ;;  %v645_v50 = vsub.f32 0.0, %v13708_v49  ;;  %vm13725_vm10 = vmor %vm4799_vm6, %vm4800_vm3 }
 0x473   : > { %v5244_v7 = vmul.f32 %v4793_v52, %v13459_v59  ;;  %v4796_v37 = vsub.f32 1.0, %v4795_v15  ;;  %5499 = vst [vmem:[%s7078_s17 + $0x778] sm:$0xff] %v5243_v61  ;;  %v1146_v14 = vmul.f32 1.442695, %v643_v42  ;;  %v1148_v59 = vmul.f32 1.442695, %v644_v13 }
 0x474   : > { %6650 = vrcp.f32 %v13713_v45  ;;  %v4817_v41 = vand.u32 2147483647, %v13713_v45  ;;  %v4819_v36 = vand.u32 2147483648, %v13713_v45  ;;  %v4806_v44 = vor.u32 1.1754944e-38, %v4805_v55 }
 0x475   : > { %5500 = vst [vmem:[%s7078_s17 + $0x780] sm:$0xff] %v5244_v7  ;;  %v4797_v10 = vmul.f32 %v6643_v56, %v4796_v37  ;;  %6652 = vpow2.f32 %v1142_v33  ;;  %v6647_v28 = vpop.eup %6646  ;;  %vm13732_vm5 = vcmp.eq.f32.partialorder %v4803_v29, 8.507059e+37  ;;  %vm4813_vm14 = vweird.f32 %v13713_v45 }
 0x476   : > { %6654 = vpow2.f32 %v1144_v47  ;;  %v13736_v8 = vadd.f32 1.0, %v6647_v28  ;;  %v6649_v58 = vpop.eup %6648  ;;  %v4820_v31 = vor.u32 1.1754944e-38, %v4819_v36  ;;  %vm13747_vm7 = vcmp.eq.f32.partialorder %v4817_v41, 8.507059e+37 }
 0x477   : > { %v4798_v48 = vadd.f32 %v6643_v56, %v4797_v10  ;;  %6656 = vpow2.f32 %v1146_v14  ;;  %v1150_v32 = vmul.f32 1.442695, %v645_v50  ;;  %v646_v46 = vsub.f32 0.0, %v13730_v2 }
 0x478   : > { %6658 = vpow2.f32 %v1148_v59  ;;  %v4831_v38 = vand.u32 2147483647, %v13736_v8  ;;  %v4833_v9 = vand.u32 2147483648, %v13736_v8  ;;  %v13760_v17 = vadd.f32 1.0, %v6649_v58 }
 0x479   : > { %v4802_v43 = vsel %vm13725_vm10, %v6643_v56, %v4798_v48  ;;  %6660 = vrcp.f32 %v13736_v8  ;;  %v647_v29 = vsub.f32 0.0, %v13740_v19  ;;  %v648_v53 = vsub.f32 0.0, %v13743_v20 }
 0x47a   : > { %v6651_v1 = vpop.eup %6650  ;;  %v4807_v34 = vsel %vm13732_vm5, %v4806_v44, %v4802_v43  ;;  %6662 = vrcp.f32 %v13760_v17  ;;  %v4845_v54 = vand.u32 2147483647, %v13760_v17  ;;  %v649_v23 = vsub.f32 0.0, %v13754_v62  ;;  %v13899_v44 = vld [vmem:[%s6904_s24 + $0x7f0] sm:$0xff] }
 0x47b   : > { %v6653_v60 = vpop.eup %6652  ;;  %v5245_v26 = vmul.f32 %v4807_v34, %v13494_v25  ;;  %v4809_v27 = vmul.f32 %v6651_v1, %v13713_v45  ;;  %vm4814_vm9 = vweird.f32 %v6651_v1  ;;  %v4847_v55 = vand.u32 2147483648, %v13760_v17 }
 0x47c   : > { %v6655_v35 = vpop.eup %6654  ;;  %v13771_v25 = vadd.f32 1.0, %v6653_v60  ;;  %vm4827_vm8 = vweird.f32 %v13736_v8  ;;  %vm13776_vm11 = vcmp.eq.f32.partialorder %v4831_v38, 8.507059e+37  ;;  %v4834_v40 = vor.u32 1.1754944e-38, %v4833_v9  ;;  %vm13787_vm15 = vmor %vm4813_vm14, %vm4814_vm9 }
 0x47d   : > { %v6657_v3 = vpop.eup %6656  ;;  %5501 = vst [vmem:[%s7078_s17 + $0x788] sm:$0xff] %v5245_v26  ;;  %v4810_v24 = vsub.f32 1.0, %v4809_v27  ;;  %v13773_v30 = vadd.f32 1.0, %v6655_v35  ;;  %6664 = vpow2.f32 %v1150_v32  ;;  %vm4841_vm13 = vweird.f32 %v13760_v17 }
 0x47e   : > { %v6659_v5 = vpop.eup %6658  ;;  %6666 = vrcp.f32 %v13771_v25  ;;  %v13782_v63 = vadd.f32 1.0, %v6657_v3  ;;  %v4859_v15 = vand.u32 2147483647, %v13771_v25  ;;  %v13793_v61 = vmul.f32 1.442695, %v646_v46 }
 0x47f   : > { %v6661_v42 = vpop.eup %6660  ;;  %v4811_v13 = vmul.f32 %v6651_v1, %v4810_v24  ;;  %v13795_v52 = vmul.f32 1.442695, %v647_v29  ;;  %vm13797_vm12 = vcmp.eq.f32.partialorder %v4845_v54, 8.507059e+37  ;;  %v4848_v33 = vor.u32 1.1754944e-38, %v4847_v55 }
 0x480   : > { %v4823_v18 = vmul.f32 %v6661_v42, %v13736_v8  ;;  %v4861_v45 = vand.u32 2147483648, %v13771_v25  ;;  %6668 = vrcp.f32 %v13773_v30  ;;  %v6663_v47 = vpop.eup %6662  ;;  %vm4828_vm0 = vweird.f32 %v6661_v42 }
 0x481   : > { %v4812_v7 = vadd.f32 %v6651_v1, %v4811_v13  ;;  %v4873_v36 = vand.u32 2147483647, %v13773_v30  ;;  %v4875_v50 = vand.u32 2147483648, %v13773_v30  ;;  %v4837_v14 = vmul.f32 %v6663_v47, %v13760_v17  ;;  %vm13820_vm2 = vmor %vm4827_vm8, %vm4828_vm0 }
 0x482   : > { %v4824_v41 = vsub.f32 1.0, %v4823_v18  ;;  %vm4855_vm4 = vweird.f32 %v13771_v25  ;;  %vm4869_vm1 = vweird.f32 %v13773_v30  ;;  %vm13812_vm6 = vcmp.eq.f32.partialorder %v4859_v15, 8.507059e+37 }
 0x483   : > { %v4816_v10 = vsel %vm13787_vm15, %v6651_v1, %v4812_v7  ;;  %v6665_v59 = vpop.eup %6664  ;;  %6670 = vrcp.f32 %v13782_v63  ;;  %v4838_v43 = vsub.f32 1.0, %v4837_v14  ;;  %vm4842_vm3 = vweird.f32 %v6663_v47 }
 0x484   : > { %v4821_v28 = vsel %vm13747_vm7, %v4820_v31, %v4816_v10  ;;  %v4825_v51 = vmul.f32 %v6661_v42, %v4824_v41  ;;  %v6667_v48 = vpop.eup %6666  ;;  %v4862_v31 = vor.u32 1.1754944e-38, %v4861_v45  ;;  %vm13825_vm10 = vcmp.eq.f32.partialorder %v4873_v36, 8.507059e+37  ;;  %vm13838_vm7 = vmor %vm4841_vm13, %vm4842_vm3 }
 0x485   : > { %v5246_v6 = vmul.f32 %v4821_v28, %v13529_v4  ;;  %v4851_v32 = vmul.f32 %v6667_v48, %v13771_v25  ;;  %v4876_v1 = vor.u32 1.1754944e-38, %v4875_v50  ;;  %vm4883_vm5 = vweird.f32 %v13782_v63 }
 0x486   : > { %v4826_v57 = vadd.f32 %v6661_v42, %v4825_v51  ;;  %v6669_v4 = vpop.eup %6668  ;;  %v4839_v8 = vmul.f32 %v6663_v47, %v4838_v43  ;;  %vm4856_vm14 = vweird.f32 %v6667_v48  ;;  %v4887_v34 = vand.u32 2147483647, %v13782_v63 }
 0x487   : > { %5502 = vst [vmem:[%s7078_s17 + $0x790] sm:$0xff] %v5246_v6  ;;  %v13832_v38 = vadd.f32 1.0, %v6659_v5  ;;  %v4852_v26 = vsub.f32 1.0, %v4851_v32  ;;  %v4865_v27 = vmul.f32 %v6669_v4, %v13773_v30  ;;  %v4889_v29 = vand.u32 2147483648, %v13782_v63  ;;  %vm13855_vm8 = vmor %vm4855_vm4, %vm4856_vm14 }
 0x488   : > { %v4830_v9 = vsel %vm13820_vm2, %v6661_v42, %v4826_v57  ;;  %v4840_v54 = vadd.f32 %v6663_v47, %v4839_v8  ;;  %v13847_v3 = vadd.f32 1.0, %v6665_v59  ;;  %vm4870_vm9 = vweird.f32 %v6669_v4 }
 0x489   : > { %v4835_v35 = vsel %vm13776_vm11, %v4834_v40, %v4830_v9  ;;  %6672 = vrcp.f32 %v13832_v38  ;;  %v6671_v24 = vpop.eup %6670  ;;  %v4853_v55 = vmul.f32 %v6667_v48, %v4852_v26  ;;  %v4866_v5 = vsub.f32 1.0, %v4865_v27  ;;  %vm13872_vm13 = vmor %vm4869_vm1, %vm4870_vm9 }
 0x48a   : > { %v5247_v17 = vmul.f32 %v4835_v35, %v13653_v11  ;;  %v4844_v42 = vsel %vm13838_vm7, %v6663_v47, %v4840_v54  ;;  %v4879_v40 = vmul.f32 %v6671_v24, %v13782_v63  ;;  %vm13860_vm11 = vcmp.eq.f32.partialorder %v4887_v34, 8.507059e+37 }
 0x48b   : > { %v4901_v11 = vand.u32 2147483647, %v13832_v38  ;;  %v4849_v39 = vsel %vm13797_vm12, %v4848_v33, %v4844_v42  ;;  %v4854_v18 = vadd.f32 %v6667_v48, %v4853_v55  ;;  %v4867_v15 = vmul.f32 %v6669_v4, %v4866_v5 }
 0x48c   : > { %5503 = vst [vmem:[%s7078_s17 + $0x798] sm:$0xff] %v5247_v17  ;;  %v4903_v25 = vand.u32 2147483648, %v13832_v38  ;;  %v5248_v7 = vmul.f32 %v4849_v39, %v13656_v21  ;;  %v4880_v47 = vsub.f32 1.0, %v4879_v40  ;;  %vm4884_vm15 = vweird.f32 %v6671_v24 }
 0x48d   : > { %6674 = vrcp.f32 %v13847_v3  ;;  %v4858_v37 = vsel %vm13855_vm8, %v6667_v48, %v4854_v18  ;;  %v4868_v33 = vadd.f32 %v6669_v4, %v4867_v15  ;;  %v4890_v41 = vor.u32 1.1754944e-38, %v4889_v29  ;;  %vm13892_vm4 = vmor %vm4883_vm5, %vm4884_vm15 }
 0x48e   : > { %vm4897_vm12 = vweird.f32 %v13832_v38  ;;  %5504 = vst [vmem:[%s7078_s17 + $0x7a0] sm:$0xff] %v5248_v7  ;;  %v4863_v21 = vsel %vm13812_vm6, %v4862_v31, %v4858_v37  ;;  %v4881_v30 = vmul.f32 %v6671_v24, %v4880_v47  ;;  %vm13883_vm0 = vcmp.eq.f32.partialorder %v4901_v11, 8.507059e+37  ;;  %v13910_v31 = vld [vmem:[%s6904_s24 + $0x7f8] sm:$0xff] }
 0x48f   : > { %v6673_v36 = vpop.eup %6672  ;;  %v4904_v10 = vor.u32 1.1754944e-38, %v4903_v25  ;;  %v5249_v14 = vmul.f32 %v4863_v21, %v13665_v22  ;;  %v4872_v59 = vsel %vm13872_vm13, %v6669_v4, %v4868_v33  ;;  %vm4911_vm1 = vweird.f32 %v13847_v3 }
 0x490   : > { %v4893_v51 = vmul.f32 %v6673_v36, %v13832_v38  ;;  %v4877_v48 = vsel %vm13825_vm10, %v4876_v1, %v4872_v59  ;;  %v4882_v22 = vadd.f32 %v6671_v24, %v4881_v30  ;;  %vm4898_vm6 = vweird.f32 %v6673_v36 }
 0x491   : > { %v4915_v6 = vand.u32 2147483647, %v13847_v3  ;;  %5505 = vst [vmem:[%s7078_s17 + $0x7a8] sm:$0xff] %v5249_v14  ;;  %v5250_v63 = vmul.f32 %v4877_v48, %v13668_v16  ;;  %6676 = vpow2.f32 %v13793_v61  ;;  %v1156_v43 = vmul.f32 1.442695, %v648_v53  ;;  %vm13927_vm2 = vmor %vm4897_vm12, %vm4898_vm6 }
 0x492   : > { %v4894_v58 = vsub.f32 1.0, %v4893_v51  ;;  %v4886_v32 = vsel %vm13892_vm4, %v6671_v24, %v4882_v22  ;;  %6678 = vpow2.f32 %v13795_v52  ;;  %v1158_v46 = vmul.f32 1.442695, %v649_v23 }
 0x493   : > { %v6675_v57 = vpop.eup %6674  ;;  %v650_v16 = vsub.f32 0.0, %v13899_v44  ;;  %5506 = vst [vmem:[%s7078_s17 + $0x7b0] sm:$0xff] %v5250_v63  ;;  %v4891_v61 = vsel %vm13860_vm11, %v4890_v41, %v4886_v32  ;;  %v4917_v4 = vand.u32 2147483648, %v13847_v3  ;;  %6680 = vpow2.f32 %v1156_v43 }
 0x494   : > { %v4895_v1 = vmul.f32 %v6673_v36, %v4894_v58  ;;  %v4907_v53 = vmul.f32 %v6675_v57, %v13847_v3  ;;  %v5251_v8 = vmul.f32 %v4891_v61, %v13681_v12  ;;  %v651_v34 = vsub.f32 0.0, %v13910_v31 }
 0x495   : > { %v1160_v23 = vmul.f32 1.442695, %v650_v16  ;;  %vm4912_vm3 = vweird.f32 %v6675_v57  ;;  %6682 = vpow2.f32 %v1158_v46  ;;  %vm4916_vm5 = vcmp.eq.f32.partialorder %v4915_v6, 8.507059e+37 }
 0x496   : > { %v4896_v9 = vadd.f32 %v6673_v36, %v4895_v1  ;;  %v4908_v60 = vsub.f32 1.0, %v4907_v53  ;;  %5507 = vst [vmem:[%s7078_s17 + $0x7b8] sm:$0xff] %v5251_v8  ;;  %v1162_v26 = vmul.f32 1.442695, %v651_v34  ;;  %vm13939_vm10 = vmor %vm4911_vm1, %vm4912_vm3  ;;  %v4918_v24 = vor.u32 1.1754944e-38, %v4917_v4 }
 0x497   : > { %6684 = vpow2.f32 %v1160_v23  ;;  %v6677_v27 = vpop.eup %6676 }
 0x498   : > { %v4900_v12 = vsel %vm13927_vm2, %v6673_v36, %v4896_v9  ;;  %v4909_v38 = vmul.f32 %v6675_v57, %v4908_v60  ;;  %v6679_v29 = vpop.eup %6678  ;;  %v1414_v17 = vadd.f32 1.0, %v6677_v27  ;;  %6686 = vpow2.f32 %v1162_v26 }
 0x499   : > { %v4905_v35 = vsel %vm13883_vm0, %v4904_v10, %v4900_v12  ;;  %v1415_v42 = vadd.f32 1.0, %v6679_v29  ;;  %v6681_v56 = vpop.eup %6680 }
 0x49a   : > { %v5252_v55 = vmul.f32 %v4905_v35, %v13684_v0  ;;  %v4910_v5 = vadd.f32 %v6675_v57, %v4909_v38  ;;  %6688 = vrcp.f32 %v1414_v17  ;;  %v4929_v39 = vand.u32 2147483647, %v1414_v17 }
 0x49b   : > { %v6683_v40 = vpop.eup %6682  ;;  %6690 = vrcp.f32 %v1415_v42  ;;  %v4931_v15 = vand.u32 2147483648, %v1414_v17  ;;  %v1416_v25 = vadd.f32 1.0, %v6681_v56  ;;  %v4943_v7 = vand.u32 2147483647, %v1415_v42 }
 0x49c   : > { %5508 = vst [vmem:[%s7078_s17 + $0x7c0] sm:$0xff] %v5252_v55  ;;  %v4914_v3 = vsel %vm13939_vm10, %v6675_v57, %v4910_v5  ;;  %v13948_v0 = vadd.f32 1.0, %v6683_v40  ;;  %vm4925_vm14 = vweird.f32 %v1414_v17  ;;  %vm4939_vm7 = vweird.f32 %v1415_v42 }
 0x49d   : > { %v6685_v13 = vpop.eup %6684  ;;  %v4919_v11 = vsel %vm4916_vm5, %v4918_v24, %v4914_v3  ;;  %6692 = vrcp.f32 %v1416_v25  ;;  %v4945_v33 = vand.u32 2147483648, %v1415_v42  ;;  %vm13954_vm9 = vcmp.eq.f32.partialorder %v4929_v39, 8.507059e+37 }
 0x49e   : > { %v5253_v18 = vmul.f32 %v4919_v11, %v13708_v49  ;;  %v6687_v45 = vpop.eup %6686  ;;  %v13951_v47 = vadd.f32 1.0, %v6685_v13  ;;  %6694 = vrcp.f32 %v13948_v0  ;;  %v4932_v21 = vor.u32 1.1754944e-38, %v4931_v15 }
 0x49f   : > { %v4957_v30 = vand.u32 2147483647, %v1416_v25  ;;  %vm13958_vm8 = vcmp.eq.f32.partialorder %v4943_v7, 8.507059e+37  ;;  %v4959_v14 = vand.u32 2147483648, %v1416_v25  ;;  %v4971_v59 = vand.u32 2147483647, %v13948_v0 }
 0x4a0   : > { %5509 = vst [vmem:[%s7078_s17 + $0x7c8] sm:$0xff] %v5253_v18  ;;  %v6689_v37 = vpop.eup %6688  ;;  %v4973_v51 = vand.u32 2147483648, %v13948_v0  ;;  %6696 = vrcp.f32 %v13951_v47  ;;  %v4946_v22 = vor.u32 1.1754944e-38, %v4945_v33  ;;  %v13965_v6 = vadd.f32 1.0, %v6687_v45 }
 0x4a1   : > { %v6691_v41 = vpop.eup %6690  ;;  %v4921_v36 = vmul.f32 %v6689_v37, %v1414_v17  ;;  %vm4926_vm11 = vweird.f32 %v6689_v37  ;;  %vm4953_vm15 = vweird.f32 %v1416_v25  ;;  %vm13967_vm12 = vcmp.eq.f32.partialorder %v4957_v30, 8.507059e+37 }
 0x4a2   : > { %v4935_v50 = vmul.f32 %v6691_v41, %v1415_v42  ;;  %vm4940_vm13 = vweird.f32 %v6691_v41  ;;  %vm4967_vm0 = vweird.f32 %v13948_v0  ;;  %vm13973_vm4 = vmor %vm4925_vm14, %vm4926_vm11  ;;  %v4960_v61 = vor.u32 1.1754944e-38, %v4959_v14 }
 0x4a3   : > { %v4922_v28 = vsub.f32 1.0, %v4921_v36  ;;  %v6693_v63 = vpop.eup %6692  ;;  %vm13977_vm1 = vcmp.eq.f32.partialorder %v4971_v59, 8.507059e+37  ;;  %vm13983_vm6 = vmor %vm4939_vm7, %vm4940_vm13  ;;  %v4974_v52 = vor.u32 1.1754944e-38, %v4973_v51  ;;  %6698 = vrcp.f32 %v13965_v6 }
 0x4a4   : > { %v4936_v48 = vsub.f32 1.0, %v4935_v50  ;;  %v6695_v57 = vpop.eup %6694  ;;  %v4949_v16 = vmul.f32 %v6693_v63, %v1416_v25  ;;  %vm4954_vm2 = vweird.f32 %v6693_v63  ;;  %v4985_v9 = vand.u32 2147483647, %v13951_v47 }
 0x4a5   : > { %v4923_v58 = vmul.f32 %v6689_v37, %v4922_v28  ;;  %v4963_v8 = vmul.f32 %v6695_v57, %v13948_v0  ;;  %vm4968_vm3 = vweird.f32 %v6695_v57  ;;  %v4987_v12 = vand.u32 2147483648, %v13951_v47  ;;  %vm14002_vm10 = vmor %vm4953_vm15, %vm4954_vm2 }
 0x4a6   : > { %v4937_v46 = vmul.f32 %v6691_v41, %v4936_v48  ;;  %v4950_v34 = vsub.f32 1.0, %v4949_v16  ;;  %v6697_v60 = vpop.eup %6696  ;;  %vm4981_vm5 = vweird.f32 %v13951_v47  ;;  %vm14010_vm14 = vmor %vm4967_vm0, %vm4968_vm3  ;;  %v4999_v25 = vand.u32 2147483647, %v13965_v6 }
 0x4a7   : > { %v4924_v53 = vadd.f32 %v6689_v37, %v4923_v58  ;;  %v4964_v27 = vsub.f32 1.0, %v4963_v8  ;;  %v4977_v54 = vmul.f32 %v6697_v60, %v13951_v47  ;;  %vm4982_vm7 = vweird.f32 %v6697_v60 }
 0x4a8   : > { %v4938_v23 = vadd.f32 %v6691_v41, %v4937_v46  ;;  %v4951_v35 = vmul.f32 %v6693_v63, %v4950_v34  ;;  %v4988_v39 = vor.u32 1.1754944e-38, %v4987_v12  ;;  %vm4983_vm11 = vmor %vm4981_vm5, %vm4982_vm7  ;;  %v5001_v45 = vand.u32 2147483648, %v13965_v6 }
 0x4a9   : > { %v4928_v26 = vsel %vm13973_vm4, %v6689_v37, %v4924_v53  ;;  %v4965_v5 = vmul.f32 %v6695_v57, %v4964_v27  ;;  %v4978_v40 = vsub.f32 1.0, %v4977_v54  ;;  %v6699_v3 = vpop.eup %6698 }
 0x4aa   : > { %v4933_v38 = vsel %vm13954_vm9, %v4932_v21, %v4928_v26  ;;  %v4942_v29 = vsel %vm13983_vm6, %v6691_v41, %v4938_v23  ;;  %v4952_v56 = vadd.f32 %v6693_v63, %v4951_v35  ;;  %vm14015_vm9 = vcmp.eq.f32.partialorder %v4985_v9, 8.507059e+37 }
 0x4ab   : > { %v5254_v24 = vmul.f32 %v4933_v38, %v13730_v2  ;;  %v4947_v17 = vsel %vm13958_vm8, %v4946_v22, %v4942_v29  ;;  %v4966_v13 = vadd.f32 %v6695_v57, %v4965_v5  ;;  %vm4995_vm8 = vweird.f32 %v13965_v6 }
 0x4ac   : > { %v5255_v42 = vmul.f32 %v4947_v17, %v13740_v19  ;;  %v4956_v19 = vsel %vm14002_vm10, %v6693_v63, %v4952_v56  ;;  %v4979_v18 = vmul.f32 %v6697_v60, %v4978_v40  ;;  %v4991_v15 = vmul.f32 %v6699_v3, %v13965_v6 }
 0x4ad   : > { %5510 = vst [vmem:[%s7078_s17 + $0x7d0] sm:$0xff] %v5254_v24  ;;  %v4961_v0 = vsel %vm13967_vm12, %v4960_v61, %v4956_v19  ;;  %v4970_v7 = vsel %vm14010_vm14, %v6695_v57, %v4966_v13  ;;  %vm4996_vm13 = vweird.f32 %v6699_v3  ;;  %v5002_v30 = vor.u32 1.1754944e-38, %v5001_v45 }
 0x4ae   : > { %5511 = vst [vmem:[%s7078_s17 + $0x7d8] sm:$0xff] %v5255_v42  ;;  %v5256_v37 = vmul.f32 %v4961_v0, %v13743_v20  ;;  %v4975_v33 = vsel %vm13977_vm1, %v4974_v52, %v4970_v7  ;;  %v4980_v41 = vadd.f32 %v6697_v60, %v4979_v18  ;;  %v4992_v36 = vsub.f32 1.0, %v4991_v15  ;;  %vm4997_vm15 = vmor %vm4995_vm8, %vm4996_vm13 }
 0x4af   : > { %v5257_v49 = vmul.f32 %v4975_v33, %v13754_v62  ;;  %vm5000_vm12 = vcmp.eq.f32.partialorder %v4999_v25, 8.507059e+37 }
 0x4b0   : > { %5512 = vst [vmem:[%s7078_s17 + $0x7e0] sm:$0xff] %v5256_v37  ;;  %v4984_v47 = vsel %vm4983_vm11, %v6697_v60, %v4980_v41  ;;  %v4993_v21 = vmul.f32 %v6699_v3, %v4992_v36 }
 0x4b1   : > { %5513 = vst [vmem:[%s7078_s17 + $0x7e8] sm:$0xff] %v5257_v49  ;;  %v4989_v20 = vsel %vm14015_vm9, %v4988_v39, %v4984_v47 }
 0x4b2   : > { %v5258_v50 = vmul.f32 %v4989_v20, %v13899_v44  ;;  %v4994_v62 = vadd.f32 %v6699_v3, %v4993_v21 }
 0x4b4   : > { %5514 = vst [vmem:[%s7078_s17 + $0x7f0] sm:$0xff] %v5258_v50  ;;  %v4998_v10 = vsel %vm4997_vm15, %v6699_v3, %v4994_v62 }
 0x4b5   : > { %v5003_v14 = vsel %vm5000_vm12, %v5002_v30, %v4998_v10 }
 0x4b6   : > { %v5259_v59 = vmul.f32 %v5003_v14, %v13910_v31 }
 0x4b8   : > { %5515 = vst [vmem:[%s7078_s17 + $0x7f8] sm:$0xff] %v5259_v59 }
 0x4b9   : > { %6757 = shalt.err (!%p6754_p4)
}
 0x4ba   : > { %s6800_s16 = smov 1024   ;;  %s6801_s20 = smov 64  }
 0x4bb   : > { %5628 = dma.vmem_to_hbm [thread:$0]  (%p6862_p11), %s5531_s28, 32768, %s5533_s29, %s5517_s30, %s6800_s16, %s6800_s16, %s6801_s20  }
 0x4bc PF: > { %s5547_s21 = sand.u32 1, %s6784_s6   ;;  %p15080_p7 = scmp.ge.s32.totalorder %s6796_s9, 2 }
 0x4bd   : > { %s5548_s22 = scalar_lea.sflag [#allocation4], %s5547_s21 }
 0x4be   : > { %p5635_p5 = pnand %p15080_p7, %p6866_p12 }
 0x4c0   : > { %p5636_p8 = pneg %p5635_p5 }
 0x4c2   : > { %6779 = dma.done.wait (%p5636_p8), %s5548_s22, 32768  }
 0x4c3   : > { %6781 = vsyncadd (%p5636_p8), %s5548_s22, 4294934528  ;;  %p14_p10 = scmp.ge.s32.totalorder %s6837_s12, 4   ;;  %s15081_s6 = smov %s6788_s7 }
 0x4c4   : > { %s15082_s7 = smov %s6792_s8  ;;  %s15083_s8 = smov %s6849_s15 }
 0x4c5   : > { %s15084_s9 = smov %s6837_s12  ;;  %16 = sbr.rel (!%p14_p10) target bundleno = 5 (0x5), region = 69 }
 0x4ca   :  { %5554 = vsyncpa [#allocation3], 1 }
 0x4cb   :  { %5556 = vsyncpa [#allocation3 + $0x1], 1 }
 0x4cc   :  { %5557 = vsyncpa [#allocation4], 1 }
 0x4cd   :  { %5559 = vsyncpa [#allocation4 + $0x1], 1 }

</bundles_post_ra>
